<compile_context>
chip_gen: v5e
topology: v5e:2x2
jax: 0.10.0
libtpu: 0.0.40
codegen_flags: <defaults>
</compile_context>

<pallas_src>
import functools

import jax
import jax.numpy as jnp
from jax.experimental import pallas as pl
from jax.experimental.pallas import tpu as pltpu


def _round_up(n, m):
    return ((n + m - 1) // m) * m


def _mlp_kernel(x_ref, w1_ref, b1_ref, w2_ref, b2_ref, w3_ref, b3_ref,
                w4t_ref, b4_ref, o_ref):
    """One (TM, input_size) f32 batch tile -> one (1, TM) lane-dense output row."""
    # In-kernel f32 -> bf16 cast (avoids a separate wrapper-side cast pass over x in HBM;
    # the cast is free filler in a DMA-bound kernel).
    x = x_ref[...].astype(jnp.bfloat16)                             # (TM, in) bf16
    h1 = jnp.dot(x, w1_ref[...], preferred_element_type=jnp.float32) + b1_ref[...]
    h1 = jnp.maximum(h1, 0.0).astype(jnp.bfloat16)                  # (TM, 64)
    # TODO(synk): Dropout(p=0.2) omitted -- identity in eval/inference mode.
    h2 = jnp.dot(h1, w2_ref[...], preferred_element_type=jnp.float32) + b2_ref[...]
    h2 = jnp.maximum(h2, 0.0).astype(jnp.bfloat16)                  # (TM, 32)
    h3 = jnp.dot(h2, w3_ref[...], preferred_element_type=jnp.float32) + b3_ref[...]
    h3 = jnp.maximum(h3, 0.0).astype(jnp.bfloat16)                  # (TM, 16)
    # Final layer computed lane-dense: contract the 16-wide feature dims of
    # w4^T (1,16) and h3 (TM,16) -> (1, TM), so the store is full 128-lane rows.
    out_row = jax.lax.dot_general(
        w4t_ref[...], h3,
        dimension_numbers=(((1,), (1,)), ((), ())),
        preferred_element_type=jnp.float32)                         # (1, TM) f32
    o_ref[...] = out_row + b4_ref[...]                              # (1,1) broadcasts over lanes


def simple_nn_forward(x, prep, *, tm=2048):
    """x: (batch, input_size) f32; prep: prepare_params(...) output. Returns (batch, 1) f32."""
    batch, in_dim = x.shape
    tm = _round_up(tm, 128)                      # lane-dense output blocks need TM % 128 == 0
    tm_eff = min(tm, _round_up(batch, 128))      # don't over-allocate tiles for small batches
    n_tiles = pl.cdiv(batch, tm_eff)
    padded = n_tiles * tm_eff                    # padded *output* columns only; x is NOT padded

    w1, w2, w3, w4t = prep["w1"], prep["w2"], prep["w3"], prep["w4t"]
    b1, b2, b3, b4 = prep["b1"], prep["b2"], prep["b3"], prep["b4"]

    flops = 2 * padded * (in_dim * 64 + 64 * 32 + 32 * 16 + 16 * 1)
    bytes_accessed = (
        padded * in_dim * 4                                       # x (f32, streamed)
        + sum(int(w.size) * 2 for w in (w1, w2, w3, w4t))         # weights (bf16, resident)
        + sum(int(b.size) * 4 for b in (b1, b2, b3, b4))          # biases (f32, resident)
        + padded * 4)                                             # output (f32)

    const = lambda i: (0, 0)  # weights/biases: same block every step -> resident, no re-DMA
    grid_spec = pltpu.PrefetchScalarGridSpec(
        num_scalar_prefetch=0,
        grid=(n_tiles,),
        in_specs=[
            # Streamed x tile; last tile may be partial (OOB rows read stale data that only
            # feeds padding output columns, sliced off below).
            # (On v6e, if a DMA gap shows up at moderate TM, add pipeline_mode=pl.Buffered(3).)
            pl.BlockSpec((tm_eff, in_dim), lambda i: (i, 0)),
            pl.BlockSpec((in_dim, 64), const),              # w1
            pl.BlockSpec((1, 64), const),                   # b1
            pl.BlockSpec((64, 32), const),                  # w2
            pl.BlockSpec((1, 32), const),                   # b2
            pl.BlockSpec((32, 16), const),                  # w3
            pl.BlockSpec((1, 16), const),                   # b3
            pl.BlockSpec((1, 16), const),                   # w4 pre-transposed (1, 16)
            pl.BlockSpec((1, 1), const),                    # b4
        ],
        # (1, TM) blocks on a (1, padded) slab: sublane dim 1 == full dim, TM % 128 == 0.
        out_specs=pl.BlockSpec((1, tm_eff), lambda i: (0, i)),
    )

    out = pl.pallas_call(
        _mlp_kernel,
        out_shape=jax.ShapeDtypeStruct((1, padded), jnp.float32),
        grid_spec=grid_spec,
        compiler_params=pltpu.CompilerParams(
            dimension_semantics=("parallel",)),
        cost_estimate=pl.CostEstimate(
            flops=flops, transcendentals=0, bytes_accessed=bytes_accessed),
    )(x, w1, b1, w2, b2, w3, b3, w4t, b4)

    # (1, padded) column-order == batch order; drop padding and restore (batch, 1).
    return out.reshape(padded, 1)[:batch]


def init_params(key, input_size):
    """Deterministic init mirroring nn.Linear shapes (weights stored as (in, out))."""
    dims = [(input_size, 64), (64, 32), (32, 16), (16, 1)]
    params = {}
    for i, (fan_in, fan_out) in enumerate(dims, start=1):
        key, kw, kb = jax.random.split(key, 3)
        bound = 1.0 / jnp.sqrt(jnp.float32(fan_in))
        params[f"w{i}"] = jax.random.uniform(
            kw, (fan_in, fan_out), jnp.float32, minval=-bound, maxval=bound)
        params[f"b{i}"] = jax.random.uniform(
            kb, (1, fan_out), jnp.float32, minval=-bound, maxval=bound)
    return params


def prepare_params(params):
    """Pre-cast weights to bf16 (MXU-native) and pre-transpose w4 for the lane-dense store."""
    return {
        "w1": params["w1"].astype(jnp.bfloat16),
        "w2": params["w2"].astype(jnp.bfloat16),
        "w3": params["w3"].astype(jnp.bfloat16),
        "w4t": params["w4"].T.astype(jnp.bfloat16),   # (1, 16)
        "b1": params["b1"], "b2": params["b2"],
        "b3": params["b3"], "b4": params["b4"],       # (1, 1)
    }


def reference_forward(x, params):
    """Same math as the kernel (bf16 MXU inputs, f32 accumulation / bias / ReLU)."""
    def lin(h, w, b):
        return jnp.dot(h.astype(jnp.bfloat16), w.astype(jnp.bfloat16),
                       preferred_element_type=jnp.float32) + b
    h = jnp.maximum(lin(x, params["w1"], params["b1"]), 0.0)
    h = jnp.maximum(lin(h, params["w2"], params["b2"]), 0.0)
    h = jnp.maximum(lin(h, params["w3"], params["b3"]), 0.0)
    return lin(h, params["w4"], params["b4"])


if __name__ == "__main__":
    key = jax.random.PRNGKey(0)
    input_size = 32

    k_x, k_p = jax.random.split(key)
    params = init_params(k_p, input_size)
    prep = prepare_params(params)

    fwd = jax.jit(functools.partial(simple_nn_forward, tm=2048))

    # Tile-aligned batch: 4 x 2048-row tiles (even tile count -> >=2 pipelined steps per
    # TensorCore on v7x megacore; plain sequential pipeline on v5e/v6e).
    x = jax.random.normal(k_x, (8192, input_size), jnp.float32)
    out = fwd(x, prep)
    jax.block_until_ready(out)
    ref = reference_forward(x, params)
    assert out.shape == (8192, 1)
    assert jnp.allclose(out, ref, atol=5e-3, rtol=5e-3)

    # Ragged batch: partial final tile, no wrapper-side pad/cast of x.
    x2 = jax.random.normal(k_x, (1000, input_size), jnp.float32)
    out2 = fwd(x2, prep)
    jax.block_until_ready(out2)
    ref2 = reference_forward(x2, params)
    assert out2.shape == (1000, 1)
    assert jnp.allclose(out2, ref2, atol=5e-3, rtol=5e-3)

    print("KERNEL_OK")
</pallas_src>

<mosaic_0001>
module attributes {stable_mosaic.version = 11 : i64} {
  func.func @_mlp_kernel(%arg0: i32, %arg1: memref<2048x32xf32, #tpu.memory_space<vmem>>, %arg2: memref<32x64xbf16, #tpu.memory_space<vmem>>, %arg3: memref<1x64xf32, #tpu.memory_space<vmem>>, %arg4: memref<64x32xbf16, #tpu.memory_space<vmem>>, %arg5: memref<1x32xf32, #tpu.memory_space<vmem>>, %arg6: memref<32x16xbf16, #tpu.memory_space<vmem>>, %arg7: memref<1x16xf32, #tpu.memory_space<vmem>>, %arg8: memref<1x16xbf16, #tpu.memory_space<vmem>>, %arg9: memref<1x1xf32, #tpu.memory_space<vmem>>, %arg10: memref<1x2048xf32, #tpu.memory_space<vmem>>) attributes {dimension_semantics = [#tpu.dimension_semantics<parallel>], iteration_bounds = array<i64: 4>, scalar_prefetch = 0 : i64, scratch_operands = 0 : i64, tpu.core_type = #tpu.core_type<tc>, window_params = [{transform_indices = @transform_0, window_bounds = array<i64: 2048, 32>}, {pipeline_mode = #tpu.pipeline_mode<synchronous>, transform_indices = @transform_1, window_bounds = array<i64: 32, 64>}, {pipeline_mode = #tpu.pipeline_mode<synchronous>, transform_indices = @transform_2, window_bounds = array<i64: 1, 64>}, {pipeline_mode = #tpu.pipeline_mode<synchronous>, transform_indices = @transform_3, window_bounds = array<i64: 64, 32>}, {pipeline_mode = #tpu.pipeline_mode<synchronous>, transform_indices = @transform_4, window_bounds = array<i64: 1, 32>}, {pipeline_mode = #tpu.pipeline_mode<synchronous>, transform_indices = @transform_5, window_bounds = array<i64: 32, 16>}, {pipeline_mode = #tpu.pipeline_mode<synchronous>, transform_indices = @transform_6, window_bounds = array<i64: 1, 16>}, {pipeline_mode = #tpu.pipeline_mode<synchronous>, transform_indices = @transform_7, window_bounds = array<i64: 1, 16>}, {pipeline_mode = #tpu.pipeline_mode<synchronous>, transform_indices = @transform_8, window_bounds = array<i64: 1, 1>}, {transform_indices = @transform_9, window_bounds = array<i64: 1, 2048>}]} {
    %c0 = arith.constant 0 : index
    %c0_0 = arith.constant 0 : index
    %0 = vector.load %arg1[%c0, %c0_0] : memref<2048x32xf32, #tpu.memory_space<vmem>>, vector<2048x32xf32>
    %1 = arith.truncf %0 : vector<2048x32xf32> to vector<2048x32xbf16>
    %c0_1 = arith.constant 0 : index
    %c0_2 = arith.constant 0 : index
    %2 = vector.load %arg2[%c0_1, %c0_2] : memref<32x64xbf16, #tpu.memory_space<vmem>>, vector<32x64xbf16>
    %cst = arith.constant dense<0.000000e+00> : vector<2048x64xf32>
    %3 = tpu.matmul %1, %2, %cst {dimension_numbers = #tpu.dot_dimension_numbers<[1], [0], [0], [1], [0, 0, 1, 1], [], []>} : vector<2048x32xbf16>, vector<32x64xbf16>, vector<2048x64xf32> -> vector<2048x64xf32>
    %c0_3 = arith.constant 0 : index
    %c0_4 = arith.constant 0 : index
    %4 = vector.load %arg3[%c0_3, %c0_4] : memref<1x64xf32, #tpu.memory_space<vmem>>, vector<1x64xf32>
    %5 = vector.broadcast %4 : vector<1x64xf32> to vector<2048x64xf32>
    %6 = arith.addf %3, %5 : vector<2048x64xf32>
    %cst_5 = arith.constant 0.000000e+00 : f32
    %7 = vector.broadcast %cst_5 : f32 to vector<2048x64xf32>
    %8 = arith.maximumf %6, %7 : vector<2048x64xf32>
    %9 = arith.truncf %8 : vector<2048x64xf32> to vector<2048x64xbf16>
    %c0_6 = arith.constant 0 : index
    %c0_7 = arith.constant 0 : index
    %10 = vector.load %arg4[%c0_6, %c0_7] : memref<64x32xbf16, #tpu.memory_space<vmem>>, vector<64x32xbf16>
    %cst_8 = arith.constant dense<0.000000e+00> : vector<2048x32xf32>
    %11 = tpu.matmul %9, %10, %cst_8 {dimension_numbers = #tpu.dot_dimension_numbers<[1], [0], [0], [1], [0, 0, 1, 1], [], []>} : vector<2048x64xbf16>, vector<64x32xbf16>, vector<2048x32xf32> -> vector<2048x32xf32>
    %c0_9 = arith.constant 0 : index
    %c0_10 = arith.constant 0 : index
    %12 = vector.load %arg5[%c0_9, %c0_10] : memref<1x32xf32, #tpu.memory_space<vmem>>, vector<1x32xf32>
    %13 = vector.broadcast %12 : vector<1x32xf32> to vector<2048x32xf32>
    %14 = arith.addf %11, %13 : vector<2048x32xf32>
    %cst_11 = arith.constant 0.000000e+00 : f32
    %15 = vector.broadcast %cst_11 : f32 to vector<2048x32xf32>
    %16 = arith.maximumf %14, %15 : vector<2048x32xf32>
    %17 = arith.truncf %16 : vector<2048x32xf32> to vector<2048x32xbf16>
    %c0_12 = arith.constant 0 : index
    %c0_13 = arith.constant 0 : index
    %18 = vector.load %arg6[%c0_12, %c0_13] : memref<32x16xbf16, #tpu.memory_space<vmem>>, vector<32x16xbf16>
    %cst_14 = arith.constant dense<0.000000e+00> : vector<2048x16xf32>
    %19 = tpu.matmul %17, %18, %cst_14 {dimension_numbers = #tpu.dot_dimension_numbers<[1], [0], [0], [1], [0, 0, 1, 1], [], []>} : vector<2048x32xbf16>, vector<32x16xbf16>, vector<2048x16xf32> -> vector<2048x16xf32>
    %c0_15 = arith.constant 0 : index
    %c0_16 = arith.constant 0 : index
    %20 = vector.load %arg7[%c0_15, %c0_16] : memref<1x16xf32, #tpu.memory_space<vmem>>, vector<1x16xf32>
    %21 = vector.broadcast %20 : vector<1x16xf32> to vector<2048x16xf32>
    %22 = arith.addf %19, %21 : vector<2048x16xf32>
    %cst_17 = arith.constant 0.000000e+00 : f32
    %23 = vector.broadcast %cst_17 : f32 to vector<2048x16xf32>
    %24 = arith.maximumf %22, %23 : vector<2048x16xf32>
    %25 = arith.truncf %24 : vector<2048x16xf32> to vector<2048x16xbf16>
    %c0_18 = arith.constant 0 : index
    %c0_19 = arith.constant 0 : index
    %26 = vector.load %arg8[%c0_18, %c0_19] : memref<1x16xbf16, #tpu.memory_space<vmem>>, vector<1x16xbf16>
    %cst_20 = arith.constant dense<0.000000e+00> : vector<1x2048xf32>
    %27 = tpu.matmul %26, %25, %cst_20 {dimension_numbers = #tpu.dot_dimension_numbers<[1], [1], [0], [0], [0, 0, 1, 0], [], []>} : vector<1x16xbf16>, vector<2048x16xbf16>, vector<1x2048xf32> -> vector<1x2048xf32>
    %c0_21 = arith.constant 0 : index
    %c0_22 = arith.constant 0 : index
    %28 = vector.load %arg9[%c0_21, %c0_22] : memref<1x1xf32, #tpu.memory_space<vmem>>, vector<1x1xf32>
    %29 = vector.broadcast %28 : vector<1x1xf32> to vector<1x2048xf32>
    %30 = arith.addf %27, %29 : vector<1x2048xf32>
    %c0_23 = arith.constant 0 : index
    %c0_24 = arith.constant 0 : index
    %31 = vector.load %arg10[%c0_23, %c0_24] : memref<1x2048xf32, #tpu.memory_space<vmem>>, vector<1x2048xf32>
    tpu.vector_store %arg10[%c0_23, %c0_24], %30 {strides = array<i32>} : memref<1x2048xf32, #tpu.memory_space<vmem>>, vector<1x2048xf32>,
    return
  }
  func.func @transform_0(%arg0: i32) -> (i32, i32) {
    %c0_i32 = arith.constant 0 : i32
    %c0_i32_0 = arith.constant 0 : i32
    return %arg0, %c0_i32 : i32, i32
  }
  func.func @transform_1(%arg0: i32) -> (i32, i32) {
    %c0_i32 = arith.constant 0 : i32
    %c0_i32_0 = arith.constant 0 : i32
    %c0_i32_1 = arith.constant 0 : i32
    return %c0_i32, %c0_i32_0 : i32, i32
  }
  func.func @transform_2(%arg0: i32) -> (i32, i32) {
    %c0_i32 = arith.constant 0 : i32
    %c0_i32_0 = arith.constant 0 : i32
    %c0_i32_1 = arith.constant 0 : i32
    return %c0_i32, %c0_i32_0 : i32, i32
  }
  func.func @transform_3(%arg0: i32) -> (i32, i32) {
    %c0_i32 = arith.constant 0 : i32
    %c0_i32_0 = arith.constant 0 : i32
    %c0_i32_1 = arith.constant 0 : i32
    return %c0_i32, %c0_i32_0 : i32, i32
  }
  func.func @transform_4(%arg0: i32) -> (i32, i32) {
    %c0_i32 = arith.constant 0 : i32
    %c0_i32_0 = arith.constant 0 : i32
    %c0_i32_1 = arith.constant 0 : i32
    return %c0_i32, %c0_i32_0 : i32, i32
  }
  func.func @transform_5(%arg0: i32) -> (i32, i32) {
    %c0_i32 = arith.constant 0 : i32
    %c0_i32_0 = arith.constant 0 : i32
    %c0_i32_1 = arith.constant 0 : i32
    return %c0_i32, %c0_i32_0 : i32, i32
  }
  func.func @transform_6(%arg0: i32) -> (i32, i32) {
    %c0_i32 = arith.constant 0 : i32
    %c0_i32_0 = arith.constant 0 : i32
    %c0_i32_1 = arith.constant 0 : i32
    return %c0_i32, %c0_i32_0 : i32, i32
  }
  func.func @transform_7(%arg0: i32) -> (i32, i32) {
    %c0_i32 = arith.constant 0 : i32
    %c0_i32_0 = arith.constant 0 : i32
    %c0_i32_1 = arith.constant 0 : i32
    return %c0_i32, %c0_i32_0 : i32, i32
  }
  func.func @transform_8(%arg0: i32) -> (i32, i32) {
    %c0_i32 = arith.constant 0 : i32
    %c0_i32_0 = arith.constant 0 : i32
    %c0_i32_1 = arith.constant 0 : i32
    return %c0_i32, %c0_i32_0 : i32, i32
  }
  func.func @transform_9(%arg0: i32) -> (i32, i32) {
    %c0_i32 = arith.constant 0 : i32
    %c0_i32_0 = arith.constant 0 : i32
    return %c0_i32, %arg0 : i32, i32
  }
}

</mosaic_0001>

<bundles_post_ra>
// kernel: simple_nn_forward.1
= control target key start
LH: loop header
LB: loop body
LE: loop exit
PB: predicated region body
PF: predicated region fallthrough
CT: control target
= control target key end

     0   :  { %s8788_s0 = inlined_call_operand.vmem [shape: f32[8192,32], index: 0, kind: input, shape index: {}]   ;;  %s8789_s1 = inlined_call_operand.vmem [shape: bf16[32,64], index: 1, kind: input, shape index: {}]   ;;  %s8790_s2 = inlined_call_operand.vmem [shape: f32[1,64], index: 2, kind: input, shape index: {}]   ;;  %s8791_s3 = inlined_call_operand.vmem [shape: bf16[64,32], index: 3, kind: input, shape index: {}]   ;;  %s8792_s4 = inlined_call_operand.vmem [shape: f32[1,32], index: 4, kind: input, shape index: {}]   ;;  %s8793_s5 = inlined_call_operand.vmem [shape: bf16[32,16], index: 5, kind: input, shape index: {}]   ;;  %s8794_s6 = inlined_call_operand.vmem [shape: f32[1,16], index: 6, kind: input, shape index: {}]   ;;  %s8795_s7 = inlined_call_operand.vmem [shape: bf16[1,16], index: 7, kind: input, shape index: {}]   ;;  %s8796_s8 = inlined_call_operand.<no memory space> [shape: f32[1,1], index: 8, kind: input, shape index: {}]   ;;  %s8797_s9 = inlined_call_operand.hbm [shape: f32[1,8192], index: 9, kind: output, shape index: {}]  }
   0x1   :  { %v14_v0 = vstv %s8796_s8 }
   0x2   :  { %15 = vst [vmem:[#allocation2] sm:$0x1] %v14_v0 }
   0x3   :  { %16 = vsyncpa [#allocation4], 0 }
   0x4   :  { %18 = vsyncpa [#allocation4 + $0x1], 0  ;;  %s6425_s11 = smov 0   ;;  %s6427_s12 = smov 0  }
   0x5   :  { %s6429_s13 = smov 0   ;;  %s6431_s14 = smov 0  }
   0x6 LB: > { %s6446_s8 = sadd.s32 4294967295, %s6369_s14   ;;  %s5784_s15 = sadd.s32 4294967294, %s6369_s14   ;;  %s6369_s14 = sphi %s6431_s14, %s8935_s14   ;;  %s6365_s13 = sphi %s6429_s13, %s8934_s13   ;;  %s6361_s12 = sphi %s6427_s12, %s8933_s12   ;;  %s6357_s11 = sphi %s6425_s11, %s8932_s11  }
   0x7   : > { %s6450_s16 = sadd.s32 1, %s6369_s14   ;;  %s225_s17 = sadd.s32 1, %s6365_s13 }
   0x8   : > { %s222_s18 = ssub.s32 %s6369_s14, %s6450_s16  ;;  %p235_p0 = scmp.ne.s32.totalorder %s6365_s13, %s6361_s12 }
   0x9   : > { %p223_p1 = scmp.eq.s32.totalorder %s222_s18, 0  ;;  %p236_p2 = scmp.eq.s32.totalorder %s6446_s8, 3 }
   0xa   : > { %p241_p3 = scmp.ne.s32.totalorder %s6361_s12, %s6357_s11  ;;  %p242_p4 = scmp.eq.s32.totalorder %s5784_s15, 3 }
   0xb   : > { %s6461_s19 = scalar_select %p223_p1, %s6365_s13, %s225_s17  }
   0xc   : > { %p6463_p5 = por %p236_p2, %p235_p0  ;;  %p6467_p6 = por %p242_p4, %p241_p3 }
   0xd   : > { %p5787_p7 = scmp.ge.s32.totalorder %s6369_s14, 1  ;;  %p293_p8 = scmp.lt.s32.totalorder %s6369_s14, 5 }
   0xf   : > { %p294_p9 = pnand %p5787_p7, %p293_p8 }
  0x11   : > { %297 = sbr.rel (%p294_p9) target bundleno = 3513 (0xdb9), region = 56 }
  0x16   : > { %v6228_v1 = vld [vmem:[%s8789_s1 + $0x8] sm:$0xff]  ;;  %s5789_s24 = sshll.u32 %s6446_s8, 8  ;;  %v6227_v2 = vld [vmem:[%s8789_s1] sm:$0xff]  ;;  %vm741_vm0 = vcmask 261120   ;;  %v6232_v23 = vld [vmem:[%s8791_s3 + $0x18] sm:$0xff]  ;;  %vm2195_vm1 = vcmask 523264  }
  0x17   : > { %p330_p10 = scmp.lt.s32.totalorder %s5789_s24, 1023  ;;  %1132 = vmatpush.bf16.msra.mxu0 %v6228_v1  ;;  %6235 = vmatpush.bf16.msra.mxu3 %v6228_v1  ;;  %v6231_v25 = vld [vmem:[%s8791_s3 + $0x10] sm:$0xff]  ;;  %v6230_v26 = vld [vmem:[%s8791_s3 + $0x8] sm:$0xff]  ;;  %v6229_v27 = vld [vmem:[%s8791_s3] sm:$0xff]  ;;  %vm5058_vm2 = vcmask 130048   ;;  %vm5684_vm3 = vcmask 1040384  }
  0x18   : > { %2584 = vmatpush.bf16.msra.mxu1 %v6232_v23  ;;  %v6526_v35 = vld [vmem:[%s8790_s2] ss:$0 sm:$0xff]  ;;  %vm5686_vm4 = vcmask 1042434   ;;  %vm5688_vm5 = vcmask 1041408   ;;  %vm5690_vm6 = vcmask 1044484   ;;  %vm5692_vm7 = vcmask 1046534  }
  0x19   : > { %s8937_s24 = smov (!%p330_p10, %s5789_s24), 1023  ;;  %vm5694_vm8 = vcmask 1045508   ;;  %vm5696_vm9 = vcmask 1043456   ;;  %s6327_s15 = scalar_lea.hbm %s8797_s9, 64 }
  0x1a   : > { %s5790_s27 = sshll.u32 %s8937_s24, 3 }
  0x1b   : > { %1133 = vmatpush.bf16.msra.mxu0 %v6227_v2  ;;  %s6483_s30 = scalar_lea.vmem %s8788_s0, %s5790_s27  ;;  %6236 = vmatpush.bf16.msra.mxu3 %v6227_v2  ;;  %s326_s27 = sand.u32 1, %s6361_s12  }
  0x1c   : > { %v337_v3 = vld [vmem:[%s6483_s30] sm:$0xff]  ;;  %v338_v4 = vld [vmem:[%s6483_s30 + $0x8] sm:$0xff]  ;;  %v339_v6 = vld [vmem:[%s6483_s30 + $0x10] sm:$0xff]  ;;  %2585 = vmatpush.bf16.msra.mxu1 %v6231_v25  ;;  %s5788_s28 = sshll.u32 %s326_s27, 4 }
  0x1d   : > { %v593_v5 = vpack.c.bf16 %v338_v4, %v337_v3  ;;  %v340_v7 = vld [vmem:[%s6483_s30 + $0x18] sm:$0xff]  ;;  %v341_v9 = vld [vmem:[%s6483_s30 + $0x20] sm:$0xff]  ;;  %v342_v10 = vld [vmem:[%s6483_s30 + $0x28] sm:$0xff]  ;;  %s8593_s29 = scalar_lea.vmem [#allocation3], %s5788_s28 }
  0x1e   : > { %v594_v8 = vpack.c.bf16 %v340_v7, %v339_v6  ;;  %v595_v11 = vpack.c.bf16 %v342_v10, %v341_v9  ;;  %v343_v12 = vld [vmem:[%s6483_s30 + $0x30] sm:$0xff]  ;;  %v344_v13 = vld [vmem:[%s6483_s30 + $0x38] sm:$0xff]  ;;  %v345_v15 = vld [vmem:[%s6483_s30 + $0x40] sm:$0xff]  ;;  %s5722_s23 = sshll.u32 %s8593_s29, 4  ;;  %s5723_s23 = int_to_ptr.vmem [resolvable:$true] %s5722_s23 }
  0x1f   : > { %5799 = vmatmul.msk.bf16.vlgmr.msra.gmra.mxu0 %vm741_vm0, %v593_v5  ;;  %v596_v14 = vpack.c.bf16 %v344_v13, %v343_v12  ;;  %v346_v16 = vld [vmem:[%s6483_s30 + $0x48] sm:$0xff]  ;;  %v347_v18 = vld [vmem:[%s6483_s30 + $0x50] sm:$0xff]  ;;  %v348_v19 = vld [vmem:[%s6483_s30 + $0x58] sm:$0xff]  ;;  %6237 = vmatpush.bf16.msrb.mxu3 %v6232_v23 }
  0x20   : > { %v597_v17 = vpack.c.bf16 %v346_v16, %v345_v15  ;;  %v598_v20 = vpack.c.bf16 %v348_v19, %v347_v18  ;;  %v349_v21 = vld [vmem:[%s6483_s30 + $0x60] sm:$0xff]  ;;  %v350_v22 = vld [vmem:[%s6483_s30 + $0x68] sm:$0xff]  ;;  %2586 = vmatpush.bf16.msra.mxu1 %v6230_v26  ;;  %v351_v28 = vld [vmem:[%s6483_s30 + $0x70] sm:$0xff] }
  0x21   : > { %v599_v24 = vpack.c.bf16 %v350_v22, %v349_v21  ;;  %v352_v29 = vld [vmem:[%s6483_s30 + $0x78] sm:$0xff]  ;;  %v353_v31 = vld [vmem:[%s6483_s30 + $0x80] sm:$0xff]  ;;  %v354_v32 = vld [vmem:[%s6483_s30 + $0x88] sm:$0xff] }
  0x22   : > { %v600_v30 = vpack.c.bf16 %v352_v29, %v351_v28  ;;  %v601_v33 = vpack.c.bf16 %v354_v32, %v353_v31  ;;  %v355_v41 = vld [vmem:[%s6483_s30 + $0x90] sm:$0xff]  ;;  %v356_v42 = vld [vmem:[%s6483_s30 + $0x98] sm:$0xff]  ;;  %v357_v51 = vld [vmem:[%s6483_s30 + $0xa0] sm:$0xff] }
  0x23   : > { %6238 = vmatpush.bf16.msrb.mxu3 %v6231_v25  ;;  %v602_v44 = vpack.c.bf16 %v356_v42, %v355_v41  ;;  %v358_v52 = vld [vmem:[%s6483_s30 + $0xa8] sm:$0xff]  ;;  %v359_v61 = vld [vmem:[%s6483_s30 + $0xb0] sm:$0xff]  ;;  %v360_v62 = vld [vmem:[%s6483_s30 + $0xb8] sm:$0xff] }
  0x24   : > { %2587 = vmatpush.bf16.msra.mxu1 %v6229_v27  ;;  %v603_v54 = vpack.c.bf16 %v358_v52, %v357_v51  ;;  %v604_v0 = vpack.c.bf16 %v360_v62, %v359_v61  ;;  %v361_v7 = vld [vmem:[%s6483_s30 + $0xc0] sm:$0xff]  ;;  %v364_v18 = vld [vmem:[%s6483_s30 + $0xd8] sm:$0xff]  ;;  %v366_v28 = vld [vmem:[%s6483_s30 + $0xe8] sm:$0xff] }
  0x25   : > { %v370_v51 = vld [vmem:[%s6483_s30 + $0x108] sm:$0xff]  ;;  %v371_v61 = vld [vmem:[%s6483_s30 + $0x110] sm:$0xff]  ;;  %v372_v62 = vld [vmem:[%s6483_s30 + $0x118] sm:$0xff] }
  0x27   : > { %6239 = vmatpush.bf16.msrb.mxu3 %v6230_v26 }
  0x2b   : > { %6240 = vmatpush.bf16.msrb.mxu3 %v6229_v27  ;;  %v365_v27 = vld [vmem:[%s6483_s30 + $0xe0] sm:$0xff] }
  0x2f   : > { %5800 = vmatmul.msk.bf16.gmra.mxu0 %vm741_vm0, %v594_v8  ;;  %v362_v8 = vld [vmem:[%s6483_s30 + $0xc8] sm:$0xff] }
  0x30   : > { %v605_v10 = vpack.c.bf16 %v362_v8, %v361_v7 }
  0x3f   : > { %5801 = vmatmul.msk.bf16.gmra.mxu0 %vm741_vm0, %v595_v11 }
  0x4f   : > { %5802 = vmatmul.msk.bf16.gmra.mxu0 %vm741_vm0, %v596_v14 }
  0x5f   : > { %5803 = vmatmul.msk.bf16.gmra.mxu0 %vm741_vm0, %v597_v17  ;;  %v363_v17 = vld [vmem:[%s6483_s30 + $0xd0] sm:$0xff] }
  0x6f   : > { %5804 = vmatmul.msk.bf16.gmra.mxu0 %vm741_vm0, %v598_v20  ;;  %v606_v20 = vpack.c.bf16 %v364_v18, %v363_v17 }
  0x7f   : > { %5805 = vmatmul.msk.bf16.gmra.mxu0 %vm741_vm0, %v599_v24 }
  0x8f   : > { %5806 = vmatmul.msk.bf16.gmra.mxu0 %vm741_vm0, %v600_v30  ;;  %v607_v30 = vpack.c.bf16 %v366_v28, %v365_v27 }
  0x9c   : > { %v1135_v34 = vpop.f32.mrf.mxu0 }
  0x9d   : > { %v1136_v36 = vadd.f32 %v6526_v35, %v1135_v34 }
  0x9f   : > { %5807 = vmatmul.msk.bf16.gmra.mxu0 %vm741_vm0, %v601_v33  ;;  %v1775_v39 = vmax.f32 %v1136_v36, 0.0 }
  0xa4   : > { %v1137_v37 = vpop.f32.mrf.mxu0 }
  0xa5   : > { %v1138_v38 = vadd.f32 %v6526_v35, %v1137_v37 }
  0xa7   : > { %v1776_v40 = vmax.f32 %v1138_v38, 0.0  ;;  %v367_v38 = vld [vmem:[%s6483_s30 + $0xf0] sm:$0xff] }
  0xa9   : > { %v2031_v43 = vpack.c.bf16 %v1776_v40, %v1775_v39  ;;  %v368_v39 = vld [vmem:[%s6483_s30 + $0xf8] sm:$0xff] }
  0xaa   : > { %v608_v41 = vpack.c.bf16 %v368_v39, %v367_v38 }
  0xab   : > { %5943 = vmatmul.msk.bf16.vlgmr.msra.gmra.mxu1 %vm2195_vm1, %v2031_v43  ;;  %v6234_v43 = vld [vmem:[%s8793_s5 + $0x8] sm:$0xff] }
  0xac   : > { %v1140_v45 = vpop.f32.mrf.mxu0  ;;  %4023 = vmatpush.bf16.msra.mxu2 %v6234_v43 }
  0xad   : > { %v1141_v46 = vadd.f32 %v6526_v35, %v1140_v45 }
  0xaf   : > { %5808 = vmatmul.msk.bf16.gmra.mxu0 %vm741_vm0, %v602_v44  ;;  %v1777_v49 = vmax.f32 %v1141_v46, 0.0  ;;  %v6233_v44 = vld [vmem:[%s8793_s5] sm:$0xff] }
  0xb0   : > { %4024 = vmatpush.bf16.msra.mxu2 %v6233_v44 }
  0xb4   : > { %v1142_v47 = vpop.f32.mrf.mxu0 }
  0xb5   : > { %v1143_v48 = vadd.f32 %v6526_v35, %v1142_v47 }
  0xb7   : > { %v1778_v50 = vmax.f32 %v1143_v48, 0.0 }
  0xb9   : > { %v2032_v53 = vpack.c.bf16 %v1778_v50, %v1777_v49  ;;  %v369_v50 = vld [vmem:[%s6483_s30 + $0x100] sm:$0xff] }
  0xbb   : > { %5944 = vmatmul.msk.bf16.gmra.mxu1 %vm2195_vm1, %v2032_v53  ;;  %v609_v53 = vpack.c.bf16 %v370_v51, %v369_v50  ;;  %v377_v50 = vld [vmem:[%s6483_s30 + $0x140] sm:$0xff]  ;;  %v378_v51 = vld [vmem:[%s6483_s30 + $0x148] sm:$0xff] }
  0xbc   : > { %v1145_v55 = vpop.f32.mrf.mxu0 }
  0xbd   : > { %v1146_v56 = vadd.f32 %v6526_v35, %v1145_v55 }
  0xbf   : > { %5809 = vmatmul.msk.bf16.gmra.mxu0 %vm741_vm0, %v603_v54  ;;  %v1779_v59 = vmax.f32 %v1146_v56, 0.0 }
  0xc4   : > { %v1147_v57 = vpop.f32.mrf.mxu0 }
  0xc5   : > { %v1148_v58 = vadd.f32 %v6526_v35, %v1147_v57 }
  0xc7   : > { %v1780_v60 = vmax.f32 %v1148_v58, 0.0 }
  0xc9   : > { %v2033_v63 = vpack.c.bf16 %v1780_v60, %v1779_v59 }
  0xcb   : > { %5945 = vmatmul.msk.bf16.gmra.mxu1 %vm2195_vm1, %v2033_v63 }
  0xcc   : > { %v1150_v1 = vpop.f32.mrf.mxu0 }
  0xcd   : > { %v1151_v2 = vadd.f32 %v6526_v35, %v1150_v1  ;;  %v610_v1 = vpack.c.bf16 %v372_v62, %v371_v61 }
  0xcf   : > { %5810 = vmatmul.msk.bf16.gmra.mxu0 %vm741_vm0, %v604_v0  ;;  %v1781_v5 = vmax.f32 %v1151_v2, 0.0  ;;  %v6590_v0 = vld [vmem:[%s8792_s4] ss:$0 sm:$0xff] }
  0xd4   : > { %v1152_v3 = vpop.f32.mrf.mxu0 }
  0xd5   : > { %v1153_v4 = vadd.f32 %v6526_v35, %v1152_v3 }
  0xd7   : > { %v1782_v6 = vmax.f32 %v1153_v4, 0.0 }
  0xd9   : > { %v2034_v9 = vpack.c.bf16 %v1782_v6, %v1781_v5 }
  0xdb   : > { %5946 = vmatmul.msk.bf16.gmra.mxu1 %vm2195_vm1, %v2034_v9 }
  0xdc   : > { %v1155_v11 = vpop.f32.mrf.mxu0 }
  0xdd   : > { %v1156_v12 = vadd.f32 %v6526_v35, %v1155_v11 }
  0xdf   : > { %5811 = vmatmul.msk.bf16.gmra.mxu0 %vm741_vm0, %v605_v10  ;;  %v1783_v15 = vmax.f32 %v1156_v12, 0.0 }
  0xe4   : > { %v1157_v13 = vpop.f32.mrf.mxu0 }
  0xe5   : > { %v1158_v14 = vadd.f32 %v6526_v35, %v1157_v13 }
  0xe7   : > { %v1784_v16 = vmax.f32 %v1158_v14, 0.0 }
  0xe9   : > { %v2035_v19 = vpack.c.bf16 %v1784_v16, %v1783_v15  ;;  %v373_v15 = vld [vmem:[%s6483_s30 + $0x120] sm:$0xff]  ;;  %v374_v16 = vld [vmem:[%s6483_s30 + $0x128] sm:$0xff] }
  0xea   : > { %v611_v18 = vpack.c.bf16 %v374_v16, %v373_v15 }
  0xeb   : > { %5947 = vmatmul.msk.bf16.gmra.mxu1 %vm2195_vm1, %v2035_v19 }
  0xec   : > { %v1160_v21 = vpop.f32.mrf.mxu0 }
  0xed   : > { %v1161_v22 = vadd.f32 %v6526_v35, %v1160_v21 }
  0xef   : > { %5812 = vmatmul.msk.bf16.gmra.mxu0 %vm741_vm0, %v606_v20  ;;  %v1785_v25 = vmax.f32 %v1161_v22, 0.0 }
  0xf4   : > { %v1162_v23 = vpop.f32.mrf.mxu0 }
  0xf5   : > { %v1163_v24 = vadd.f32 %v6526_v35, %v1162_v23 }
  0xf7   : > { %v1786_v26 = vmax.f32 %v1163_v24, 0.0 }
  0xf9   : > { %v2036_v29 = vpack.c.bf16 %v1786_v26, %v1785_v25 }
  0xfb   : > { %5948 = vmatmul.msk.bf16.gmra.mxu1 %vm2195_vm1, %v2036_v29 }
  0xfc   : > { %v1165_v31 = vpop.f32.mrf.mxu0 }
  0xfd   : > { %v1166_v32 = vadd.f32 %v6526_v35, %v1165_v31 }
  0xff   : > { %5813 = vmatmul.msk.bf16.gmra.mxu0 %vm741_vm0, %v607_v30  ;;  %v1787_v36 = vmax.f32 %v1166_v32, 0.0  ;;  %v375_v32 = vld [vmem:[%s6483_s30 + $0x130] sm:$0xff] }
 0x104   : > { %v1167_v33 = vpop.f32.mrf.mxu0 }
 0x105   : > { %v1168_v34 = vadd.f32 %v6526_v35, %v1167_v33  ;;  %v376_v33 = vld [vmem:[%s6483_s30 + $0x138] sm:$0xff] }
 0x107   : > { %v1788_v37 = vmax.f32 %v1168_v34, 0.0 }
 0x109   : > { %v2037_v40 = vpack.c.bf16 %v1788_v37, %v1787_v36  ;;  %v612_v36 = vpack.c.bf16 %v376_v33, %v375_v32 }
 0x10b   : > { %5949 = vmatmul.msk.bf16.gmra.mxu1 %vm2195_vm1, %v2037_v40 }
 0x10c   : > { %v1170_v42 = vpop.f32.mrf.mxu0 }
 0x10d   : > { %v1171_v45 = vadd.f32 %v6526_v35, %v1170_v42 }
 0x10f   : > { %5814 = vmatmul.msk.bf16.gmra.mxu0 %vm741_vm0, %v608_v41  ;;  %v1789_v48 = vmax.f32 %v1171_v45, 0.0 }
 0x114   : > { %v1172_v46 = vpop.f32.mrf.mxu0 }
 0x115   : > { %v1173_v47 = vadd.f32 %v6526_v35, %v1172_v46 }
 0x117   : > { %v1790_v49 = vmax.f32 %v1173_v47, 0.0 }
 0x119   : > { %v2038_v52 = vpack.c.bf16 %v1790_v49, %v1789_v48 }
 0x11b   : > { %5950 = vmatmul.msk.bf16.gmra.mxu1 %vm2195_vm1, %v2038_v52 }
 0x11c   : > { %v1175_v54 = vpop.f32.mrf.mxu0 }
 0x11d   : > { %v1176_v55 = vadd.f32 %v6526_v35, %v1175_v54 }
 0x11f   : > { %5815 = vmatmul.msk.bf16.gmra.mxu0 %vm741_vm0, %v609_v53  ;;  %v1791_v58 = vmax.f32 %v1176_v55, 0.0  ;;  %v613_v53 = vpack.c.bf16 %v378_v51, %v377_v50 }
 0x124   : > { %v1177_v56 = vpop.f32.mrf.mxu0 }
 0x125   : > { %v1178_v57 = vadd.f32 %v6526_v35, %v1177_v56 }
 0x127   : > { %v1792_v59 = vmax.f32 %v1178_v57, 0.0 }
 0x128   : > { %v2589_v60 = vpop.f32.mrf.mxu1 }
 0x129   : > { %v2039_v63 = vpack.c.bf16 %v1792_v59, %v1791_v58  ;;  %v2590_v3 = vadd.f32 %v6590_v0, %v2589_v60 }
 0x12b   : > { %5951 = vmatmul.msk.bf16.gmra.mxu1 %vm2195_vm1, %v2039_v63  ;;  %v3229_v6 = vmax.f32 %v2590_v3, 0.0 }
 0x12c   : > { %v1180_v2 = vpop.f32.mrf.mxu0 }
 0x12d   : > { %v1181_v7 = vadd.f32 %v6526_v35, %v1180_v2 }
 0x12f   : > { %5816 = vmatmul.msk.bf16.gmra.mxu0 %vm741_vm0, %v610_v1  ;;  %v1793_v12 = vmax.f32 %v1181_v7, 0.0 }
 0x130   : > { %v2591_v4 = vpop.f32.mrf.mxu1 }
 0x131   : > { %v2592_v5 = vadd.f32 %v6590_v0, %v2591_v4  ;;  %v379_v4 = vld [vmem:[%s6483_s30 + $0x150] sm:$0xff] }
 0x133   : > { %v3230_v8 = vmax.f32 %v2592_v5, 0.0  ;;  %v380_v5 = vld [vmem:[%s6483_s30 + $0x158] sm:$0xff] }
 0x134   : > { %v1182_v9 = vpop.f32.mrf.mxu0  ;;  %v614_v7 = vpack.c.bf16 %v380_v5, %v379_v4 }
 0x135   : > { %v1183_v10 = vadd.f32 %v6526_v35, %v1182_v9  ;;  %v3485_v11 = vpack.c.bf16 %v3230_v8, %v3229_v6 }
 0x137   : > { %v1794_v13 = vmax.f32 %v1183_v10, 0.0  ;;  %6079 = vmatmul.msk.bf16.vlgmr.msra.gmra.mxu2 %vm741_vm0, %v3485_v11 }
 0x138   : > { %v2594_v14 = vpop.f32.mrf.mxu1 }
 0x139   : > { %v2040_v17 = vpack.c.bf16 %v1794_v13, %v1793_v12  ;;  %v2595_v20 = vadd.f32 %v6590_v0, %v2594_v14 }
 0x13b   : > { %5952 = vmatmul.msk.bf16.gmra.mxu1 %vm2195_vm1, %v2040_v17  ;;  %v3231_v23 = vmax.f32 %v2595_v20, 0.0 }
 0x13c   : > { %v1185_v19 = vpop.f32.mrf.mxu0 }
 0x13d   : > { %v1186_v24 = vadd.f32 %v6526_v35, %v1185_v19 }
 0x13f   : > { %5817 = vmatmul.msk.bf16.gmra.mxu0 %vm741_vm0, %v611_v18  ;;  %v1795_v29 = vmax.f32 %v1186_v24, 0.0 }
 0x140   : > { %v2596_v21 = vpop.f32.mrf.mxu1 }
 0x141   : > { %v2597_v22 = vadd.f32 %v6590_v0, %v2596_v21  ;;  %v381_v21 = vld [vmem:[%s6483_s30 + $0x160] sm:$0xff] }
 0x143   : > { %v3232_v25 = vmax.f32 %v2597_v22, 0.0  ;;  %v382_v22 = vld [vmem:[%s6483_s30 + $0x168] sm:$0xff] }
 0x144   : > { %v1187_v26 = vpop.f32.mrf.mxu0  ;;  %v615_v24 = vpack.c.bf16 %v382_v22, %v381_v21 }
 0x145   : > { %v1188_v27 = vadd.f32 %v6526_v35, %v1187_v26  ;;  %v3486_v28 = vpack.c.bf16 %v3232_v25, %v3231_v23 }
 0x147   : > { %v1796_v30 = vmax.f32 %v1188_v27, 0.0  ;;  %6080 = vmatmul.msk.bf16.gmra.mxu2 %vm741_vm0, %v3486_v28 }
 0x148   : > { %v2599_v31 = vpop.f32.mrf.mxu1 }
 0x149   : > { %v2041_v34 = vpack.c.bf16 %v1796_v30, %v1795_v29  ;;  %v2600_v38 = vadd.f32 %v6590_v0, %v2599_v31 }
 0x14b   : > { %5953 = vmatmul.msk.bf16.gmra.mxu1 %vm2195_vm1, %v2041_v34  ;;  %v3233_v41 = vmax.f32 %v2600_v38, 0.0 }
 0x14c   : > { %v1190_v37 = vpop.f32.mrf.mxu0 }
 0x14d   : > { %v1191_v42 = vadd.f32 %v6526_v35, %v1190_v37 }
 0x14f   : > { %5818 = vmatmul.msk.bf16.gmra.mxu0 %vm741_vm0, %v612_v36  ;;  %v1797_v47 = vmax.f32 %v1191_v42, 0.0 }
 0x150   : > { %v2601_v39 = vpop.f32.mrf.mxu1 }
 0x151   : > { %v2602_v40 = vadd.f32 %v6590_v0, %v2601_v39  ;;  %v383_v39 = vld [vmem:[%s6483_s30 + $0x170] sm:$0xff] }
 0x153   : > { %v3234_v43 = vmax.f32 %v2602_v40, 0.0  ;;  %v384_v40 = vld [vmem:[%s6483_s30 + $0x178] sm:$0xff] }
 0x154   : > { %v1192_v44 = vpop.f32.mrf.mxu0  ;;  %v616_v42 = vpack.c.bf16 %v384_v40, %v383_v39 }
 0x155   : > { %v1193_v45 = vadd.f32 %v6526_v35, %v1192_v44  ;;  %v3487_v46 = vpack.c.bf16 %v3234_v43, %v3233_v41 }
 0x157   : > { %v1798_v48 = vmax.f32 %v1193_v45, 0.0  ;;  %6081 = vmatmul.msk.bf16.gmra.mxu2 %vm741_vm0, %v3487_v46 }
 0x158   : > { %v2604_v49 = vpop.f32.mrf.mxu1 }
 0x159   : > { %v2042_v52 = vpack.c.bf16 %v1798_v48, %v1797_v47  ;;  %v2605_v55 = vadd.f32 %v6590_v0, %v2604_v49 }
 0x15b   : > { %5954 = vmatmul.msk.bf16.gmra.mxu1 %vm2195_vm1, %v2042_v52  ;;  %v3235_v58 = vmax.f32 %v2605_v55, 0.0 }
 0x15c   : > { %v1195_v54 = vpop.f32.mrf.mxu0 }
 0x15d   : > { %v1196_v59 = vadd.f32 %v6526_v35, %v1195_v54 }
 0x15f   : > { %5819 = vmatmul.msk.bf16.gmra.mxu0 %vm741_vm0, %v613_v53  ;;  %v1799_v1 = vmax.f32 %v1196_v59, 0.0 }
 0x160   : > { %v2606_v56 = vpop.f32.mrf.mxu1 }
 0x161   : > { %v2607_v57 = vadd.f32 %v6590_v0, %v2606_v56  ;;  %v385_v56 = vld [vmem:[%s6483_s30 + $0x180] sm:$0xff] }
 0x163   : > { %v3236_v60 = vmax.f32 %v2607_v57, 0.0  ;;  %v386_v57 = vld [vmem:[%s6483_s30 + $0x188] sm:$0xff] }
 0x164   : > { %v1197_v61 = vpop.f32.mrf.mxu0  ;;  %v617_v59 = vpack.c.bf16 %v386_v57, %v385_v56 }
 0x165   : > { %v1198_v62 = vadd.f32 %v6526_v35, %v1197_v61  ;;  %v3488_v63 = vpack.c.bf16 %v3236_v60, %v3235_v58 }
 0x167   : > { %v1800_v2 = vmax.f32 %v1198_v62, 0.0  ;;  %6082 = vmatmul.msk.bf16.gmra.mxu2 %vm741_vm0, %v3488_v63 }
 0x168   : > { %v2609_v3 = vpop.f32.mrf.mxu1 }
 0x169   : > { %v2043_v6 = vpack.c.bf16 %v1800_v2, %v1799_v1  ;;  %v2610_v9 = vadd.f32 %v6590_v0, %v2609_v3 }
 0x16b   : > { %5955 = vmatmul.msk.bf16.gmra.mxu1 %vm2195_vm1, %v2043_v6  ;;  %v3237_v12 = vmax.f32 %v2610_v9, 0.0 }
 0x16c   : > { %v1200_v8 = vpop.f32.mrf.mxu0 }
 0x16d   : > { %v1201_v13 = vadd.f32 %v6526_v35, %v1200_v8 }
 0x16f   : > { %5820 = vmatmul.msk.bf16.gmra.mxu0 %vm741_vm0, %v614_v7  ;;  %v1801_v18 = vmax.f32 %v1201_v13, 0.0 }
 0x170   : > { %v2611_v10 = vpop.f32.mrf.mxu1 }
 0x171   : > { %v2612_v11 = vadd.f32 %v6590_v0, %v2611_v10  ;;  %v387_v10 = vld [vmem:[%s6483_s30 + $0x190] sm:$0xff] }
 0x173   : > { %v3238_v14 = vmax.f32 %v2612_v11, 0.0  ;;  %v388_v11 = vld [vmem:[%s6483_s30 + $0x198] sm:$0xff] }
 0x174   : > { %v1202_v15 = vpop.f32.mrf.mxu0  ;;  %v618_v13 = vpack.c.bf16 %v388_v11, %v387_v10 }
 0x175   : > { %v1203_v16 = vadd.f32 %v6526_v35, %v1202_v15  ;;  %v3489_v17 = vpack.c.bf16 %v3238_v14, %v3237_v12 }
 0x177   : > { %v1802_v19 = vmax.f32 %v1203_v16, 0.0  ;;  %6083 = vmatmul.msk.bf16.gmra.mxu2 %vm741_vm0, %v3489_v17 }
 0x178   : > { %v2614_v20 = vpop.f32.mrf.mxu1 }
 0x179   : > { %v2044_v23 = vpack.c.bf16 %v1802_v19, %v1801_v18  ;;  %v2615_v26 = vadd.f32 %v6590_v0, %v2614_v20 }
 0x17b   : > { %5956 = vmatmul.msk.bf16.gmra.mxu1 %vm2195_vm1, %v2044_v23  ;;  %v3239_v29 = vmax.f32 %v2615_v26, 0.0 }
 0x17c   : > { %v1205_v25 = vpop.f32.mrf.mxu0 }
 0x17d   : > { %v1206_v30 = vadd.f32 %v6526_v35, %v1205_v25 }
 0x17f   : > { %5821 = vmatmul.msk.bf16.gmra.mxu0 %vm741_vm0, %v615_v24  ;;  %v1803_v36 = vmax.f32 %v1206_v30, 0.0 }
 0x180   : > { %v2616_v27 = vpop.f32.mrf.mxu1 }
 0x181   : > { %v2617_v28 = vadd.f32 %v6590_v0, %v2616_v27  ;;  %v389_v27 = vld [vmem:[%s6483_s30 + $0x1a0] sm:$0xff] }
 0x183   : > { %v3240_v31 = vmax.f32 %v2617_v28, 0.0  ;;  %v390_v28 = vld [vmem:[%s6483_s30 + $0x1a8] sm:$0xff] }
 0x184   : > { %v1207_v32 = vpop.f32.mrf.mxu0 }
 0x185   : > { %v1208_v33 = vadd.f32 %v6526_v35, %v1207_v32  ;;  %v3490_v34 = vpack.c.bf16 %v3240_v31, %v3239_v29  ;;  %v619_v31 = vpack.c.bf16 %v390_v28, %v389_v27 }
 0x187   : > { %v1804_v37 = vmax.f32 %v1208_v33, 0.0  ;;  %6084 = vmatmul.msk.bf16.gmra.mxu2 %vm741_vm0, %v3490_v34  ;;  %v6677_v33 = vld [vmem:[%s8794_s6] ss:$0 sm:$0xff] }
 0x188   : > { %v2619_v38 = vpop.f32.mrf.mxu1 }
 0x189   : > { %v2045_v41 = vpack.c.bf16 %v1804_v37, %v1803_v36  ;;  %v2620_v44 = vadd.f32 %v6590_v0, %v2619_v38 }
 0x18b   : > { %5957 = vmatmul.msk.bf16.gmra.mxu1 %vm2195_vm1, %v2045_v41  ;;  %v3241_v47 = vmax.f32 %v2620_v44, 0.0 }
 0x18c   : > { %v1210_v43 = vpop.f32.mrf.mxu0 }
 0x18d   : > { %v1211_v48 = vadd.f32 %v6526_v35, %v1210_v43 }
 0x18f   : > { %5822 = vmatmul.msk.bf16.gmra.mxu0 %vm741_vm0, %v616_v42  ;;  %v1805_v53 = vmax.f32 %v1211_v48, 0.0 }
 0x190   : > { %v2621_v45 = vpop.f32.mrf.mxu1 }
 0x191   : > { %v2622_v46 = vadd.f32 %v6590_v0, %v2621_v45 }
 0x193   : > { %v3242_v49 = vmax.f32 %v2622_v46, 0.0 }
 0x194   : > { %v1212_v50 = vpop.f32.mrf.mxu0 }
 0x195   : > { %v1213_v51 = vadd.f32 %v6526_v35, %v1212_v50  ;;  %v3491_v52 = vpack.c.bf16 %v3242_v49, %v3241_v47 }
 0x197   : > { %v1806_v54 = vmax.f32 %v1213_v51, 0.0  ;;  %6085 = vmatmul.msk.bf16.gmra.mxu2 %vm741_vm0, %v3491_v52 }
 0x198   : > { %v2624_v55 = vpop.f32.mrf.mxu1 }
 0x199   : > { %v2046_v58 = vpack.c.bf16 %v1806_v54, %v1805_v53  ;;  %v2625_v61 = vadd.f32 %v6590_v0, %v2624_v55  ;;  %v391_v53 = vld [vmem:[%s6483_s30 + $0x1b0] sm:$0xff]  ;;  %v392_v54 = vld [vmem:[%s6483_s30 + $0x1b8] sm:$0xff] }
 0x19a   : > { %v620_v57 = vpack.c.bf16 %v392_v54, %v391_v53 }
 0x19b   : > { %5958 = vmatmul.msk.bf16.gmra.mxu1 %vm2195_vm1, %v2046_v58  ;;  %v3243_v1 = vmax.f32 %v2625_v61, 0.0 }
 0x19c   : > { %v1215_v60 = vpop.f32.mrf.mxu0 }
 0x19d   : > { %v1216_v2 = vadd.f32 %v6526_v35, %v1215_v60 }
 0x19f   : > { %5823 = vmatmul.msk.bf16.gmra.mxu0 %vm741_vm0, %v617_v59  ;;  %v1807_v7 = vmax.f32 %v1216_v2, 0.0 }
 0x1a0   : > { %v2626_v62 = vpop.f32.mrf.mxu1 }
 0x1a1   : > { %v2627_v63 = vadd.f32 %v6590_v0, %v2626_v62 }
 0x1a3   : > { %v3244_v3 = vmax.f32 %v2627_v63, 0.0 }
 0x1a4   : > { %v1217_v4 = vpop.f32.mrf.mxu0 }
 0x1a5   : > { %v1218_v5 = vadd.f32 %v6526_v35, %v1217_v4  ;;  %v3492_v6 = vpack.c.bf16 %v3244_v3, %v3243_v1 }
 0x1a7   : > { %v1808_v8 = vmax.f32 %v1218_v5, 0.0  ;;  %6086 = vmatmul.msk.bf16.gmra.mxu2 %vm741_vm0, %v3492_v6 }
 0x1a8   : > { %v2629_v9 = vpop.f32.mrf.mxu1 }
 0x1a9   : > { %v2047_v12 = vpack.c.bf16 %v1808_v8, %v1807_v7  ;;  %v2630_v15 = vadd.f32 %v6590_v0, %v2629_v9 }
 0x1ab   : > { %5959 = vmatmul.msk.bf16.gmra.mxu1 %vm2195_vm1, %v2047_v12  ;;  %v3245_v18 = vmax.f32 %v2630_v15, 0.0  ;;  %v394_v15 = vld [vmem:[%s6483_s30 + $0x1c8] sm:$0xff] }
 0x1ac   : > { %v1220_v14 = vpop.f32.mrf.mxu0 }
 0x1ad   : > { %v1221_v19 = vadd.f32 %v6526_v35, %v1220_v14  ;;  %v393_v14 = vld [vmem:[%s6483_s30 + $0x1c0] sm:$0xff] }
 0x1af   : > { %5824 = vmatmul.msk.bf16.gmra.mxu0 %vm741_vm0, %v618_v13  ;;  %v1809_v24 = vmax.f32 %v1221_v19, 0.0 }
 0x1b0   : > { %v2631_v16 = vpop.f32.mrf.mxu1 }
 0x1b1   : > { %v2632_v17 = vadd.f32 %v6590_v0, %v2631_v16 }
 0x1b3   : > { %v3246_v20 = vmax.f32 %v2632_v17, 0.0 }
 0x1b4   : > { %v1222_v21 = vpop.f32.mrf.mxu0 }
 0x1b5   : > { %v1223_v22 = vadd.f32 %v6526_v35, %v1222_v21  ;;  %v3493_v23 = vpack.c.bf16 %v3246_v20, %v3245_v18  ;;  %v621_v18 = vpack.c.bf16 %v394_v15, %v393_v14 }
 0x1b7   : > { %v1810_v25 = vmax.f32 %v1223_v22, 0.0  ;;  %6087 = vmatmul.msk.bf16.gmra.mxu2 %vm741_vm0, %v3493_v23 }
 0x1b8   : > { %v2634_v26 = vpop.f32.mrf.mxu1 }
 0x1b9   : > { %v2048_v29 = vpack.c.bf16 %v1810_v25, %v1809_v24  ;;  %v2635_v34 = vadd.f32 %v6590_v0, %v2634_v26 }
 0x1ba   : > { %v4026_v30 = vpop.f32.mrf.mxu2 }
 0x1bb   : > { %5960 = vmatmul.msk.bf16.gmra.mxu1 %vm2195_vm1, %v2048_v29  ;;  %v4027_v37 = vadd.f32 %v6677_v33, %v4026_v30  ;;  %v3247_v40 = vmax.f32 %v2635_v34, 0.0 }
 0x1bc   : > { %v1225_v32 = vpop.f32.mrf.mxu0 }
 0x1bd   : > { %v1226_v41 = vadd.f32 %v6526_v35, %v1225_v32  ;;  %v4666_v45 = vmax.f32 %v4027_v37, 0.0 }
 0x1bf   : > { %5825 = vmatmul.msk.bf16.gmra.mxu0 %vm741_vm0, %v619_v31  ;;  %v1811_v49 = vmax.f32 %v1226_v41, 0.0  ;;  %v396_v41 = vld [vmem:[%s6483_s30 + $0x1d8] sm:$0xff] }
 0x1c0   : > { %v2636_v36 = vpop.f32.mrf.mxu1 }
 0x1c1   : > { %v2637_v38 = vadd.f32 %v6590_v0, %v2636_v36 }
 0x1c2   : > { %v4028_v39 = vpop.f32.mrf.mxu2 }
 0x1c3   : > { %v3248_v42 = vmax.f32 %v2637_v38, 0.0  ;;  %v4029_v43 = vadd.f32 %v6677_v33, %v4028_v39 }
 0x1c4   : > { %v1227_v44 = vpop.f32.mrf.mxu0 }
 0x1c5   : > { %v4667_v46 = vmax.f32 %v4029_v43, 0.0  ;;  %v1228_v47 = vadd.f32 %v6526_v35, %v1227_v44  ;;  %v3494_v48 = vpack.c.bf16 %v3248_v42, %v3247_v40  ;;  %v395_v40 = vld [vmem:[%s6483_s30 + $0x1d0] sm:$0xff] }
 0x1c6   : > { %v622_v44 = vpack.c.bf16 %v396_v41, %v395_v40 }
 0x1c7   : > { %v1812_v50 = vmax.f32 %v1228_v47, 0.0  ;;  %6088 = vmatmul.msk.bf16.gmra.mxu2 %vm741_vm0, %v3494_v48  ;;  %v6687_v51 = vpack.c.bf16 %v4667_v46, %v4666_v45 }
 0x1c8   : > { %v2639_v52 = vpop.f32.mrf.mxu1 }
 0x1c9   : > { %v2049_v55 = vpack.c.bf16 %v1812_v50, %v1811_v49  ;;  %v2640_v59 = vadd.f32 %v6590_v0, %v2639_v52 }
 0x1ca   : > { %v4031_v56 = vpop.f32.mrf.mxu2 }
 0x1cb   : > { %5961 = vmatmul.msk.bf16.gmra.mxu1 %vm2195_vm1, %v2049_v55  ;;  %v4032_v61 = vadd.f32 %v6677_v33, %v4031_v56  ;;  %v3249_v1 = vmax.f32 %v2640_v59, 0.0 }
 0x1cc   : > { %v1230_v58 = vpop.f32.mrf.mxu0 }
 0x1cd   : > { %v1231_v2 = vadd.f32 %v6526_v35, %v1230_v58  ;;  %v4668_v6 = vmax.f32 %v4032_v61, 0.0 }
 0x1cf   : > { %5826 = vmatmul.msk.bf16.gmra.mxu0 %vm741_vm0, %v620_v57  ;;  %v1813_v10 = vmax.f32 %v1231_v2, 0.0  ;;  %v397_v2 = vld [vmem:[%s6483_s30 + $0x1e0] sm:$0xff] }
 0x1d0   : > { %v2641_v60 = vpop.f32.mrf.mxu1 }
 0x1d1   : > { %v2642_v62 = vadd.f32 %v6590_v0, %v2641_v60 }
 0x1d2   : > { %v4033_v63 = vpop.f32.mrf.mxu2 }
 0x1d3   : > { %v3250_v3 = vmax.f32 %v2642_v62, 0.0  ;;  %v4034_v4 = vadd.f32 %v6677_v33, %v4033_v63 }
 0x1d4   : > { %v1232_v5 = vpop.f32.mrf.mxu0 }
 0x1d5   : > { %v4669_v7 = vmax.f32 %v4034_v4, 0.0  ;;  %v1233_v8 = vadd.f32 %v6526_v35, %v1232_v5  ;;  %v3495_v9 = vpack.c.bf16 %v3250_v3, %v3249_v1  ;;  %v398_v3 = vld [vmem:[%s6483_s30 + $0x1e8] sm:$0xff] }
 0x1d7   : > { %v1814_v11 = vmax.f32 %v1233_v8, 0.0  ;;  %6089 = vmatmul.msk.bf16.gmra.mxu2 %vm741_vm0, %v3495_v9  ;;  %v6700_v12 = vpack.c.bf16 %v4669_v7, %v4668_v6  ;;  %v623_v6 = vpack.c.bf16 %v398_v3, %v397_v2 }
 0x1d8   : > { %v2644_v13 = vpop.f32.mrf.mxu1 }
 0x1d9   : > { %v2050_v16 = vpack.c.bf16 %v1814_v11, %v1813_v10  ;;  %v2645_v20 = vadd.f32 %v6590_v0, %v2644_v13 }
 0x1da   : > { %v4036_v17 = vpop.f32.mrf.mxu2 }
 0x1db   : > { %5962 = vmatmul.msk.bf16.gmra.mxu1 %vm2195_vm1, %v2050_v16  ;;  %v4037_v22 = vadd.f32 %v6677_v33, %v4036_v17  ;;  %v3251_v25 = vmax.f32 %v2645_v20, 0.0 }
 0x1dc   : > { %v1235_v19 = vpop.f32.mrf.mxu0 }
 0x1dd   : > { %v1236_v26 = vadd.f32 %v6526_v35, %v1235_v19  ;;  %v4670_v30 = vmax.f32 %v4037_v22, 0.0 }
 0x1df   : > { %5827 = vmatmul.msk.bf16.gmra.mxu0 %vm741_vm0, %v621_v18  ;;  %v1815_v36 = vmax.f32 %v1236_v26, 0.0 }
 0x1e0   : > { %v2646_v21 = vpop.f32.mrf.mxu1 }
 0x1e1   : > { %v2647_v23 = vadd.f32 %v6590_v0, %v2646_v21 }
 0x1e2   : > { %v4038_v24 = vpop.f32.mrf.mxu2 }
 0x1e3   : > { %v3252_v27 = vmax.f32 %v2647_v23, 0.0  ;;  %v4039_v28 = vadd.f32 %v6677_v33, %v4038_v24 }
 0x1e4   : > { %v1237_v29 = vpop.f32.mrf.mxu0 }
 0x1e5   : > { %v4671_v31 = vmax.f32 %v4039_v28, 0.0  ;;  %v1238_v32 = vadd.f32 %v6526_v35, %v1237_v29  ;;  %v3496_v34 = vpack.c.bf16 %v3252_v27, %v3251_v25  ;;  %v399_v27 = vld [vmem:[%s6483_s30 + $0x1f0] sm:$0xff]  ;;  %v400_v28 = vld [vmem:[%s6483_s30 + $0x1f8] sm:$0xff] }
 0x1e7   : > { %v1816_v37 = vmax.f32 %v1238_v32, 0.0  ;;  %6090 = vmatmul.msk.bf16.gmra.mxu2 %vm741_vm0, %v3496_v34  ;;  %v6713_v38 = vpack.c.bf16 %v4671_v31, %v4670_v30  ;;  %v624_v31 = vpack.c.bf16 %v400_v28, %v399_v27 }
 0x1e8   : > { %v2649_v39 = vpop.f32.mrf.mxu1 }
 0x1e9   : > { %v2051_v42 = vpack.c.bf16 %v1816_v37, %v1815_v36  ;;  %v2650_v46 = vadd.f32 %v6590_v0, %v2649_v39 }
 0x1ea   : > { %v4041_v43 = vpop.f32.mrf.mxu2 }
 0x1eb   : > { %5963 = vmatmul.msk.bf16.gmra.mxu1 %vm2195_vm1, %v2051_v42  ;;  %v4042_v48 = vadd.f32 %v6677_v33, %v4041_v43  ;;  %v3253_v52 = vmax.f32 %v2650_v46, 0.0 }
 0x1ec   : > { %v1240_v45 = vpop.f32.mrf.mxu0 }
 0x1ed   : > { %v1241_v53 = vadd.f32 %v6526_v35, %v1240_v45  ;;  %v4672_v57 = vmax.f32 %v4042_v48, 0.0 }
 0x1ef   : > { %5828 = vmatmul.msk.bf16.gmra.mxu0 %vm741_vm0, %v622_v44  ;;  %v1817_v61 = vmax.f32 %v1241_v53, 0.0 }
 0x1f0   : > { %v2651_v47 = vpop.f32.mrf.mxu1 }
 0x1f1   : > { %v2652_v49 = vadd.f32 %v6590_v0, %v2651_v47 }
 0x1f2   : > { %v4043_v50 = vpop.f32.mrf.mxu2 }
 0x1f3   : > { %v3254_v54 = vmax.f32 %v2652_v49, 0.0  ;;  %v4044_v55 = vadd.f32 %v6677_v33, %v4043_v50 }
 0x1f4   : > { %v1242_v56 = vpop.f32.mrf.mxu0 }
 0x1f5   : > { %v3497_v58 = vpack.c.bf16 %v3254_v54, %v3253_v52  ;;  %v4673_v59 = vmax.f32 %v4044_v55, 0.0  ;;  %v1243_v60 = vadd.f32 %v6526_v35, %v1242_v56  ;;  %v401_v55 = vld [vmem:[%s6483_s30 + $0x200] sm:$0xff]  ;;  %v402_v56 = vld [vmem:[%s6483_s30 + $0x208] sm:$0xff] }
 0x1f7   : > { %v1818_v62 = vmax.f32 %v1243_v60, 0.0  ;;  %6091 = vmatmul.msk.bf16.gmra.mxu2 %vm741_vm0, %v3497_v58  ;;  %v6726_v63 = vpack.c.bf16 %v4673_v59, %v4672_v57  ;;  %v625_v59 = vpack.c.bf16 %v402_v56, %v401_v55 }
 0x1f8   : > { %v2654_v1 = vpop.f32.mrf.mxu1 }
 0x1f9   : > { %v2052_v4 = vpack.c.bf16 %v1818_v62, %v1817_v61  ;;  %v2655_v8 = vadd.f32 %v6590_v0, %v2654_v1 }
 0x1fa   : > { %v4046_v5 = vpop.f32.mrf.mxu2 }
 0x1fb   : > { %5964 = vmatmul.msk.bf16.gmra.mxu1 %vm2195_vm1, %v2052_v4  ;;  %v4047_v10 = vadd.f32 %v6677_v33, %v4046_v5  ;;  %v3255_v14 = vmax.f32 %v2655_v8, 0.0 }
 0x1fc   : > { %v1245_v7 = vpop.f32.mrf.mxu0 }
 0x1fd   : > { %v1246_v15 = vadd.f32 %v6526_v35, %v1245_v7  ;;  %v4674_v19 = vmax.f32 %v4047_v10, 0.0 }
 0x1ff   : > { %5829 = vmatmul.msk.bf16.gmra.mxu0 %vm741_vm0, %v623_v6  ;;  %v1819_v23 = vmax.f32 %v1246_v15, 0.0 }
 0x200   : > { %v2656_v9 = vpop.f32.mrf.mxu1 }
 0x201   : > { %v2657_v11 = vadd.f32 %v6590_v0, %v2656_v9 }
 0x202   : > { %v4048_v13 = vpop.f32.mrf.mxu2 }
 0x203   : > { %v3256_v16 = vmax.f32 %v2657_v11, 0.0  ;;  %v4049_v17 = vadd.f32 %v6677_v33, %v4048_v13 }
 0x204   : > { %v1247_v18 = vpop.f32.mrf.mxu0 }
 0x205   : > { %v3498_v20 = vpack.c.bf16 %v3256_v16, %v3255_v14  ;;  %v4675_v21 = vmax.f32 %v4049_v17, 0.0  ;;  %v1248_v22 = vadd.f32 %v6526_v35, %v1247_v18  ;;  %v403_v18 = vld [vmem:[%s6483_s30 + $0x210] sm:$0xff] }
 0x207   : > { %v1820_v24 = vmax.f32 %v1248_v22, 0.0  ;;  %6092 = vmatmul.msk.bf16.gmra.mxu2 %vm741_vm0, %v3498_v20  ;;  %v6739_v25 = vpack.c.bf16 %v4675_v21, %v4674_v19  ;;  %v404_v19 = vld [vmem:[%s6483_s30 + $0x218] sm:$0xff] }
 0x208   : > { %v2659_v26 = vpop.f32.mrf.mxu1  ;;  %v626_v22 = vpack.c.bf16 %v404_v19, %v403_v18 }
 0x209   : > { %v2053_v29 = vpack.c.bf16 %v1820_v24, %v1819_v23  ;;  %v2660_v34 = vadd.f32 %v6590_v0, %v2659_v26 }
 0x20a   : > { %v4051_v30 = vpop.f32.mrf.mxu2 }
 0x20b   : > { %5965 = vmatmul.msk.bf16.gmra.mxu1 %vm2195_vm1, %v2053_v29  ;;  %v4052_v37 = vadd.f32 %v6677_v33, %v4051_v30  ;;  %v3257_v41 = vmax.f32 %v2660_v34, 0.0 }
 0x20c   : > { %v1250_v32 = vpop.f32.mrf.mxu0 }
 0x20d   : > { %v1251_v42 = vadd.f32 %v6526_v35, %v1250_v32  ;;  %v4676_v46 = vmax.f32 %v4052_v37, 0.0 }
 0x20f   : > { %5830 = vmatmul.msk.bf16.gmra.mxu0 %vm741_vm0, %v624_v31  ;;  %v1821_v50 = vmax.f32 %v1251_v42, 0.0 }
 0x210   : > { %v2661_v36 = vpop.f32.mrf.mxu1 }
 0x211   : > { %v2662_v39 = vadd.f32 %v6590_v0, %v2661_v36 }
 0x212   : > { %v4053_v40 = vpop.f32.mrf.mxu2 }
 0x213   : > { %v3258_v43 = vmax.f32 %v2662_v39, 0.0  ;;  %v4054_v44 = vadd.f32 %v6677_v33, %v4053_v40 }
 0x214   : > { %v1252_v45 = vpop.f32.mrf.mxu0 }
 0x215   : > { %v3499_v47 = vpack.c.bf16 %v3258_v43, %v3257_v41  ;;  %v4677_v48 = vmax.f32 %v4054_v44, 0.0  ;;  %v1253_v49 = vadd.f32 %v6526_v35, %v1252_v45 }
 0x217   : > { %v1822_v52 = vmax.f32 %v1253_v49, 0.0  ;;  %6093 = vmatmul.msk.bf16.gmra.mxu2 %vm741_vm0, %v3499_v47  ;;  %v6752_v53 = vpack.c.bf16 %v4677_v48, %v4676_v46  ;;  %v405_v46 = vld [vmem:[%s6483_s30 + $0x220] sm:$0xff]  ;;  %v406_v47 = vld [vmem:[%s6483_s30 + $0x228] sm:$0xff] }
 0x218   : > { %v2664_v54 = vpop.f32.mrf.mxu1 }
 0x219   : > { %v2054_v57 = vpack.c.bf16 %v1822_v52, %v1821_v50  ;;  %v2665_v61 = vadd.f32 %v6590_v0, %v2664_v54  ;;  %v627_v50 = vpack.c.bf16 %v406_v47, %v405_v46 }
 0x21a   : > { %v4056_v58 = vpop.f32.mrf.mxu2 }
 0x21b   : > { %5966 = vmatmul.msk.bf16.gmra.mxu1 %vm2195_vm1, %v2054_v57  ;;  %v4057_v1 = vadd.f32 %v6677_v33, %v4056_v58  ;;  %v3259_v4 = vmax.f32 %v2665_v61, 0.0 }
 0x21c   : > { %v1255_v60 = vpop.f32.mrf.mxu0 }
 0x21d   : > { %v1256_v5 = vadd.f32 %v6526_v35, %v1255_v60  ;;  %v4678_v9 = vmax.f32 %v4057_v1, 0.0 }
 0x21f   : > { %5831 = vmatmul.msk.bf16.gmra.mxu0 %vm741_vm0, %v625_v59  ;;  %v1823_v14 = vmax.f32 %v1256_v5, 0.0  ;;  %v6790_v59 = vld [vmem:[%s8790_s2] ss:$0 sm:$0xff] }
 0x220   : > { %v2666_v62 = vpop.f32.mrf.mxu1 }
 0x221   : > { %v2667_v2 = vadd.f32 %v6590_v0, %v2666_v62 }
 0x222   : > { %v4058_v3 = vpop.f32.mrf.mxu2 }
 0x223   : > { %v3260_v6 = vmax.f32 %v2667_v2, 0.0  ;;  %v4059_v7 = vadd.f32 %v6677_v33, %v4058_v3 }
 0x224   : > { %v1257_v8 = vpop.f32.mrf.mxu0 }
 0x225   : > { %v3500_v10 = vpack.c.bf16 %v3260_v6, %v3259_v4  ;;  %v4679_v11 = vmax.f32 %v4059_v7, 0.0  ;;  %v1258_v13 = vadd.f32 %v6526_v35, %v1257_v8 }
 0x227   : > { %v1824_v15 = vmax.f32 %v1258_v13, 0.0  ;;  %6094 = vmatmul.msk.bf16.gmra.mxu2 %vm741_vm0, %v3500_v10  ;;  %v6765_v16 = vpack.c.bf16 %v4679_v11, %v4678_v9  ;;  %v407_v10 = vld [vmem:[%s6483_s30 + $0x230] sm:$0xff]  ;;  %v408_v11 = vld [vmem:[%s6483_s30 + $0x238] sm:$0xff] }
 0x228   : > { %v2669_v17 = vpop.f32.mrf.mxu1 }
 0x229   : > { %v2055_v20 = vpack.c.bf16 %v1824_v15, %v1823_v14  ;;  %v2670_v24 = vadd.f32 %v6590_v0, %v2669_v17  ;;  %v628_v15 = vpack.c.bf16 %v408_v11, %v407_v10 }
 0x22a   : > { %v4061_v21 = vpop.f32.mrf.mxu2 }
 0x22b   : > { %5967 = vmatmul.msk.bf16.gmra.mxu1 %vm2195_vm1, %v2055_v20  ;;  %v4062_v27 = vadd.f32 %v6677_v33, %v4061_v21  ;;  %v3261_v30 = vmax.f32 %v2670_v24, 0.0 }
 0x22c   : > { %v1260_v23 = vpop.f32.mrf.mxu0 }
 0x22d   : > { %v1261_v31 = vadd.f32 %v6526_v35, %v1260_v23  ;;  %v4680_v37 = vmax.f32 %v4062_v27, 0.0 }
 0x22f   : > { %5832 = vmatmul.msk.bf16.gmra.mxu0 %vm741_vm0, %v626_v22  ;;  %v1825_v42 = vmax.f32 %v1261_v31, 0.0 }
 0x230   : > { %v2671_v26 = vpop.f32.mrf.mxu1 }
 0x231   : > { %v2672_v28 = vadd.f32 %v6590_v0, %v2671_v26 }
 0x232   : > { %v4063_v29 = vpop.f32.mrf.mxu2 }
 0x233   : > { %v3262_v32 = vmax.f32 %v2672_v28, 0.0  ;;  %v4064_v34 = vadd.f32 %v6677_v33, %v4063_v29 }
 0x234   : > { %v1262_v36 = vpop.f32.mrf.mxu0 }
 0x235   : > { %v3501_v39 = vpack.c.bf16 %v3262_v32, %v3261_v30  ;;  %v4681_v40 = vmax.f32 %v4064_v34, 0.0  ;;  %v1263_v41 = vadd.f32 %v6526_v35, %v1262_v36 }
 0x237   : > { %v6777_v43 = vpack.c.bf16 %v4681_v40, %v4680_v37  ;;  %v1826_v44 = vmax.f32 %v1263_v41, 0.0  ;;  %6095 = vmatmul.msk.bf16.gmra.mxu2 %vm741_vm0, %v3501_v39  ;;  %v409_v40 = vld [vmem:[%s6483_s30 + $0x240] sm:$0xff]  ;;  %v410_v41 = vld [vmem:[%s6483_s30 + $0x248] sm:$0xff] }
 0x238   : > { %v2674_v45 = vpop.f32.mrf.mxu1 }
 0x239   : > { %v2056_v48 = vpack.c.bf16 %v1826_v44, %v1825_v42  ;;  %v2675_v54 = vadd.f32 %v6590_v0, %v2674_v45  ;;  %v629_v45 = vpack.c.bf16 %v410_v41, %v409_v40 }
 0x23a   : > { %v4066_v49 = vpop.f32.mrf.mxu2 }
 0x23b   : > { %5968 = vmatmul.msk.bf16.gmra.mxu1 %vm2195_vm1, %v2056_v48  ;;  %v4067_v55 = vadd.f32 %v6677_v33, %v4066_v49  ;;  %v3263_v58 = vmax.f32 %v2675_v54, 0.0 }
 0x23c   : > { %v1265_v52 = vpop.f32.mrf.mxu0 }
 0x23d   : > { %v1266_v60 = vadd.f32 %v6790_v59, %v1265_v52  ;;  %v4682_v2 = vmax.f32 %v4067_v55, 0.0 }
 0x23f   : > { %5833 = vmatmul.msk.bf16.gmra.mxu0 %vm741_vm0, %v627_v50  ;;  %v1827_v6 = vmax.f32 %v1266_v60, 0.0 }
 0x240   : > { %v2676_v35 = vpop.f32.mrf.mxu1 }
 0x241   : > { %v2677_v56 = vadd.f32 %v6590_v0, %v2676_v35 }
 0x242   : > { %v4068_v57 = vpop.f32.mrf.mxu2 }
 0x243   : > { %v3264_v61 = vmax.f32 %v2677_v56, 0.0  ;;  %v4069_v62 = vadd.f32 %v6677_v33, %v4068_v57 }
 0x244   : > { %v1267_v1 = vpop.f32.mrf.mxu0 }
 0x245   : > { %v3502_v3 = vpack.c.bf16 %v3264_v61, %v3263_v58  ;;  %v4683_v4 = vmax.f32 %v4069_v62, 0.0  ;;  %v1268_v5 = vadd.f32 %v6790_v59, %v1267_v1 }
 0x247   : > { %v1828_v7 = vmax.f32 %v1268_v5, 0.0  ;;  %6096 = vmatmul.msk.bf16.gmra.mxu2 %vm741_vm0, %v3502_v3  ;;  %v6796_v8 = vpack.c.bf16 %v4683_v4, %v4682_v2  ;;  %v411_v5 = vld [vmem:[%s6483_s30 + $0x250] sm:$0xff] }
 0x248   : > { %v2679_v9 = vpop.f32.mrf.mxu1 }
 0x249   : > { %v2057_v13 = vpack.c.bf16 %v1828_v7, %v1827_v6  ;;  %v2680_v18 = vadd.f32 %v6590_v0, %v2679_v9  ;;  %v412_v6 = vld [vmem:[%s6483_s30 + $0x258] sm:$0xff] }
 0x24a   : > { %v4071_v14 = vpop.f32.mrf.mxu2  ;;  %v630_v10 = vpack.c.bf16 %v412_v6, %v411_v5 }
 0x24b   : > { %5969 = vmatmul.msk.bf16.gmra.mxu1 %vm2195_vm1, %v2057_v13  ;;  %v4072_v20 = vadd.f32 %v6677_v33, %v4071_v14  ;;  %v3265_v23 = vmax.f32 %v2680_v18, 0.0 }
 0x24c   : > { %v1270_v17 = vpop.f32.mrf.mxu0 }
 0x24d   : > { %v1271_v24 = vadd.f32 %v6790_v59, %v1270_v17  ;;  %v4684_v29 = vmax.f32 %v4072_v20, 0.0 }
 0x24f   : > { %5834 = vmatmul.msk.bf16.gmra.mxu0 %vm741_vm0, %v628_v15  ;;  %v1829_v34 = vmax.f32 %v1271_v24, 0.0 }
 0x250   : > { %v2681_v19 = vpop.f32.mrf.mxu1 }
 0x251   : > { %v2682_v21 = vadd.f32 %v6590_v0, %v2681_v19 }
 0x252   : > { %v4073_v22 = vpop.f32.mrf.mxu2 }
 0x253   : > { %v3266_v26 = vmax.f32 %v2682_v21, 0.0  ;;  %v4074_v27 = vadd.f32 %v6677_v33, %v4073_v22 }
 0x254   : > { %v1272_v28 = vpop.f32.mrf.mxu0 }
 0x255   : > { %v3503_v30 = vpack.c.bf16 %v3266_v26, %v3265_v23  ;;  %v4685_v31 = vmax.f32 %v4074_v27, 0.0  ;;  %v1273_v32 = vadd.f32 %v6790_v59, %v1272_v28 }
 0x257   : > { %v1830_v36 = vmax.f32 %v1273_v32, 0.0  ;;  %6097 = vmatmul.msk.bf16.gmra.mxu2 %vm741_vm0, %v3503_v30  ;;  %v6809_v37 = vpack.c.bf16 %v4685_v31, %v4684_v29 }
 0x258   : > { %v2684_v39 = vpop.f32.mrf.mxu1 }
 0x259   : > { %v2058_v42 = vpack.c.bf16 %v1830_v36, %v1829_v34  ;;  %v2685_v47 = vadd.f32 %v6590_v0, %v2684_v39  ;;  %v413_v34 = vld [vmem:[%s6483_s30 + $0x260] sm:$0xff]  ;;  %v414_v36 = vld [vmem:[%s6483_s30 + $0x268] sm:$0xff] }
 0x25a   : > { %v4076_v44 = vpop.f32.mrf.mxu2  ;;  %v631_v41 = vpack.c.bf16 %v414_v36, %v413_v34  ;;  %v418_v34 = vld [vmem:[%s6483_s30 + $0x288] sm:$0xff] }
 0x25b   : > { %5970 = vmatmul.msk.bf16.gmra.mxu1 %vm2195_vm1, %v2058_v42  ;;  %v4077_v49 = vadd.f32 %v6677_v33, %v4076_v44  ;;  %v3267_v54 = vmax.f32 %v2685_v47, 0.0  ;;  %v6846_v47 = vld [vmem:[%s8792_s4] ss:$0 sm:$0xff] }
 0x25c   : > { %v1275_v46 = vpop.f32.mrf.mxu0 }
 0x25d   : > { %v1276_v35 = vadd.f32 %v6790_v59, %v1275_v46  ;;  %v4686_v58 = vmax.f32 %v4077_v49, 0.0 }
 0x25f   : > { %5835 = vmatmul.msk.bf16.gmra.mxu0 %vm741_vm0, %v629_v45  ;;  %v1831_v1 = vmax.f32 %v1276_v35, 0.0 }
 0x260   : > { %v2686_v48 = vpop.f32.mrf.mxu1 }
 0x261   : > { %v2687_v50 = vadd.f32 %v6590_v0, %v2686_v48 }
 0x262   : > { %v4078_v52 = vpop.f32.mrf.mxu2 }
 0x263   : > { %v3268_v55 = vmax.f32 %v2687_v50, 0.0  ;;  %v4079_v56 = vadd.f32 %v6677_v33, %v4078_v52 }
 0x264   : > { %v1277_v57 = vpop.f32.mrf.mxu0 }
 0x265   : > { %v3504_v60 = vpack.c.bf16 %v3268_v55, %v3267_v54  ;;  %v4687_v61 = vmax.f32 %v4079_v56, 0.0  ;;  %v1278_v62 = vadd.f32 %v6790_v59, %v1277_v57 }
 0x267   : > { %v1832_v2 = vmax.f32 %v1278_v62, 0.0  ;;  %6098 = vmatmul.msk.bf16.gmra.mxu2 %vm741_vm0, %v3504_v60  ;;  %v6822_v3 = vpack.c.bf16 %v4687_v61, %v4686_v58 }
 0x268   : > { %v2689_v4 = vpop.f32.mrf.mxu1 }
 0x269   : > { %v2059_v7 = vpack.c.bf16 %v1832_v2, %v1831_v1  ;;  %v2690_v13 = vadd.f32 %v6590_v0, %v2689_v4  ;;  %v415_v2 = vld [vmem:[%s6483_s30 + $0x270] sm:$0xff]  ;;  %v416_v4 = vld [vmem:[%s6483_s30 + $0x278] sm:$0xff] }
 0x26a   : > { %v4081_v9 = vpop.f32.mrf.mxu2 }
 0x26b   : > { %5971 = vmatmul.msk.bf16.gmra.mxu1 %vm2195_vm1, %v2059_v7  ;;  %v4082_v15 = vadd.f32 %v6677_v33, %v4081_v9  ;;  %v3269_v19 = vmax.f32 %v2690_v13, 0.0  ;;  %v632_v7 = vpack.c.bf16 %v416_v4, %v415_v2  ;;  %v419_v2 = vld [vmem:[%s6483_s30 + $0x290] sm:$0xff]  ;;  %v420_v4 = vld [vmem:[%s6483_s30 + $0x298] sm:$0xff] }
 0x26c   : > { %v1280_v11 = vpop.f32.mrf.mxu0 }
 0x26d   : > { %v1281_v20 = vadd.f32 %v6790_v59, %v1280_v11  ;;  %v4688_v24 = vmax.f32 %v4082_v15, 0.0 }
 0x26f   : > { %5836 = vmatmul.msk.bf16.gmra.mxu0 %vm741_vm0, %v630_v10  ;;  %v1833_v29 = vmax.f32 %v1281_v20, 0.0 }
 0x270   : > { %v2691_v14 = vpop.f32.mrf.mxu1 }
 0x271   : > { %v2692_v17 = vadd.f32 %v6590_v0, %v2691_v14 }
 0x272   : > { %v4083_v18 = vpop.f32.mrf.mxu2 }
 0x273   : > { %v3270_v21 = vmax.f32 %v2692_v17, 0.0  ;;  %v4084_v22 = vadd.f32 %v6677_v33, %v4083_v18 }
 0x274   : > { %v1282_v23 = vpop.f32.mrf.mxu0 }
 0x275   : > { %v3505_v26 = vpack.c.bf16 %v3270_v21, %v3269_v19  ;;  %v4689_v27 = vmax.f32 %v4084_v22, 0.0  ;;  %v1283_v28 = vadd.f32 %v6790_v59, %v1282_v23 }
 0x277   : > { %v1834_v30 = vmax.f32 %v1283_v28, 0.0  ;;  %6099 = vmatmul.msk.bf16.gmra.mxu2 %vm741_vm0, %v3505_v26  ;;  %v6835_v31 = vpack.c.bf16 %v4689_v27, %v4688_v24 }
 0x278   : > { %v2694_v32 = vpop.f32.mrf.mxu1 }
 0x279   : > { %v2060_v39 = vpack.c.bf16 %v1834_v30, %v1833_v29  ;;  %v2695_v44 = vadd.f32 %v6590_v0, %v2694_v32  ;;  %v417_v32 = vld [vmem:[%s6483_s30 + $0x280] sm:$0xff] }
 0x27a   : > { %v4086_v40 = vpop.f32.mrf.mxu2 }
 0x27b   : > { %5972 = vmatmul.msk.bf16.gmra.mxu1 %vm2195_vm1, %v2060_v39  ;;  %v4087_v46 = vadd.f32 %v6677_v33, %v4086_v40  ;;  %v3271_v50 = vmax.f32 %v2695_v44, 0.0  ;;  %v633_v40 = vpack.c.bf16 %v418_v34, %v417_v32  ;;  %v421_v34 = vld [vmem:[%s6483_s30 + $0x2a0] sm:$0xff] }
 0x27c   : > { %v1285_v42 = vpop.f32.mrf.mxu0 }
 0x27d   : > { %v1286_v52 = vadd.f32 %v6790_v59, %v1285_v42  ;;  %v4690_v55 = vmax.f32 %v4087_v46, 0.0 }
 0x27f   : > { %5837 = vmatmul.msk.bf16.gmra.mxu0 %vm741_vm0, %v631_v41  ;;  %v1835_v60 = vmax.f32 %v1286_v52, 0.0 }
 0x280   : > { %v2696_v45 = vpop.f32.mrf.mxu1 }
 0x281   : > { %v2697_v48 = vadd.f32 %v6846_v47, %v2696_v45 }
 0x282   : > { %v4088_v49 = vpop.f32.mrf.mxu2 }
 0x283   : > { %v3272_v54 = vmax.f32 %v2697_v48, 0.0  ;;  %v4089_v0 = vadd.f32 %v6677_v33, %v4088_v49 }
 0x284   : > { %v1287_v35 = vpop.f32.mrf.mxu0 }
 0x285   : > { %v3506_v56 = vpack.c.bf16 %v3272_v54, %v3271_v50  ;;  %v4691_v57 = vmax.f32 %v4089_v0, 0.0  ;;  %v1288_v58 = vadd.f32 %v6790_v59, %v1287_v35 }
 0x287   : > { %v1836_v61 = vmax.f32 %v1288_v58, 0.0  ;;  %6100 = vmatmul.msk.bf16.gmra.mxu2 %vm741_vm0, %v3506_v56  ;;  %v6853_v62 = vpack.c.bf16 %v4691_v57, %v4690_v55 }
 0x288   : > { %v2699_v1 = vpop.f32.mrf.mxu1 }
 0x289   : > { %v2061_v5 = vpack.c.bf16 %v1836_v61, %v1835_v60  ;;  %v2700_v10 = vadd.f32 %v6846_v47, %v2699_v1 }
 0x28a   : > { %v4091_v6 = vpop.f32.mrf.mxu2 }
 0x28b   : > { %5973 = vmatmul.msk.bf16.gmra.mxu1 %vm2195_vm1, %v2061_v5  ;;  %v4092_v13 = vadd.f32 %v6677_v33, %v4091_v6  ;;  %v3273_v17 = vmax.f32 %v2700_v10, 0.0 }
 0x28c   : > { %v1290_v9 = vpop.f32.mrf.mxu0 }
 0x28d   : > { %v1291_v18 = vadd.f32 %v6790_v59, %v1290_v9  ;;  %v4692_v22 = vmax.f32 %v4092_v13, 0.0 }
 0x28f   : > { %5838 = vmatmul.msk.bf16.gmra.mxu0 %vm741_vm0, %v632_v7  ;;  %v1837_v27 = vmax.f32 %v1291_v18, 0.0  ;;  %v634_v7 = vpack.c.bf16 %v420_v4, %v419_v2 }
 0x290   : > { %v2701_v11 = vpop.f32.mrf.mxu1 }
 0x291   : > { %v2702_v14 = vadd.f32 %v6846_v47, %v2701_v11 }
 0x292   : > { %v4093_v15 = vpop.f32.mrf.mxu2 }
 0x293   : > { %v3274_v19 = vmax.f32 %v2702_v14, 0.0  ;;  %v4094_v20 = vadd.f32 %v6677_v33, %v4093_v15 }
 0x294   : > { %v1292_v21 = vpop.f32.mrf.mxu0 }
 0x295   : > { %v3507_v23 = vpack.c.bf16 %v3274_v19, %v3273_v17  ;;  %v4693_v24 = vmax.f32 %v4094_v20, 0.0  ;;  %v1293_v26 = vadd.f32 %v6790_v59, %v1292_v21 }
 0x297   : > { %v1838_v28 = vmax.f32 %v1293_v26, 0.0  ;;  %6101 = vmatmul.msk.bf16.gmra.mxu2 %vm741_vm0, %v3507_v23  ;;  %v6866_v29 = vpack.c.bf16 %v4693_v24, %v4692_v22 }
 0x298   : > { %v2704_v30 = vpop.f32.mrf.mxu1 }
 0x299   : > { %v2062_v36 = vpack.c.bf16 %v1838_v28, %v1837_v27  ;;  %v2705_v42 = vadd.f32 %v6846_v47, %v2704_v30 }
 0x29a   : > { %v4096_v39 = vpop.f32.mrf.mxu2 }
 0x29b   : > { %5974 = vmatmul.msk.bf16.gmra.mxu1 %vm2195_vm1, %v2062_v36  ;;  %v4097_v45 = vadd.f32 %v6677_v33, %v4096_v39  ;;  %v3275_v49 = vmax.f32 %v2705_v42, 0.0  ;;  %v422_v36 = vld [vmem:[%s6483_s30 + $0x2a8] sm:$0xff] }
 0x29c   : > { %v1295_v41 = vpop.f32.mrf.mxu0 }
 0x29d   : > { %v1296_v50 = vadd.f32 %v6790_v59, %v1295_v41  ;;  %v4694_v35 = vmax.f32 %v4097_v45, 0.0  ;;  %v635_v41 = vpack.c.bf16 %v422_v36, %v421_v34 }
 0x29f   : > { %5839 = vmatmul.msk.bf16.gmra.mxu0 %vm741_vm0, %v633_v40  ;;  %v1839_v58 = vmax.f32 %v1296_v50, 0.0 }
 0x2a0   : > { %v2706_v44 = vpop.f32.mrf.mxu1 }
 0x2a1   : > { %v2707_v46 = vadd.f32 %v6846_v47, %v2706_v44 }
 0x2a2   : > { %v4098_v48 = vpop.f32.mrf.mxu2 }
 0x2a3   : > { %v3276_v52 = vmax.f32 %v2707_v46, 0.0  ;;  %v4099_v54 = vadd.f32 %v6677_v33, %v4098_v48 }
 0x2a4   : > { %v1297_v0 = vpop.f32.mrf.mxu0 }
 0x2a5   : > { %v3508_v55 = vpack.c.bf16 %v3276_v52, %v3275_v49  ;;  %v4695_v56 = vmax.f32 %v4099_v54, 0.0  ;;  %v1298_v57 = vadd.f32 %v6790_v59, %v1297_v0 }
 0x2a7   : > { %v1840_v60 = vmax.f32 %v1298_v57, 0.0  ;;  %6102 = vmatmul.msk.bf16.gmra.mxu2 %vm741_vm0, %v3508_v55  ;;  %v6879_v61 = vpack.c.bf16 %v4695_v56, %v4694_v35 }
 0x2a8   : > { %v2709_v1 = vpop.f32.mrf.mxu1 }
 0x2a9   : > { %v2063_v5 = vpack.c.bf16 %v1840_v60, %v1839_v58  ;;  %v2710_v10 = vadd.f32 %v6846_v47, %v2709_v1 }
 0x2aa   : > { %v4101_v6 = vpop.f32.mrf.mxu2 }
 0x2ab   : > { %5975 = vmatmul.msk.bf16.gmra.mxu1 %vm2195_vm1, %v2063_v5  ;;  %v4102_v13 = vadd.f32 %v6677_v33, %v4101_v6  ;;  %v3277_v17 = vmax.f32 %v2710_v10, 0.0  ;;  %v423_v5 = vld [vmem:[%s6483_s30 + $0x2b0] sm:$0xff]  ;;  %v424_v6 = vld [vmem:[%s6483_s30 + $0x2b8] sm:$0xff] }
 0x2ac   : > { %v1300_v9 = vpop.f32.mrf.mxu0  ;;  %v636_v10 = vpack.c.bf16 %v424_v6, %v423_v5 }
 0x2ad   : > { %v1301_v18 = vadd.f32 %v6790_v59, %v1300_v9  ;;  %v4696_v22 = vmax.f32 %v4102_v13, 0.0 }
 0x2af   : > { %5840 = vmatmul.msk.bf16.gmra.mxu0 %vm741_vm0, %v634_v7  ;;  %v1841_v27 = vmax.f32 %v1301_v18, 0.0 }
 0x2b0   : > { %v2711_v11 = vpop.f32.mrf.mxu1 }
 0x2b1   : > { %v2712_v14 = vadd.f32 %v6846_v47, %v2711_v11 }
 0x2b2   : > { %v4103_v15 = vpop.f32.mrf.mxu2 }
 0x2b3   : > { %v3278_v19 = vmax.f32 %v2712_v14, 0.0  ;;  %v4104_v20 = vadd.f32 %v6677_v33, %v4103_v15 }
 0x2b4   : > { %v1302_v21 = vpop.f32.mrf.mxu0 }
 0x2b5   : > { %v3509_v23 = vpack.c.bf16 %v3278_v19, %v3277_v17  ;;  %v4697_v24 = vmax.f32 %v4104_v20, 0.0  ;;  %v1303_v26 = vadd.f32 %v6790_v59, %v1302_v21 }
 0x2b7   : > { %v6891_v28 = vpack.c.bf16 %v4697_v24, %v4696_v22  ;;  %v1842_v30 = vmax.f32 %v1303_v26, 0.0  ;;  %6103 = vmatmul.msk.bf16.gmra.mxu2 %vm741_vm0, %v3509_v23 }
 0x2b8   : > { %v2714_v32 = vpop.f32.mrf.mxu1 }
 0x2b9   : > { %v2064_v39 = vpack.c.bf16 %v1842_v30, %v1841_v27  ;;  %v2715_v44 = vadd.f32 %v6846_v47, %v2714_v32 }
 0x2ba   : > { %v4106_v40 = vpop.f32.mrf.mxu2 }
 0x2bb   : > { %5976 = vmatmul.msk.bf16.gmra.mxu1 %vm2195_vm1, %v2064_v39  ;;  %v4107_v46 = vadd.f32 %v6677_v33, %v4106_v40  ;;  %v3279_v50 = vmax.f32 %v2715_v44, 0.0  ;;  %v425_v40 = vld [vmem:[%s6483_s30 + $0x2c0] sm:$0xff] }
 0x2bc   : > { %v1305_v42 = vpop.f32.mrf.mxu0 }
 0x2bd   : > { %v1306_v52 = vadd.f32 %v6790_v59, %v1305_v42  ;;  %v4698_v55 = vmax.f32 %v4107_v46, 0.0 }
 0x2bf   : > { %5841 = vmatmul.msk.bf16.gmra.mxu0 %vm741_vm0, %v635_v41  ;;  %v1843_v60 = vmax.f32 %v1306_v52, 0.0  ;;  %v426_v41 = vld [vmem:[%s6483_s30 + $0x2c8] sm:$0xff] }
 0x2c0   : > { %v2716_v45 = vpop.f32.mrf.mxu1 }
 0x2c1   : > { %v2717_v48 = vadd.f32 %v6846_v47, %v2716_v45  ;;  %v637_v45 = vpack.c.bf16 %v426_v41, %v425_v40 }
 0x2c2   : > { %v4108_v49 = vpop.f32.mrf.mxu2 }
 0x2c3   : > { %v3280_v54 = vmax.f32 %v2717_v48, 0.0  ;;  %v4109_v0 = vadd.f32 %v6677_v33, %v4108_v49 }
 0x2c4   : > { %v1307_v35 = vpop.f32.mrf.mxu0 }
 0x2c5   : > { %v3510_v56 = vpack.c.bf16 %v3280_v54, %v3279_v50  ;;  %v4699_v57 = vmax.f32 %v4109_v0, 0.0  ;;  %v1308_v58 = vadd.f32 %v6790_v59, %v1307_v35 }
 0x2c7   : > { %v1844_v1 = vmax.f32 %v1308_v58, 0.0  ;;  %6104 = vmatmul.msk.bf16.gmra.mxu2 %vm741_vm0, %v3510_v56  ;;  %v6905_v2 = vpack.c.bf16 %v4699_v57, %v4698_v55 }
 0x2c8   : > { %v2719_v4 = vpop.f32.mrf.mxu1 }
 0x2c9   : > { %v2065_v7 = vpack.c.bf16 %v1844_v1, %v1843_v60  ;;  %v2720_v13 = vadd.f32 %v6846_v47, %v2719_v4 }
 0x2ca   : > { %v4111_v9 = vpop.f32.mrf.mxu2 }
 0x2cb   : > { %5977 = vmatmul.msk.bf16.gmra.mxu1 %vm2195_vm1, %v2065_v7  ;;  %v4112_v15 = vadd.f32 %v6677_v33, %v4111_v9  ;;  %v3281_v19 = vmax.f32 %v2720_v13, 0.0 }
 0x2cc   : > { %v1310_v11 = vpop.f32.mrf.mxu0 }
 0x2cd   : > { %v1311_v20 = vadd.f32 %v6790_v59, %v1310_v11  ;;  %v4700_v24 = vmax.f32 %v4112_v15, 0.0  ;;  %v428_v11 = vld [vmem:[%s6483_s30 + $0x2d8] sm:$0xff] }
 0x2cf   : > { %5842 = vmatmul.msk.bf16.gmra.mxu0 %vm741_vm0, %v636_v10  ;;  %v1845_v32 = vmax.f32 %v1311_v20, 0.0  ;;  %v427_v10 = vld [vmem:[%s6483_s30 + $0x2d0] sm:$0xff] }
 0x2d0   : > { %v2721_v14 = vpop.f32.mrf.mxu1 }
 0x2d1   : > { %v2722_v17 = vadd.f32 %v6846_v47, %v2721_v14 }
 0x2d2   : > { %v4113_v18 = vpop.f32.mrf.mxu2 }
 0x2d3   : > { %v3282_v21 = vmax.f32 %v2722_v17, 0.0  ;;  %v4114_v22 = vadd.f32 %v6677_v33, %v4113_v18 }
 0x2d4   : > { %v1312_v23 = vpop.f32.mrf.mxu0 }
 0x2d5   : > { %v3511_v26 = vpack.c.bf16 %v3282_v21, %v3281_v19  ;;  %v4701_v27 = vmax.f32 %v4114_v22, 0.0  ;;  %v1313_v30 = vadd.f32 %v6790_v59, %v1312_v23  ;;  %v6941_v19 = vld [vmem:[%s8794_s6] ss:$0 sm:$0xff] }
 0x2d7   : > { %v1846_v34 = vmax.f32 %v1313_v30, 0.0  ;;  %6105 = vmatmul.msk.bf16.gmra.mxu2 %vm741_vm0, %v3511_v26  ;;  %v6918_v36 = vpack.c.bf16 %v4701_v27, %v4700_v24 }
 0x2d8   : > { %v2724_v39 = vpop.f32.mrf.mxu1 }
 0x2d9   : > { %v2066_v42 = vpack.c.bf16 %v1846_v34, %v1845_v32  ;;  %v2725_v48 = vadd.f32 %v6846_v47, %v2724_v39 }
 0x2da   : > { %v4116_v44 = vpop.f32.mrf.mxu2 }
 0x2db   : > { %5978 = vmatmul.msk.bf16.gmra.mxu1 %vm2195_vm1, %v2066_v42  ;;  %v4117_v50 = vadd.f32 %v6677_v33, %v4116_v44  ;;  %v3283_v0 = vmax.f32 %v2725_v48, 0.0  ;;  %v430_v48 = vld [vmem:[%s6483_s30 + $0x2e8] sm:$0xff] }
 0x2dc   : > { %v1315_v46 = vpop.f32.mrf.mxu0 }
 0x2dd   : > { %v1316_v35 = vadd.f32 %v6790_v59, %v1315_v46  ;;  %v4702_v58 = vmax.f32 %v4117_v50, 0.0  ;;  %v429_v46 = vld [vmem:[%s6483_s30 + $0x2e0] sm:$0xff] }
 0x2df   : > { %5843 = vmatmul.msk.bf16.gmra.mxu0 %vm741_vm0, %v637_v45  ;;  %v1847_v5 = vmax.f32 %v1316_v35, 0.0 }
 0x2e0   : > { %v2726_v49 = vpop.f32.mrf.mxu1 }
 0x2e1   : > { %v2727_v52 = vadd.f32 %v6846_v47, %v2726_v49 }
 0x2e2   : > { %v4118_v54 = vpop.f32.mrf.mxu2 }
 0x2e3   : > { %v3284_v55 = vmax.f32 %v2727_v52, 0.0  ;;  %v4119_v56 = vadd.f32 %v6677_v33, %v4118_v54  ;;  %v638_v33 = vpack.c.bf16 %v428_v11, %v427_v10  ;;  %v639_v52 = vpack.c.bf16 %v430_v48, %v429_v46 }
 0x2e4   : > { %v1317_v57 = vpop.f32.mrf.mxu0 }
 0x2e5   : > { %v3512_v60 = vpack.c.bf16 %v3284_v55, %v3283_v0  ;;  %v4703_v1 = vmax.f32 %v4119_v56, 0.0  ;;  %v1318_v4 = vadd.f32 %v6790_v59, %v1317_v57 }
 0x2e7   : > { %v1848_v6 = vmax.f32 %v1318_v4, 0.0  ;;  %6106 = vmatmul.msk.bf16.gmra.mxu2 %vm741_vm0, %v3512_v60  ;;  %v6931_v7 = vpack.c.bf16 %v4703_v1, %v4702_v58 }
 0x2e8   : > { %v2729_v9 = vpop.f32.mrf.mxu1 }
 0x2e9   : > { %v2067_v13 = vpack.c.bf16 %v1848_v6, %v1847_v5  ;;  %v2730_v17 = vadd.f32 %v6846_v47, %v2729_v9 }
 0x2ea   : > { %v4121_v14 = vpop.f32.mrf.mxu2 }
 0x2eb   : > { %5979 = vmatmul.msk.bf16.gmra.mxu1 %vm2195_vm1, %v2067_v13  ;;  %v4122_v20 = vadd.f32 %v6941_v19, %v4121_v14  ;;  %v3285_v23 = vmax.f32 %v2730_v17, 0.0  ;;  %v431_v17 = vld [vmem:[%s6483_s30 + $0x2f0] sm:$0xff] }
 0x2ec   : > { %v1320_v15 = vpop.f32.mrf.mxu0 }
 0x2ed   : > { %v1321_v24 = vadd.f32 %v6790_v59, %v1320_v15  ;;  %v4704_v32 = vmax.f32 %v4122_v20, 0.0 }
 0x2ef   : > { %5844 = vmatmul.msk.bf16.gmra.mxu0 %vm741_vm0, %v638_v33  ;;  %v1849_v41 = vmax.f32 %v1321_v24, 0.0 }
 0x2f0   : > { %v2731_v18 = vpop.f32.mrf.mxu1 }
 0x2f1   : > { %v2732_v21 = vadd.f32 %v6846_v47, %v2731_v18  ;;  %v432_v18 = vld [vmem:[%s6483_s30 + $0x2f8] sm:$0xff] }
 0x2f2   : > { %v4123_v22 = vpop.f32.mrf.mxu2 }
 0x2f3   : > { %v3286_v26 = vmax.f32 %v2732_v21, 0.0  ;;  %v4124_v27 = vadd.f32 %v6941_v19, %v4123_v22  ;;  %v640_v22 = vpack.c.bf16 %v432_v18, %v431_v17 }
 0x2f4   : > { %v1322_v30 = vpop.f32.mrf.mxu0 }
 0x2f5   : > { %v3513_v34 = vpack.c.bf16 %v3286_v26, %v3285_v23  ;;  %v4705_v39 = vmax.f32 %v4124_v27, 0.0  ;;  %v1323_v40 = vadd.f32 %v6790_v59, %v1322_v30 }
 0x2f7   : > { %v1850_v42 = vmax.f32 %v1323_v40, 0.0  ;;  %6107 = vmatmul.msk.bf16.gmra.mxu2 %vm741_vm0, %v3513_v34  ;;  %v6949_v44 = vpack.c.bf16 %v4705_v39, %v4704_v32 }
 0x2f8   : > { %v2734_v45 = vpop.f32.mrf.mxu1 }
 0x2f9   : > { %v2068_v49 = vpack.c.bf16 %v1850_v42, %v1849_v41  ;;  %v2735_v0 = vadd.f32 %v6846_v47, %v2734_v45 }
 0x2fa   : > { %v4126_v50 = vpop.f32.mrf.mxu2 }
 0x2fb   : > { %5980 = vmatmul.msk.bf16.gmra.mxu1 %vm2195_vm1, %v2068_v49  ;;  %v4127_v55 = vadd.f32 %v6941_v19, %v4126_v50  ;;  %v3287_v58 = vmax.f32 %v2735_v0, 0.0 }
 0x2fc   : > { %v1325_v54 = vpop.f32.mrf.mxu0 }
 0x2fd   : > { %v1326_v60 = vadd.f32 %v6790_v59, %v1325_v54  ;;  %v4706_v6 = vmax.f32 %v4127_v55, 0.0  ;;  %v434_v55 = vld [vmem:[%s6483_s30 + $0x308] sm:$0xff] }
 0x2ff   : > { %5845 = vmatmul.msk.bf16.gmra.mxu0 %vm741_vm0, %v639_v52  ;;  %v1851_v13 = vmax.f32 %v1326_v60, 0.0 }
 0x300   : > { %v2736_v35 = vpop.f32.mrf.mxu1 }
 0x301   : > { %v2737_v56 = vadd.f32 %v6846_v47, %v2736_v35  ;;  %v433_v35 = vld [vmem:[%s6483_s30 + $0x300] sm:$0xff] }
 0x302   : > { %v4128_v57 = vpop.f32.mrf.mxu2 }
 0x303   : > { %v3288_v1 = vmax.f32 %v2737_v56, 0.0  ;;  %v4129_v4 = vadd.f32 %v6941_v19, %v4128_v57 }
 0x304   : > { %v1327_v5 = vpop.f32.mrf.mxu0 }
 0x305   : > { %v3514_v9 = vpack.c.bf16 %v3288_v1, %v3287_v58  ;;  %v4707_v10 = vmax.f32 %v4129_v4, 0.0  ;;  %v1328_v11 = vadd.f32 %v6790_v59, %v1327_v5  ;;  %v641_v58 = vpack.c.bf16 %v434_v55, %v433_v35 }
 0x307   : > { %v1852_v14 = vmax.f32 %v1328_v11, 0.0  ;;  %6108 = vmatmul.msk.bf16.gmra.mxu2 %vm741_vm0, %v3514_v9  ;;  %v6962_v33 = vpack.c.bf16 %v4707_v10, %v4706_v6 }
 0x308   : > { %v2739_v15 = vpop.f32.mrf.mxu1 }
 0x309   : > { %v2069_v20 = vpack.c.bf16 %v1852_v14, %v1851_v13  ;;  %v2740_v24 = vadd.f32 %v6846_v47, %v2739_v15 }
 0x30a   : > { %v4131_v21 = vpop.f32.mrf.mxu2 }
 0x30b   : > { %5981 = vmatmul.msk.bf16.gmra.mxu1 %vm2195_vm1, %v2069_v20  ;;  %v4132_v27 = vadd.f32 %v6941_v19, %v4131_v21  ;;  %v3289_v34 = vmax.f32 %v2740_v24, 0.0 }
 0x30c   : > { %v1330_v23 = vpop.f32.mrf.mxu0 }
 0x30d   : > { %v1331_v39 = vadd.f32 %v6790_v59, %v1330_v23  ;;  %v4708_v45 = vmax.f32 %v4132_v27, 0.0  ;;  %v435_v27 = vld [vmem:[%s6483_s30 + $0x310] sm:$0xff] }
 0x30f   : > { %5846 = vmatmul.msk.bf16.gmra.mxu0 %vm741_vm0, %v640_v22  ;;  %v1853_v50 = vmax.f32 %v1331_v39, 0.0 }
 0x310   : > { %v2741_v26 = vpop.f32.mrf.mxu1 }
 0x311   : > { %v2742_v30 = vadd.f32 %v6846_v47, %v2741_v26 }
 0x312   : > { %v4133_v32 = vpop.f32.mrf.mxu2 }
 0x313   : > { %v3290_v40 = vmax.f32 %v2742_v30, 0.0  ;;  %v4134_v41 = vadd.f32 %v6941_v19, %v4133_v32  ;;  %v436_v30 = vld [vmem:[%s6483_s30 + $0x318] sm:$0xff] }
 0x314   : > { %v1332_v42 = vpop.f32.mrf.mxu0  ;;  %v642_v39 = vpack.c.bf16 %v436_v30, %v435_v27 }
 0x315   : > { %v3515_v46 = vpack.c.bf16 %v3290_v40, %v3289_v34  ;;  %v4709_v48 = vmax.f32 %v4134_v41, 0.0  ;;  %v1333_v49 = vadd.f32 %v6790_v59, %v1332_v42 }
 0x317   : > { %v1854_v52 = vmax.f32 %v1333_v49, 0.0  ;;  %6109 = vmatmul.msk.bf16.gmra.mxu2 %vm741_vm0, %v3515_v46  ;;  %v6975_v54 = vpack.c.bf16 %v4709_v48, %v4708_v45 }
 0x318   : > { %v2744_v0 = vpop.f32.mrf.mxu1 }
 0x319   : > { %v2070_v56 = vpack.c.bf16 %v1854_v52, %v1853_v50  ;;  %v2745_v1 = vadd.f32 %v6846_v47, %v2744_v0 }
 0x31a   : > { %v4136_v57 = vpop.f32.mrf.mxu2 }
 0x31b   : > { %5982 = vmatmul.msk.bf16.gmra.mxu1 %vm2195_vm1, %v2070_v56  ;;  %v4137_v5 = vadd.f32 %v6941_v19, %v4136_v57  ;;  %v3291_v10 = vmax.f32 %v2745_v1, 0.0 }
 0x31c   : > { %v1335_v60 = vpop.f32.mrf.mxu0 }
 0x31d   : > { %v1336_v11 = vadd.f32 %v6790_v59, %v1335_v60  ;;  %v4710_v17 = vmax.f32 %v4137_v5, 0.0 }
 0x31f   : > { %5847 = vmatmul.msk.bf16.gmra.mxu0 %vm741_vm0, %v641_v58  ;;  %v1855_v22 = vmax.f32 %v1336_v11, 0.0 }
 0x320   : > { %v2746_v4 = vpop.f32.mrf.mxu1 }
 0x321   : > { %v2747_v6 = vadd.f32 %v6846_v47, %v2746_v4 }
 0x322   : > { %v4138_v9 = vpop.f32.mrf.mxu2 }
 0x323   : > { %v3292_v13 = vmax.f32 %v2747_v6, 0.0  ;;  %v4139_v14 = vadd.f32 %v6941_v19, %v4138_v9  ;;  %v437_v6 = vld [vmem:[%s6483_s30 + $0x320] sm:$0xff]  ;;  %v438_v9 = vld [vmem:[%s6483_s30 + $0x328] sm:$0xff] }
 0x324   : > { %v1337_v15 = vpop.f32.mrf.mxu0 }
 0x325   : > { %v3516_v18 = vpack.c.bf16 %v3292_v13, %v3291_v10  ;;  %v4711_v20 = vmax.f32 %v4139_v14, 0.0  ;;  %v1338_v21 = vadd.f32 %v6790_v59, %v1337_v15  ;;  %v643_v13 = vpack.c.bf16 %v438_v9, %v437_v6 }
 0x327   : > { %v1856_v23 = vmax.f32 %v1338_v21, 0.0  ;;  %6110 = vmatmul.msk.bf16.gmra.mxu2 %vm741_vm0, %v3516_v18  ;;  %v6988_v24 = vpack.c.bf16 %v4711_v20, %v4710_v17 }
 0x328   : > { %v2749_v26 = vpop.f32.mrf.mxu1 }
 0x329   : > { %v2071_v32 = vpack.c.bf16 %v1856_v23, %v1855_v22  ;;  %v2750_v41 = vadd.f32 %v6846_v47, %v2749_v26 }
 0x32a   : > { %v4141_v34 = vpop.f32.mrf.mxu2 }
 0x32b   : > { %5983 = vmatmul.msk.bf16.gmra.mxu1 %vm2195_vm1, %v2071_v32  ;;  %v4142_v45 = vadd.f32 %v6941_v19, %v4141_v34  ;;  %v3293_v49 = vmax.f32 %v2750_v41, 0.0 }
 0x32c   : > { %v1340_v40 = vpop.f32.mrf.mxu0 }
 0x32d   : > { %v1341_v50 = vadd.f32 %v6790_v59, %v1340_v40  ;;  %v4712_v55 = vmax.f32 %v4142_v45, 0.0 }
 0x32f   : > { %5848 = vmatmul.msk.bf16.gmra.mxu0 %vm741_vm0, %v642_v39  ;;  %v1857_v60 = vmax.f32 %v1341_v50, 0.0 }
 0x330   : > { %v2751_v42 = vpop.f32.mrf.mxu1 }
 0x331   : > { %v2752_v46 = vadd.f32 %v6846_v47, %v2751_v42 }
 0x332   : > { %v4143_v48 = vpop.f32.mrf.mxu2 }
 0x333   : > { %v3294_v52 = vmax.f32 %v2752_v46, 0.0  ;;  %v4144_v0 = vadd.f32 %v6941_v19, %v4143_v48  ;;  %v439_v48 = vld [vmem:[%s6483_s30 + $0x330] sm:$0xff] }
 0x334   : > { %v1342_v35 = vpop.f32.mrf.mxu0 }
 0x335   : > { %v3517_v56 = vpack.c.bf16 %v3294_v52, %v3293_v49  ;;  %v4713_v57 = vmax.f32 %v4144_v0, 0.0  ;;  %v1343_v58 = vadd.f32 %v6790_v59, %v1342_v35  ;;  %v440_v49 = vld [vmem:[%s6483_s30 + $0x338] sm:$0xff] }
 0x336   : > { %v644_v0 = vpack.c.bf16 %v440_v49, %v439_v48 }
 0x337   : > { %v7000_v1 = vpack.c.bf16 %v4713_v57, %v4712_v55  ;;  %v1858_v4 = vmax.f32 %v1343_v58, 0.0  ;;  %6111 = vmatmul.msk.bf16.gmra.mxu2 %vm741_vm0, %v3517_v56 }
 0x338   : > { %v2754_v5 = vpop.f32.mrf.mxu1 }
 0x339   : > { %v2072_v10 = vpack.c.bf16 %v1858_v4, %v1857_v60  ;;  %v2755_v15 = vadd.f32 %v6846_v47, %v2754_v5 }
 0x33a   : > { %v4146_v11 = vpop.f32.mrf.mxu2 }
 0x33b   : > { %5984 = vmatmul.msk.bf16.gmra.mxu1 %vm2195_vm1, %v2072_v10  ;;  %v4147_v18 = vadd.f32 %v6941_v19, %v4146_v11  ;;  %v3295_v22 = vmax.f32 %v2755_v15, 0.0 }
 0x33c   : > { %v1345_v14 = vpop.f32.mrf.mxu0 }
 0x33d   : > { %v1346_v23 = vadd.f32 %v6790_v59, %v1345_v14  ;;  %v4714_v32 = vmax.f32 %v4147_v18, 0.0 }
 0x33f   : > { %5849 = vmatmul.msk.bf16.gmra.mxu0 %vm741_vm0, %v643_v13  ;;  %v1859_v41 = vmax.f32 %v1346_v23, 0.0  ;;  %v442_v23 = vld [vmem:[%s6483_s30 + $0x348] sm:$0xff] }
 0x340   : > { %v2756_v17 = vpop.f32.mrf.mxu1 }
 0x341   : > { %v2757_v20 = vadd.f32 %v6846_v47, %v2756_v17 }
 0x342   : > { %v4148_v21 = vpop.f32.mrf.mxu2 }
 0x343   : > { %v3296_v26 = vmax.f32 %v2757_v20, 0.0  ;;  %v4149_v27 = vadd.f32 %v6941_v19, %v4148_v21 }
 0x344   : > { %v1347_v30 = vpop.f32.mrf.mxu0 }
 0x345   : > { %v3518_v34 = vpack.c.bf16 %v3296_v26, %v3295_v22  ;;  %v4715_v39 = vmax.f32 %v4149_v27, 0.0  ;;  %v1348_v40 = vadd.f32 %v6790_v59, %v1347_v30  ;;  %v441_v22 = vld [vmem:[%s6483_s30 + $0x340] sm:$0xff] }
 0x346   : > { %v645_v30 = vpack.c.bf16 %v442_v23, %v441_v22  ;;  %v7052_v22 = vld [vmem:[%s8790_s2] ss:$0 sm:$0xff] }
 0x347   : > { %v1860_v42 = vmax.f32 %v1348_v40, 0.0  ;;  %6112 = vmatmul.msk.bf16.gmra.mxu2 %vm741_vm0, %v3518_v34  ;;  %v7014_v45 = vpack.c.bf16 %v4715_v39, %v4714_v32 }
 0x348   : > { %v2759_v46 = vpop.f32.mrf.mxu1 }
 0x349   : > { %8800 = vst [vmem:[#allocation6_spill] sm:$0xff] %v7014_v45  ;;  %v2073_v50 = vpack.c.bf16 %v1860_v42, %v1859_v41  ;;  %v2760_v55 = vadd.f32 %v6846_v47, %v2759_v46 }
 0x34a   : > { %v4151_v52 = vpop.f32.mrf.mxu2 }
 0x34b   : > { %5985 = vmatmul.msk.bf16.gmra.mxu1 %vm2195_vm1, %v2073_v50  ;;  %v4152_v57 = vadd.f32 %v6941_v19, %v4151_v52  ;;  %v3297_v4 = vmax.f32 %v2760_v55, 0.0 }
 0x34c   : > { %v1350_v35 = vpop.f32.mrf.mxu0 }
 0x34d   : > { %v1351_v5 = vadd.f32 %v6790_v59, %v1350_v35  ;;  %v4716_v11 = vmax.f32 %v4152_v57, 0.0 }
 0x34f   : > { %5850 = vmatmul.msk.bf16.gmra.mxu0 %vm741_vm0, %v644_v0  ;;  %v1861_v17 = vmax.f32 %v1351_v5, 0.0  ;;  %v443_v5 = vld [vmem:[%s6483_s30 + $0x350] sm:$0xff] }
 0x350   : > { %v2761_v56 = vpop.f32.mrf.mxu1 }
 0x351   : > { %v2762_v58 = vadd.f32 %v6846_v47, %v2761_v56 }
 0x352   : > { %v4153_v60 = vpop.f32.mrf.mxu2 }
 0x353   : > { %v3298_v6 = vmax.f32 %v2762_v58, 0.0  ;;  %v4154_v9 = vadd.f32 %v6941_v19, %v4153_v60 }
 0x354   : > { %v1352_v10 = vpop.f32.mrf.mxu0 }
 0x355   : > { %v3519_v13 = vpack.c.bf16 %v3298_v6, %v3297_v4  ;;  %v4717_v14 = vmax.f32 %v4154_v9, 0.0  ;;  %v1353_v15 = vadd.f32 %v6790_v59, %v1352_v10  ;;  %v444_v6 = vld [vmem:[%s6483_s30 + $0x358] sm:$0xff] }
 0x357   : > { %v1862_v18 = vmax.f32 %v1353_v15, 0.0  ;;  %6113 = vmatmul.msk.bf16.gmra.mxu2 %vm741_vm0, %v3519_v13  ;;  %v7027_v20 = vpack.c.bf16 %v4717_v14, %v4716_v11  ;;  %v646_v11 = vpack.c.bf16 %v444_v6, %v443_v5 }
 0x358   : > { %v2764_v21 = vpop.f32.mrf.mxu1 }
 0x359   : > { %8801 = vst [vmem:[#allocation7_spill] sm:$0xff] %v7027_v20  ;;  %v2074_v26 = vpack.c.bf16 %v1862_v18, %v1861_v17  ;;  %v2765_v34 = vadd.f32 %v6846_v47, %v2764_v21 }
 0x35a   : > { %v4156_v27 = vpop.f32.mrf.mxu2 }
 0x35b   : > { %5986 = vmatmul.msk.bf16.gmra.mxu1 %vm2195_vm1, %v2074_v26  ;;  %v4157_v40 = vadd.f32 %v6941_v19, %v4156_v27  ;;  %v3299_v46 = vmax.f32 %v2765_v34, 0.0 }
 0x35c   : > { %v1355_v32 = vpop.f32.mrf.mxu0 }
 0x35d   : > { %v1356_v48 = vadd.f32 %v6790_v59, %v1355_v32  ;;  %v4718_v0 = vmax.f32 %v4157_v40, 0.0 }
 0x35f   : > { %5851 = vmatmul.msk.bf16.gmra.mxu0 %vm741_vm0, %v645_v30  ;;  %v1863_v57 = vmax.f32 %v1356_v48, 0.0 }
 0x360   : > { %v2766_v39 = vpop.f32.mrf.mxu1 }
 0x361   : > { %v2767_v41 = vadd.f32 %v6846_v47, %v2766_v39 }
 0x362   : > { %v4158_v42 = vpop.f32.mrf.mxu2 }
 0x363   : > { %v3300_v49 = vmax.f32 %v2767_v41, 0.0  ;;  %v4159_v50 = vadd.f32 %v6941_v19, %v4158_v42 }
 0x364   : > { %v1357_v52 = vpop.f32.mrf.mxu0 }
 0x365   : > { %v3520_v35 = vpack.c.bf16 %v3300_v49, %v3299_v46  ;;  %v4719_v55 = vmax.f32 %v4159_v50, 0.0  ;;  %v1358_v56 = vadd.f32 %v6790_v59, %v1357_v52  ;;  %v445_v49 = vld [vmem:[%s6483_s30 + $0x360] sm:$0xff]  ;;  %v446_v50 = vld [vmem:[%s6483_s30 + $0x368] sm:$0xff] }
 0x367   : > { %v1864_v58 = vmax.f32 %v1358_v56, 0.0  ;;  %6114 = vmatmul.msk.bf16.gmra.mxu2 %vm741_vm0, %v3520_v35  ;;  %v7040_v60 = vpack.c.bf16 %v4719_v55, %v4718_v0  ;;  %v647_v35 = vpack.c.bf16 %v446_v50, %v445_v49 }
 0x368   : > { %v2769_v4 = vpop.f32.mrf.mxu1 }
 0x369   : > { %8802 = vst [vmem:[#allocation8_spill] sm:$0xff] %v7040_v60  ;;  %v2075_v9 = vpack.c.bf16 %v1864_v58, %v1863_v57  ;;  %v2770_v14 = vadd.f32 %v6846_v47, %v2769_v4 }
 0x36a   : > { %v4161_v10 = vpop.f32.mrf.mxu2 }
 0x36b   : > { %5987 = vmatmul.msk.bf16.gmra.mxu1 %vm2195_vm1, %v2075_v9  ;;  %v4162_v15 = vadd.f32 %v6941_v19, %v4161_v10  ;;  %v3301_v21 = vmax.f32 %v2770_v14, 0.0 }
 0x36c   : > { %v1360_v13 = vpop.f32.mrf.mxu0 }
 0x36d   : > { %v1361_v23 = vadd.f32 %v7052_v22, %v1360_v13  ;;  %v4720_v32 = vmax.f32 %v4162_v15, 0.0 }
 0x36f   : > { %5852 = vmatmul.msk.bf16.gmra.mxu0 %vm741_vm0, %v646_v11  ;;  %v1865_v41 = vmax.f32 %v1361_v23, 0.0 }
 0x370   : > { %v2771_v59 = vpop.f32.mrf.mxu1 }
 0x371   : > { %v2772_v17 = vadd.f32 %v6846_v47, %v2771_v59 }
 0x372   : > { %v4163_v18 = vpop.f32.mrf.mxu2 }
 0x373   : > { %v3302_v26 = vmax.f32 %v2772_v17, 0.0  ;;  %v4164_v27 = vadd.f32 %v6941_v19, %v4163_v18 }
 0x374   : > { %v1362_v30 = vpop.f32.mrf.mxu0 }
 0x375   : > { %v3521_v34 = vpack.c.bf16 %v3302_v26, %v3301_v21  ;;  %v4721_v39 = vmax.f32 %v4164_v27, 0.0  ;;  %v1363_v40 = vadd.f32 %v7052_v22, %v1362_v30  ;;  %v447_v27 = vld [vmem:[%s6483_s30 + $0x370] sm:$0xff]  ;;  %v448_v30 = vld [vmem:[%s6483_s30 + $0x378] sm:$0xff] }
 0x377   : > { %v1866_v42 = vmax.f32 %v1363_v40, 0.0  ;;  %6115 = vmatmul.msk.bf16.gmra.mxu2 %vm741_vm0, %v3521_v34  ;;  %v7058_v46 = vpack.c.bf16 %v4721_v39, %v4720_v32  ;;  %v648_v39 = vpack.c.bf16 %v448_v30, %v447_v27 }
 0x378   : > { %v2774_v48 = vpop.f32.mrf.mxu1 }
 0x379   : > { %8803 = vst [vmem:[#allocation9_spill] sm:$0xff] %v7058_v46  ;;  %v2076_v52 = vpack.c.bf16 %v1866_v42, %v1865_v41  ;;  %v2775_v56 = vadd.f32 %v6846_v47, %v2774_v48 }
 0x37a   : > { %v4166_v0 = vpop.f32.mrf.mxu2 }
 0x37b   : > { %5988 = vmatmul.msk.bf16.gmra.mxu1 %vm2195_vm1, %v2076_v52  ;;  %v4167_v58 = vadd.f32 %v6941_v19, %v4166_v0  ;;  %v3303_v6 = vmax.f32 %v2775_v56, 0.0 }
 0x37c   : > { %v1365_v55 = vpop.f32.mrf.mxu0 }
 0x37d   : > { %v1366_v9 = vadd.f32 %v7052_v22, %v1365_v55  ;;  %v4722_v14 = vmax.f32 %v4167_v58, 0.0 }
 0x37f   : > { %5853 = vmatmul.msk.bf16.gmra.mxu0 %vm741_vm0, %v647_v35  ;;  %v1867_v18 = vmax.f32 %v1366_v9, 0.0 }
 0x380   : > { %v2776_v57 = vpop.f32.mrf.mxu1 }
 0x381   : > { %v2777_v4 = vadd.f32 %v6846_v47, %v2776_v57 }
 0x382   : > { %v4168_v5 = vpop.f32.mrf.mxu2 }
 0x383   : > { %v3304_v10 = vmax.f32 %v2777_v4, 0.0  ;;  %v4169_v11 = vadd.f32 %v6941_v19, %v4168_v5 }
 0x384   : > { %v1367_v13 = vpop.f32.mrf.mxu0 }
 0x385   : > { %v3522_v59 = vpack.c.bf16 %v3304_v10, %v3303_v6  ;;  %v4723_v15 = vmax.f32 %v4169_v11, 0.0  ;;  %v1368_v17 = vadd.f32 %v7052_v22, %v1367_v13  ;;  %v449_v13 = vld [vmem:[%s6483_s30 + $0x380] sm:$0xff] }
 0x387   : > { %v1868_v21 = vmax.f32 %v1368_v17, 0.0  ;;  %6116 = vmatmul.msk.bf16.gmra.mxu2 %vm741_vm0, %v3522_v59  ;;  %v7071_v23 = vpack.c.bf16 %v4723_v15, %v4722_v14  ;;  %v450_v14 = vld [vmem:[%s6483_s30 + $0x388] sm:$0xff] }
 0x388   : > { %v2779_v26 = vpop.f32.mrf.mxu1  ;;  %v649_v17 = vpack.c.bf16 %v450_v14, %v449_v13 }
 0x389   : > { %v2077_v32 = vpack.c.bf16 %v1868_v21, %v1867_v18  ;;  %v2780_v41 = vadd.f32 %v6846_v47, %v2779_v26 }
 0x38a   : > { %v4171_v34 = vpop.f32.mrf.mxu2 }
 0x38b   : > { %5989 = vmatmul.msk.bf16.gmra.mxu1 %vm2195_vm1, %v2077_v32  ;;  %v4172_v48 = vadd.f32 %v6941_v19, %v4171_v34  ;;  %v3305_v52 = vmax.f32 %v2780_v41, 0.0 }
 0x38c   : > { %v1370_v40 = vpop.f32.mrf.mxu0 }
 0x38d   : > { %v1371_v0 = vadd.f32 %v7052_v22, %v1370_v40  ;;  %v4724_v57 = vmax.f32 %v4172_v48, 0.0 }
 0x38f   : > { %5854 = vmatmul.msk.bf16.gmra.mxu0 %vm741_vm0, %v648_v39  ;;  %v1869_v6 = vmax.f32 %v1371_v0, 0.0 }
 0x390   : > { %v2781_v42 = vpop.f32.mrf.mxu1 }
 0x391   : > { %v2782_v49 = vadd.f32 %v6846_v47, %v2781_v42 }
 0x392   : > { %v4173_v50 = vpop.f32.mrf.mxu2 }
 0x393   : > { %v3306_v35 = vmax.f32 %v2782_v49, 0.0  ;;  %v4174_v55 = vadd.f32 %v6941_v19, %v4173_v50 }
 0x394   : > { %v1372_v56 = vpop.f32.mrf.mxu0 }
 0x395   : > { %v3523_v58 = vpack.c.bf16 %v3306_v35, %v3305_v52  ;;  %v4725_v4 = vmax.f32 %v4174_v55, 0.0  ;;  %v1373_v5 = vadd.f32 %v7052_v22, %v1372_v56 }
 0x397   : > { %v1870_v9 = vmax.f32 %v1373_v5, 0.0  ;;  %6117 = vmatmul.msk.bf16.gmra.mxu2 %vm741_vm0, %v3523_v58  ;;  %v7084_v10 = vpack.c.bf16 %v4725_v4, %v4724_v57  ;;  %v451_v57 = vld [vmem:[%s6483_s30 + $0x390] sm:$0xff]  ;;  %v452_v58 = vld [vmem:[%s6483_s30 + $0x398] sm:$0xff] }
 0x398   : > { %v2784_v11 = vpop.f32.mrf.mxu1 }
 0x399   : > { %v2078_v59 = vpack.c.bf16 %v1870_v9, %v1869_v6  ;;  %v2785_v21 = vadd.f32 %v6846_v47, %v2784_v11  ;;  %v650_v6 = vpack.c.bf16 %v452_v58, %v451_v57 }
 0x39a   : > { %v4176_v15 = vpop.f32.mrf.mxu2 }
 0x39b   : > { %5990 = vmatmul.msk.bf16.gmra.mxu1 %vm2195_vm1, %v2078_v59  ;;  %v4177_v27 = vadd.f32 %v6941_v19, %v4176_v15  ;;  %v3307_v34 = vmax.f32 %v2785_v21, 0.0  ;;  %v7108_v59 = vld [vmem:[%s8792_s4] ss:$0 sm:$0xff] }
 0x39c   : > { %v1375_v18 = vpop.f32.mrf.mxu0 }
 0x39d   : > { %v1376_v39 = vadd.f32 %v7052_v22, %v1375_v18  ;;  %v4726_v48 = vmax.f32 %v4177_v27, 0.0 }
 0x39f   : > { %5855 = vmatmul.msk.bf16.gmra.mxu0 %vm741_vm0, %v649_v17  ;;  %v1871_v0 = vmax.f32 %v1376_v39, 0.0 }
 0x3a0   : > { %v2786_v26 = vpop.f32.mrf.mxu1 }
 0x3a1   : > { %v2787_v30 = vadd.f32 %v6846_v47, %v2786_v26 }
 0x3a2   : > { %v4178_v32 = vpop.f32.mrf.mxu2 }
 0x3a3   : > { %v3308_v40 = vmax.f32 %v2787_v30, 0.0  ;;  %v4179_v41 = vadd.f32 %v6941_v19, %v4178_v32 }
 0x3a4   : > { %v1377_v42 = vpop.f32.mrf.mxu0 }
 0x3a5   : > { %v3524_v49 = vpack.c.bf16 %v3308_v40, %v3307_v34  ;;  %v4727_v50 = vmax.f32 %v4179_v41, 0.0  ;;  %v1378_v52 = vadd.f32 %v7052_v22, %v1377_v42 }
 0x3a7   : > { %v1872_v35 = vmax.f32 %v1378_v52, 0.0  ;;  %6118 = vmatmul.msk.bf16.gmra.mxu2 %vm741_vm0, %v3524_v49  ;;  %v7097_v55 = vpack.c.bf16 %v4727_v50, %v4726_v48  ;;  %v453_v49 = vld [vmem:[%s6483_s30 + $0x3a0] sm:$0xff]  ;;  %v454_v50 = vld [vmem:[%s6483_s30 + $0x3a8] sm:$0xff] }
 0x3a8   : > { %v2789_v56 = vpop.f32.mrf.mxu1 }
 0x3a9   : > { %v2079_v4 = vpack.c.bf16 %v1872_v35, %v1871_v0  ;;  %v2790_v11 = vadd.f32 %v6846_v47, %v2789_v56  ;;  %v651_v35 = vpack.c.bf16 %v454_v50, %v453_v49 }
 0x3aa   : > { %v4181_v5 = vpop.f32.mrf.mxu2 }
 0x3ab   : > { %5991 = vmatmul.msk.bf16.gmra.mxu1 %vm2195_vm1, %v2079_v4  ;;  %v4182_v14 = vadd.f32 %v6941_v19, %v4181_v5  ;;  %v3309_v18 = vmax.f32 %v2790_v11, 0.0 }
 0x3ac   : > { %v1380_v9 = vpop.f32.mrf.mxu0 }
 0x3ad   : > { %v1381_v21 = vadd.f32 %v7052_v22, %v1380_v9  ;;  %v4728_v30 = vmax.f32 %v4182_v14, 0.0 }
 0x3af   : > { %5856 = vmatmul.msk.bf16.gmra.mxu0 %vm741_vm0, %v650_v6  ;;  %v1873_v40 = vmax.f32 %v1381_v21, 0.0 }
 0x3b0   : > { %v2791_v13 = vpop.f32.mrf.mxu1 }
 0x3b1   : > { %v2792_v15 = vadd.f32 %v7108_v59, %v2791_v13 }
 0x3b2   : > { %v4183_v17 = vpop.f32.mrf.mxu2 }
 0x3b3   : > { %v3310_v26 = vmax.f32 %v2792_v15, 0.0  ;;  %v4184_v47 = vadd.f32 %v6941_v19, %v4183_v17 }
 0x3b4   : > { %v1382_v27 = vpop.f32.mrf.mxu0 }
 0x3b5   : > { %v3525_v32 = vpack.c.bf16 %v3310_v26, %v3309_v18  ;;  %v4729_v34 = vmax.f32 %v4184_v47, 0.0  ;;  %v1383_v39 = vadd.f32 %v7052_v22, %v1382_v27 }
 0x3b7   : > { %v7114_v41 = vpack.c.bf16 %v4729_v34, %v4728_v30  ;;  %v1874_v42 = vmax.f32 %v1383_v39, 0.0  ;;  %6119 = vmatmul.msk.bf16.gmra.mxu2 %vm741_vm0, %v3525_v32  ;;  %v455_v34 = vld [vmem:[%s6483_s30 + $0x3b0] sm:$0xff]  ;;  %v456_v39 = vld [vmem:[%s6483_s30 + $0x3b8] sm:$0xff] }
 0x3b8   : > { %v2794_v48 = vpop.f32.mrf.mxu1 }
 0x3b9   : > { %v2080_v52 = vpack.c.bf16 %v1874_v42, %v1873_v40  ;;  %v2795_v57 = vadd.f32 %v7108_v59, %v2794_v48  ;;  %v652_v48 = vpack.c.bf16 %v456_v39, %v455_v34 }
 0x3ba   : > { %v4186_v0 = vpop.f32.mrf.mxu2 }
 0x3bb   : > { %5992 = vmatmul.msk.bf16.gmra.mxu1 %vm2195_vm1, %v2080_v52  ;;  %v4187_v4 = vadd.f32 %v6941_v19, %v4186_v0  ;;  %v3311_v9 = vmax.f32 %v2795_v57, 0.0 }
 0x3bc   : > { %v1385_v56 = vpop.f32.mrf.mxu0 }
 0x3bd   : > { %v1386_v11 = vadd.f32 %v7052_v22, %v1385_v56  ;;  %v4730_v17 = vmax.f32 %v4187_v4, 0.0 }
 0x3bf   : > { %5857 = vmatmul.msk.bf16.gmra.mxu0 %vm741_vm0, %v651_v35  ;;  %v1875_v47 = vmax.f32 %v1386_v11, 0.0 }
 0x3c0   : > { %v2796_v58 = vpop.f32.mrf.mxu1 }
 0x3c1   : > { %v2797_v5 = vadd.f32 %v7108_v59, %v2796_v58 }
 0x3c2   : > { %v4188_v6 = vpop.f32.mrf.mxu2 }
 0x3c3   : > { %v3312_v13 = vmax.f32 %v2797_v5, 0.0  ;;  %v4189_v14 = vadd.f32 %v6941_v19, %v4188_v6 }
 0x3c4   : > { %v1387_v15 = vpop.f32.mrf.mxu0 }
 0x3c5   : > { %v3526_v18 = vpack.c.bf16 %v3312_v13, %v3311_v9  ;;  %v4731_v21 = vmax.f32 %v4189_v14, 0.0  ;;  %v1388_v26 = vadd.f32 %v7052_v22, %v1387_v15 }
 0x3c7   : > { %v1876_v27 = vmax.f32 %v1388_v26, 0.0  ;;  %6120 = vmatmul.msk.bf16.gmra.mxu2 %vm741_vm0, %v3526_v18  ;;  %v7128_v30 = vpack.c.bf16 %v4731_v21, %v4730_v17  ;;  %v457_v26 = vld [vmem:[%s6483_s30 + $0x3c0] sm:$0xff] }
 0x3c8   : > { %v2799_v32 = vpop.f32.mrf.mxu1 }
 0x3c9   : > { %8804 = vst [vmem:[#allocation10_spill] sm:$0xff] %v7128_v30  ;;  %v2081_v40 = vpack.c.bf16 %v1876_v27, %v1875_v47  ;;  %v2800_v50 = vadd.f32 %v7108_v59, %v2799_v32  ;;  %v458_v47 = vld [vmem:[%s6483_s30 + $0x3c8] sm:$0xff] }
 0x3ca   : > { %v4191_v42 = vpop.f32.mrf.mxu2  ;;  %v653_v34 = vpack.c.bf16 %v458_v47, %v457_v26 }
 0x3cb   : > { %5993 = vmatmul.msk.bf16.gmra.mxu1 %vm2195_vm1, %v2081_v40  ;;  %v4192_v0 = vadd.f32 %v6941_v19, %v4191_v42  ;;  %v3313_v57 = vmax.f32 %v2800_v50, 0.0 }
 0x3cc   : > { %v1390_v49 = vpop.f32.mrf.mxu0 }
 0x3cd   : > { %v1391_v58 = vadd.f32 %v7052_v22, %v1390_v49  ;;  %v4732_v9 = vmax.f32 %v4192_v0, 0.0 }
 0x3cf   : > { %5858 = vmatmul.msk.bf16.gmra.mxu0 %vm741_vm0, %v652_v48  ;;  %v1877_v15 = vmax.f32 %v1391_v58, 0.0 }
 0x3d0   : > { %v2801_v52 = vpop.f32.mrf.mxu1 }
 0x3d1   : > { %v2802_v35 = vadd.f32 %v7108_v59, %v2801_v52 }
 0x3d2   : > { %v4193_v56 = vpop.f32.mrf.mxu2 }
 0x3d3   : > { %v3314_v4 = vmax.f32 %v2802_v35, 0.0  ;;  %v4194_v5 = vadd.f32 %v6941_v19, %v4193_v56 }
 0x3d4   : > { %v1392_v6 = vpop.f32.mrf.mxu0 }
 0x3d5   : > { %v3527_v11 = vpack.c.bf16 %v3314_v4, %v3313_v57  ;;  %v4733_v13 = vmax.f32 %v4194_v5, 0.0  ;;  %v1393_v14 = vadd.f32 %v7052_v22, %v1392_v6 }
 0x3d7   : > { %v1878_v17 = vmax.f32 %v1393_v14, 0.0  ;;  %6121 = vmatmul.msk.bf16.gmra.mxu2 %vm741_vm0, %v3527_v11  ;;  %v7141_v18 = vpack.c.bf16 %v4733_v13, %v4732_v9 }
 0x3d8   : > { %v2804_v21 = vpop.f32.mrf.mxu1 }
 0x3d9   : > { %8805 = vst [vmem:[#allocation11_spill] sm:$0xff] %v7141_v18  ;;  %v2082_v27 = vpack.c.bf16 %v1878_v17, %v1877_v15  ;;  %v2805_v40 = vadd.f32 %v7108_v59, %v2804_v21  ;;  %v459_v15 = vld [vmem:[%s6483_s30 + $0x3d0] sm:$0xff]  ;;  %v460_v17 = vld [vmem:[%s6483_s30 + $0x3d8] sm:$0xff] }
 0x3da   : > { %v4196_v32 = vpop.f32.mrf.mxu2  ;;  %v654_v47 = vpack.c.bf16 %v460_v17, %v459_v15 }
 0x3db   : > { %5994 = vmatmul.msk.bf16.gmra.mxu1 %vm2195_vm1, %v2082_v27  ;;  %v4197_v48 = vadd.f32 %v6941_v19, %v4196_v32  ;;  %v3315_v52 = vmax.f32 %v2805_v40, 0.0 }
 0x3dc   : > { %v1395_v39 = vpop.f32.mrf.mxu0 }
 0x3dd   : > { %v1396_v0 = vadd.f32 %v7052_v22, %v1395_v39  ;;  %v4734_v58 = vmax.f32 %v4197_v48, 0.0 }
 0x3df   : > { %5859 = vmatmul.msk.bf16.gmra.mxu0 %vm741_vm0, %v653_v34  ;;  %v1879_v9 = vmax.f32 %v1396_v0, 0.0 }
 0x3e0   : > { %v2806_v42 = vpop.f32.mrf.mxu1 }
 0x3e1   : > { %v2807_v49 = vadd.f32 %v7108_v59, %v2806_v42 }
 0x3e2   : > { %v4198_v50 = vpop.f32.mrf.mxu2 }
 0x3e3   : > { %v3316_v35 = vmax.f32 %v2807_v49, 0.0  ;;  %v4199_v56 = vadd.f32 %v6941_v19, %v4198_v50 }
 0x3e4   : > { %v1397_v57 = vpop.f32.mrf.mxu0 }
 0x3e5   : > { %v3528_v4 = vpack.c.bf16 %v3316_v35, %v3315_v52  ;;  %v4735_v5 = vmax.f32 %v4199_v56, 0.0  ;;  %v1398_v6 = vadd.f32 %v7052_v22, %v1397_v57 }
 0x3e7   : > { %v1880_v11 = vmax.f32 %v1398_v6, 0.0  ;;  %6122 = vmatmul.msk.bf16.gmra.mxu2 %vm741_vm0, %v3528_v4  ;;  %v7154_v13 = vpack.c.bf16 %v4735_v5, %v4734_v58 }
 0x3e8   : > { %v2809_v14 = vpop.f32.mrf.mxu1 }
 0x3e9   : > { %8806 = vst [vmem:[#allocation12_spill] sm:$0xff] %v7154_v13  ;;  %v2083_v21 = vpack.c.bf16 %v1880_v11, %v1879_v9  ;;  %v2810_v32 = vadd.f32 %v7108_v59, %v2809_v14  ;;  %v461_v11 = vld [vmem:[%s6483_s30 + $0x3e0] sm:$0xff]  ;;  %v462_v14 = vld [vmem:[%s6483_s30 + $0x3e8] sm:$0xff] }
 0x3ea   : > { %v4201_v26 = vpop.f32.mrf.mxu2 }
 0x3eb   : > { %5995 = vmatmul.msk.bf16.gmra.mxu1 %vm2195_vm1, %v2083_v21  ;;  %v4202_v39 = vadd.f32 %v6941_v19, %v4201_v26  ;;  %v3317_v48 = vmax.f32 %v2810_v32, 0.0  ;;  %v655_v21 = vpack.c.bf16 %v462_v14, %v461_v11  ;;  %v464_v11 = vld [vmem:[%s6483_s30 + $0x3f8] sm:$0xff] }
 0x3ec   : > { %v1400_v27 = vpop.f32.mrf.mxu0 }
 0x3ed   : > { %v1401_v49 = vadd.f32 %v7052_v22, %v1400_v27  ;;  %v4736_v35 = vmax.f32 %v4202_v39, 0.0 }
 0x3ef   : > { %5860 = vmatmul.msk.bf16.gmra.mxu0 %vm741_vm0, %v654_v47  ;;  %v1881_v4 = vmax.f32 %v1401_v49, 0.0 }
 0x3f0   : > { %v2811_v34 = vpop.f32.mrf.mxu1 }
 0x3f1   : > { %v2812_v40 = vadd.f32 %v7108_v59, %v2811_v34 }
 0x3f2   : > { %v4203_v42 = vpop.f32.mrf.mxu2 }
 0x3f3   : > { %v3318_v50 = vmax.f32 %v2812_v40, 0.0  ;;  %v4204_v52 = vadd.f32 %v6941_v19, %v4203_v42 }
 0x3f4   : > { %v1402_v0 = vpop.f32.mrf.mxu0 }
 0x3f5   : > { %v3529_v56 = vpack.c.bf16 %v3318_v50, %v3317_v48  ;;  %v4737_v57 = vmax.f32 %v4204_v52, 0.0  ;;  %v1403_v58 = vadd.f32 %v7052_v22, %v1402_v0 }
 0x3f7   : > { %v1882_v5 = vmax.f32 %v1403_v58, 0.0  ;;  %6123 = vmatmul.msk.bf16.gmra.mxu2 %vm741_vm0, %v3529_v56  ;;  %v7167_v6 = vpack.c.bf16 %v4737_v57, %v4736_v35 }
 0x3f8   : > { %v2814_v9 = vpop.f32.mrf.mxu1 }
 0x3f9   : > { %8807 = vst [vmem:[#allocation13_spill] sm:$0xff] %v7167_v6  ;;  %v2084_v15 = vpack.c.bf16 %v1882_v5, %v1881_v4  ;;  %v2815_v47 = vadd.f32 %v7108_v59, %v2814_v9  ;;  %v463_v9 = vld [vmem:[%s6483_s30 + $0x3f0] sm:$0xff] }
 0x3fa   : > { %v4206_v17 = vpop.f32.mrf.mxu2 }
 0x3fb   : > { %5996 = vmatmul.msk.bf16.gmra.mxu1 %vm2195_vm1, %v2084_v15  ;;  %v4207_v32 = vadd.f32 %v6941_v19, %v4206_v17  ;;  %v3319_v40 = vmax.f32 %v2815_v47, 0.0  ;;  %v656_v17 = vpack.c.bf16 %v464_v11, %v463_v9  ;;  %v465_v9 = vld [vmem:[%s6483_s30 + $0x400] sm:$0xff]  ;;  %v466_v11 = vld [vmem:[%s6483_s30 + $0x408] sm:$0xff] }
 0x3fc   : > { %v1405_v26 = vpop.f32.mrf.mxu0 }
 0x3fd   : > { %v1406_v42 = vadd.f32 %v7052_v22, %v1405_v26  ;;  %v4738_v52 = vmax.f32 %v4207_v32, 0.0 }
 0x3ff   : > { %5861 = vmatmul.msk.bf16.gmra.mxu0 %vm741_vm0, %v655_v21  ;;  %v1883_v57 = vmax.f32 %v1406_v42, 0.0 }
 0x400   : > { %v2816_v27 = vpop.f32.mrf.mxu1 }
 0x401   : > { %v2817_v34 = vadd.f32 %v7108_v59, %v2816_v27 }
 0x402   : > { %v4208_v39 = vpop.f32.mrf.mxu2 }
 0x403   : > { %v3320_v48 = vmax.f32 %v2817_v34, 0.0  ;;  %v4209_v49 = vadd.f32 %v6941_v19, %v4208_v39 }
 0x404   : > { %v1407_v50 = vpop.f32.mrf.mxu0 }
 0x405   : > { %v3530_v0 = vpack.c.bf16 %v3320_v48, %v3319_v40  ;;  %v4739_v35 = vmax.f32 %v4209_v49, 0.0  ;;  %v1408_v56 = vadd.f32 %v7052_v22, %v1407_v50 }
 0x407   : > { %v1884_v58 = vmax.f32 %v1408_v56, 0.0  ;;  %6124 = vmatmul.msk.bf16.gmra.mxu2 %vm741_vm0, %v3530_v0  ;;  %v7180_v4 = vpack.c.bf16 %v4739_v35, %v4738_v52 }
 0x408   : > { %v2819_v5 = vpop.f32.mrf.mxu1 }
 0x409   : > { %8808 = vst [vmem:[#allocation14_spill] sm:$0xff] %v7180_v4  ;;  %v2085_v14 = vpack.c.bf16 %v1884_v58, %v1883_v57  ;;  %v2820_v26 = vadd.f32 %v7108_v59, %v2819_v5 }
 0x40a   : > { %v4211_v15 = vpop.f32.mrf.mxu2 }
 0x40b   : > { %5997 = vmatmul.msk.bf16.gmra.mxu1 %vm2195_vm1, %v2085_v14  ;;  %v4212_v27 = vadd.f32 %v6941_v19, %v4211_v15  ;;  %v3321_v39 = vmax.f32 %v2820_v26, 0.0 }
 0x40c   : > { %v1410_v21 = vpop.f32.mrf.mxu0 }
 0x40d   : > { %v1411_v40 = vadd.f32 %v7052_v22, %v1410_v21  ;;  %v4740_v50 = vmax.f32 %v4212_v27, 0.0 }
 0x40f   : > { %5862 = vmatmul.msk.bf16.gmra.mxu0 %vm741_vm0, %v656_v17  ;;  %v1885_v56 = vmax.f32 %v1411_v40, 0.0 }
 0x410   : > { %v2821_v47 = vpop.f32.mrf.mxu1 }
 0x411   : > { %v2822_v32 = vadd.f32 %v7108_v59, %v2821_v47  ;;  %v7203_v47 = vld [vmem:[%s8794_s6] ss:$0 sm:$0xff] }
 0x412   : > { %v4213_v34 = vpop.f32.mrf.mxu2 }
 0x413   : > { %v3322_v42 = vmax.f32 %v2822_v32, 0.0  ;;  %v4214_v48 = vadd.f32 %v6941_v19, %v4213_v34  ;;  %v657_v19 = vpack.c.bf16 %v466_v11, %v465_v9  ;;  %v467_v11 = vld [vmem:[%s6483_s30 + $0x410] sm:$0xff] }
 0x414   : > { %v1412_v49 = vpop.f32.mrf.mxu0 }
 0x415   : > { %v3531_v52 = vpack.c.bf16 %v3322_v42, %v3321_v39  ;;  %v4741_v0 = vmax.f32 %v4214_v48, 0.0  ;;  %v1413_v35 = vadd.f32 %v7052_v22, %v1412_v49 }
 0x417   : > { %v1886_v57 = vmax.f32 %v1413_v35, 0.0  ;;  %6125 = vmatmul.msk.bf16.gmra.mxu2 %vm741_vm0, %v3531_v52  ;;  %v7193_v58 = vpack.c.bf16 %v4741_v0, %v4740_v50 }
 0x418   : > { %v2824_v5 = vpop.f32.mrf.mxu1 }
 0x419   : > { %8809 = vst [vmem:[#allocation15_spill] sm:$0xff] %v7193_v58  ;;  %v2086_v14 = vpack.c.bf16 %v1886_v57, %v1885_v56  ;;  %v2825_v21 = vadd.f32 %v7108_v59, %v2824_v5 }
 0x41a   : > { %v4216_v15 = vpop.f32.mrf.mxu2 }
 0x41b   : > { %5998 = vmatmul.msk.bf16.gmra.mxu1 %vm2195_vm1, %v2086_v14  ;;  %v4217_v27 = vadd.f32 %v7203_v47, %v4216_v15  ;;  %v3323_v39 = vmax.f32 %v2825_v21, 0.0  ;;  %v468_v14 = vld [vmem:[%s6483_s30 + $0x418] sm:$0xff] }
 0x41c   : > { %v1415_v17 = vpop.f32.mrf.mxu0 }
 0x41d   : > { %v1416_v40 = vadd.f32 %v7052_v22, %v1415_v17  ;;  %v4742_v50 = vmax.f32 %v4217_v27, 0.0  ;;  %v658_v17 = vpack.c.bf16 %v468_v14, %v467_v11 }
 0x41f   : > { %5863 = vmatmul.msk.bf16.gmra.mxu0 %vm741_vm0, %v657_v19  ;;  %v1887_v56 = vmax.f32 %v1416_v40, 0.0 }
 0x420   : > { %v2826_v26 = vpop.f32.mrf.mxu1 }
 0x421   : > { %v2827_v32 = vadd.f32 %v7108_v59, %v2826_v26 }
 0x422   : > { %v4218_v34 = vpop.f32.mrf.mxu2 }
 0x423   : > { %v3324_v42 = vmax.f32 %v2827_v32, 0.0  ;;  %v4219_v48 = vadd.f32 %v7203_v47, %v4218_v34 }
 0x424   : > { %v1417_v49 = vpop.f32.mrf.mxu0 }
 0x425   : > { %v3532_v52 = vpack.c.bf16 %v3324_v42, %v3323_v39  ;;  %v4743_v0 = vmax.f32 %v4219_v48, 0.0  ;;  %v1418_v35 = vadd.f32 %v7052_v22, %v1417_v49 }
 0x427   : > { %v1888_v57 = vmax.f32 %v1418_v35, 0.0  ;;  %6126 = vmatmul.msk.bf16.gmra.mxu2 %vm741_vm0, %v3532_v52  ;;  %v7211_v5 = vpack.c.bf16 %v4743_v0, %v4742_v50 }
 0x428   : > { %v2829_v9 = vpop.f32.mrf.mxu1 }
 0x429   : > { %8810 = vst [vmem:[#allocation16_spill] sm:$0xff] %v7211_v5  ;;  %v2087_v15 = vpack.c.bf16 %v1888_v57, %v1887_v56  ;;  %v2830_v26 = vadd.f32 %v7108_v59, %v2829_v9 }
 0x42a   : > { %v4221_v19 = vpop.f32.mrf.mxu2 }
 0x42b   : > { %5999 = vmatmul.msk.bf16.gmra.mxu1 %vm2195_vm1, %v2087_v15  ;;  %v4222_v32 = vadd.f32 %v7203_v47, %v4221_v19  ;;  %v3325_v40 = vmax.f32 %v2830_v26, 0.0  ;;  %v469_v15 = vld [vmem:[%s6483_s30 + $0x420] sm:$0xff]  ;;  %v470_v19 = vld [vmem:[%s6483_s30 + $0x428] sm:$0xff] }
 0x42c   : > { %v1420_v21 = vpop.f32.mrf.mxu0  ;;  %v659_v26 = vpack.c.bf16 %v470_v19, %v469_v15 }
 0x42d   : > { %v1421_v42 = vadd.f32 %v7052_v22, %v1420_v21  ;;  %v4744_v52 = vmax.f32 %v4222_v32, 0.0 }
 0x42f   : > { %5864 = vmatmul.msk.bf16.gmra.mxu0 %vm741_vm0, %v658_v17  ;;  %v1889_v57 = vmax.f32 %v1421_v42, 0.0 }
 0x430   : > { %v2831_v27 = vpop.f32.mrf.mxu1 }
 0x431   : > { %v2832_v34 = vadd.f32 %v7108_v59, %v2831_v27 }
 0x432   : > { %v4223_v39 = vpop.f32.mrf.mxu2 }
 0x433   : > { %v3326_v48 = vmax.f32 %v2832_v34, 0.0  ;;  %v4224_v49 = vadd.f32 %v7203_v47, %v4223_v39 }
 0x434   : > { %v1422_v50 = vpop.f32.mrf.mxu0 }
 0x435   : > { %v3533_v0 = vpack.c.bf16 %v3326_v48, %v3325_v40  ;;  %v4745_v35 = vmax.f32 %v4224_v49, 0.0  ;;  %v1423_v56 = vadd.f32 %v7052_v22, %v1422_v50 }
 0x437   : > { %v7223_v9 = vpack.c.bf16 %v4745_v35, %v4744_v52  ;;  %v1890_v11 = vmax.f32 %v1423_v56, 0.0  ;;  %6127 = vmatmul.msk.bf16.gmra.mxu2 %vm741_vm0, %v3533_v0 }
 0x438   : > { %v2834_v14 = vpop.f32.mrf.mxu1 }
 0x439   : > { %8811 = vst [vmem:[#allocation17_spill] sm:$0xff] %v7223_v9  ;;  %v2088_v17 = vpack.c.bf16 %v1890_v11, %v1889_v57  ;;  %v2835_v32 = vadd.f32 %v7108_v59, %v2834_v14 }
 0x43a   : > { %v4226_v21 = vpop.f32.mrf.mxu2 }
 0x43b   : > { %6000 = vmatmul.msk.bf16.gmra.mxu1 %vm2195_vm1, %v2088_v17  ;;  %v4227_v39 = vadd.f32 %v7203_v47, %v4226_v21  ;;  %v3327_v48 = vmax.f32 %v2835_v32, 0.0  ;;  %v471_v21 = vld [vmem:[%s6483_s30 + $0x430] sm:$0xff] }
 0x43c   : > { %v1425_v27 = vpop.f32.mrf.mxu0 }
 0x43d   : > { %v1426_v49 = vadd.f32 %v7052_v22, %v1425_v27  ;;  %v4746_v35 = vmax.f32 %v4227_v39, 0.0 }
 0x43f   : > { %5865 = vmatmul.msk.bf16.gmra.mxu0 %vm741_vm0, %v659_v26  ;;  %v1891_v14 = vmax.f32 %v1426_v49, 0.0  ;;  %v472_v26 = vld [vmem:[%s6483_s30 + $0x438] sm:$0xff] }
 0x440   : > { %v2836_v34 = vpop.f32.mrf.mxu1 }
 0x441   : > { %v2837_v40 = vadd.f32 %v7108_v59, %v2836_v34  ;;  %v660_v34 = vpack.c.bf16 %v472_v26, %v471_v21 }
 0x442   : > { %v4228_v42 = vpop.f32.mrf.mxu2 }
 0x443   : > { %v3328_v50 = vmax.f32 %v2837_v40, 0.0  ;;  %v4229_v52 = vadd.f32 %v7203_v47, %v4228_v42 }
 0x444   : > { %v1427_v0 = vpop.f32.mrf.mxu0 }
 0x445   : > { %v3534_v56 = vpack.c.bf16 %v3328_v50, %v3327_v48  ;;  %v4747_v57 = vmax.f32 %v4229_v52, 0.0  ;;  %v1428_v11 = vadd.f32 %v7052_v22, %v1427_v0 }
 0x447   : > { %v1892_v15 = vmax.f32 %v1428_v11, 0.0  ;;  %6128 = vmatmul.msk.bf16.gmra.mxu2 %vm741_vm0, %v3534_v56  ;;  %v7237_v19 = vpack.c.bf16 %v4747_v57, %v4746_v35 }
 0x448   : > { %v2839_v17 = vpop.f32.mrf.mxu1 }
 0x449   : > { %8812 = vst [vmem:[#allocation18_spill] sm:$0xff] %v7237_v19  ;;  %v2089_v32 = vpack.c.bf16 %v1892_v15, %v1891_v14  ;;  %v2840_v39 = vadd.f32 %v7108_v59, %v2839_v17 }
 0x44a   : > { %v4231_v27 = vpop.f32.mrf.mxu2 }
 0x44b   : > { %6001 = vmatmul.msk.bf16.gmra.mxu1 %vm2195_vm1, %v2089_v32  ;;  %v4232_v48 = vadd.f32 %v7203_v47, %v4231_v27  ;;  %v3329_v52 = vmax.f32 %v2840_v39, 0.0  ;;  %v474_v39 = vld [vmem:[%s6483_s30 + $0x448] sm:$0xff] }
 0x44c   : > { %v1430_v40 = vpop.f32.mrf.mxu0 }
 0x44d   : > { %v1431_v0 = vadd.f32 %v7052_v22, %v1430_v40  ;;  %v4748_v11 = vmax.f32 %v4232_v48, 0.0 }
 0x44f   : > { %5866 = vmatmul.msk.bf16.gmra.mxu0 %vm741_vm0, %v660_v34  ;;  %v1893_v21 = vmax.f32 %v1431_v0, 0.0  ;;  %v473_v34 = vld [vmem:[%s6483_s30 + $0x440] sm:$0xff] }
 0x450   : > { %v2841_v42 = vpop.f32.mrf.mxu1 }
 0x451   : > { %v2842_v49 = vadd.f32 %v7108_v59, %v2841_v42 }
 0x452   : > { %v4233_v50 = vpop.f32.mrf.mxu2 }
 0x453   : > { %v3330_v35 = vmax.f32 %v2842_v49, 0.0  ;;  %v4234_v56 = vadd.f32 %v7203_v47, %v4233_v50  ;;  %v661_v49 = vpack.c.bf16 %v474_v39, %v473_v34 }
 0x454   : > { %v1432_v57 = vpop.f32.mrf.mxu0 }
 0x455   : > { %v3535_v14 = vpack.c.bf16 %v3330_v35, %v3329_v52  ;;  %v4749_v15 = vmax.f32 %v4234_v56, 0.0  ;;  %v1433_v17 = vadd.f32 %v7052_v22, %v1432_v57 }
 0x457   : > { %v1894_v26 = vmax.f32 %v1433_v17, 0.0  ;;  %6129 = vmatmul.msk.bf16.gmra.mxu2 %vm741_vm0, %v3535_v14  ;;  %v7250_v32 = vpack.c.bf16 %v4749_v15, %v4748_v11 }
 0x458   : > { %v2844_v27 = vpop.f32.mrf.mxu1 }
 0x459   : > { %8813 = vst [vmem:[#allocation19_spill] sm:$0xff] %v7250_v32  ;;  %v2090_v42 = vpack.c.bf16 %v1894_v26, %v1893_v21  ;;  %v2845_v48 = vadd.f32 %v7108_v59, %v2844_v27 }
 0x45a   : > { %v4236_v40 = vpop.f32.mrf.mxu2 }
 0x45b   : > { %6002 = vmatmul.msk.bf16.gmra.mxu1 %vm2195_vm1, %v2090_v42  ;;  %v4237_v0 = vadd.f32 %v7203_v47, %v4236_v40  ;;  %v3331_v57 = vmax.f32 %v2845_v48, 0.0  ;;  %v476_v48 = vld [vmem:[%s6483_s30 + $0x458] sm:$0xff] }
 0x45c   : > { %v1435_v50 = vpop.f32.mrf.mxu0 }
 0x45d   : > { %v1436_v11 = vadd.f32 %v7052_v22, %v1435_v50  ;;  %v4750_v21 = vmax.f32 %v4237_v0, 0.0 }
 0x45f   : > { %5867 = vmatmul.msk.bf16.gmra.mxu0 %vm741_vm0, %v661_v49  ;;  %v1895_v39 = vmax.f32 %v1436_v11, 0.0 }
 0x460   : > { %v2846_v52 = vpop.f32.mrf.mxu1 }
 0x461   : > { %v2847_v35 = vadd.f32 %v7108_v59, %v2846_v52  ;;  %v475_v52 = vld [vmem:[%s6483_s30 + $0x450] sm:$0xff] }
 0x462   : > { %v4238_v56 = vpop.f32.mrf.mxu2 }
 0x463   : > { %v3332_v14 = vmax.f32 %v2847_v35, 0.0  ;;  %v4239_v15 = vadd.f32 %v7203_v47, %v4238_v56  ;;  %v662_v35 = vpack.c.bf16 %v476_v48, %v475_v52 }
 0x464   : > { %v1437_v17 = vpop.f32.mrf.mxu0 }
 0x465   : > { %v3536_v26 = vpack.c.bf16 %v3332_v14, %v3331_v57  ;;  %v4751_v27 = vmax.f32 %v4239_v15, 0.0  ;;  %v1438_v34 = vadd.f32 %v7052_v22, %v1437_v17 }
 0x467   : > { %v1896_v42 = vmax.f32 %v1438_v34, 0.0  ;;  %6130 = vmatmul.msk.bf16.gmra.mxu2 %vm741_vm0, %v3536_v26  ;;  %v7263_v40 = vpack.c.bf16 %v4751_v27, %v4750_v21 }
 0x468   : > { %v2849_v49 = vpop.f32.mrf.mxu1 }
 0x469   : > { %8814 = vst [vmem:[#allocation20_spill] sm:$0xff] %v7263_v40  ;;  %v2091_v19 = vpack.c.bf16 %v1896_v42, %v1895_v39  ;;  %v2850_v0 = vadd.f32 %v7108_v59, %v2849_v49 }
 0x46a   : > { %v4241_v50 = vpop.f32.mrf.mxu2 }
 0x46b   : > { %6003 = vmatmul.msk.bf16.gmra.mxu1 %vm2195_vm1, %v2091_v19  ;;  %v4242_v11 = vadd.f32 %v7203_v47, %v4241_v50  ;;  %v3333_v17 = vmax.f32 %v2850_v0, 0.0  ;;  %v478_v0 = vld [vmem:[%s6483_s30 + $0x468] sm:$0xff] }
 0x46c   : > { %v1440_v56 = vpop.f32.mrf.mxu0 }
 0x46d   : > { %v1441_v21 = vadd.f32 %v7052_v22, %v1440_v56  ;;  %v4752_v34 = vmax.f32 %v4242_v11, 0.0 }
 0x46f   : > { %5868 = vmatmul.msk.bf16.gmra.mxu0 %vm741_vm0, %v662_v35  ;;  %v1897_v52 = vmax.f32 %v1441_v21, 0.0 }
 0x470   : > { %v2851_v57 = vpop.f32.mrf.mxu1 }
 0x471   : > { %v2852_v14 = vadd.f32 %v7108_v59, %v2851_v57  ;;  %v477_v57 = vld [vmem:[%s6483_s30 + $0x460] sm:$0xff] }
 0x472   : > { %v4243_v15 = vpop.f32.mrf.mxu2 }
 0x473   : > { %v3334_v26 = vmax.f32 %v2852_v14, 0.0  ;;  %v4244_v19 = vadd.f32 %v7203_v47, %v4243_v15  ;;  %v663_v14 = vpack.c.bf16 %v478_v0, %v477_v57 }
 0x474   : > { %v1442_v27 = vpop.f32.mrf.mxu0 }
 0x475   : > { %v3537_v39 = vpack.c.bf16 %v3334_v26, %v3333_v17  ;;  %v4753_v42 = vmax.f32 %v4244_v19, 0.0  ;;  %v1443_v49 = vadd.f32 %v7052_v22, %v1442_v27 }
 0x477   : > { %v1898_v48 = vmax.f32 %v1443_v49, 0.0  ;;  %6131 = vmatmul.msk.bf16.gmra.mxu2 %vm741_vm0, %v3537_v39  ;;  %v7276_v50 = vpack.c.bf16 %v4753_v42, %v4752_v34 }
 0x478   : > { %v2854_v35 = vpop.f32.mrf.mxu1 }
 0x479   : > { %8815 = vst [vmem:[#allocation21_spill] sm:$0xff] %v7276_v50  ;;  %v2092_v32 = vpack.c.bf16 %v1898_v48, %v1897_v52  ;;  %v2855_v11 = vadd.f32 %v7108_v59, %v2854_v35 }
 0x47a   : > { %v4246_v56 = vpop.f32.mrf.mxu2 }
 0x47b   : > { %6004 = vmatmul.msk.bf16.gmra.mxu1 %vm2195_vm1, %v2092_v32  ;;  %v4247_v21 = vadd.f32 %v7203_v47, %v4246_v56  ;;  %v3335_v27 = vmax.f32 %v2855_v11, 0.0  ;;  %v480_v11 = vld [vmem:[%s6483_s30 + $0x478] sm:$0xff] }
 0x47c   : > { %v1445_v15 = vpop.f32.mrf.mxu0 }
 0x47d   : > { %v1446_v34 = vadd.f32 %v7052_v22, %v1445_v15  ;;  %v4754_v49 = vmax.f32 %v4247_v21, 0.0 }
 0x47f   : > { %5869 = vmatmul.msk.bf16.gmra.mxu0 %vm741_vm0, %v663_v14  ;;  %v1899_v57 = vmax.f32 %v1446_v34, 0.0 }
 0x480   : > { %v2856_v17 = vpop.f32.mrf.mxu1 }
 0x481   : > { %v2857_v26 = vadd.f32 %v7108_v59, %v2856_v17  ;;  %v479_v17 = vld [vmem:[%s6483_s30 + $0x470] sm:$0xff] }
 0x482   : > { %v4248_v19 = vpop.f32.mrf.mxu2 }
 0x483   : > { %v3336_v39 = vmax.f32 %v2857_v26, 0.0  ;;  %v4249_v32 = vadd.f32 %v7203_v47, %v4248_v19  ;;  %v664_v26 = vpack.c.bf16 %v480_v11, %v479_v17 }
 0x484   : > { %v1447_v42 = vpop.f32.mrf.mxu0 }
 0x485   : > { %v3538_v52 = vpack.c.bf16 %v3336_v39, %v3335_v27  ;;  %v4755_v48 = vmax.f32 %v4249_v32, 0.0  ;;  %v1448_v35 = vadd.f32 %v7052_v22, %v1447_v42 }
 0x487   : > { %v1900_v0 = vmax.f32 %v1448_v35, 0.0  ;;  %6132 = vmatmul.msk.bf16.gmra.mxu2 %vm741_vm0, %v3538_v52  ;;  %v7289_v56 = vpack.c.bf16 %v4755_v48, %v4754_v49 }
 0x488   : > { %v2859_v14 = vpop.f32.mrf.mxu1 }
 0x489   : > { %8816 = vst [vmem:[#allocation22_spill] sm:$0xff] %v7289_v56  ;;  %v2093_v40 = vpack.c.bf16 %v1900_v0, %v1899_v57  ;;  %v2860_v21 = vadd.f32 %v7108_v59, %v2859_v14 }
 0x48a   : > { %v4251_v15 = vpop.f32.mrf.mxu2 }
 0x48b   : > { %6005 = vmatmul.msk.bf16.gmra.mxu1 %vm2195_vm1, %v2093_v40  ;;  %v4252_v34 = vadd.f32 %v7203_v47, %v4251_v15  ;;  %v3337_v42 = vmax.f32 %v2860_v21, 0.0  ;;  %v482_v21 = vld [vmem:[%s6483_s30 + $0x488] sm:$0xff] }
 0x48c   : > { %v1450_v19 = vpop.f32.mrf.mxu0 }
 0x48d   : > { %v1451_v49 = vadd.f32 %v7052_v22, %v1450_v19  ;;  %v4756_v35 = vmax.f32 %v4252_v34, 0.0 }
 0x48f   : > { %5870 = vmatmul.msk.bf16.gmra.mxu0 %vm741_vm0, %v664_v26  ;;  %v1901_v17 = vmax.f32 %v1451_v49, 0.0 }
 0x490   : > { %v2861_v27 = vpop.f32.mrf.mxu1 }
 0x491   : > { %v2862_v39 = vadd.f32 %v7108_v59, %v2861_v27  ;;  %v481_v27 = vld [vmem:[%s6483_s30 + $0x480] sm:$0xff] }
 0x492   : > { %v4253_v32 = vpop.f32.mrf.mxu2 }
 0x493   : > { %v3338_v52 = vmax.f32 %v2862_v39, 0.0  ;;  %v4254_v40 = vadd.f32 %v7203_v47, %v4253_v32  ;;  %v665_v39 = vpack.c.bf16 %v482_v21, %v481_v27 }
 0x494   : > { %v1452_v48 = vpop.f32.mrf.mxu0 }
 0x495   : > { %v3539_v57 = vpack.c.bf16 %v3338_v52, %v3337_v42  ;;  %v4757_v0 = vmax.f32 %v4254_v40, 0.0  ;;  %v1453_v14 = vadd.f32 %v7052_v22, %v1452_v48  ;;  %v7314_v48 = vld [vmem:[%s8790_s2] ss:$0 sm:$0xff] }
 0x497   : > { %v1902_v11 = vmax.f32 %v1453_v14, 0.0  ;;  %6133 = vmatmul.msk.bf16.gmra.mxu2 %vm741_vm0, %v3539_v57  ;;  %v7302_v15 = vpack.c.bf16 %v4757_v0, %v4756_v35 }
 0x498   : > { %v2864_v26 = vpop.f32.mrf.mxu1 }
 0x499   : > { %8817 = vst [vmem:[#allocation23_spill] sm:$0xff] %v7302_v15  ;;  %v2094_v50 = vpack.c.bf16 %v1902_v11, %v1901_v17  ;;  %v2865_v34 = vadd.f32 %v7108_v59, %v2864_v26 }
 0x49a   : > { %v4256_v19 = vpop.f32.mrf.mxu2 }
 0x49b   : > { %6006 = vmatmul.msk.bf16.gmra.mxu1 %vm2195_vm1, %v2094_v50  ;;  %v4257_v42 = vadd.f32 %v7203_v47, %v4256_v19  ;;  %v3339_v40 = vmax.f32 %v2865_v34, 0.0  ;;  %v483_v34 = vld [vmem:[%s6483_s30 + $0x490] sm:$0xff] }
 0x49c   : > { %v1455_v32 = vpop.f32.mrf.mxu0 }
 0x49d   : > { %v1456_v50 = vadd.f32 %v7314_v48, %v1455_v32  ;;  %v4758_v14 = vmax.f32 %v4257_v42, 0.0 }
 0x49f   : > { %5871 = vmatmul.msk.bf16.gmra.mxu0 %vm741_vm0, %v665_v39  ;;  %v1903_v27 = vmax.f32 %v1456_v50, 0.0 }
 0x4a0   : > { %v2866_v22 = vpop.f32.mrf.mxu1 }
 0x4a1   : > { %v2867_v49 = vadd.f32 %v7108_v59, %v2866_v22  ;;  %v484_v22 = vld [vmem:[%s6483_s30 + $0x498] sm:$0xff] }
 0x4a2   : > { %v4258_v52 = vpop.f32.mrf.mxu2 }
 0x4a3   : > { %v3340_v35 = vmax.f32 %v2867_v49, 0.0  ;;  %v4259_v57 = vadd.f32 %v7203_v47, %v4258_v52  ;;  %v666_v49 = vpack.c.bf16 %v484_v22, %v483_v34 }
 0x4a4   : > { %v1457_v0 = vpop.f32.mrf.mxu0 }
 0x4a5   : > { %v3540_v17 = vpack.c.bf16 %v3340_v35, %v3339_v40  ;;  %v4759_v11 = vmax.f32 %v4259_v57, 0.0  ;;  %v1458_v26 = vadd.f32 %v7314_v48, %v1457_v0 }
 0x4a7   : > { %v1904_v21 = vmax.f32 %v1458_v26, 0.0  ;;  %6134 = vmatmul.msk.bf16.gmra.mxu2 %vm741_vm0, %v3540_v17  ;;  %v7320_v19 = vpack.c.bf16 %v4759_v11, %v4758_v14 }
 0x4a8   : > { %v2869_v39 = vpop.f32.mrf.mxu1 }
 0x4a9   : > { %8818 = vst [vmem:[#allocation24_spill] sm:$0xff] %v7320_v19  ;;  %v2095_v56 = vpack.c.bf16 %v1904_v21, %v1903_v27  ;;  %v2870_v42 = vadd.f32 %v7108_v59, %v2869_v39 }
 0x4aa   : > { %v4261_v32 = vpop.f32.mrf.mxu2 }
 0x4ab   : > { %6007 = vmatmul.msk.bf16.gmra.mxu1 %vm2195_vm1, %v2095_v56  ;;  %v4262_v50 = vadd.f32 %v7203_v47, %v4261_v32  ;;  %v3341_v0 = vmax.f32 %v2870_v42, 0.0  ;;  %v486_v42 = vld [vmem:[%s6483_s30 + $0x4a8] sm:$0xff] }
 0x4ac   : > { %v1460_v52 = vpop.f32.mrf.mxu0 }
 0x4ad   : > { %v1461_v14 = vadd.f32 %v7314_v48, %v1460_v52  ;;  %v4760_v26 = vmax.f32 %v4262_v50, 0.0 }
 0x4af   : > { %5872 = vmatmul.msk.bf16.gmra.mxu0 %vm741_vm0, %v666_v49  ;;  %v1905_v34 = vmax.f32 %v1461_v14, 0.0 }
 0x4b0   : > { %v2871_v40 = vpop.f32.mrf.mxu1 }
 0x4b1   : > { %v2872_v35 = vadd.f32 %v7108_v59, %v2871_v40  ;;  %v485_v40 = vld [vmem:[%s6483_s30 + $0x4a0] sm:$0xff] }
 0x4b2   : > { %v4263_v57 = vpop.f32.mrf.mxu2 }
 0x4b3   : > { %v3342_v17 = vmax.f32 %v2872_v35, 0.0  ;;  %v4264_v56 = vadd.f32 %v7203_v47, %v4263_v57  ;;  %v667_v35 = vpack.c.bf16 %v486_v42, %v485_v40 }
 0x4b4   : > { %v1462_v11 = vpop.f32.mrf.mxu0 }
 0x4b5   : > { %v3541_v27 = vpack.c.bf16 %v3342_v17, %v3341_v0  ;;  %v4761_v21 = vmax.f32 %v4264_v56, 0.0  ;;  %v1463_v39 = vadd.f32 %v7314_v48, %v1462_v11 }
 0x4b7   : > { %v7332_v22 = vpack.c.bf16 %v4761_v21, %v4760_v26  ;;  %v1906_v32 = vmax.f32 %v1463_v39, 0.0  ;;  %6135 = vmatmul.msk.bf16.gmra.mxu2 %vm741_vm0, %v3541_v27 }
 0x4b8   : > { %v2874_v49 = vpop.f32.mrf.mxu1 }
 0x4b9   : > { %8819 = vst [vmem:[#allocation25_spill] sm:$0xff] %v7332_v22  ;;  %v2096_v15 = vpack.c.bf16 %v1906_v32, %v1905_v34  ;;  %v2875_v50 = vadd.f32 %v7108_v59, %v2874_v49 }
 0x4ba   : > { %v4266_v52 = vpop.f32.mrf.mxu2 }
 0x4bb   : > { %6008 = vmatmul.msk.bf16.gmra.mxu1 %vm2195_vm1, %v2096_v15  ;;  %v4267_v14 = vadd.f32 %v7203_v47, %v4266_v52  ;;  %v3343_v11 = vmax.f32 %v2875_v50, 0.0  ;;  %v488_v50 = vld [vmem:[%s6483_s30 + $0x4b8] sm:$0xff] }
 0x4bc   : > { %v1465_v57 = vpop.f32.mrf.mxu0 }
 0x4bd   : > { %v1466_v26 = vadd.f32 %v7314_v48, %v1465_v57  ;;  %v4762_v39 = vmax.f32 %v4267_v14, 0.0 }
 0x4bf   : > { %5873 = vmatmul.msk.bf16.gmra.mxu0 %vm741_vm0, %v667_v35  ;;  %v1907_v40 = vmax.f32 %v1466_v26, 0.0 }
 0x4c0   : > { %v2876_v0 = vpop.f32.mrf.mxu1 }
 0x4c1   : > { %v2877_v17 = vadd.f32 %v7108_v59, %v2876_v0  ;;  %v487_v0 = vld [vmem:[%s6483_s30 + $0x4b0] sm:$0xff] }
 0x4c2   : > { %v4268_v56 = vpop.f32.mrf.mxu2 }
 0x4c3   : > { %v3344_v27 = vmax.f32 %v2877_v17, 0.0  ;;  %v4269_v15 = vadd.f32 %v7203_v47, %v4268_v56  ;;  %v668_v17 = vpack.c.bf16 %v488_v50, %v487_v0 }
 0x4c4   : > { %v1467_v21 = vpop.f32.mrf.mxu0 }
 0x4c5   : > { %v3542_v34 = vpack.c.bf16 %v3344_v27, %v3343_v11  ;;  %v4763_v32 = vmax.f32 %v4269_v15, 0.0  ;;  %v1468_v49 = vadd.f32 %v7314_v48, %v1467_v21 }
 0x4c7   : > { %v1908_v42 = vmax.f32 %v1468_v49, 0.0  ;;  %6136 = vmatmul.msk.bf16.gmra.mxu2 %vm741_vm0, %v3542_v34  ;;  %v7346_v52 = vpack.c.bf16 %v4763_v32, %v4762_v39 }
 0x4c8   : > { %v2879_v35 = vpop.f32.mrf.mxu1 }
 0x4c9   : > { %8820 = vst [vmem:[#allocation26_spill] sm:$0xff] %v7346_v52  ;;  %v2097_v19 = vpack.c.bf16 %v1908_v42, %v1907_v40  ;;  %v2880_v14 = vadd.f32 %v7108_v59, %v2879_v35 }
 0x4ca   : > { %v4271_v57 = vpop.f32.mrf.mxu2 }
 0x4cb   : > { %6009 = vmatmul.msk.bf16.gmra.mxu1 %vm2195_vm1, %v2097_v19  ;;  %v4272_v26 = vadd.f32 %v7203_v47, %v4271_v57  ;;  %v3345_v21 = vmax.f32 %v2880_v14, 0.0  ;;  %v490_v14 = vld [vmem:[%s6483_s30 + $0x4c8] sm:$0xff] }
 0x4cc   : > { %v1470_v56 = vpop.f32.mrf.mxu0 }
 0x4cd   : > { %v1471_v39 = vadd.f32 %v7314_v48, %v1470_v56  ;;  %v4764_v49 = vmax.f32 %v4272_v26, 0.0 }
 0x4cf   : > { %5874 = vmatmul.msk.bf16.gmra.mxu0 %vm741_vm0, %v668_v17  ;;  %v1909_v0 = vmax.f32 %v1471_v39, 0.0 }
 0x4d0   : > { %v2881_v11 = vpop.f32.mrf.mxu1 }
 0x4d1   : > { %v2882_v27 = vadd.f32 %v7108_v59, %v2881_v11  ;;  %v489_v11 = vld [vmem:[%s6483_s30 + $0x4c0] sm:$0xff] }
 0x4d2   : > { %v4273_v15 = vpop.f32.mrf.mxu2 }
 0x4d3   : > { %v3346_v34 = vmax.f32 %v2882_v27, 0.0  ;;  %v4274_v19 = vadd.f32 %v7203_v47, %v4273_v15  ;;  %v669_v27 = vpack.c.bf16 %v490_v14, %v489_v11 }
 0x4d4   : > { %v1472_v32 = vpop.f32.mrf.mxu0 }
 0x4d5   : > { %v3543_v40 = vpack.c.bf16 %v3346_v34, %v3345_v21  ;;  %v4765_v42 = vmax.f32 %v4274_v19, 0.0  ;;  %v1473_v35 = vadd.f32 %v7314_v48, %v1472_v32  ;;  %v7370_v34 = vld [vmem:[%s8792_s4] ss:$0 sm:$0xff] }
 0x4d7   : > { %v1910_v50 = vmax.f32 %v1473_v35, 0.0  ;;  %6137 = vmatmul.msk.bf16.gmra.mxu2 %vm741_vm0, %v3543_v40  ;;  %v7359_v57 = vpack.c.bf16 %v4765_v42, %v4764_v49 }
 0x4d8   : > { %v2884_v17 = vpop.f32.mrf.mxu1 }
 0x4d9   : > { %8821 = vst [vmem:[#allocation27_spill] sm:$0xff] %v7359_v57  ;;  %v2098_v52 = vpack.c.bf16 %v1910_v50, %v1909_v0  ;;  %v2885_v26 = vadd.f32 %v7108_v59, %v2884_v17 }
 0x4da   : > { %v4276_v56 = vpop.f32.mrf.mxu2 }
 0x4db   : > { %6010 = vmatmul.msk.bf16.gmra.mxu1 %vm2195_vm1, %v2098_v52  ;;  %v4277_v39 = vadd.f32 %v7203_v47, %v4276_v56  ;;  %v3347_v52 = vmax.f32 %v2885_v26, 0.0  ;;  %v492_v26 = vld [vmem:[%s6483_s30 + $0x4d8] sm:$0xff] }
 0x4dc   : > { %v1475_v15 = vpop.f32.mrf.mxu0 }
 0x4dd   : > { %v1476_v49 = vadd.f32 %v7314_v48, %v1475_v15  ;;  %v4766_v35 = vmax.f32 %v4277_v39, 0.0 }
 0x4df   : > { %5875 = vmatmul.msk.bf16.gmra.mxu0 %vm741_vm0, %v669_v27  ;;  %v1911_v11 = vmax.f32 %v1476_v49, 0.0 }
 0x4e0   : > { %v2886_v21 = vpop.f32.mrf.mxu1 }
 0x4e1   : > { %v2887_v19 = vadd.f32 %v7370_v34, %v2886_v21  ;;  %v491_v21 = vld [vmem:[%s6483_s30 + $0x4d0] sm:$0xff] }
 0x4e2   : > { %v4278_v32 = vpop.f32.mrf.mxu2 }
 0x4e3   : > { %v3348_v40 = vmax.f32 %v2887_v19, 0.0  ;;  %v4279_v59 = vadd.f32 %v7203_v47, %v4278_v32  ;;  %v670_v19 = vpack.c.bf16 %v492_v26, %v491_v21 }
 0x4e4   : > { %v1477_v42 = vpop.f32.mrf.mxu0 }
 0x4e5   : > { %v3544_v0 = vpack.c.bf16 %v3348_v40, %v3347_v52  ;;  %v4767_v50 = vmax.f32 %v4279_v59, 0.0  ;;  %v1478_v17 = vadd.f32 %v7314_v48, %v1477_v42 }
 0x4e7   : > { %v1912_v14 = vmax.f32 %v1478_v17, 0.0  ;;  %6138 = vmatmul.msk.bf16.gmra.mxu2 %vm741_vm0, %v3544_v0  ;;  %v7377_v56 = vpack.c.bf16 %v4767_v50, %v4766_v35 }
 0x4e8   : > { %v2889_v27 = vpop.f32.mrf.mxu1 }
 0x4e9   : > { %8822 = vst [vmem:[#allocation28_spill] sm:$0xff] %v7377_v56  ;;  %v2099_v57 = vpack.c.bf16 %v1912_v14, %v1911_v11  ;;  %v2890_v39 = vadd.f32 %v7370_v34, %v2889_v27 }
 0x4ea   : > { %v4281_v15 = vpop.f32.mrf.mxu2 }
 0x4eb   : > { %6011 = vmatmul.msk.bf16.gmra.mxu1 %vm2195_vm1, %v2099_v57  ;;  %v4282_v49 = vadd.f32 %v7203_v47, %v4281_v15  ;;  %v3349_v42 = vmax.f32 %v2890_v39, 0.0  ;;  %v494_v39 = vld [vmem:[%s6483_s30 + $0x4e8] sm:$0xff] }
 0x4ec   : > { %v1480_v32 = vpop.f32.mrf.mxu0 }
 0x4ed   : > { %v1481_v35 = vadd.f32 %v7314_v48, %v1480_v32  ;;  %v4768_v17 = vmax.f32 %v4282_v49, 0.0 }
 0x4ef   : > { %5876 = vmatmul.msk.bf16.gmra.mxu0 %vm741_vm0, %v670_v19  ;;  %v1913_v21 = vmax.f32 %v1481_v35, 0.0 }
 0x4f0   : > { %v2891_v52 = vpop.f32.mrf.mxu1 }
 0x4f1   : > { %v2892_v40 = vadd.f32 %v7370_v34, %v2891_v52  ;;  %v493_v52 = vld [vmem:[%s6483_s30 + $0x4e0] sm:$0xff] }
 0x4f2   : > { %v4283_v59 = vpop.f32.mrf.mxu2 }
 0x4f3   : > { %v3350_v0 = vmax.f32 %v2892_v40, 0.0  ;;  %v4284_v57 = vadd.f32 %v7203_v47, %v4283_v59  ;;  %v671_v40 = vpack.c.bf16 %v494_v39, %v493_v52 }
 0x4f4   : > { %v1482_v50 = vpop.f32.mrf.mxu0 }
 0x4f5   : > { %v3545_v11 = vpack.c.bf16 %v3350_v0, %v3349_v42  ;;  %v4769_v14 = vmax.f32 %v4284_v57, 0.0  ;;  %v1483_v27 = vadd.f32 %v7314_v48, %v1482_v50 }
 0x4f7   : > { %v1914_v26 = vmax.f32 %v1483_v27, 0.0  ;;  %6139 = vmatmul.msk.bf16.gmra.mxu2 %vm741_vm0, %v3545_v11  ;;  %v7390_v15 = vpack.c.bf16 %v4769_v14, %v4768_v17 }
 0x4f8   : > { %v2894_v19 = vpop.f32.mrf.mxu1 }
 0x4f9   : > { %8823 = vst [vmem:[#allocation29_spill] sm:$0xff] %v7390_v15  ;;  %v2100_v56 = vpack.c.bf16 %v1914_v26, %v1913_v21  ;;  %v2895_v49 = vadd.f32 %v7370_v34, %v2894_v19 }
 0x4fa   : > { %v4286_v32 = vpop.f32.mrf.mxu2 }
 0x4fb   : > { %6012 = vmatmul.msk.bf16.gmra.mxu1 %vm2195_vm1, %v2100_v56  ;;  %v4287_v35 = vadd.f32 %v7203_v47, %v4286_v32  ;;  %v3351_v50 = vmax.f32 %v2895_v49, 0.0  ;;  %v496_v49 = vld [vmem:[%s6483_s30 + $0x4f8] sm:$0xff] }
 0x4fc   : > { %v1485_v59 = vpop.f32.mrf.mxu0 }
 0x4fd   : > { %v1486_v17 = vadd.f32 %v7314_v48, %v1485_v59  ;;  %v4770_v27 = vmax.f32 %v4287_v35, 0.0 }
 0x4ff   : > { %5877 = vmatmul.msk.bf16.gmra.mxu0 %vm741_vm0, %v671_v40  ;;  %v1915_v52 = vmax.f32 %v1486_v17, 0.0 }
 0x500   : > { %v2896_v42 = vpop.f32.mrf.mxu1 }
 0x501   : > { %v2897_v0 = vadd.f32 %v7370_v34, %v2896_v42  ;;  %v495_v42 = vld [vmem:[%s6483_s30 + $0x4f0] sm:$0xff] }
 0x502   : > { %v4288_v57 = vpop.f32.mrf.mxu2 }
 0x503   : > { %v3352_v11 = vmax.f32 %v2897_v0, 0.0  ;;  %v4289_v56 = vadd.f32 %v7203_v47, %v4288_v57  ;;  %v672_v0 = vpack.c.bf16 %v496_v49, %v495_v42 }
 0x504   : > { %v1487_v14 = vpop.f32.mrf.mxu0 }
 0x505   : > { %v3546_v21 = vpack.c.bf16 %v3352_v11, %v3351_v50  ;;  %v4771_v26 = vmax.f32 %v4289_v56, 0.0  ;;  %v1488_v19 = vadd.f32 %v7314_v48, %v1487_v14 }
 0x507   : > { %v1916_v39 = vmax.f32 %v1488_v19, 0.0  ;;  %6140 = vmatmul.msk.bf16.gmra.mxu2 %vm741_vm0, %v3546_v21  ;;  %v7403_v32 = vpack.c.bf16 %v4771_v26, %v4770_v27 }
 0x508   : > { %v2899_v40 = vpop.f32.mrf.mxu1 }
 0x509   : > { %8824 = vst [vmem:[#allocation30_spill] sm:$0xff] %v7403_v32  ;;  %v2101_v15 = vpack.c.bf16 %v1916_v39, %v1915_v52  ;;  %v2900_v35 = vadd.f32 %v7370_v34, %v2899_v40 }
 0x50a   : > { %v4291_v59 = vpop.f32.mrf.mxu2 }
 0x50b   : > { %6013 = vmatmul.msk.bf16.gmra.mxu1 %vm2195_vm1, %v2101_v15  ;;  %v4292_v17 = vadd.f32 %v7203_v47, %v4291_v59  ;;  %v3353_v14 = vmax.f32 %v2900_v35, 0.0  ;;  %v498_v35 = vld [vmem:[%s6483_s30 + $0x508] sm:$0xff] }
 0x50c   : > { %v1490_v57 = vpop.f32.mrf.mxu0 }
 0x50d   : > { %v1491_v27 = vadd.f32 %v7314_v48, %v1490_v57  ;;  %v4772_v19 = vmax.f32 %v4292_v17, 0.0 }
 0x50f   : > { %5878 = vmatmul.msk.bf16.gmra.mxu0 %vm741_vm0, %v672_v0  ;;  %v1917_v42 = vmax.f32 %v1491_v27, 0.0 }
 0x510   : > { %v2901_v50 = vpop.f32.mrf.mxu1 }
 0x511   : > { %v2902_v11 = vadd.f32 %v7370_v34, %v2901_v50  ;;  %v497_v50 = vld [vmem:[%s6483_s30 + $0x500] sm:$0xff] }
 0x512   : > { %v4293_v56 = vpop.f32.mrf.mxu2 }
 0x513   : > { %v3354_v21 = vmax.f32 %v2902_v11, 0.0  ;;  %v4294_v15 = vadd.f32 %v7203_v47, %v4293_v56  ;;  %v673_v11 = vpack.c.bf16 %v498_v35, %v497_v50 }
 0x514   : > { %v1492_v26 = vpop.f32.mrf.mxu0 }
 0x515   : > { %v3547_v52 = vpack.c.bf16 %v3354_v21, %v3353_v14  ;;  %v4773_v39 = vmax.f32 %v4294_v15, 0.0  ;;  %v1493_v40 = vadd.f32 %v7314_v48, %v1492_v26 }
 0x517   : > { %v1918_v49 = vmax.f32 %v1493_v40, 0.0  ;;  %6141 = vmatmul.msk.bf16.gmra.mxu2 %vm741_vm0, %v3547_v52  ;;  %v7416_v59 = vpack.c.bf16 %v4773_v39, %v4772_v19 }
 0x518   : > { %v2904_v0 = vpop.f32.mrf.mxu1 }
 0x519   : > { %8825 = vst [vmem:[#allocation31_spill] sm:$0xff] %v7416_v59  ;;  %v2102_v32 = vpack.c.bf16 %v1918_v49, %v1917_v42  ;;  %v2905_v17 = vadd.f32 %v7370_v34, %v2904_v0 }
 0x51a   : > { %v4296_v57 = vpop.f32.mrf.mxu2 }
 0x51b   : > { %6014 = vmatmul.msk.bf16.gmra.mxu1 %vm2195_vm1, %v2102_v32  ;;  %v4297_v27 = vadd.f32 %v7203_v47, %v4296_v57  ;;  %v3355_v26 = vmax.f32 %v2905_v17, 0.0  ;;  %v500_v17 = vld [vmem:[%s6483_s30 + $0x518] sm:$0xff] }
 0x51c   : > { %v1495_v56 = vpop.f32.mrf.mxu0 }
 0x51d   : > { %v1496_v19 = vadd.f32 %v7314_v48, %v1495_v56  ;;  %v4774_v40 = vmax.f32 %v4297_v27, 0.0 }
 0x51f   : > { %5879 = vmatmul.msk.bf16.gmra.mxu0 %vm741_vm0, %v673_v11  ;;  %v1919_v50 = vmax.f32 %v1496_v19, 0.0 }
 0x520   : > { %v2906_v14 = vpop.f32.mrf.mxu1 }
 0x521   : > { %v2907_v21 = vadd.f32 %v7370_v34, %v2906_v14  ;;  %v499_v14 = vld [vmem:[%s6483_s30 + $0x510] sm:$0xff] }
 0x522   : > { %v4298_v15 = vpop.f32.mrf.mxu2 }
 0x523   : > { %v3356_v52 = vmax.f32 %v2907_v21, 0.0  ;;  %v4299_v32 = vadd.f32 %v7203_v47, %v4298_v15  ;;  %v674_v21 = vpack.c.bf16 %v500_v17, %v499_v14 }
 0x524   : > { %v1497_v39 = vpop.f32.mrf.mxu0 }
 0x525   : > { %v3548_v42 = vpack.c.bf16 %v3356_v52, %v3355_v26  ;;  %v4775_v49 = vmax.f32 %v4299_v32, 0.0  ;;  %v1498_v0 = vadd.f32 %v7314_v48, %v1497_v39 }
 0x527   : > { %v1920_v35 = vmax.f32 %v1498_v0, 0.0  ;;  %6142 = vmatmul.msk.bf16.gmra.mxu2 %vm741_vm0, %v3548_v42  ;;  %v7429_v57 = vpack.c.bf16 %v4775_v49, %v4774_v40 }
 0x528   : > { %v2909_v11 = vpop.f32.mrf.mxu1 }
 0x529   : > { %8826 = vst [vmem:[#allocation32_spill] sm:$0xff] %v7429_v57  ;;  %v2103_v59 = vpack.c.bf16 %v1920_v35, %v1919_v50  ;;  %v2910_v27 = vadd.f32 %v7370_v34, %v2909_v11 }
 0x52a   : > { %v4301_v56 = vpop.f32.mrf.mxu2 }
 0x52b   : > { %6015 = vmatmul.msk.bf16.gmra.mxu1 %vm2195_vm1, %v2103_v59  ;;  %v4302_v19 = vadd.f32 %v7203_v47, %v4301_v56  ;;  %v3357_v39 = vmax.f32 %v2910_v27, 0.0  ;;  %v502_v27 = vld [vmem:[%s6483_s30 + $0x528] sm:$0xff] }
 0x52c   : > { %v1500_v15 = vpop.f32.mrf.mxu0 }
 0x52d   : > { %v1501_v40 = vadd.f32 %v7314_v48, %v1500_v15  ;;  %v4776_v0 = vmax.f32 %v4302_v19, 0.0 }
 0x52f   : > { %5880 = vmatmul.msk.bf16.gmra.mxu0 %vm741_vm0, %v674_v21  ;;  %v1921_v14 = vmax.f32 %v1501_v40, 0.0 }
 0x530   : > { %v2911_v26 = vpop.f32.mrf.mxu1 }
 0x531   : > { %v2912_v52 = vadd.f32 %v7370_v34, %v2911_v26  ;;  %v501_v26 = vld [vmem:[%s6483_s30 + $0x520] sm:$0xff] }
 0x532   : > { %v4303_v32 = vpop.f32.mrf.mxu2 }
 0x533   : > { %v3358_v42 = vmax.f32 %v2912_v52, 0.0  ;;  %v4304_v59 = vadd.f32 %v7203_v47, %v4303_v32  ;;  %v675_v52 = vpack.c.bf16 %v502_v27, %v501_v26 }
 0x534   : > { %v1502_v49 = vpop.f32.mrf.mxu0 }
 0x535   : > { %v3549_v50 = vpack.c.bf16 %v3358_v42, %v3357_v39  ;;  %v4777_v35 = vmax.f32 %v4304_v59, 0.0  ;;  %v1503_v11 = vadd.f32 %v7314_v48, %v1502_v49 }
 0x537   : > { %v7441_v17 = vpack.c.bf16 %v4777_v35, %v4776_v0  ;;  %v1922_v56 = vmax.f32 %v1503_v11, 0.0  ;;  %6143 = vmatmul.msk.bf16.gmra.mxu2 %vm741_vm0, %v3549_v50 }
 0x538   : > { %v2914_v21 = vpop.f32.mrf.mxu1 }
 0x539   : > { %8827 = vst [vmem:[#allocation33_spill] sm:$0xff] %v7441_v17  ;;  %v2104_v57 = vpack.c.bf16 %v1922_v56, %v1921_v14  ;;  %v2915_v19 = vadd.f32 %v7370_v34, %v2914_v21 }
 0x53a   : > { %v4306_v15 = vpop.f32.mrf.mxu2 }
 0x53b   : > { %6016 = vmatmul.msk.bf16.gmra.mxu1 %vm2195_vm1, %v2104_v57  ;;  %v4307_v40 = vadd.f32 %v7203_v47, %v4306_v15  ;;  %v3359_v49 = vmax.f32 %v2915_v19, 0.0  ;;  %v504_v19 = vld [vmem:[%s6483_s30 + $0x538] sm:$0xff] }
 0x53c   : > { %v1505_v32 = vpop.f32.mrf.mxu0 }
 0x53d   : > { %v1506_v0 = vadd.f32 %v7314_v48, %v1505_v32  ;;  %v4778_v11 = vmax.f32 %v4307_v40, 0.0 }
 0x53f   : > { %5881 = vmatmul.msk.bf16.gmra.mxu0 %vm741_vm0, %v675_v52  ;;  %v1923_v26 = vmax.f32 %v1506_v0, 0.0 }
 0x540   : > { %v2916_v39 = vpop.f32.mrf.mxu1 }
 0x541   : > { %v2917_v42 = vadd.f32 %v7370_v34, %v2916_v39  ;;  %v503_v39 = vld [vmem:[%s6483_s30 + $0x530] sm:$0xff] }
 0x542   : > { %v4308_v59 = vpop.f32.mrf.mxu2 }
 0x543   : > { %v3360_v50 = vmax.f32 %v2917_v42, 0.0  ;;  %v4309_v57 = vadd.f32 %v7203_v47, %v4308_v59  ;;  %v676_v47 = vpack.c.bf16 %v504_v19, %v503_v39 }
 0x544   : > { %v1507_v35 = vpop.f32.mrf.mxu0 }
 0x545   : > { %v3550_v14 = vpack.c.bf16 %v3360_v50, %v3359_v49  ;;  %v4779_v56 = vmax.f32 %v4309_v57, 0.0  ;;  %v1508_v21 = vadd.f32 %v7314_v48, %v1507_v35  ;;  %v7465_v49 = vld [vmem:[%s8794_s6] ss:$0 sm:$0xff] }
 0x547   : > { %v1924_v27 = vmax.f32 %v1508_v21, 0.0  ;;  %6144 = vmatmul.msk.bf16.gmra.mxu2 %vm741_vm0, %v3550_v14  ;;  %v7455_v15 = vpack.c.bf16 %v4779_v56, %v4778_v11 }
 0x548   : > { %v2919_v52 = vpop.f32.mrf.mxu1 }
 0x549   : > { %8828 = vst [vmem:[#allocation34_spill] sm:$0xff] %v7455_v15  ;;  %v2105_v17 = vpack.c.bf16 %v1924_v27, %v1923_v26  ;;  %v2920_v40 = vadd.f32 %v7370_v34, %v2919_v52 }
 0x54a   : > { %v4311_v32 = vpop.f32.mrf.mxu2 }
 0x54b   : > { %6017 = vmatmul.msk.bf16.gmra.mxu1 %vm2195_vm1, %v2105_v17  ;;  %v4312_v0 = vadd.f32 %v7465_v49, %v4311_v32  ;;  %v3361_v17 = vmax.f32 %v2920_v40, 0.0  ;;  %v506_v40 = vld [vmem:[%s6483_s30 + $0x548] sm:$0xff] }
 0x54c   : > { %v1510_v42 = vpop.f32.mrf.mxu0 }
 0x54d   : > { %v1511_v35 = vadd.f32 %v7314_v48, %v1510_v42  ;;  %v4780_v21 = vmax.f32 %v4312_v0, 0.0 }
 0x54f   : > { %5882 = vmatmul.msk.bf16.gmra.mxu0 %vm741_vm0, %v676_v47  ;;  %v1925_v39 = vmax.f32 %v1511_v35, 0.0 }
 0x550   : > { %v2921_v59 = vpop.f32.mrf.mxu1 }
 0x551   : > { %v2922_v50 = vadd.f32 %v7370_v34, %v2921_v59  ;;  %v505_v59 = vld [vmem:[%s6483_s30 + $0x540] sm:$0xff] }
 0x552   : > { %v4313_v57 = vpop.f32.mrf.mxu2 }
 0x553   : > { %v3362_v11 = vmax.f32 %v2922_v50, 0.0  ;;  %v4314_v14 = vadd.f32 %v7465_v49, %v4313_v57  ;;  %v677_v50 = vpack.c.bf16 %v506_v40, %v505_v59 }
 0x554   : > { %v1512_v56 = vpop.f32.mrf.mxu0 }
 0x555   : > { %v3551_v26 = vpack.c.bf16 %v3362_v11, %v3361_v17  ;;  %v4781_v27 = vmax.f32 %v4314_v14, 0.0  ;;  %v1513_v52 = vadd.f32 %v7314_v48, %v1512_v56 }
 0x557   : > { %v1926_v19 = vmax.f32 %v1513_v52, 0.0  ;;  %6145 = vmatmul.msk.bf16.gmra.mxu2 %vm741_vm0, %v3551_v26  ;;  %v7473_v32 = vpack.c.bf16 %v4781_v27, %v4780_v21 }
 0x558   : > { %v2924_v47 = vpop.f32.mrf.mxu1 }
 0x559   : > { %8829 = vst [vmem:[#allocation35_spill] sm:$0xff] %v7473_v32  ;;  %v2106_v15 = vpack.c.bf16 %v1926_v19, %v1925_v39  ;;  %v2925_v0 = vadd.f32 %v7370_v34, %v2924_v47 }
 0x55a   : > { %v4316_v42 = vpop.f32.mrf.mxu2 }
 0x55b   : > { %6018 = vmatmul.msk.bf16.gmra.mxu1 %vm2195_vm1, %v2106_v15  ;;  %v4317_v35 = vadd.f32 %v7465_v49, %v4316_v42  ;;  %v3363_v56 = vmax.f32 %v2925_v0, 0.0  ;;  %v508_v0 = vld [vmem:[%s6483_s30 + $0x558] sm:$0xff] }
 0x55c   : > { %v1515_v57 = vpop.f32.mrf.mxu0 }
 0x55d   : > { %v1516_v21 = vadd.f32 %v7314_v48, %v1515_v57  ;;  %v4782_v52 = vmax.f32 %v4317_v35, 0.0 }
 0x55f   : > { %5883 = vmatmul.msk.bf16.gmra.mxu0 %vm741_vm0, %v677_v50  ;;  %v1927_v59 = vmax.f32 %v1516_v21, 0.0 }
 0x560   : > { %v2926_v17 = vpop.f32.mrf.mxu1 }
 0x561   : > { %v2927_v11 = vadd.f32 %v7370_v34, %v2926_v17  ;;  %v507_v17 = vld [vmem:[%s6483_s30 + $0x550] sm:$0xff] }
 0x562   : > { %v4318_v14 = vpop.f32.mrf.mxu2 }
 0x563   : > { %v3364_v26 = vmax.f32 %v2927_v11, 0.0  ;;  %v4319_v15 = vadd.f32 %v7465_v49, %v4318_v14  ;;  %v678_v11 = vpack.c.bf16 %v508_v0, %v507_v17 }
 0x564   : > { %v1517_v27 = vpop.f32.mrf.mxu0 }
 0x565   : > { %v3552_v39 = vpack.c.bf16 %v3364_v26, %v3363_v56  ;;  %v4783_v19 = vmax.f32 %v4319_v15, 0.0  ;;  %v1518_v47 = vadd.f32 %v7314_v48, %v1517_v27 }
 0x567   : > { %v1928_v40 = vmax.f32 %v1518_v47, 0.0  ;;  %6146 = vmatmul.msk.bf16.gmra.mxu2 %vm741_vm0, %v3552_v39  ;;  %v7486_v42 = vpack.c.bf16 %v4783_v19, %v4782_v52 }
 0x568   : > { %v2929_v50 = vpop.f32.mrf.mxu1 }
 0x569   : > { %8830 = vst [vmem:[#allocation36_spill] sm:$0xff] %v7486_v42  ;;  %v2107_v32 = vpack.c.bf16 %v1928_v40, %v1927_v59  ;;  %v2930_v35 = vadd.f32 %v7370_v34, %v2929_v50 }
 0x56a   : > { %v4321_v57 = vpop.f32.mrf.mxu2 }
 0x56b   : > { %6019 = vmatmul.msk.bf16.gmra.mxu1 %vm2195_vm1, %v2107_v32  ;;  %v4322_v21 = vadd.f32 %v7465_v49, %v4321_v57  ;;  %v3365_v27 = vmax.f32 %v2930_v35, 0.0  ;;  %v510_v35 = vld [vmem:[%s6483_s30 + $0x568] sm:$0xff] }
 0x56c   : > { %v1520_v14 = vpop.f32.mrf.mxu0 }
 0x56d   : > { %v1521_v52 = vadd.f32 %v7314_v48, %v1520_v14  ;;  %v4784_v47 = vmax.f32 %v4322_v21, 0.0 }
 0x56f   : > { %5884 = vmatmul.msk.bf16.gmra.mxu0 %vm741_vm0, %v678_v11  ;;  %v1929_v17 = vmax.f32 %v1521_v52, 0.0 }
 0x570   : > { %v2931_v56 = vpop.f32.mrf.mxu1 }
 0x571   : > { %v2932_v26 = vadd.f32 %v7370_v34, %v2931_v56  ;;  %v509_v56 = vld [vmem:[%s6483_s30 + $0x560] sm:$0xff] }
 0x572   : > { %v4323_v15 = vpop.f32.mrf.mxu2 }
 0x573   : > { %v3366_v39 = vmax.f32 %v2932_v26, 0.0  ;;  %v4324_v32 = vadd.f32 %v7465_v49, %v4323_v15  ;;  %v679_v26 = vpack.c.bf16 %v510_v35, %v509_v56 }
 0x574   : > { %v1522_v19 = vpop.f32.mrf.mxu0 }
 0x575   : > { %v3553_v59 = vpack.c.bf16 %v3366_v39, %v3365_v27  ;;  %v4785_v40 = vmax.f32 %v4324_v32, 0.0  ;;  %v1523_v50 = vadd.f32 %v7314_v48, %v1522_v19 }
 0x577   : > { %v1930_v0 = vmax.f32 %v1523_v50, 0.0  ;;  %6147 = vmatmul.msk.bf16.gmra.mxu2 %vm741_vm0, %v3553_v59  ;;  %v7499_v57 = vpack.c.bf16 %v4785_v40, %v4784_v47 }
 0x578   : > { %v2934_v11 = vpop.f32.mrf.mxu1 }
 0x579   : > { %8831 = vst [vmem:[#allocation37_spill] sm:$0xff] %v7499_v57  ;;  %v2108_v42 = vpack.c.bf16 %v1930_v0, %v1929_v17  ;;  %v2935_v21 = vadd.f32 %v7370_v34, %v2934_v11 }
 0x57a   : > { %v4326_v14 = vpop.f32.mrf.mxu2 }
 0x57b   : > { %6020 = vmatmul.msk.bf16.gmra.mxu1 %vm2195_vm1, %v2108_v42  ;;  %v4327_v52 = vadd.f32 %v7465_v49, %v4326_v14  ;;  %v3367_v19 = vmax.f32 %v2935_v21, 0.0  ;;  %v512_v21 = vld [vmem:[%s6483_s30 + $0x578] sm:$0xff] }
 0x57c   : > { %v1525_v15 = vpop.f32.mrf.mxu0 }
 0x57d   : > { %v1526_v47 = vadd.f32 %v7314_v48, %v1525_v15  ;;  %v4786_v50 = vmax.f32 %v4327_v52, 0.0 }
 0x57f   : > { %5885 = vmatmul.msk.bf16.gmra.mxu0 %vm741_vm0, %v679_v26  ;;  %v1931_v56 = vmax.f32 %v1526_v47, 0.0 }
 0x580   : > { %v2936_v27 = vpop.f32.mrf.mxu1 }
 0x581   : > { %v2937_v39 = vadd.f32 %v7370_v34, %v2936_v27  ;;  %v511_v27 = vld [vmem:[%s6483_s30 + $0x570] sm:$0xff] }
 0x582   : > { %v4328_v32 = vpop.f32.mrf.mxu2 }
 0x583   : > { %v3368_v59 = vmax.f32 %v2937_v39, 0.0  ;;  %v4329_v42 = vadd.f32 %v7465_v49, %v4328_v32  ;;  %v680_v39 = vpack.c.bf16 %v512_v21, %v511_v27 }
 0x584   : > { %v1527_v40 = vpop.f32.mrf.mxu0 }
 0x585   : > { %v3554_v17 = vpack.c.bf16 %v3368_v59, %v3367_v19  ;;  %v4787_v0 = vmax.f32 %v4329_v42, 0.0  ;;  %v1528_v11 = vadd.f32 %v7314_v48, %v1527_v40 }
 0x587   : > { %v1932_v35 = vmax.f32 %v1528_v11, 0.0  ;;  %6148 = vmatmul.msk.bf16.gmra.mxu2 %vm741_vm0, %v3554_v17  ;;  %v7512_v14 = vpack.c.bf16 %v4787_v0, %v4786_v50 }
 0x588   : > { %v2939_v26 = vpop.f32.mrf.mxu1 }
 0x589   : > { %8832 = vst [vmem:[#allocation38_spill] sm:$0xff] %v7512_v14  ;;  %v2109_v57 = vpack.c.bf16 %v1932_v35, %v1931_v56  ;;  %v2940_v52 = vadd.f32 %v7370_v34, %v2939_v26 }
 0x58a   : > { %v4331_v15 = vpop.f32.mrf.mxu2 }
 0x58b   : > { %6021 = vmatmul.msk.bf16.gmra.mxu1 %vm2195_vm1, %v2109_v57  ;;  %v4332_v47 = vadd.f32 %v7465_v49, %v4331_v15  ;;  %v3369_v40 = vmax.f32 %v2940_v52, 0.0  ;;  %v514_v52 = vld [vmem:[%s6483_s30 + $0x588] sm:$0xff] }
 0x58c   : > { %v1530_v32 = vpop.f32.mrf.mxu0 }
 0x58d   : > { %v1531_v50 = vadd.f32 %v7314_v48, %v1530_v32  ;;  %v4788_v11 = vmax.f32 %v4332_v47, 0.0 }
 0x58f   : > { %5886 = vmatmul.msk.bf16.gmra.mxu0 %vm741_vm0, %v680_v39  ;;  %v1933_v27 = vmax.f32 %v1531_v50, 0.0 }
 0x590   : > { %v2941_v19 = vpop.f32.mrf.mxu1 }
 0x591   : > { %v2942_v59 = vadd.f32 %v7370_v34, %v2941_v19  ;;  %v513_v19 = vld [vmem:[%s6483_s30 + $0x580] sm:$0xff] }
 0x592   : > { %v4333_v42 = vpop.f32.mrf.mxu2 }
 0x593   : > { %v3370_v17 = vmax.f32 %v2942_v59, 0.0  ;;  %v4334_v57 = vadd.f32 %v7465_v49, %v4333_v42  ;;  %v681_v59 = vpack.c.bf16 %v514_v52, %v513_v19 }
 0x594   : > { %v1532_v0 = vpop.f32.mrf.mxu0 }
 0x595   : > { %v3555_v56 = vpack.c.bf16 %v3370_v17, %v3369_v40  ;;  %v4789_v35 = vmax.f32 %v4334_v57, 0.0  ;;  %v1533_v26 = vadd.f32 %v7314_v48, %v1532_v0 }
 0x597   : > { %v1934_v21 = vmax.f32 %v1533_v26, 0.0  ;;  %6149 = vmatmul.msk.bf16.gmra.mxu2 %vm741_vm0, %v3555_v56  ;;  %v7525_v15 = vpack.c.bf16 %v4789_v35, %v4788_v11 }
 0x598   : > { %v2944_v39 = vpop.f32.mrf.mxu1 }
 0x599   : > { %8833 = vst [vmem:[#allocation39_spill] sm:$0xff] %v7525_v15  ;;  %v2110_v14 = vpack.c.bf16 %v1934_v21, %v1933_v27  ;;  %v2945_v47 = vadd.f32 %v7370_v34, %v2944_v39 }
 0x59a   : > { %v4336_v32 = vpop.f32.mrf.mxu2 }
 0x59b   : > { %6022 = vmatmul.msk.bf16.gmra.mxu1 %vm2195_vm1, %v2110_v14  ;;  %v4337_v50 = vadd.f32 %v7465_v49, %v4336_v32  ;;  %v3371_v0 = vmax.f32 %v2945_v47, 0.0  ;;  %v516_v47 = vld [vmem:[%s6483_s30 + $0x598] sm:$0xff] }
 0x59c   : > { %v1535_v42 = vpop.f32.mrf.mxu0 }
 0x59d   : > { %v1536_v11 = vadd.f32 %v7314_v48, %v1535_v42  ;;  %v4790_v26 = vmax.f32 %v4337_v50, 0.0 }
 0x59f   : > { %5887 = vmatmul.msk.bf16.gmra.mxu0 %vm741_vm0, %v681_v59  ;;  %v1935_v19 = vmax.f32 %v1536_v11, 0.0 }
 0x5a0   : > { %v2946_v40 = vpop.f32.mrf.mxu1 }
 0x5a1   : > { %v2947_v17 = vadd.f32 %v7370_v34, %v2946_v40  ;;  %v515_v40 = vld [vmem:[%s6483_s30 + $0x590] sm:$0xff] }
 0x5a2   : > { %v4338_v57 = vpop.f32.mrf.mxu2 }
 0x5a3   : > { %v3372_v56 = vmax.f32 %v2947_v17, 0.0  ;;  %v4339_v14 = vadd.f32 %v7465_v49, %v4338_v57  ;;  %v682_v17 = vpack.c.bf16 %v516_v47, %v515_v40 }
 0x5a4   : > { %v1537_v35 = vpop.f32.mrf.mxu0 }
 0x5a5   : > { %v3556_v27 = vpack.c.bf16 %v3372_v56, %v3371_v0  ;;  %v4791_v21 = vmax.f32 %v4339_v14, 0.0  ;;  %v1538_v39 = vadd.f32 %v7314_v48, %v1537_v35 }
 0x5a7   : > { %v1936_v52 = vmax.f32 %v1538_v39, 0.0  ;;  %6150 = vmatmul.msk.bf16.gmra.mxu2 %vm741_vm0, %v3556_v27  ;;  %v7538_v32 = vpack.c.bf16 %v4791_v21, %v4790_v26 }
 0x5a8   : > { %v2949_v59 = vpop.f32.mrf.mxu1 }
 0x5a9   : > { %8834 = vst [vmem:[#allocation40_spill] sm:$0xff] %v7538_v32  ;;  %v2111_v15 = vpack.c.bf16 %v1936_v52, %v1935_v19  ;;  %v2950_v50 = vadd.f32 %v7370_v34, %v2949_v59 }
 0x5aa   : > { %v4341_v42 = vpop.f32.mrf.mxu2 }
 0x5ab   : > { %6023 = vmatmul.msk.bf16.gmra.mxu1 %vm2195_vm1, %v2111_v15  ;;  %v4342_v11 = vadd.f32 %v7465_v49, %v4341_v42  ;;  %v3373_v35 = vmax.f32 %v2950_v50, 0.0  ;;  %v518_v50 = vld [vmem:[%s6483_s30 + $0x5a8] sm:$0xff] }
 0x5ac   : > { %v1540_v57 = vpop.f32.mrf.mxu0 }
 0x5ad   : > { %v1541_v26 = vadd.f32 %v7314_v48, %v1540_v57  ;;  %v4792_v39 = vmax.f32 %v4342_v11, 0.0 }
 0x5af   : > { %5888 = vmatmul.msk.bf16.gmra.mxu0 %vm741_vm0, %v682_v17  ;;  %v1937_v40 = vmax.f32 %v1541_v26, 0.0 }
 0x5b0   : > { %v2951_v0 = vpop.f32.mrf.mxu1 }
 0x5b1   : > { %v2952_v56 = vadd.f32 %v7370_v34, %v2951_v0  ;;  %v517_v0 = vld [vmem:[%s6483_s30 + $0x5a0] sm:$0xff] }
 0x5b2   : > { %v4343_v14 = vpop.f32.mrf.mxu2 }
 0x5b3   : > { %v3374_v27 = vmax.f32 %v2952_v56, 0.0  ;;  %v4344_v15 = vadd.f32 %v7465_v49, %v4343_v14  ;;  %v683_v56 = vpack.c.bf16 %v518_v50, %v517_v0 }
 0x5b4   : > { %v1542_v21 = vpop.f32.mrf.mxu0 }
 0x5b5   : > { %v3557_v19 = vpack.c.bf16 %v3374_v27, %v3373_v35  ;;  %v4793_v52 = vmax.f32 %v4344_v15, 0.0  ;;  %v1543_v59 = vadd.f32 %v7314_v48, %v1542_v21 }
 0x5b7   : > { %v7550_v47 = vpack.c.bf16 %v4793_v52, %v4792_v39  ;;  %v1938_v42 = vmax.f32 %v1543_v59, 0.0  ;;  %6151 = vmatmul.msk.bf16.gmra.mxu2 %vm741_vm0, %v3557_v19 }
 0x5b8   : > { %v2954_v17 = vpop.f32.mrf.mxu1 }
 0x5b9   : > { %8835 = vst [vmem:[#allocation41_spill] sm:$0xff] %v7550_v47  ;;  %v2112_v32 = vpack.c.bf16 %v1938_v42, %v1937_v40  ;;  %v2955_v11 = vadd.f32 %v7370_v34, %v2954_v17 }
 0x5ba   : > { %v4346_v57 = vpop.f32.mrf.mxu2 }
 0x5bb   : > { %6024 = vmatmul.msk.bf16.gmra.mxu1 %vm2195_vm1, %v2112_v32  ;;  %v4347_v26 = vadd.f32 %v7465_v49, %v4346_v57  ;;  %v3375_v21 = vmax.f32 %v2955_v11, 0.0  ;;  %v520_v11 = vld [vmem:[%s6483_s30 + $0x5b8] sm:$0xff] }
 0x5bc   : > { %v1545_v14 = vpop.f32.mrf.mxu0 }
 0x5bd   : > { %v1546_v39 = vadd.f32 %v7314_v48, %v1545_v14  ;;  %v4794_v59 = vmax.f32 %v4347_v26, 0.0 }
 0x5bf   : > { %5889 = vmatmul.msk.bf16.gmra.mxu0 %vm741_vm0, %v683_v56  ;;  %v1939_v0 = vmax.f32 %v1546_v39, 0.0 }
 0x5c0   : > { %v2956_v35 = vpop.f32.mrf.mxu1 }
 0x5c1   : > { %v2957_v27 = vadd.f32 %v7370_v34, %v2956_v35  ;;  %v519_v35 = vld [vmem:[%s6483_s30 + $0x5b0] sm:$0xff] }
 0x5c2   : > { %v4348_v15 = vpop.f32.mrf.mxu2 }
 0x5c3   : > { %v3376_v19 = vmax.f32 %v2957_v27, 0.0  ;;  %v4349_v32 = vadd.f32 %v7465_v49, %v4348_v15  ;;  %v684_v27 = vpack.c.bf16 %v520_v11, %v519_v35 }
 0x5c4   : > { %v1547_v52 = vpop.f32.mrf.mxu0 }
 0x5c5   : > { %v3558_v40 = vpack.c.bf16 %v3376_v19, %v3375_v21  ;;  %v4795_v42 = vmax.f32 %v4349_v32, 0.0  ;;  %v1548_v17 = vadd.f32 %v7314_v48, %v1547_v52  ;;  %v7576_v52 = vld [vmem:[%s8790_s2] ss:$0 sm:$0xff] }
 0x5c7   : > { %v1940_v50 = vmax.f32 %v1548_v17, 0.0  ;;  %6152 = vmatmul.msk.bf16.gmra.mxu2 %vm741_vm0, %v3558_v40  ;;  %v7564_v57 = vpack.c.bf16 %v4795_v42, %v4794_v59 }
 0x5c8   : > { %v2959_v56 = vpop.f32.mrf.mxu1 }
 0x5c9   : > { %8836 = vst [vmem:[#allocation42_spill] sm:$0xff] %v7564_v57  ;;  %v2113_v47 = vpack.c.bf16 %v1940_v50, %v1939_v0  ;;  %v2960_v26 = vadd.f32 %v7370_v34, %v2959_v56 }
 0x5ca   : > { %v4351_v14 = vpop.f32.mrf.mxu2 }
 0x5cb   : > { %6025 = vmatmul.msk.bf16.gmra.mxu1 %vm2195_vm1, %v2113_v47  ;;  %v4352_v21 = vadd.f32 %v7465_v49, %v4351_v14  ;;  %v3377_v32 = vmax.f32 %v2960_v26, 0.0  ;;  %v521_v26 = vld [vmem:[%s6483_s30 + $0x5c0] sm:$0xff] }
 0x5cc   : > { %v1550_v15 = vpop.f32.mrf.mxu0 }
 0x5cd   : > { %v1551_v47 = vadd.f32 %v7576_v52, %v1550_v15  ;;  %v4796_v17 = vmax.f32 %v4352_v21, 0.0 }
 0x5cf   : > { %5890 = vmatmul.msk.bf16.gmra.mxu0 %vm741_vm0, %v684_v27  ;;  %v1941_v35 = vmax.f32 %v1551_v47, 0.0 }
 0x5d0   : > { %v2961_v48 = vpop.f32.mrf.mxu1 }
 0x5d1   : > { %v2962_v39 = vadd.f32 %v7370_v34, %v2961_v48  ;;  %v522_v48 = vld [vmem:[%s6483_s30 + $0x5c8] sm:$0xff] }
 0x5d2   : > { %v4353_v19 = vpop.f32.mrf.mxu2 }
 0x5d3   : > { %v3378_v59 = vmax.f32 %v2962_v39, 0.0  ;;  %v4354_v40 = vadd.f32 %v7465_v49, %v4353_v19  ;;  %v685_v39 = vpack.c.bf16 %v522_v48, %v521_v26 }
 0x5d4   : > { %v1552_v42 = vpop.f32.mrf.mxu0 }
 0x5d5   : > { %v3559_v0 = vpack.c.bf16 %v3378_v59, %v3377_v32  ;;  %v4797_v50 = vmax.f32 %v4354_v40, 0.0  ;;  %v1553_v56 = vadd.f32 %v7576_v52, %v1552_v42 }
 0x5d7   : > { %v1942_v11 = vmax.f32 %v1553_v56, 0.0  ;;  %6153 = vmatmul.msk.bf16.gmra.mxu2 %vm741_vm0, %v3559_v0  ;;  %v7582_v14 = vpack.c.bf16 %v4797_v50, %v4796_v17 }
 0x5d8   : > { %v2964_v27 = vpop.f32.mrf.mxu1 }
 0x5d9   : > { %8837 = vst [vmem:[#allocation43_spill] sm:$0xff] %v7582_v14  ;;  %v2114_v57 = vpack.c.bf16 %v1942_v11, %v1941_v35  ;;  %v2965_v21 = vadd.f32 %v7370_v34, %v2964_v27 }
 0x5da   : > { %v4356_v15 = vpop.f32.mrf.mxu2 }
 0x5db   : > { %6026 = vmatmul.msk.bf16.gmra.mxu1 %vm2195_vm1, %v2114_v57  ;;  %v4357_v47 = vadd.f32 %v7465_v49, %v4356_v15  ;;  %v3379_v42 = vmax.f32 %v2965_v21, 0.0  ;;  %v524_v21 = vld [vmem:[%s6483_s30 + $0x5d8] sm:$0xff] }
 0x5dc   : > { %v1555_v19 = vpop.f32.mrf.mxu0 }
 0x5dd   : > { %v1556_v17 = vadd.f32 %v7576_v52, %v1555_v19  ;;  %v4798_v56 = vmax.f32 %v4357_v47, 0.0 }
 0x5df   : > { %5891 = vmatmul.msk.bf16.gmra.mxu0 %vm741_vm0, %v685_v39  ;;  %v1943_v26 = vmax.f32 %v1556_v17, 0.0 }
 0x5e0   : > { %v2966_v32 = vpop.f32.mrf.mxu1 }
 0x5e1   : > { %v2967_v59 = vadd.f32 %v7370_v34, %v2966_v32  ;;  %v523_v32 = vld [vmem:[%s6483_s30 + $0x5d0] sm:$0xff] }
 0x5e2   : > { %v4358_v40 = vpop.f32.mrf.mxu2 }
 0x5e3   : > { %v3380_v0 = vmax.f32 %v2967_v59, 0.0  ;;  %v4359_v57 = vadd.f32 %v7465_v49, %v4358_v40  ;;  %v686_v59 = vpack.c.bf16 %v524_v21, %v523_v32 }
 0x5e4   : > { %v1557_v50 = vpop.f32.mrf.mxu0 }
 0x5e5   : > { %v3560_v35 = vpack.c.bf16 %v3380_v0, %v3379_v42  ;;  %v4799_v11 = vmax.f32 %v4359_v57, 0.0  ;;  %v1558_v27 = vadd.f32 %v7576_v52, %v1557_v50 }
 0x5e7   : > { %v1944_v48 = vmax.f32 %v1558_v27, 0.0  ;;  %6154 = vmatmul.msk.bf16.gmra.mxu2 %vm741_vm0, %v3560_v35  ;;  %v7595_v15 = vpack.c.bf16 %v4799_v11, %v4798_v56 }
 0x5e8   : > { %v2969_v39 = vpop.f32.mrf.mxu1 }
 0x5e9   : > { %8838 = vst [vmem:[#allocation44_spill] sm:$0xff] %v7595_v15  ;;  %v2115_v14 = vpack.c.bf16 %v1944_v48, %v1943_v26  ;;  %v2970_v47 = vadd.f32 %v7370_v34, %v2969_v39 }
 0x5ea   : > { %v4361_v19 = vpop.f32.mrf.mxu2 }
 0x5eb   : > { %6027 = vmatmul.msk.bf16.gmra.mxu1 %vm2195_vm1, %v2115_v14  ;;  %v4362_v17 = vadd.f32 %v7465_v49, %v4361_v19  ;;  %v3381_v50 = vmax.f32 %v2970_v47, 0.0  ;;  %v526_v47 = vld [vmem:[%s6483_s30 + $0x5e8] sm:$0xff] }
 0x5ec   : > { %v1560_v40 = vpop.f32.mrf.mxu0 }
 0x5ed   : > { %v1561_v56 = vadd.f32 %v7576_v52, %v1560_v40  ;;  %v4800_v27 = vmax.f32 %v4362_v17, 0.0 }
 0x5ef   : > { %5892 = vmatmul.msk.bf16.gmra.mxu0 %vm741_vm0, %v686_v59  ;;  %v1945_v32 = vmax.f32 %v1561_v56, 0.0 }
 0x5f0   : > { %v2971_v42 = vpop.f32.mrf.mxu1 }
 0x5f1   : > { %v2972_v0 = vadd.f32 %v7370_v34, %v2971_v42  ;;  %v525_v42 = vld [vmem:[%s6483_s30 + $0x5e0] sm:$0xff] }
 0x5f2   : > { %v4363_v57 = vpop.f32.mrf.mxu2 }
 0x5f3   : > { %v3382_v35 = vmax.f32 %v2972_v0, 0.0  ;;  %v4364_v14 = vadd.f32 %v7465_v49, %v4363_v57  ;;  %v687_v0 = vpack.c.bf16 %v526_v47, %v525_v42 }
 0x5f4   : > { %v1562_v11 = vpop.f32.mrf.mxu0 }
 0x5f5   : > { %v3561_v26 = vpack.c.bf16 %v3382_v35, %v3381_v50  ;;  %v4801_v48 = vmax.f32 %v4364_v14, 0.0  ;;  %v1563_v39 = vadd.f32 %v7576_v52, %v1562_v11 }
 0x5f7   : > { %v1946_v21 = vmax.f32 %v1563_v39, 0.0  ;;  %6155 = vmatmul.msk.bf16.gmra.mxu2 %vm741_vm0, %v3561_v26  ;;  %v7608_v19 = vpack.c.bf16 %v4801_v48, %v4800_v27 }
 0x5f8   : > { %v2974_v59 = vpop.f32.mrf.mxu1 }
 0x5f9   : > { %8839 = vst [vmem:[#allocation45_spill] sm:$0xff] %v7608_v19  ;;  %v2116_v15 = vpack.c.bf16 %v1946_v21, %v1945_v32  ;;  %v2975_v17 = vadd.f32 %v7370_v34, %v2974_v59 }
 0x5fa   : > { %v4366_v40 = vpop.f32.mrf.mxu2 }
 0x5fb   : > { %6028 = vmatmul.msk.bf16.gmra.mxu1 %vm2195_vm1, %v2116_v15  ;;  %v4367_v56 = vadd.f32 %v7465_v49, %v4366_v40  ;;  %v3383_v11 = vmax.f32 %v2975_v17, 0.0  ;;  %v528_v17 = vld [vmem:[%s6483_s30 + $0x5f8] sm:$0xff] }
 0x5fc   : > { %v1565_v57 = vpop.f32.mrf.mxu0 }
 0x5fd   : > { %v1566_v27 = vadd.f32 %v7576_v52, %v1565_v57  ;;  %v4802_v39 = vmax.f32 %v4367_v56, 0.0 }
 0x5ff   : > { %5893 = vmatmul.msk.bf16.gmra.mxu0 %vm741_vm0, %v687_v0  ;;  %v1947_v42 = vmax.f32 %v1566_v27, 0.0 }
 0x600   : > { %v2976_v50 = vpop.f32.mrf.mxu1 }
 0x601   : > { %v2977_v35 = vadd.f32 %v7370_v34, %v2976_v50  ;;  %v527_v50 = vld [vmem:[%s6483_s30 + $0x5f0] sm:$0xff] }
 0x602   : > { %v4368_v14 = vpop.f32.mrf.mxu2 }
 0x603   : > { %v3384_v26 = vmax.f32 %v2977_v35, 0.0  ;;  %v4369_v15 = vadd.f32 %v7465_v49, %v4368_v14  ;;  %v688_v35 = vpack.c.bf16 %v528_v17, %v527_v50 }
 0x604   : > { %v1567_v48 = vpop.f32.mrf.mxu0 }
 0x605   : > { %v3562_v32 = vpack.c.bf16 %v3384_v26, %v3383_v11  ;;  %v4803_v21 = vmax.f32 %v4369_v15, 0.0  ;;  %v1568_v59 = vadd.f32 %v7576_v52, %v1567_v48  ;;  %v7632_v26 = vld [vmem:[%s8792_s4] ss:$0 sm:$0xff] }
 0x607   : > { %v1948_v47 = vmax.f32 %v1568_v59, 0.0  ;;  %6156 = vmatmul.msk.bf16.gmra.mxu2 %vm741_vm0, %v3562_v32  ;;  %v7621_v40 = vpack.c.bf16 %v4803_v21, %v4802_v39 }
 0x608   : > { %v2979_v0 = vpop.f32.mrf.mxu1 }
 0x609   : > { %8840 = vst [vmem:[#allocation46_spill] sm:$0xff] %v7621_v40  ;;  %v2117_v19 = vpack.c.bf16 %v1948_v47, %v1947_v42  ;;  %v2980_v56 = vadd.f32 %v7370_v34, %v2979_v0 }
 0x60a   : > { %v4371_v57 = vpop.f32.mrf.mxu2 }
 0x60b   : > { %6029 = vmatmul.msk.bf16.gmra.mxu1 %vm2195_vm1, %v2117_v19  ;;  %v4372_v27 = vadd.f32 %v7465_v49, %v4371_v57  ;;  %v3385_v19 = vmax.f32 %v2980_v56, 0.0  ;;  %v530_v56 = vld [vmem:[%s6483_s30 + $0x608] sm:$0xff] }
 0x60c   : > { %v1570_v14 = vpop.f32.mrf.mxu0 }
 0x60d   : > { %v1571_v39 = vadd.f32 %v7576_v52, %v1570_v14  ;;  %v4804_v59 = vmax.f32 %v4372_v27, 0.0 }
 0x60f   : > { %5894 = vmatmul.msk.bf16.gmra.mxu0 %vm741_vm0, %v688_v35  ;;  %v1949_v50 = vmax.f32 %v1571_v39, 0.0 }
 0x610   : > { %v2981_v11 = vpop.f32.mrf.mxu1 }
 0x611   : > { %v2982_v15 = vadd.f32 %v7632_v26, %v2981_v11  ;;  %v529_v11 = vld [vmem:[%s6483_s30 + $0x600] sm:$0xff] }
 0x612   : > { %v4373_v48 = vpop.f32.mrf.mxu2 }
 0x613   : > { %v3386_v32 = vmax.f32 %v2982_v15, 0.0  ;;  %v4374_v34 = vadd.f32 %v7465_v49, %v4373_v48  ;;  %v689_v15 = vpack.c.bf16 %v530_v56, %v529_v11 }
 0x614   : > { %v1572_v21 = vpop.f32.mrf.mxu0 }
 0x615   : > { %v3563_v42 = vpack.c.bf16 %v3386_v32, %v3385_v19  ;;  %v4805_v47 = vmax.f32 %v4374_v34, 0.0  ;;  %v1573_v0 = vadd.f32 %v7576_v52, %v1572_v21 }
 0x617   : > { %v1950_v17 = vmax.f32 %v1573_v0, 0.0  ;;  %6157 = vmatmul.msk.bf16.gmra.mxu2 %vm741_vm0, %v3563_v42  ;;  %v7639_v57 = vpack.c.bf16 %v4805_v47, %v4804_v59 }
 0x618   : > { %v2984_v35 = vpop.f32.mrf.mxu1 }
 0x619   : > { %8841 = vst [vmem:[#allocation47_spill] sm:$0xff] %v7639_v57  ;;  %v2118_v40 = vpack.c.bf16 %v1950_v17, %v1949_v50  ;;  %v2985_v27 = vadd.f32 %v7632_v26, %v2984_v35 }
 0x61a   : > { %v4376_v14 = vpop.f32.mrf.mxu2 }
 0x61b   : > { %6030 = vmatmul.msk.bf16.gmra.mxu1 %vm2195_vm1, %v2118_v40  ;;  %v4377_v39 = vadd.f32 %v7465_v49, %v4376_v14  ;;  %v3387_v21 = vmax.f32 %v2985_v27, 0.0  ;;  %v532_v27 = vld [vmem:[%s6483_s30 + $0x618] sm:$0xff] }
 0x61c   : > { %v1575_v48 = vpop.f32.mrf.mxu0 }
 0x61d   : > { %v1576_v59 = vadd.f32 %v7576_v52, %v1575_v48  ;;  %v4806_v0 = vmax.f32 %v4377_v39, 0.0 }
 0x61f   : > { %5895 = vmatmul.msk.bf16.gmra.mxu0 %vm741_vm0, %v689_v15  ;;  %v1951_v11 = vmax.f32 %v1576_v59, 0.0 }
 0x620   : > { %v2986_v19 = vpop.f32.mrf.mxu1 }
 0x621   : > { %v2987_v32 = vadd.f32 %v7632_v26, %v2986_v19  ;;  %v531_v19 = vld [vmem:[%s6483_s30 + $0x610] sm:$0xff] }
 0x622   : > { %v4378_v34 = vpop.f32.mrf.mxu2 }
 0x623   : > { %v3388_v42 = vmax.f32 %v2987_v32, 0.0  ;;  %v4379_v40 = vadd.f32 %v7465_v49, %v4378_v34  ;;  %v690_v32 = vpack.c.bf16 %v532_v27, %v531_v19 }
 0x624   : > { %v1577_v47 = vpop.f32.mrf.mxu0 }
 0x625   : > { %v3564_v50 = vpack.c.bf16 %v3388_v42, %v3387_v21  ;;  %v4807_v17 = vmax.f32 %v4379_v40, 0.0  ;;  %v1578_v35 = vadd.f32 %v7576_v52, %v1577_v47 }
 0x627   : > { %v1952_v56 = vmax.f32 %v1578_v35, 0.0  ;;  %6158 = vmatmul.msk.bf16.gmra.mxu2 %vm741_vm0, %v3564_v50  ;;  %v7652_v14 = vpack.c.bf16 %v4807_v17, %v4806_v0 }
 0x628   : > { %v2989_v15 = vpop.f32.mrf.mxu1 }
 0x629   : > { %8842 = vst [vmem:[#allocation48_spill] sm:$0xff] %v7652_v14  ;;  %v2119_v57 = vpack.c.bf16 %v1952_v56, %v1951_v11  ;;  %v2990_v39 = vadd.f32 %v7632_v26, %v2989_v15 }
 0x62a   : > { %v4381_v48 = vpop.f32.mrf.mxu2 }
 0x62b   : > { %6031 = vmatmul.msk.bf16.gmra.mxu1 %vm2195_vm1, %v2119_v57  ;;  %v4382_v59 = vadd.f32 %v7465_v49, %v4381_v48  ;;  %v3389_v47 = vmax.f32 %v2990_v39, 0.0  ;;  %v534_v39 = vld [vmem:[%s6483_s30 + $0x628] sm:$0xff] }
 0x62c   : > { %v1580_v34 = vpop.f32.mrf.mxu0 }
 0x62d   : > { %v1581_v0 = vadd.f32 %v7576_v52, %v1580_v34  ;;  %v4808_v35 = vmax.f32 %v4382_v59, 0.0 }
 0x62f   : > { %5896 = vmatmul.msk.bf16.gmra.mxu0 %vm741_vm0, %v690_v32  ;;  %v1953_v19 = vmax.f32 %v1581_v0, 0.0 }
 0x630   : > { %v2991_v21 = vpop.f32.mrf.mxu1 }
 0x631   : > { %v2992_v42 = vadd.f32 %v7632_v26, %v2991_v21  ;;  %v533_v21 = vld [vmem:[%s6483_s30 + $0x620] sm:$0xff] }
 0x632   : > { %v4383_v40 = vpop.f32.mrf.mxu2 }
 0x633   : > { %v3390_v50 = vmax.f32 %v2992_v42, 0.0  ;;  %v4384_v57 = vadd.f32 %v7465_v49, %v4383_v40  ;;  %v691_v42 = vpack.c.bf16 %v534_v39, %v533_v21 }
 0x634   : > { %v1582_v17 = vpop.f32.mrf.mxu0 }
 0x635   : > { %v3565_v11 = vpack.c.bf16 %v3390_v50, %v3389_v47  ;;  %v4809_v56 = vmax.f32 %v4384_v57, 0.0  ;;  %v1583_v15 = vadd.f32 %v7576_v52, %v1582_v17 }
 0x637   : > { %v7664_v27 = vpack.c.bf16 %v4809_v56, %v4808_v35  ;;  %v1954_v48 = vmax.f32 %v1583_v15, 0.0  ;;  %6159 = vmatmul.msk.bf16.gmra.mxu2 %vm741_vm0, %v3565_v11 }
 0x638   : > { %v2994_v32 = vpop.f32.mrf.mxu1 }
 0x639   : > { %8843 = vst [vmem:[#allocation49_spill] sm:$0xff] %v7664_v27  ;;  %v2120_v14 = vpack.c.bf16 %v1954_v48, %v1953_v19  ;;  %v2995_v59 = vadd.f32 %v7632_v26, %v2994_v32 }
 0x63a   : > { %v4386_v34 = vpop.f32.mrf.mxu2 }
 0x63b   : > { %6032 = vmatmul.msk.bf16.gmra.mxu1 %vm2195_vm1, %v2120_v14  ;;  %v4387_v0 = vadd.f32 %v7465_v49, %v4386_v34  ;;  %v3391_v17 = vmax.f32 %v2995_v59, 0.0  ;;  %v536_v59 = vld [vmem:[%s6483_s30 + $0x638] sm:$0xff] }
 0x63c   : > { %v1585_v40 = vpop.f32.mrf.mxu0 }
 0x63d   : > { %v1586_v35 = vadd.f32 %v7576_v52, %v1585_v40  ;;  %v4810_v15 = vmax.f32 %v4387_v0, 0.0 }
 0x63f   : > { %5897 = vmatmul.msk.bf16.gmra.mxu0 %vm741_vm0, %v691_v42  ;;  %v1955_v21 = vmax.f32 %v1586_v35, 0.0 }
 0x640   : > { %v2996_v47 = vpop.f32.mrf.mxu1 }
 0x641   : > { %v2997_v50 = vadd.f32 %v7632_v26, %v2996_v47  ;;  %v535_v47 = vld [vmem:[%s6483_s30 + $0x630] sm:$0xff] }
 0x642   : > { %v4388_v57 = vpop.f32.mrf.mxu2 }
 0x643   : > { %v3392_v11 = vmax.f32 %v2997_v50, 0.0  ;;  %v4389_v14 = vadd.f32 %v7465_v49, %v4388_v57  ;;  %v692_v50 = vpack.c.bf16 %v536_v59, %v535_v47 }
 0x644   : > { %v1587_v56 = vpop.f32.mrf.mxu0 }
 0x645   : > { %v3566_v19 = vpack.c.bf16 %v3392_v11, %v3391_v17  ;;  %v4811_v48 = vmax.f32 %v4389_v14, 0.0  ;;  %v1588_v32 = vadd.f32 %v7576_v52, %v1587_v56 }
 0x647   : > { %v1956_v39 = vmax.f32 %v1588_v32, 0.0  ;;  %6160 = vmatmul.msk.bf16.gmra.mxu2 %vm741_vm0, %v3566_v19  ;;  %v7678_v34 = vpack.c.bf16 %v4811_v48, %v4810_v15 }
 0x648   : > { %v2999_v42 = vpop.f32.mrf.mxu1 }
 0x649   : > { %8844 = vst [vmem:[#allocation50_spill] sm:$0xff] %v7678_v34  ;;  %v2121_v27 = vpack.c.bf16 %v1956_v39, %v1955_v21  ;;  %v3000_v0 = vadd.f32 %v7632_v26, %v2999_v42 }
 0x64a   : > { %v4391_v40 = vpop.f32.mrf.mxu2 }
 0x64b   : > { %6033 = vmatmul.msk.bf16.gmra.mxu1 %vm2195_vm1, %v2121_v27  ;;  %v4392_v35 = vadd.f32 %v7465_v49, %v4391_v40  ;;  %v3393_v56 = vmax.f32 %v3000_v0, 0.0  ;;  %v538_v0 = vld [vmem:[%s6483_s30 + $0x648] sm:$0xff] }
 0x64c   : > { %v1590_v57 = vpop.f32.mrf.mxu0 }
 0x64d   : > { %v1591_v15 = vadd.f32 %v7576_v52, %v1590_v57  ;;  %v4812_v32 = vmax.f32 %v4392_v35, 0.0 }
 0x64f   : > { %5898 = vmatmul.msk.bf16.gmra.mxu0 %vm741_vm0, %v692_v50  ;;  %v1957_v47 = vmax.f32 %v1591_v15, 0.0 }
 0x650   : > { %v3001_v17 = vpop.f32.mrf.mxu1 }
 0x651   : > { %v3002_v11 = vadd.f32 %v7632_v26, %v3001_v17  ;;  %v537_v17 = vld [vmem:[%s6483_s30 + $0x640] sm:$0xff] }
 0x652   : > { %v4393_v14 = vpop.f32.mrf.mxu2 }
 0x653   : > { %v3394_v19 = vmax.f32 %v3002_v11, 0.0  ;;  %v4394_v27 = vadd.f32 %v7465_v49, %v4393_v14  ;;  %v693_v11 = vpack.c.bf16 %v538_v0, %v537_v17 }
 0x654   : > { %v1592_v48 = vpop.f32.mrf.mxu0 }
 0x655   : > { %v3567_v21 = vpack.c.bf16 %v3394_v19, %v3393_v56  ;;  %v4813_v39 = vmax.f32 %v4394_v27, 0.0  ;;  %v1593_v42 = vadd.f32 %v7576_v52, %v1592_v48 }
 0x657   : > { %v1958_v59 = vmax.f32 %v1593_v42, 0.0  ;;  %6161 = vmatmul.msk.bf16.gmra.mxu2 %vm741_vm0, %v3567_v21  ;;  %v7691_v40 = vpack.c.bf16 %v4813_v39, %v4812_v32 }
 0x658   : > { %v3004_v50 = vpop.f32.mrf.mxu1 }
 0x659   : > { %8845 = vst [vmem:[#allocation51_spill] sm:$0xff] %v7691_v40  ;;  %v2122_v34 = vpack.c.bf16 %v1958_v59, %v1957_v47  ;;  %v3005_v35 = vadd.f32 %v7632_v26, %v3004_v50 }
 0x65a   : > { %v4396_v57 = vpop.f32.mrf.mxu2 }
 0x65b   : > { %6034 = vmatmul.msk.bf16.gmra.mxu1 %vm2195_vm1, %v2122_v34  ;;  %v4397_v15 = vadd.f32 %v7465_v49, %v4396_v57  ;;  %v3395_v48 = vmax.f32 %v3005_v35, 0.0  ;;  %v539_v35 = vld [vmem:[%s6483_s30 + $0x650] sm:$0xff] }
 0x65c   : > { %v1595_v14 = vpop.f32.mrf.mxu0 }
 0x65d   : > { %v1596_v32 = vadd.f32 %v7576_v52, %v1595_v14  ;;  %v4814_v42 = vmax.f32 %v4397_v15, 0.0  ;;  %v540_v14 = vld [vmem:[%s6483_s30 + $0x658] sm:$0xff] }
 0x65e   : > { %v694_v15 = vpack.c.bf16 %v540_v14, %v539_v35  ;;  %v6298_v14 = vld [vmem:[%s8793_s5 + $0x8] sm:$0xff] }
 0x65f   : > { %5899 = vmatmul.msk.bf16.gmra.mxu0 %vm741_vm0, %v693_v11  ;;  %v1959_v17 = vmax.f32 %v1596_v32, 0.0 }
 0x660   : > { %v3006_v56 = vpop.f32.mrf.mxu1 }
 0x661   : > { %v3007_v19 = vadd.f32 %v7632_v26, %v3006_v56 }
 0x662   : > { %v4398_v27 = vpop.f32.mrf.mxu2 }
 0x663   : > { %v3396_v21 = vmax.f32 %v3007_v19, 0.0  ;;  %v4399_v34 = vadd.f32 %v7465_v49, %v4398_v27 }
 0x664   : > { %v1597_v39 = vpop.f32.mrf.mxu0 }
 0x665   : > { %v3568_v47 = vpack.c.bf16 %v3396_v21, %v3395_v48  ;;  %v4815_v59 = vmax.f32 %v4399_v34, 0.0  ;;  %v1598_v50 = vadd.f32 %v7576_v52, %v1597_v39  ;;  %v561_v21 = vld [vmem:[%s6483_s30 + $0x700] sm:$0xff]  ;;  %v562_v34 = vld [vmem:[%s6483_s30 + $0x708] sm:$0xff] }
 0x667   : > { %v1960_v0 = vmax.f32 %v1598_v50, 0.0  ;;  %6162 = vmatmul.msk.bf16.gmra.mxu2 %vm741_vm0, %v3568_v47  ;;  %v7704_v57 = vpack.c.bf16 %v4815_v59, %v4814_v42  ;;  %v705_v47 = vpack.c.bf16 %v562_v34, %v561_v21  ;;  %v541_v34 = vld [vmem:[%s6483_s30 + $0x660] sm:$0xff] }
 0x668   : > { %v3009_v11 = vpop.f32.mrf.mxu1 }
 0x669   : > { %8846 = vst [vmem:[#allocation52_spill] sm:$0xff] %v7704_v57  ;;  %v2123_v56 = vpack.c.bf16 %v1960_v0, %v1959_v17  ;;  %v3010_v48 = vadd.f32 %v7632_v26, %v3009_v11  ;;  %5911 = vmatmul.msk.bf16.vlgmr.msra.gmra.mxu3 %vm741_vm0, %v705_v47  ;;  %v6299_v47 = vld [vmem:[%s8793_s5] sm:$0xff] }
 0x66a   : > { %v4401_v19 = vpop.f32.mrf.mxu2  ;;  %6241 = vmatpush.bf16.msra.mxu3 %v6298_v14  ;;  %v564_v14 = vld [vmem:[%s6483_s30 + $0x718] sm:$0xff] }
 0x66b   : > { %6035 = vmatmul.msk.bf16.gmra.mxu1 %vm2195_vm1, %v2123_v56  ;;  %v4402_v39 = vadd.f32 %v7465_v49, %v4401_v19  ;;  %v3397_v50 = vmax.f32 %v3010_v48, 0.0 }
 0x66c   : > { %v1600_v27 = vpop.f32.mrf.mxu0 }
 0x66d   : > { %v1601_v17 = vadd.f32 %v7576_v52, %v1600_v27  ;;  %v4816_v56 = vmax.f32 %v4402_v39, 0.0 }
 0x66e   : > { %6242 = vmatpush.bf16.msra.mxu3 %v6299_v47 }
 0x66f   : > { %5900 = vmatmul.msk.bf16.gmra.mxu0 %vm741_vm0, %v694_v15 }
 0x670   : > { %v3011_v32 = vpop.f32.mrf.mxu1 }
 0x671   : > { %v3012_v42 = vadd.f32 %v7632_v26, %v3011_v32  ;;  %v1961_v32 = vmax.f32 %v1601_v17, 0.0 }
 0x672   : > { %v4403_v59 = vpop.f32.mrf.mxu2 }
 0x673   : > { %v3398_v0 = vmax.f32 %v3012_v42, 0.0  ;;  %v4404_v35 = vadd.f32 %v7465_v49, %v4403_v59  ;;  %v542_v42 = vld [vmem:[%s6483_s30 + $0x668] sm:$0xff] }
 0x674   : > { %v1602_v11 = vpop.f32.mrf.mxu0 }
 0x675   : > { %v3569_v19 = vpack.c.bf16 %v3398_v0, %v3397_v50  ;;  %v4817_v15 = vmax.f32 %v4404_v35, 0.0  ;;  %v1603_v48 = vadd.f32 %v7576_v52, %v1602_v11  ;;  %v695_v50 = vpack.c.bf16 %v542_v42, %v541_v34  ;;  %v563_v11 = vld [vmem:[%s6483_s30 + $0x710] sm:$0xff] }
 0x677   : > { %v1962_v27 = vmax.f32 %v1603_v48, 0.0  ;;  %6163 = vmatmul.msk.bf16.gmra.mxu2 %vm741_vm0, %v3569_v19  ;;  %v7723_v49 = vpack.c.bf16 %v4817_v15, %v4816_v56  ;;  %v7738_v56 = vld [vmem:[%s8794_s6] ss:$0 sm:$0xff]  ;;  %v706_v48 = vpack.c.bf16 %v564_v14, %v563_v11  ;;  %v543_v14 = vld [vmem:[%s6483_s30 + $0x670] sm:$0xff] }
 0x678   : > { %v3014_v21 = vpop.f32.mrf.mxu1 }
 0x679   : > { %8847 = vst [vmem:[#allocation53_spill] sm:$0xff] %v7723_v49  ;;  %v2124_v39 = vpack.c.bf16 %v1962_v27, %v1961_v32  ;;  %v3015_v0 = vadd.f32 %v7632_v26, %v3014_v21  ;;  %5912 = vmatmul.msk.bf16.gmra.mxu3 %vm741_vm0, %v706_v48 }
 0x67a   : > { %v4406_v59 = vpop.f32.mrf.mxu2 }
 0x67b   : > { %6036 = vmatmul.msk.bf16.gmra.mxu1 %vm2195_vm1, %v2124_v39  ;;  %v4407_v19 = vadd.f32 %v7738_v56, %v4406_v59  ;;  %v3399_v27 = vmax.f32 %v3015_v0, 0.0 }
 0x67c   : > { %v1605_v17 = vpop.f32.mrf.mxu0 }
 0x67d   : > { %v1606_v21 = vadd.f32 %v7576_v52, %v1605_v17  ;;  %v4818_v39 = vmax.f32 %v4407_v19, 0.0 }
 0x67f   : > { %5901 = vmatmul.msk.bf16.gmra.mxu0 %vm741_vm0, %v695_v50 }
 0x680   : > { %v3016_v35 = vpop.f32.mrf.mxu1 }
 0x681   : > { %v3017_v15 = vadd.f32 %v7632_v26, %v3016_v35  ;;  %v1963_v35 = vmax.f32 %v1606_v21, 0.0 }
 0x682   : > { %v4408_v32 = vpop.f32.mrf.mxu2 }
 0x683   : > { %v3400_v34 = vmax.f32 %v3017_v15, 0.0  ;;  %v4409_v42 = vadd.f32 %v7738_v56, %v4408_v32  ;;  %v544_v15 = vld [vmem:[%s6483_s30 + $0x678] sm:$0xff] }
 0x684   : > { %v1607_v47 = vpop.f32.mrf.mxu0  ;;  %v696_v19 = vpack.c.bf16 %v544_v15, %v543_v14 }
 0x685   : > { %v3570_v50 = vpack.c.bf16 %v3400_v34, %v3399_v27  ;;  %v4819_v40 = vmax.f32 %v4409_v42, 0.0  ;;  %v1608_v59 = vadd.f32 %v7576_v52, %v1607_v47  ;;  %v565_v34 = vld [vmem:[%s6483_s30 + $0x720] sm:$0xff]  ;;  %v566_v42 = vld [vmem:[%s6483_s30 + $0x728] sm:$0xff] }
 0x687   : > { %v1964_v11 = vmax.f32 %v1608_v59, 0.0  ;;  %6164 = vmatmul.msk.bf16.gmra.mxu2 %vm741_vm0, %v3570_v50  ;;  %v7747_v0 = vpack.c.bf16 %v4819_v40, %v4818_v39  ;;  %v707_v39 = vpack.c.bf16 %v566_v42, %v565_v34  ;;  %v545_v42 = vld [vmem:[%s6483_s30 + $0x680] sm:$0xff] }
 0x688   : > { %v3019_v17 = vpop.f32.mrf.mxu1 }
 0x689   : > { %8848 = vst [vmem:[#allocation54_spill] sm:$0xff] %v7747_v0  ;;  %v2125_v32 = vpack.c.bf16 %v1964_v11, %v1963_v35  ;;  %v3020_v27 = vadd.f32 %v7632_v26, %v3019_v17  ;;  %5913 = vmatmul.msk.bf16.gmra.mxu3 %vm741_vm0, %v707_v39 }
 0x68a   : > { %v4411_v57 = vpop.f32.mrf.mxu2 }
 0x68b   : > { %6037 = vmatmul.msk.bf16.gmra.mxu1 %vm2195_vm1, %v2125_v32  ;;  %v4412_v47 = vadd.f32 %v7738_v56, %v4411_v57  ;;  %v3401_v59 = vmax.f32 %v3020_v27, 0.0 }
 0x68c   : > { %v1610_v48 = vpop.f32.mrf.mxu0 }
 0x68d   : > { %v1611_v35 = vadd.f32 %v7576_v52, %v1610_v48  ;;  %v4820_v15 = vmax.f32 %v4412_v47, 0.0 }
 0x68f   : > { %5902 = vmatmul.msk.bf16.gmra.mxu0 %vm741_vm0, %v696_v19 }
 0x690   : > { %v3021_v21 = vpop.f32.mrf.mxu1 }
 0x691   : > { %v3022_v40 = vadd.f32 %v7632_v26, %v3021_v21  ;;  %v1965_v21 = vmax.f32 %v1611_v35, 0.0 }
 0x692   : > { %v4413_v50 = vpop.f32.mrf.mxu2 }
 0x693   : > { %v3402_v11 = vmax.f32 %v3022_v40, 0.0  ;;  %v4414_v14 = vadd.f32 %v7738_v56, %v4413_v50  ;;  %v546_v40 = vld [vmem:[%s6483_s30 + $0x688] sm:$0xff] }
 0x694   : > { %v1612_v17 = vpop.f32.mrf.mxu0  ;;  %v697_v47 = vpack.c.bf16 %v546_v40, %v545_v42 }
 0x695   : > { %v3571_v32 = vpack.c.bf16 %v3402_v11, %v3401_v59  ;;  %v4821_v19 = vmax.f32 %v4414_v14, 0.0  ;;  %v1613_v57 = vadd.f32 %v7576_v52, %v1612_v17  ;;  %v567_v11 = vld [vmem:[%s6483_s30 + $0x730] sm:$0xff]  ;;  %v568_v14 = vld [vmem:[%s6483_s30 + $0x738] sm:$0xff] }
 0x697   : > { %v1966_v34 = vmax.f32 %v1613_v57, 0.0  ;;  %6165 = vmatmul.msk.bf16.gmra.mxu2 %vm741_vm0, %v3571_v32  ;;  %v7763_v27 = vpack.c.bf16 %v4821_v19, %v4820_v15  ;;  %v708_v32 = vpack.c.bf16 %v568_v14, %v567_v11  ;;  %v547_v14 = vld [vmem:[%s6483_s30 + $0x690] sm:$0xff] }
 0x698   : > { %v3024_v48 = vpop.f32.mrf.mxu1 }
 0x699   : > { %8849 = vst [vmem:[#allocation55_spill] sm:$0xff] %v7763_v27  ;;  %v2126_v50 = vpack.c.bf16 %v1966_v34, %v1965_v21  ;;  %v3025_v59 = vadd.f32 %v7632_v26, %v3024_v48  ;;  %5914 = vmatmul.msk.bf16.gmra.mxu3 %vm741_vm0, %v708_v32 }
 0x69a   : > { %v4416_v49 = vpop.f32.mrf.mxu2 }
 0x69b   : > { %6038 = vmatmul.msk.bf16.gmra.mxu1 %vm2195_vm1, %v2126_v50  ;;  %v4417_v17 = vadd.f32 %v7738_v56, %v4416_v49  ;;  %v3403_v57 = vmax.f32 %v3025_v59, 0.0 }
 0x69c   : > { %v1615_v39 = vpop.f32.mrf.mxu0 }
 0x69d   : > { %v1616_v21 = vadd.f32 %v7576_v52, %v1615_v39  ;;  %v4822_v40 = vmax.f32 %v4417_v17, 0.0 }
 0x69f   : > { %5903 = vmatmul.msk.bf16.gmra.mxu0 %vm741_vm0, %v697_v47 }
 0x6a0   : > { %v3026_v35 = vpop.f32.mrf.mxu1 }
 0x6a1   : > { %v3027_v15 = vadd.f32 %v7632_v26, %v3026_v35  ;;  %v1967_v35 = vmax.f32 %v1616_v21, 0.0 }
 0x6a2   : > { %v4418_v19 = vpop.f32.mrf.mxu2 }
 0x6a3   : > { %v3404_v34 = vmax.f32 %v3027_v15, 0.0  ;;  %v4419_v42 = vadd.f32 %v7738_v56, %v4418_v19  ;;  %v548_v15 = vld [vmem:[%s6483_s30 + $0x698] sm:$0xff] }
 0x6a4   : > { %v1617_v48 = vpop.f32.mrf.mxu0  ;;  %v698_v17 = vpack.c.bf16 %v548_v15, %v547_v14 }
 0x6a5   : > { %v3572_v50 = vpack.c.bf16 %v3404_v34, %v3403_v57  ;;  %v4823_v47 = vmax.f32 %v4419_v42, 0.0  ;;  %v1618_v49 = vadd.f32 %v7576_v52, %v1617_v48  ;;  %v569_v34 = vld [vmem:[%s6483_s30 + $0x740] sm:$0xff]  ;;  %v570_v42 = vld [vmem:[%s6483_s30 + $0x748] sm:$0xff] }
 0x6a7   : > { %v1968_v11 = vmax.f32 %v1618_v49, 0.0  ;;  %6166 = vmatmul.msk.bf16.gmra.mxu2 %vm741_vm0, %v3572_v50  ;;  %v7779_v59 = vpack.c.bf16 %v4823_v47, %v4822_v40  ;;  %v709_v50 = vpack.c.bf16 %v570_v42, %v569_v34  ;;  %v549_v42 = vld [vmem:[%s6483_s30 + $0x6a0] sm:$0xff] }
 0x6a8   : > { %v3029_v39 = vpop.f32.mrf.mxu1 }
 0x6a9   : > { %8850 = vst [vmem:[#allocation56_spill] sm:$0xff] %v7779_v59  ;;  %v2127_v19 = vpack.c.bf16 %v1968_v11, %v1967_v35  ;;  %v3030_v57 = vadd.f32 %v7632_v26, %v3029_v39  ;;  %5915 = vmatmul.msk.bf16.gmra.mxu3 %vm741_vm0, %v709_v50 }
 0x6aa   : > { %v4421_v0 = vpop.f32.mrf.mxu2 }
 0x6ab   : > { %6039 = vmatmul.msk.bf16.gmra.mxu1 %vm2195_vm1, %v2127_v19  ;;  %v4422_v48 = vadd.f32 %v7738_v56, %v4421_v0  ;;  %v3405_v49 = vmax.f32 %v3030_v57, 0.0 }
 0x6ac   : > { %v1620_v32 = vpop.f32.mrf.mxu0 }
 0x6ad   : > { %v1621_v35 = vadd.f32 %v7576_v52, %v1620_v32  ;;  %v4824_v15 = vmax.f32 %v4422_v48, 0.0 }
 0x6af   : > { %5904 = vmatmul.msk.bf16.gmra.mxu0 %vm741_vm0, %v698_v17 }
 0x6b0   : > { %v3031_v21 = vpop.f32.mrf.mxu1 }
 0x6b1   : > { %v3032_v40 = vadd.f32 %v7632_v26, %v3031_v21  ;;  %v1969_v21 = vmax.f32 %v1621_v35, 0.0 }
 0x6b2   : > { %v4423_v47 = vpop.f32.mrf.mxu2 }
 0x6b3   : > { %v3406_v11 = vmax.f32 %v3032_v40, 0.0  ;;  %v4424_v14 = vadd.f32 %v7738_v56, %v4423_v47  ;;  %v550_v40 = vld [vmem:[%s6483_s30 + $0x6a8] sm:$0xff] }
 0x6b4   : > { %v1622_v39 = vpop.f32.mrf.mxu0  ;;  %v699_v48 = vpack.c.bf16 %v550_v40, %v549_v42 }
 0x6b5   : > { %v3573_v19 = vpack.c.bf16 %v3406_v11, %v3405_v49  ;;  %v4825_v17 = vmax.f32 %v4424_v14, 0.0  ;;  %v1623_v0 = vadd.f32 %v7576_v52, %v1622_v39  ;;  %v571_v11 = vld [vmem:[%s6483_s30 + $0x750] sm:$0xff]  ;;  %v572_v14 = vld [vmem:[%s6483_s30 + $0x758] sm:$0xff] }
 0x6b7   : > { %v7794_v34 = vpack.c.bf16 %v4825_v17, %v4824_v15  ;;  %v1970_v57 = vmax.f32 %v1623_v0, 0.0  ;;  %6167 = vmatmul.msk.bf16.gmra.mxu2 %vm741_vm0, %v3573_v19  ;;  %v710_v19 = vpack.c.bf16 %v572_v14, %v571_v11  ;;  %v551_v14 = vld [vmem:[%s6483_s30 + $0x6b0] sm:$0xff] }
 0x6b8   : > { %v3034_v32 = vpop.f32.mrf.mxu1 }
 0x6b9   : > { %8851 = vst [vmem:[#allocation57_spill] sm:$0xff] %v7794_v34  ;;  %v2128_v47 = vpack.c.bf16 %v1970_v57, %v1969_v21  ;;  %v3035_v49 = vadd.f32 %v7632_v26, %v3034_v32  ;;  %5916 = vmatmul.msk.bf16.gmra.mxu3 %vm741_vm0, %v710_v19 }
 0x6ba   : > { %v4426_v27 = vpop.f32.mrf.mxu2 }
 0x6bb   : > { %6040 = vmatmul.msk.bf16.gmra.mxu1 %vm2195_vm1, %v2128_v47  ;;  %v4427_v39 = vadd.f32 %v7738_v56, %v4426_v27  ;;  %v3407_v0 = vmax.f32 %v3035_v49, 0.0 }
 0x6bc   : > { %v1625_v50 = vpop.f32.mrf.mxu0 }
 0x6bd   : > { %v1626_v21 = vadd.f32 %v7576_v52, %v1625_v50  ;;  %v4826_v40 = vmax.f32 %v4427_v39, 0.0 }
 0x6bf   : > { %5905 = vmatmul.msk.bf16.gmra.mxu0 %vm741_vm0, %v699_v48 }
 0x6c0   : > { %v3036_v35 = vpop.f32.mrf.mxu1 }
 0x6c1   : > { %v3037_v15 = vadd.f32 %v7632_v26, %v3036_v35  ;;  %v1971_v35 = vmax.f32 %v1626_v21, 0.0 }
 0x6c2   : > { %v4428_v17 = vpop.f32.mrf.mxu2 }
 0x6c3   : > { %v3408_v57 = vmax.f32 %v3037_v15, 0.0  ;;  %v4429_v42 = vadd.f32 %v7738_v56, %v4428_v17  ;;  %v552_v15 = vld [vmem:[%s6483_s30 + $0x6b8] sm:$0xff] }
 0x6c4   : > { %v1627_v32 = vpop.f32.mrf.mxu0  ;;  %v700_v39 = vpack.c.bf16 %v552_v15, %v551_v14 }
 0x6c5   : > { %v3574_v47 = vpack.c.bf16 %v3408_v57, %v3407_v0  ;;  %v4827_v48 = vmax.f32 %v4429_v42, 0.0  ;;  %v1628_v27 = vadd.f32 %v7576_v52, %v1627_v32  ;;  %v573_v57 = vld [vmem:[%s6483_s30 + $0x760] sm:$0xff]  ;;  %v574_v42 = vld [vmem:[%s6483_s30 + $0x768] sm:$0xff] }
 0x6c7   : > { %v1972_v11 = vmax.f32 %v1628_v27, 0.0  ;;  %6168 = vmatmul.msk.bf16.gmra.mxu2 %vm741_vm0, %v3574_v47  ;;  %v7811_v49 = vpack.c.bf16 %v4827_v48, %v4826_v40  ;;  %v711_v47 = vpack.c.bf16 %v574_v42, %v573_v57  ;;  %v553_v42 = vld [vmem:[%s6483_s30 + $0x6c0] sm:$0xff] }
 0x6c8   : > { %v3039_v50 = vpop.f32.mrf.mxu1 }
 0x6c9   : > { %8852 = vst [vmem:[#allocation58_spill] sm:$0xff] %v7811_v49  ;;  %v2129_v17 = vpack.c.bf16 %v1972_v11, %v1971_v35  ;;  %v3040_v0 = vadd.f32 %v7632_v26, %v3039_v50  ;;  %5917 = vmatmul.msk.bf16.gmra.mxu3 %vm741_vm0, %v711_v47 }
 0x6ca   : > { %v4431_v59 = vpop.f32.mrf.mxu2 }
 0x6cb   : > { %6041 = vmatmul.msk.bf16.gmra.mxu1 %vm2195_vm1, %v2129_v17  ;;  %v4432_v32 = vadd.f32 %v7738_v56, %v4431_v59  ;;  %v3409_v27 = vmax.f32 %v3040_v0, 0.0 }
 0x6cc   : > { %v1630_v19 = vpop.f32.mrf.mxu0 }
 0x6cd   : > { %v1631_v35 = vadd.f32 %v7576_v52, %v1630_v19  ;;  %v4828_v15 = vmax.f32 %v4432_v32, 0.0 }
 0x6cf   : > { %5906 = vmatmul.msk.bf16.gmra.mxu0 %vm741_vm0, %v700_v39 }
 0x6d0   : > { %v3041_v21 = vpop.f32.mrf.mxu1 }
 0x6d1   : > { %v3042_v40 = vadd.f32 %v7632_v26, %v3041_v21  ;;  %v1973_v21 = vmax.f32 %v1631_v35, 0.0 }
 0x6d2   : > { %v4433_v48 = vpop.f32.mrf.mxu2 }
 0x6d3   : > { %v3410_v11 = vmax.f32 %v3042_v40, 0.0  ;;  %v4434_v14 = vadd.f32 %v7738_v56, %v4433_v48  ;;  %v554_v40 = vld [vmem:[%s6483_s30 + $0x6c8] sm:$0xff] }
 0x6d4   : > { %v1632_v50 = vpop.f32.mrf.mxu0  ;;  %v701_v32 = vpack.c.bf16 %v554_v40, %v553_v42 }
 0x6d5   : > { %v3575_v17 = vpack.c.bf16 %v3410_v11, %v3409_v27  ;;  %v4829_v39 = vmax.f32 %v4434_v14, 0.0  ;;  %v1633_v59 = vadd.f32 %v7576_v52, %v1632_v50  ;;  %v575_v11 = vld [vmem:[%s6483_s30 + $0x770] sm:$0xff]  ;;  %v576_v14 = vld [vmem:[%s6483_s30 + $0x778] sm:$0xff] }
 0x6d7   : > { %v1974_v57 = vmax.f32 %v1633_v59, 0.0  ;;  %6169 = vmatmul.msk.bf16.gmra.mxu2 %vm741_vm0, %v3575_v17  ;;  %v7827_v0 = vpack.c.bf16 %v4829_v39, %v4828_v15  ;;  %v712_v17 = vpack.c.bf16 %v576_v14, %v575_v11  ;;  %v555_v14 = vld [vmem:[%s6483_s30 + $0x6d0] sm:$0xff] }
 0x6d8   : > { %v3044_v19 = vpop.f32.mrf.mxu1 }
 0x6d9   : > { %8853 = vst [vmem:[#allocation59_spill] sm:$0xff] %v7827_v0  ;;  %v2130_v48 = vpack.c.bf16 %v1974_v57, %v1973_v21  ;;  %v3045_v27 = vadd.f32 %v7632_v26, %v3044_v19  ;;  %5918 = vmatmul.msk.bf16.gmra.mxu3 %vm741_vm0, %v712_v17 }
 0x6da   : > { %v4436_v49 = vpop.f32.mrf.mxu2 }
 0x6db   : > { %6042 = vmatmul.msk.bf16.gmra.mxu1 %vm2195_vm1, %v2130_v48  ;;  %v4437_v50 = vadd.f32 %v7738_v56, %v4436_v49  ;;  %v3411_v59 = vmax.f32 %v3045_v27, 0.0 }
 0x6dc   : > { %v1635_v47 = vpop.f32.mrf.mxu0 }
 0x6dd   : > { %v1636_v21 = vadd.f32 %v7576_v52, %v1635_v47  ;;  %v4830_v40 = vmax.f32 %v4437_v50, 0.0 }
 0x6df   : > { %5907 = vmatmul.msk.bf16.gmra.mxu0 %vm741_vm0, %v701_v32 }
 0x6e0   : > { %v3046_v35 = vpop.f32.mrf.mxu1 }
 0x6e1   : > { %v3047_v15 = vadd.f32 %v7632_v26, %v3046_v35  ;;  %v1975_v35 = vmax.f32 %v1636_v21, 0.0  ;;  %v577_v21 = vld [vmem:[%s6483_s30 + $0x780] sm:$0xff] }
 0x6e2   : > { %v4438_v39 = vpop.f32.mrf.mxu2 }
 0x6e3   : > { %v3412_v57 = vmax.f32 %v3047_v15, 0.0  ;;  %v4439_v42 = vadd.f32 %v7738_v56, %v4438_v39  ;;  %v556_v15 = vld [vmem:[%s6483_s30 + $0x6d8] sm:$0xff] }
 0x6e4   : > { %v1637_v19 = vpop.f32.mrf.mxu0  ;;  %v702_v50 = vpack.c.bf16 %v556_v15, %v555_v14 }
 0x6e5   : > { %v3576_v48 = vpack.c.bf16 %v3412_v57, %v3411_v59  ;;  %v4831_v32 = vmax.f32 %v4439_v42, 0.0  ;;  %v1638_v49 = vadd.f32 %v7576_v52, %v1637_v19  ;;  %v578_v57 = vld [vmem:[%s6483_s30 + $0x788] sm:$0xff] }
 0x6e7   : > { %v1976_v11 = vmax.f32 %v1638_v49, 0.0  ;;  %6170 = vmatmul.msk.bf16.gmra.mxu2 %vm741_vm0, %v3576_v48  ;;  %v7843_v27 = vpack.c.bf16 %v4831_v32, %v4830_v40  ;;  %v713_v40 = vpack.c.bf16 %v578_v57, %v577_v21  ;;  %v7857_v49 = vld [vmem:[%s8790_s2] ss:$0 sm:$0xff] }
 0x6e8   : > { %v3049_v47 = vpop.f32.mrf.mxu1 }
 0x6e9   : > { %8854 = vst [vmem:[#allocation60_spill] sm:$0xff] %v7843_v27  ;;  %v2131_v39 = vpack.c.bf16 %v1976_v11, %v1975_v35  ;;  %v3050_v59 = vadd.f32 %v7632_v26, %v3049_v47  ;;  %5919 = vmatmul.msk.bf16.gmra.mxu3 %vm741_vm0, %v713_v40 }
 0x6ea   : > { %v4441_v0 = vpop.f32.mrf.mxu2 }
 0x6eb   : > { %6043 = vmatmul.msk.bf16.gmra.mxu1 %vm2195_vm1, %v2131_v39  ;;  %v4442_v42 = vadd.f32 %v7738_v56, %v4441_v0  ;;  %v3413_v32 = vmax.f32 %v3050_v59, 0.0 }
 0x6ec   : > { %v1640_v17 = vpop.f32.mrf.mxu0  ;;  %v1695_v59 = vpop.f32.mrf.mxu3 }
 0x6ed   : > { %v1641_v35 = vadd.f32 %v7857_v49, %v1640_v17  ;;  %v4832_v14 = vmax.f32 %v4442_v42, 0.0 }
 0x6ef   : > { %5908 = vmatmul.msk.bf16.gmra.mxu0 %vm741_vm0, %v702_v50 }
 0x6f0   : > { %v3051_v52 = vpop.f32.mrf.mxu1 }
 0x6f1   : > { %v3052_v19 = vadd.f32 %v7632_v26, %v3051_v52  ;;  %v1977_v52 = vmax.f32 %v1641_v35, 0.0 }
 0x6f2   : > { %v4443_v48 = vpop.f32.mrf.mxu2 }
 0x6f3   : > { %v3414_v11 = vmax.f32 %v3052_v19, 0.0  ;;  %v4444_v47 = vadd.f32 %v7738_v56, %v4443_v48  ;;  %v557_v19 = vld [vmem:[%s6483_s30 + $0x6e0] sm:$0xff]  ;;  %v558_v48 = vld [vmem:[%s6483_s30 + $0x6e8] sm:$0xff] }
 0x6f4   : > { %v1642_v0 = vpop.f32.mrf.mxu0  ;;  %v703_v42 = vpack.c.bf16 %v558_v48, %v557_v19 }
 0x6f5   : > { %v3577_v15 = vpack.c.bf16 %v3414_v11, %v3413_v32  ;;  %v4833_v39 = vmax.f32 %v4444_v47, 0.0  ;;  %v1643_v50 = vadd.f32 %v7857_v49, %v1642_v0  ;;  %v1696_v32 = vadd.f32 %v7857_v49, %v1695_v59  ;;  %v1697_v47 = vpop.f32.mrf.mxu3 }
 0x6f7   : > { %v1978_v21 = vmax.f32 %v1643_v50, 0.0  ;;  %6171 = vmatmul.msk.bf16.gmra.mxu2 %vm741_vm0, %v3577_v15  ;;  %v7864_v57 = vpack.c.bf16 %v4833_v39, %v4832_v14  ;;  %v1999_v0 = vmax.f32 %v1696_v32, 0.0  ;;  %v1698_v14 = vadd.f32 %v7857_v49, %v1697_v47  ;;  %v579_v39 = vld [vmem:[%s6483_s30 + $0x790] sm:$0xff]  ;;  %v580_v50 = vld [vmem:[%s6483_s30 + $0x798] sm:$0xff] }
 0x6f8   : > { %v3054_v17 = vpop.f32.mrf.mxu1  ;;  %v714_v19 = vpack.c.bf16 %v580_v50, %v579_v39 }
 0x6f9   : > { %8855 = vst [vmem:[#allocation61_spill] sm:$0xff] %v7864_v57  ;;  %v2132_v27 = vpack.c.bf16 %v1978_v21, %v1977_v52  ;;  %v3055_v35 = vadd.f32 %v7632_v26, %v3054_v17 }
 0x6fa   : > { %v4446_v40 = vpop.f32.mrf.mxu2  ;;  %5920 = vmatmul.msk.bf16.gmra.mxu3 %vm741_vm0, %v714_v19 }
 0x6fb   : > { %6044 = vmatmul.msk.bf16.gmra.mxu1 %vm2195_vm1, %v2132_v27  ;;  %v4447_v52 = vadd.f32 %v7738_v56, %v4446_v40  ;;  %v2000_v27 = vmax.f32 %v1698_v14, 0.0  ;;  %v3415_v48 = vmax.f32 %v3055_v35, 0.0 }
 0x6fc   : > { %v1645_v11 = vpop.f32.mrf.mxu0 }
 0x6fd   : > { %v1646_v57 = vadd.f32 %v7857_v49, %v1645_v11  ;;  %v7879_v32 = vpack.c.bf16 %v2000_v27, %v1999_v0  ;;  %v4834_v34 = vmax.f32 %v4447_v52, 0.0  ;;  %v559_v0 = vld [vmem:[%s6483_s30 + $0x6f0] sm:$0xff] }
 0x6ff   : > { %5909 = vmatmul.msk.bf16.gmra.mxu0 %vm741_vm0, %v703_v42  ;;  %v1979_v35 = vmax.f32 %v1646_v57, 0.0 }
 0x700   : > { %v3056_v15 = vpop.f32.mrf.mxu1 }
 0x701   : > { %v3057_v21 = vadd.f32 %v7632_v26, %v3056_v15  ;;  %v1700_v15 = vpop.f32.mrf.mxu3 }
 0x702   : > { %v4448_v59 = vpop.f32.mrf.mxu2 }
 0x703   : > { %v3416_v17 = vmax.f32 %v3057_v21, 0.0  ;;  %v4449_v42 = vadd.f32 %v7738_v56, %v4448_v59  ;;  %v560_v21 = vld [vmem:[%s6483_s30 + $0x6f8] sm:$0xff] }
 0x704   : > { %v1647_v47 = vpop.f32.mrf.mxu0  ;;  %v704_v52 = vpack.c.bf16 %v560_v21, %v559_v0 }
 0x705   : > { %v3578_v40 = vpack.c.bf16 %v3416_v17, %v3415_v48  ;;  %v4835_v22 = vmax.f32 %v4449_v42, 0.0  ;;  %v1648_v14 = vadd.f32 %v7857_v49, %v1647_v47  ;;  %v1701_v48 = vadd.f32 %v7857_v49, %v1700_v15  ;;  %v581_v47 = vld [vmem:[%s6483_s30 + $0x7a0] sm:$0xff] }
 0x707   : > { %v1980_v39 = vmax.f32 %v1648_v14, 0.0  ;;  %6172 = vmatmul.msk.bf16.gmra.mxu2 %vm741_vm0, %v3578_v40  ;;  %v7884_v11 = vpack.c.bf16 %v4835_v22, %v4834_v34  ;;  %v2001_v22 = vmax.f32 %v1701_v48, 0.0  ;;  %v582_v40 = vld [vmem:[%s6483_s30 + $0x7a8] sm:$0xff] }
 0x708   : > { %v3059_v50 = vpop.f32.mrf.mxu1  ;;  %v715_v0 = vpack.c.bf16 %v582_v40, %v581_v47 }
 0x709   : > { %8856 = vst [vmem:[#allocation62_spill] sm:$0xff] %v7884_v11  ;;  %v2133_v27 = vpack.c.bf16 %v1980_v39, %v1979_v35  ;;  %v3060_v57 = vadd.f32 %v7632_v26, %v3059_v50  ;;  %v1702_v17 = vpop.f32.mrf.mxu3 }
 0x70a   : > { %v4451_v19 = vpop.f32.mrf.mxu2  ;;  %v1703_v34 = vadd.f32 %v7857_v49, %v1702_v17  ;;  %5921 = vmatmul.msk.bf16.gmra.mxu3 %vm741_vm0, %v715_v0 }
 0x70b   : > { %6045 = vmatmul.msk.bf16.gmra.mxu1 %vm2195_vm1, %v2133_v27  ;;  %v4452_v14 = vadd.f32 %v7738_v56, %v4451_v19  ;;  %v3417_v21 = vmax.f32 %v3060_v57, 0.0 }
 0x70c   : > { %v1650_v59 = vpop.f32.mrf.mxu0  ;;  %v2002_v39 = vmax.f32 %v1703_v34, 0.0 }
 0x70d   : > { %v1651_v27 = vadd.f32 %v7857_v49, %v1650_v59  ;;  %v4836_v17 = vmax.f32 %v4452_v14, 0.0 }
 0x70f   : > { %5910 = vmatmul.msk.bf16.gmra.mxu0 %vm741_vm0, %v704_v52  ;;  %v7899_v52 = vpack.c.bf16 %v2002_v39, %v2001_v22  ;;  %v1981_v34 = vmax.f32 %v1651_v27, 0.0 }
 0x710   : > { %v3061_v42 = vpop.f32.mrf.mxu1 }
 0x711   : > { %v3062_v35 = vadd.f32 %v7632_v26, %v3061_v42  ;;  %v1705_v26 = vpop.f32.mrf.mxu3 }
 0x712   : > { %v4453_v15 = vpop.f32.mrf.mxu2  ;;  %v1706_v40 = vadd.f32 %v7857_v49, %v1705_v26 }
 0x713   : > { %v3418_v50 = vmax.f32 %v3062_v35, 0.0  ;;  %v4454_v11 = vadd.f32 %v7738_v56, %v4453_v15  ;;  %v584_v15 = vld [vmem:[%s6483_s30 + $0x7b8] sm:$0xff] }
 0x714   : > { %v1652_v48 = vpop.f32.mrf.mxu0  ;;  %v2003_v0 = vmax.f32 %v1706_v40, 0.0 }
 0x715   : > { %v3579_v30 = vpack.c.bf16 %v3418_v50, %v3417_v21  ;;  %v4837_v18 = vmax.f32 %v4454_v11, 0.0  ;;  %v1653_v19 = vadd.f32 %v7857_v49, %v1652_v48  ;;  %v7911_v11 = vld [vmem:[%s8792_s4] ss:$0 sm:$0xff]  ;;  %v583_v21 = vld [vmem:[%s6483_s30 + $0x7b0] sm:$0xff] }
 0x717   : > { %v1982_v57 = vmax.f32 %v1653_v19, 0.0  ;;  %6173 = vmatmul.msk.bf16.gmra.mxu2 %vm741_vm0, %v3579_v30  ;;  %v7904_v59 = vpack.c.bf16 %v4837_v18, %v4836_v17  ;;  %v716_v17 = vpack.c.bf16 %v584_v15, %v583_v21 }
 0x718   : > { %v3064_v42 = vpop.f32.mrf.mxu1 }
 0x719   : > { %8857 = vst [vmem:[#allocation63_spill] sm:$0xff] %v7904_v59  ;;  %v2134_v22 = vpack.c.bf16 %v1982_v57, %v1981_v34  ;;  %v3065_v35 = vadd.f32 %v7911_v11, %v3064_v42  ;;  %v1707_v39 = vpop.f32.mrf.mxu3 }
 0x71a   : > { %v4456_v47 = vpop.f32.mrf.mxu2  ;;  %v1708_v30 = vadd.f32 %v7857_v49, %v1707_v39  ;;  %5922 = vmatmul.msk.bf16.gmra.mxu3 %vm741_vm0, %v716_v17 }
 0x71b   : > { %6046 = vmatmul.msk.bf16.gmra.mxu1 %vm2195_vm1, %v2134_v22  ;;  %v4457_v27 = vadd.f32 %v7738_v56, %v4456_v47  ;;  %v3419_v19 = vmax.f32 %v3065_v35, 0.0 }
 0x71c   : > { %v1655_v14 = vpop.f32.mrf.mxu0  ;;  %v2004_v48 = vmax.f32 %v1708_v30, 0.0 }
 0x71d   : > { %v1656_v34 = vadd.f32 %v7857_v49, %v1655_v14  ;;  %v4838_v39 = vmax.f32 %v4457_v27, 0.0 }
 0x71e   : > { %v7921_v22 = vpack.c.bf16 %v2004_v48, %v2003_v0 }
 0x71f   : > { %v1983_v30 = vmax.f32 %v1656_v34, 0.0 }
 0x720   : > { %v3066_v18 = vpop.f32.mrf.mxu1 }
 0x721   : > { %v3067_v50 = vadd.f32 %v7911_v11, %v3066_v18  ;;  %v1710_v18 = vpop.f32.mrf.mxu3 }
 0x722   : > { %v4458_v26 = vpop.f32.mrf.mxu2  ;;  %v1711_v27 = vadd.f32 %v7857_v49, %v1710_v18 }
 0x723   : > { %v3420_v57 = vmax.f32 %v3067_v50, 0.0  ;;  %v4459_v42 = vadd.f32 %v7738_v56, %v4458_v26 }
 0x724   : > { %v1657_v40 = vpop.f32.mrf.mxu0 }
 0x725   : > { %v3580_v59 = vpack.c.bf16 %v3420_v57, %v3419_v19  ;;  %v4839_v13 = vmax.f32 %v4459_v42, 0.0  ;;  %v1658_v47 = vadd.f32 %v7857_v49, %v1657_v40  ;;  %v2005_v19 = vmax.f32 %v1711_v27, 0.0  ;;  %v585_v57 = vld [vmem:[%s6483_s30 + $0x7c0] sm:$0xff]  ;;  %v586_v42 = vld [vmem:[%s6483_s30 + $0x7c8] sm:$0xff] }
 0x727   : > { %v1984_v35 = vmax.f32 %v1658_v47, 0.0  ;;  %6174 = vmatmul.msk.bf16.gmra.mxu2 %vm741_vm0, %v3580_v59  ;;  %v7926_v14 = vpack.c.bf16 %v4839_v13, %v4838_v39  ;;  %v717_v39 = vpack.c.bf16 %v586_v42, %v585_v57 }
 0x728   : > { %v3069_v21 = vpop.f32.mrf.mxu1 }
 0x729   : > { %8858 = vst [vmem:[#allocation64_spill] sm:$0xff] %v7926_v14  ;;  %v2135_v0 = vpack.c.bf16 %v1984_v35, %v1983_v30  ;;  %v3070_v48 = vadd.f32 %v7911_v11, %v3069_v21  ;;  %v1712_v17 = vpop.f32.mrf.mxu3 }
 0x72a   : > { %v4461_v15 = vpop.f32.mrf.mxu2  ;;  %v1713_v26 = vadd.f32 %v7857_v49, %v1712_v17  ;;  %5923 = vmatmul.msk.bf16.gmra.mxu3 %vm741_vm0, %v717_v39 }
 0x72b   : > { %6047 = vmatmul.msk.bf16.gmra.mxu1 %vm2195_vm1, %v2135_v0  ;;  %v4462_v13 = vadd.f32 %v7738_v56, %v4461_v15  ;;  %v3421_v47 = vmax.f32 %v3070_v48, 0.0 }
 0x72c   : > { %v1660_v50 = vpop.f32.mrf.mxu0  ;;  %v2006_v40 = vmax.f32 %v1713_v26, 0.0 }
 0x72d   : > { %v1661_v18 = vadd.f32 %v7857_v49, %v1660_v50  ;;  %v4840_v17 = vmax.f32 %v4462_v13, 0.0 }
 0x72e   : > { %v7938_v0 = vpack.c.bf16 %v2006_v40, %v2005_v19 }
 0x72f   : > { %v1985_v48 = vmax.f32 %v1661_v18, 0.0 }
 0x730   : > { %v3071_v34 = vpop.f32.mrf.mxu1 }
 0x731   : > { %v3072_v59 = vadd.f32 %v7911_v11, %v3071_v34  ;;  %v7942_v34 = vpop.f32.mrf.mxu3 }
 0x732   : > { %v4463_v30 = vpop.f32.mrf.mxu2 }
 0x733   : > { %v3422_v35 = vmax.f32 %v3072_v59, 0.0  ;;  %v4464_v21 = vadd.f32 %v7738_v56, %v4463_v30  ;;  %v587_v30 = vld [vmem:[%s6483_s30 + $0x7d0] sm:$0xff] }
 0x734   : > { %v1662_v27 = vpop.f32.mrf.mxu0 }
 0x735   : > { %v3581_v14 = vpack.c.bf16 %v3422_v35, %v3421_v47  ;;  %v4841_v15 = vmax.f32 %v4464_v21, 0.0  ;;  %v1663_v26 = vadd.f32 %v7857_v49, %v1662_v27  ;;  %v588_v35 = vld [vmem:[%s6483_s30 + $0x7d8] sm:$0xff] }
 0x736   : > { %v718_v27 = vpack.c.bf16 %v588_v35, %v587_v30 }
 0x737   : > { %v7944_v57 = vpack.c.bf16 %v4841_v15, %v4840_v17  ;;  %v1986_v50 = vmax.f32 %v1663_v26, 0.0  ;;  %6175 = vmatmul.msk.bf16.gmra.mxu2 %vm741_vm0, %v3581_v14 }
 0x738   : > { %v3074_v19 = vpop.f32.mrf.mxu1 }
 0x739   : > { %8859 = vst [vmem:[#allocation65_spill] sm:$0xff] %v7944_v57  ;;  %v2136_v42 = vpack.c.bf16 %v1986_v50, %v1985_v48  ;;  %v7948_v40 = vpop.f32.mrf.mxu3  ;;  %v3075_v39 = vadd.f32 %v7911_v11, %v3074_v19 }
 0x73a   : > { %v4466_v59 = vpop.f32.mrf.mxu2  ;;  %5924 = vmatmul.msk.bf16.gmra.mxu3 %vm741_vm0, %v718_v27 }
 0x73b   : > { %6048 = vmatmul.msk.bf16.gmra.mxu1 %vm2195_vm1, %v2136_v42  ;;  %v4467_v18 = vadd.f32 %v7738_v56, %v4466_v59  ;;  %v3423_v14 = vmax.f32 %v3075_v39, 0.0 }
 0x73c   : > { %v1665_v13 = vpop.f32.mrf.mxu0 }
 0x73d   : > { %v1666_v15 = vadd.f32 %v7857_v49, %v1665_v13  ;;  %v4842_v42 = vmax.f32 %v4467_v18, 0.0 }
 0x740   : > { %v3076_v47 = vpop.f32.mrf.mxu1 }
 0x741   : > { %v3077_v21 = vadd.f32 %v7911_v11, %v3076_v47  ;;  %v7959_v6 = vpop.f32.mrf.mxu3  ;;  %v1987_v47 = vmax.f32 %v1666_v15, 0.0 }
 0x742   : > { %v4468_v17 = vpop.f32.mrf.mxu2 }
 0x743   : > { %v3424_v26 = vmax.f32 %v3077_v21, 0.0  ;;  %v4469_v48 = vadd.f32 %v7738_v56, %v4468_v17 }
 0x744   : > { %v1667_v50 = vpop.f32.mrf.mxu0 }
 0x745   : > { %v3582_v19 = vpack.c.bf16 %v3424_v26, %v3423_v14  ;;  %v4843_v57 = vmax.f32 %v4469_v48, 0.0  ;;  %v1668_v59 = vadd.f32 %v7857_v49, %v1667_v50  ;;  %v589_v26 = vld [vmem:[%s6483_s30 + $0x7e0] sm:$0xff]  ;;  %v590_v48 = vld [vmem:[%s6483_s30 + $0x7e8] sm:$0xff] }
 0x747   : > { %v1988_v30 = vmax.f32 %v1668_v59, 0.0  ;;  %6176 = vmatmul.msk.bf16.gmra.mxu2 %vm741_vm0, %v3582_v19  ;;  %v7962_v13 = vpack.c.bf16 %v4843_v57, %v4842_v42  ;;  %v719_v19 = vpack.c.bf16 %v590_v48, %v589_v26 }
 0x748   : > { %v3079_v39 = vpop.f32.mrf.mxu1 }
 0x749   : > { %8860 = vst [vmem:[#allocation66_spill] sm:$0xff] %v7962_v13  ;;  %v2137_v35 = vpack.c.bf16 %v1988_v30, %v1987_v47  ;;  %v7965_v27 = vpop.f32.mrf.mxu3  ;;  %v3080_v17 = vadd.f32 %v7911_v11, %v3079_v39 }
 0x74a   : > { %v4471_v21 = vpop.f32.mrf.mxu2  ;;  %5925 = vmatmul.msk.bf16.gmra.mxu3 %vm741_vm0, %v719_v19 }
 0x74b   : > { %6049 = vmatmul.msk.bf16.gmra.mxu1 %vm2195_vm1, %v2137_v35  ;;  %v4472_v15 = vadd.f32 %v7738_v56, %v4471_v21  ;;  %v3425_v42 = vmax.f32 %v3080_v17, 0.0 }
 0x74c   : > { %v1670_v18 = vpop.f32.mrf.mxu0 }
 0x74d   : > { %v1671_v59 = vadd.f32 %v7857_v49, %v1670_v18  ;;  %v4844_v13 = vmax.f32 %v4472_v15, 0.0 }
 0x74f   : > { %v1989_v58 = vmax.f32 %v1671_v59, 0.0 }
 0x750   : > { %v3081_v14 = vpop.f32.mrf.mxu1 }
 0x751   : > { %v3082_v50 = vadd.f32 %v7911_v11, %v3081_v14  ;;  %v7979_v26 = vpop.f32.mrf.mxu3 }
 0x752   : > { %v4473_v57 = vpop.f32.mrf.mxu2 }
 0x753   : > { %v3426_v47 = vmax.f32 %v3082_v50, 0.0  ;;  %v4474_v30 = vadd.f32 %v7738_v56, %v4473_v57 }
 0x754   : > { %v1672_v35 = vpop.f32.mrf.mxu0 }
 0x755   : > { %v3583_v39 = vpack.c.bf16 %v3426_v47, %v3425_v42  ;;  %v4845_v4 = vmax.f32 %v4474_v30, 0.0  ;;  %v1673_v21 = vadd.f32 %v7857_v49, %v1672_v35  ;;  %v591_v42 = vld [vmem:[%s6483_s30 + $0x7f0] sm:$0xff]  ;;  %v592_v47 = vld [vmem:[%s6483_s30 + $0x7f8] sm:$0xff]  ;;  %s6224_s30 = sshll.u32 %s6446_s8, 4  ;;  %s5710_s8 = scalar_lea.sflag [#allocation4], %s326_s27 }
 0x756   : > { %v720_v35 = vpack.c.bf16 %v592_v47, %v591_v42  ;;  %s5720_s22 = scalar_lea.hbm %s8797_s9, %s6224_s30 }
 0x757   : > { %v1990_v14 = vmax.f32 %v1673_v21, 0.0  ;;  %6177 = vmatmul.msk.bf16.gmra.mxu2 %vm741_vm0, %v3583_v39  ;;  %v7977_v17 = vpack.c.bf16 %v4845_v4, %v4844_v13  ;;  %s5724_s24 = sshll.u32 %s5720_s22, 4  ;;  %s5725_s24 = int_to_ptr.hbm [resolvable:$true] %s5724_s24 }
 0x758   : > { %v3084_v18 = vpop.f32.mrf.mxu1  ;;  %s6321_s25 = sshra.s32 %s5725_s24, 4  ;;  %s6322_s25 = int_to_ptr.hbm [resolvable:$true] %s6321_s25 }
 0x759   : > { %8861 = vst [vmem:[#allocation67_spill] sm:$0xff] %v7977_v17  ;;  %v2138_v48 = vpack.c.bf16 %v1990_v14, %v1989_v58  ;;  %v3085_v19 = vadd.f32 %v7911_v11, %v3084_v18  ;;  %v7987_v13 = vpop.f32.mrf.mxu3  ;;  %s6323_s26 = scalar_lea.hbm %s6322_s25, 16  ;;  %p6328_p0 = scmp.lt.s32.totalorder %s6322_s25, %s8797_s9 }
 0x75a   : > { %v4476_v50 = vpop.f32.mrf.mxu2  ;;  %5926 = vmatmul.msk.bf16.gmra.mxu3 %vm741_vm0, %v720_v35  ;;  %p6324_p11 = scmp.ne.s32.totalorder %s6322_s25, %s6323_s26  ;;  %p6329_p1 = scmp.lt.s32.totalorder %s6327_s15, %s6323_s26 }
 0x75b   : > { %6050 = vmatmul.msk.bf16.gmra.mxu1 %vm2195_vm1, %v2138_v48  ;;  %v4477_v59 = vadd.f32 %v7738_v56, %v4476_v50  ;;  %v3427_v39 = vmax.f32 %v3085_v19, 0.0 }
 0x75c   : > { %v1675_v15 = vpop.f32.mrf.mxu0  ;;  %p6325_p12 = pnand %p6324_p11, %p6463_p5  ;;  %p6330_p2 = por %p6329_p1, %p6328_p0 }
 0x75d   : > { %v1676_v58 = vadd.f32 %v7857_v49, %v1675_v15  ;;  %v4846_v48 = vmax.f32 %v4477_v59, 0.0 }
 0x75e   : > { %p6326_p13 = pneg %p6325_p12 }
 0x75f   : > { %v1991_v9 = vmax.f32 %v1676_v58, 0.0 }
 0x760   : > { %v3086_v57 = vpop.f32.mrf.mxu1  ;;  %p6331_p3 = pnand %p6330_p2, %p6326_p13 }
 0x761   : > { %v3087_v30 = vadd.f32 %v7911_v11, %v3086_v57 }
 0x762   : > { %v4478_v4 = vpop.f32.mrf.mxu2 }
 0x763   : > { %v3428_v21 = vmax.f32 %v3087_v30, 0.0  ;;  %v4479_v14 = vadd.f32 %v7738_v56, %v4478_v4  ;;  %v7997_v4 = vpop.f32.mrf.mxu3 }
 0x764   : > { %v1677_v18 = vpop.f32.mrf.mxu0 }
 0x765   : > { %v3584_v17 = vpack.c.bf16 %v3428_v21, %v3427_v39  ;;  %v4847_v5 = vmax.f32 %v4479_v14, 0.0  ;;  %v1678_v50 = vadd.f32 %v7857_v49, %v1677_v18 }
 0x767   : > { %v1992_v57 = vmax.f32 %v1678_v50, 0.0  ;;  %6178 = vmatmul.msk.bf16.gmra.mxu2 %vm741_vm0, %v3584_v17  ;;  %v7994_v42 = vpack.c.bf16 %v4847_v5, %v4846_v48 }
 0x768   : > { %v3089_v19 = vpop.f32.mrf.mxu1 }
 0x769   : > { %8862 = vst [vmem:[#allocation68_spill] sm:$0xff] %v7994_v42  ;;  %v2139_v47 = vpack.c.bf16 %v1992_v57, %v1991_v9  ;;  %v3090_v59 = vadd.f32 %v7911_v11, %v3089_v19 }
 0x76a   : > { %v4481_v15 = vpop.f32.mrf.mxu2 }
 0x76b   : > { %6051 = vmatmul.msk.bf16.gmra.mxu1 %vm2195_vm1, %v2139_v47  ;;  %v4482_v39 = vadd.f32 %v7738_v56, %v4481_v15  ;;  %v3429_v14 = vmax.f32 %v3090_v59, 0.0  ;;  %v8005_v42 = vpop.f32.mrf.mxu3 }
 0x76c   : > { %v1680_v30 = vpop.f32.mrf.mxu0 }
 0x76d   : > { %v1681_v5 = vadd.f32 %v7857_v49, %v1680_v30  ;;  %v4848_v48 = vmax.f32 %v4482_v39, 0.0 }
 0x76f   : > { %v1993_v19 = vmax.f32 %v1681_v5, 0.0 }
 0x770   : > { %v3091_v35 = vpop.f32.mrf.mxu1 }
 0x771   : > { %v3092_v58 = vadd.f32 %v7911_v11, %v3091_v35 }
 0x772   : > { %v4483_v21 = vpop.f32.mrf.mxu2 }
 0x773   : > { %v3430_v17 = vmax.f32 %v3092_v58, 0.0  ;;  %v4484_v9 = vadd.f32 %v7738_v56, %v4483_v21 }
 0x774   : > { %v1682_v18 = vpop.f32.mrf.mxu0 }
 0x775   : > { %v3585_v50 = vpack.c.bf16 %v3430_v17, %v3429_v14  ;;  %v4849_v57 = vmax.f32 %v4484_v9, 0.0  ;;  %v1683_v47 = vadd.f32 %v7857_v49, %v1682_v18  ;;  %v8012_v14 = vpop.f32.mrf.mxu3 }
 0x777   : > { %v1994_v45 = vmax.f32 %v1683_v47, 0.0  ;;  %6179 = vmatmul.msk.bf16.gmra.mxu2 %vm741_vm0, %v3585_v50  ;;  %v8008_v15 = vpack.c.bf16 %v4849_v57, %v4848_v48 }
 0x778   : > { %v3094_v59 = vpop.f32.mrf.mxu1 }
 0x779   : > { %8863 = vst [vmem:[#allocation69_spill] sm:$0xff] %v8008_v15  ;;  %v2140_v35 = vpack.c.bf16 %v1994_v45, %v1993_v19  ;;  %v3095_v39 = vadd.f32 %v7911_v11, %v3094_v59 }
 0x77a   : > { %v4486_v30 = vpop.f32.mrf.mxu2 }
 0x77b   : > { %6052 = vmatmul.msk.bf16.gmra.mxu1 %vm2195_vm1, %v2140_v35  ;;  %v4487_v17 = vadd.f32 %v7738_v56, %v4486_v30  ;;  %v3431_v18 = vmax.f32 %v3095_v39, 0.0 }
 0x77c   : > { %v1685_v58 = vpop.f32.mrf.mxu0 }
 0x77d   : > { %v1686_v48 = vadd.f32 %v7857_v49, %v1685_v58  ;;  %v4850_v47 = vmax.f32 %v4487_v17, 0.0  ;;  %v8022_v46 = vpop.f32.mrf.mxu3 }
 0x77f   : > { %v1995_v15 = vmax.f32 %v1686_v48, 0.0 }
 0x780   : > { %v3096_v21 = vpop.f32.mrf.mxu1 }
 0x781   : > { %v3097_v5 = vadd.f32 %v7911_v11, %v3096_v21 }
 0x782   : > { %v4488_v9 = vpop.f32.mrf.mxu2 }
 0x783   : > { %v3432_v50 = vmax.f32 %v3097_v5, 0.0  ;;  %v4489_v45 = vadd.f32 %v7738_v56, %v4488_v9  ;;  %v8029_v5 = vld [vmem:[%s8794_s6] ss:$0 sm:$0xff] }
 0x784   : > { %v1687_v57 = vpop.f32.mrf.mxu0 }
 0x785   : > { %v3586_v19 = vpack.c.bf16 %v3432_v50, %v3431_v18  ;;  %v4851_v35 = vmax.f32 %v4489_v45, 0.0  ;;  %v1688_v59 = vadd.f32 %v7857_v49, %v1687_v57  ;;  %v8035_v57 = vpop.f32.mrf.mxu3 }
 0x787   : > { %v1996_v20 = vmax.f32 %v1688_v59, 0.0  ;;  %6180 = vmatmul.msk.bf16.gmra.mxu2 %vm741_vm0, %v3586_v19  ;;  %v8020_v30 = vpack.c.bf16 %v4851_v35, %v4850_v47 }
 0x788   : > { %v3099_v21 = vpop.f32.mrf.mxu1 }
 0x789   : > { %8864 = vst [vmem:[#allocation70_spill] sm:$0xff] %v8020_v30  ;;  %v2141_v60 = vpack.c.bf16 %v1996_v20, %v1995_v15  ;;  %v3100_v58 = vadd.f32 %v7911_v11, %v3099_v21 }
 0x78a   : > { %v4491_v39 = vpop.f32.mrf.mxu2 }
 0x78b   : > { %6053 = vmatmul.msk.bf16.gmra.mxu1 %vm2195_vm1, %v2141_v60  ;;  %v4492_v9 = vadd.f32 %v8029_v5, %v4491_v39  ;;  %v3433_v20 = vmax.f32 %v3100_v58, 0.0 }
 0x78c   : > { %v1690_v56 = vpop.f32.mrf.mxu0 }
 0x78d   : > { %v1691_v15 = vadd.f32 %v7857_v49, %v1690_v56  ;;  %v4852_v47 = vmax.f32 %v4492_v9, 0.0  ;;  %v8044_v9 = vpop.f32.mrf.mxu3 }
 0x78f   : > { %v1997_v21 = vmax.f32 %v1691_v15, 0.0 }
 0x790   : > { %v3101_v17 = vpop.f32.mrf.mxu1 }
 0x791   : > { %v3102_v18 = vadd.f32 %v7911_v11, %v3101_v17 }
 0x792   : > { %v4493_v48 = vpop.f32.mrf.mxu2 }
 0x793   : > { %v3434_v50 = vmax.f32 %v3102_v18, 0.0  ;;  %v4494_v60 = vadd.f32 %v8029_v5, %v4493_v48  ;;  %v5084_v18 = vsel %vm5058_vm2, %v6777_v43, 0 }
 0x794   : > { %v1692_v45 = vpop.f32.mrf.mxu0 }
 0x795   : > { %v3587_v19 = vpack.c.bf16 %v3434_v50, %v3433_v20  ;;  %v4853_v35 = vmax.f32 %v4494_v60, 0.0  ;;  %v1693_v59 = vadd.f32 %v7857_v49, %v1692_v45 }
 0x797   : > { %v1998_v30 = vmax.f32 %v1693_v59, 0.0  ;;  %6181 = vmatmul.msk.bf16.gmra.mxu2 %vm741_vm0, %v3587_v19  ;;  %v8039_v39 = vpack.c.bf16 %v4853_v35, %v4852_v47  ;;  %v5081_v19 = vsel %vm5058_vm2, %v6765_v16, 0 }
 0x798   : > { %v3104_v58 = vpop.f32.mrf.mxu1 }
 0x799   : > { %v2142_v17 = vpack.c.bf16 %v1998_v30, %v1997_v21  ;;  %v3105_v48 = vadd.f32 %v7911_v11, %v3104_v58 }
 0x79a   : > { %v4496_v56 = vpop.f32.mrf.mxu2 }
 0x79b   : > { %6054 = vmatmul.msk.bf16.vlgmr.msrb.gmra.mxu3 %vm2195_vm1, %v2142_v17  ;;  %v4497_v15 = vadd.f32 %v8029_v5, %v4496_v56  ;;  %v3435_v45 = vmax.f32 %v3105_v48, 0.0  ;;  %v8055_v17 = vpop.f32.mrf.mxu3 }
 0x79c   : > { %5446 = vmatpush.bf16.xpose.msrb.mxu3 %v5084_v18  ;;  %v5078_v18 = vsel %vm5058_vm2, %v6752_v53, 0 }
 0x79d   : > { %v4854_v43 = vmax.f32 %v4497_v15, 0.0 }
 0x7a0   : > { %v3106_v20 = vpop.f32.mrf.mxu1 }
 0x7a1   : > { %v3107_v50 = vadd.f32 %v7911_v11, %v3106_v20 }
 0x7a2   : > { %v4498_v60 = vpop.f32.mrf.mxu2 }
 0x7a3   : > { %v3436_v30 = vmax.f32 %v3107_v50, 0.0  ;;  %v4499_v47 = vadd.f32 %v8029_v5, %v4498_v60  ;;  %v8064_v60 = vpop.f32.mrf.mxu3 }
 0x7a4   : > { %5447 = vmatpush.bf16.xpose.msrb.mxu3 %v5081_v19 }
 0x7a5   : > { %v3588_v35 = vpack.c.bf16 %v3436_v30, %v3435_v45  ;;  %v4855_v59 = vmax.f32 %v4499_v47, 0.0 }
 0x7a7   : > { %6182 = vmatmul.msk.bf16.gmra.mxu2 %vm741_vm0, %v3588_v35  ;;  %v8053_v21 = vpack.c.bf16 %v4855_v59, %v4854_v43 }
 0x7a8   : > { %v3109_v58 = vpop.f32.mrf.mxu1 }
 0x7a9   : > { %v3110_v16 = vadd.f32 %v7911_v11, %v3109_v58 }
 0x7aa   : > { %v4501_v56 = vpop.f32.mrf.mxu2 }
 0x7ab   : > { %6055 = vmatmul.msk.bf16.gmra.mxu3 %vm2195_vm1, %v7879_v32  ;;  %v4502_v20 = vadd.f32 %v8029_v5, %v4501_v56  ;;  %v3437_v45 = vmax.f32 %v3110_v16, 0.0  ;;  %v5075_v32 = vsel %vm5058_vm2, %v6739_v25, 0  ;;  %v5072_v56 = vsel %vm5058_vm2, %v6726_v63, 0 }
 0x7ac   : > { %5448 = vmatpush.bf16.xpose.msrb.mxu3 %v5078_v18  ;;  %v8076_v18 = vpop.f32.mrf.mxu3 }
 0x7ad   : > { %v4856_v53 = vmax.f32 %v4502_v20, 0.0 }
 0x7b0   : > { %v3111_v48 = vpop.f32.mrf.mxu1 }
 0x7b1   : > { %v3112_v15 = vadd.f32 %v7911_v11, %v3111_v48 }
 0x7b2   : > { %v4503_v50 = vpop.f32.mrf.mxu2 }
 0x7b3   : > { %v3438_v30 = vmax.f32 %v3112_v15, 0.0  ;;  %v4504_v47 = vadd.f32 %v8029_v5, %v4503_v50 }
 0x7b4   : > { %5449 = vmatpush.bf16.xpose.msrb.mxu3 %v5075_v32 }
 0x7b5   : > { %v3589_v19 = vpack.c.bf16 %v3438_v30, %v3437_v45  ;;  %v4857_v43 = vmax.f32 %v4504_v47, 0.0 }
 0x7b7   : > { %v8069_v35 = vpack.c.bf16 %v4857_v43, %v4856_v53  ;;  %6183 = vmatmul.msk.bf16.gmra.mxu2 %vm741_vm0, %v3589_v19  ;;  %v8084_v53 = vpop.f32.mrf.mxu3 }
 0x7b8   : > { %v3114_v59 = vpop.f32.mrf.mxu1 }
 0x7b9   : > { %v3115_v25 = vadd.f32 %v7911_v11, %v3114_v59 }
 0x7ba   : > { %v4506_v58 = vpop.f32.mrf.mxu2 }
 0x7bb   : > { %6056 = vmatmul.msk.bf16.gmra.mxu3 %vm2195_vm1, %v7899_v52  ;;  %v4507_v48 = vadd.f32 %v8029_v5, %v4506_v58  ;;  %v3439_v50 = vmax.f32 %v3115_v25, 0.0  ;;  %v5069_v52 = vsel %vm5058_vm2, %v6713_v38, 0  ;;  %v5066_v58 = vsel %vm5058_vm2, %v6700_v12, 0 }
 0x7bc   : > { %5450 = vmatpush.bf16.xpose.msrb.mxu3 %v5072_v56 }
 0x7bd   : > { %v4858_v63 = vmax.f32 %v4507_v48, 0.0 }
 0x7bf   : > { %v8094_v25 = vpop.f32.mrf.mxu3 }
 0x7c0   : > { %v3116_v16 = vpop.f32.mrf.mxu1 }
 0x7c1   : > { %v3117_v20 = vadd.f32 %v7911_v11, %v3116_v16 }
 0x7c2   : > { %v4508_v15 = vpop.f32.mrf.mxu2 }
 0x7c3   : > { %v3440_v45 = vmax.f32 %v3117_v20, 0.0  ;;  %v4509_v30 = vadd.f32 %v8029_v5, %v4508_v15 }
 0x7c4   : > { %5451 = vmatpush.bf16.xpose.msrb.mxu3 %v5069_v52 }
 0x7c5   : > { %v3590_v47 = vpack.c.bf16 %v3440_v45, %v3439_v50  ;;  %v4859_v32 = vmax.f32 %v4509_v30, 0.0 }
 0x7c7   : > { %6184 = vmatmul.msk.bf16.gmra.mxu2 %vm741_vm0, %v3590_v47  ;;  %v8087_v19 = vpack.c.bf16 %v4859_v32, %v4858_v63 }
 0x7c8   : > { %v3119_v43 = vpop.f32.mrf.mxu1 }
 0x7c9   : > { %8865 = vst [vmem:[#allocation71_spill] sm:$0xff] %v8087_v19  ;;  %v3120_v38 = vadd.f32 %v7911_v11, %v3119_v43  ;;  %v8104_v43 = vpop.f32.mrf.mxu3 }
 0x7ca   : > { %v4511_v59 = vpop.f32.mrf.mxu2 }
 0x7cb   : > { %6057 = vmatmul.msk.bf16.gmra.mxu3 %vm2195_vm1, %v7921_v22  ;;  %v4512_v16 = vadd.f32 %v8029_v5, %v4511_v59  ;;  %v3441_v15 = vmax.f32 %v3120_v38, 0.0  ;;  %v5063_v22 = vsel %vm5058_vm2, %v6687_v51, 0  ;;  %v1716_v51 = vadd.f32 %v7857_v49, %v7942_v34 }
 0x7cc   : > { %5452 = vmatpush.bf16.xpose.msrb.mxu3 %v5066_v58  ;;  %v1718_v38 = vadd.f32 %v7857_v49, %v7948_v40 }
 0x7cd   : > { %v4860_v12 = vmax.f32 %v4512_v16, 0.0 }
 0x7d0   : > { %v3121_v56 = vpop.f32.mrf.mxu1 }
 0x7d1   : > { %v3122_v48 = vadd.f32 %v7911_v11, %v3121_v56 }
 0x7d2   : > { %v4513_v20 = vpop.f32.mrf.mxu2 }
 0x7d3   : > { %v3442_v50 = vmax.f32 %v3122_v48, 0.0  ;;  %v4514_v45 = vadd.f32 %v8029_v5, %v4513_v20 }
 0x7d4   : > { %5453 = vmatpush.bf16.xpose.msrb.mxu3 %v5063_v22  ;;  %v2008_v22 = vmax.f32 %v1718_v38, 0.0 }
 0x7d5   : > { %v3591_v30 = vpack.c.bf16 %v3442_v50, %v3441_v15  ;;  %v4861_v52 = vmax.f32 %v4514_v45, 0.0  ;;  %v2007_v45 = vmax.f32 %v1716_v51, 0.0  ;;  %v1721_v51 = vadd.f32 %v7857_v49, %v7959_v6 }
 0x7d7   : > { %6185 = vmatmul.msk.bf16.gmra.mxu2 %vm741_vm0, %v3591_v30  ;;  %v8102_v63 = vpack.c.bf16 %v4861_v52, %v4860_v12 }
 0x7d8   : > { %v3124_v47 = vpop.f32.mrf.mxu1 }
 0x7d9   : > { %v3125_v59 = vadd.f32 %v7911_v11, %v3124_v47  ;;  %v2147_v47 = vpack.c.bf16 %v2008_v22, %v2007_v45  ;;  %v2009_v22 = vmax.f32 %v1721_v51, 0.0  ;;  %v1726_v51 = vadd.f32 %v7857_v49, %v7979_v26 }
 0x7da   : > { %v4516_v32 = vpop.f32.mrf.mxu2 }
 0x7db   : > { %6058 = vmatmul.msk.bf16.gmra.mxu3 %vm2195_vm1, %v7938_v0  ;;  %v4517_v56 = vadd.f32 %v8029_v5, %v4516_v32  ;;  %v3443_v20 = vmax.f32 %v3125_v59, 0.0  ;;  %v8116_v0 = vpop.f32.mrf.mxu3 }
 0x7dd   : > { %v4862_v12 = vmax.f32 %v4517_v56, 0.0  ;;  %v1723_v56 = vadd.f32 %v7857_v49, %v7965_v27 }
 0x7e0   : > { %v3126_v58 = vpop.f32.mrf.mxu1 }
 0x7e1   : > { %v3127_v16 = vadd.f32 %v7911_v11, %v3126_v58 }
 0x7e2   : > { %v4518_v48 = vpop.f32.mrf.mxu2 }
 0x7e3   : > { %v3444_v15 = vmax.f32 %v3127_v16, 0.0  ;;  %v4519_v50 = vadd.f32 %v8029_v5, %v4518_v48  ;;  %v8122_v59 = vpop.f32.mrf.mxu3 }
 0x7e5   : > { %v3592_v30 = vpack.c.bf16 %v3444_v15, %v3443_v20  ;;  %v4863_v34 = vmax.f32 %v4519_v50, 0.0 }
 0x7e7   : > { %6186 = vmatmul.msk.bf16.gmra.mxu2 %vm741_vm0, %v3592_v30  ;;  %v8119_v52 = vpack.c.bf16 %v4863_v34, %v4862_v12  ;;  %v2010_v12 = vmax.f32 %v1723_v56, 0.0  ;;  %v1728_v56 = vadd.f32 %v7857_v49, %v7987_v13 }
 0x7e8   : > { %v3129_v40 = vpop.f32.mrf.mxu1 }
 0x7e9   : > { %v3130_v58 = vadd.f32 %v7911_v11, %v3129_v40 }
 0x7ea   : > { %v4521_v32 = vpop.f32.mrf.mxu2 }
 0x7eb   : > { %6059 = vmatmul.msk.bf16.gmra.mxu3 %vm2195_vm1, %v2147_v47  ;;  %v4522_v16 = vadd.f32 %v8029_v5, %v4521_v32  ;;  %v3445_v15 = vmax.f32 %v3130_v58, 0.0  ;;  %v8135_v47 = vpop.f32.mrf.mxu3  ;;  %v2148_v32 = vpack.c.bf16 %v2010_v12, %v2009_v22  ;;  %v2011_v12 = vmax.f32 %v1726_v51, 0.0 }
 0x7ec   : > { %v1731_v51 = vadd.f32 %v7857_v49, %v7997_v4 }
 0x7ed   : > { %v4864_v30 = vmax.f32 %v4522_v16, 0.0 }
 0x7f0   : > { %v3131_v38 = vpop.f32.mrf.mxu1 }
 0x7f1   : > { %v3132_v48 = vadd.f32 %v7911_v11, %v3131_v38 }
 0x7f2   : > { %v4523_v20 = vpop.f32.mrf.mxu2 }
 0x7f3   : > { %v3446_v50 = vmax.f32 %v3132_v48, 0.0  ;;  %v4524_v45 = vadd.f32 %v8029_v5, %v4523_v20  ;;  %v8145_v20 = vpop.f32.mrf.mxu3 }
 0x7f5   : > { %v3593_v34 = vpack.c.bf16 %v3446_v50, %v3445_v15  ;;  %v4865_v40 = vmax.f32 %v4524_v45, 0.0 }
 0x7f7   : > { %6187 = vmatmul.msk.bf16.gmra.mxu2 %vm741_vm0, %v3593_v34  ;;  %v8133_v6 = vpack.c.bf16 %v4865_v40, %v4864_v30  ;;  %v2012_v30 = vmax.f32 %v1728_v56, 0.0 }
 0x7f8   : > { %v3134_v27 = vpop.f32.mrf.mxu1 }
 0x7f9   : > { %v3135_v58 = vadd.f32 %v7911_v11, %v3134_v27 }
 0x7fa   : > { %v4526_v19 = vpop.f32.mrf.mxu2 }
 0x7fb   : > { %6060 = vmatmul.msk.bf16.gmra.mxu3 %vm2195_vm1, %v2148_v32  ;;  %v4527_v16 = vadd.f32 %v8029_v5, %v4526_v19  ;;  %v3447_v50 = vmax.f32 %v3135_v58, 0.0  ;;  %v2149_v19 = vpack.c.bf16 %v2012_v30, %v2011_v12  ;;  %v2013_v30 = vmax.f32 %v1731_v51, 0.0 }
 0x7fc   : > { %v1738_v51 = vadd.f32 %v7857_v49, %v8022_v46 }
 0x7fd   : > { %v4866_v34 = vmax.f32 %v4527_v16, 0.0  ;;  %v1733_v16 = vadd.f32 %v7857_v49, %v8005_v42 }
 0x800   : > { %v3136_v38 = vpop.f32.mrf.mxu1 }
 0x801   : > { %v3137_v48 = vadd.f32 %v7911_v11, %v3136_v38  ;;  %v8152_v38 = vpop.f32.mrf.mxu3 }
 0x802   : > { %v4528_v15 = vpop.f32.mrf.mxu2 }
 0x803   : > { %v3448_v45 = vmax.f32 %v3137_v48, 0.0  ;;  %v4529_v22 = vadd.f32 %v8029_v5, %v4528_v15 }
 0x805   : > { %v3594_v40 = vpack.c.bf16 %v3448_v45, %v3447_v50  ;;  %v4867_v26 = vmax.f32 %v4529_v22, 0.0 }
 0x807   : > { %v8148_v27 = vpack.c.bf16 %v4867_v26, %v4866_v34  ;;  %6188 = vmatmul.msk.bf16.gmra.mxu2 %vm741_vm0, %v3594_v40  ;;  %v2014_v34 = vmax.f32 %v1733_v16, 0.0 }
 0x808   : > { %v3139_v13 = vpop.f32.mrf.mxu1 }
 0x809   : > { %v3140_v58 = vadd.f32 %v7911_v11, %v3139_v13  ;;  %v2150_v42 = vpack.c.bf16 %v2014_v34, %v2013_v30 }
 0x80a   : > { %v4531_v32 = vpop.f32.mrf.mxu2 }
 0x80b   : > { %6061 = vmatmul.msk.bf16.gmra.mxu3 %vm2195_vm1, %v2149_v19  ;;  %v4532_v48 = vadd.f32 %v8029_v5, %v4531_v32  ;;  %v3449_v45 = vmax.f32 %v3140_v58, 0.0  ;;  %v8162_v19 = vpop.f32.mrf.mxu3  ;;  %v1736_v58 = vadd.f32 %v7857_v49, %v8012_v14 }
 0x80d   : > { %v4868_v40 = vmax.f32 %v4532_v48, 0.0 }
 0x810   : > { %v3141_v56 = vpop.f32.mrf.mxu1 }
 0x811   : > { %v3142_v15 = vadd.f32 %v7911_v11, %v3141_v56 }
 0x812   : > { %v4533_v50 = vpop.f32.mrf.mxu2 }
 0x813   : > { %v3450_v22 = vmax.f32 %v3142_v15, 0.0  ;;  %v4534_v12 = vadd.f32 %v8029_v5, %v4533_v50  ;;  %v2015_v50 = vmax.f32 %v1736_v58, 0.0 }
 0x815   : > { %v3595_v26 = vpack.c.bf16 %v3450_v22, %v3449_v45  ;;  %v4869_v13 = vmax.f32 %v4534_v12, 0.0  ;;  %v2016_v45 = vmax.f32 %v1738_v51, 0.0 }
 0x817   : > { %v8164_v4 = vpack.c.bf16 %v4869_v13, %v4868_v40  ;;  %6189 = vmatmul.msk.bf16.gmra.mxu2 %vm741_vm0, %v3595_v26  ;;  %v2151_v14 = vpack.c.bf16 %v2016_v45, %v2015_v50 }
 0x81a   : > { %v4536_v32 = vpop.f32.mrf.mxu2 }
 0x81b   : > { %6062 = vmatmul.msk.bf16.gmra.mxu3 %vm2195_vm1, %v2150_v42  ;;  %v4537_v16 = vadd.f32 %v8029_v5, %v4536_v32 }
 0x81d   : > { %v4870_v22 = vmax.f32 %v4537_v16, 0.0 }
 0x81e   : > { %v3144_v56 = vpop.f32.mrf.mxu3 }
 0x81f   : > { %v3145_v12 = vadd.f32 %v7911_v11, %v3144_v56  ;;  %v8183_v56 = vld [vmem:[%s8790_s2] ss:$0 sm:$0xff] }
 0x820   : > { %v1741_v58 = vadd.f32 %v8183_v56, %v8035_v57  ;;  %v1743_v51 = vadd.f32 %v8183_v56, %v8044_v9 }
 0x821   : > { %v3451_v13 = vmax.f32 %v3145_v12, 0.0 }
 0x822   : > { %v4538_v48 = vpop.f32.mrf.mxu2  ;;  %v2017_v50 = vmax.f32 %v1741_v58, 0.0  ;;  %v2018_v45 = vmax.f32 %v1743_v51, 0.0  ;;  %v1746_v58 = vadd.f32 %v8183_v56, %v8055_v17 }
 0x823   : > { %v4539_v15 = vadd.f32 %v8029_v5, %v4538_v48 }
 0x824   : > { %v2152_v57 = vpack.c.bf16 %v2018_v45, %v2017_v50 }
 0x825   : > { %v4871_v30 = vmax.f32 %v4539_v15, 0.0 }
 0x826   : > { %v3146_v34 = vpop.f32.mrf.mxu3 }
 0x827   : > { %v8175_v40 = vpack.c.bf16 %v4871_v30, %v4870_v22  ;;  %v3147_v26 = vadd.f32 %v7911_v11, %v3146_v34 }
 0x829   : > { %v3452_v42 = vmax.f32 %v3147_v26, 0.0 }
 0x82a   : > { %v4541_v46 = vpop.f32.mrf.mxu2 }
 0x82b   : > { %v3596_v49 = vpack.c.bf16 %v3452_v42, %v3451_v13  ;;  %6063 = vmatmul.msk.bf16.gmra.mxu3 %vm2195_vm1, %v2151_v14  ;;  %v4542_v16 = vadd.f32 %v8029_v5, %v4541_v46 }
 0x82d   : > { %6190 = vmatmul.msk.bf16.gmra.mxu2 %vm741_vm0, %v3596_v49  ;;  %v4872_v22 = vmax.f32 %v4542_v16, 0.0 }
 0x82e   : > { %v3149_v32 = vpop.f32.mrf.mxu3 }
 0x82f   : > { %v3150_v12 = vadd.f32 %v7911_v11, %v3149_v32  ;;  %v1748_v32 = vadd.f32 %v8183_v56, %v8064_v60 }
 0x831   : > { %v3453_v13 = vmax.f32 %v3150_v12, 0.0  ;;  %v2020_v50 = vmax.f32 %v1748_v32, 0.0 }
 0x832   : > { %v4543_v48 = vpop.f32.mrf.mxu2 }
 0x833   : > { %v4544_v15 = vadd.f32 %v8029_v5, %v4543_v48 }
 0x835   : > { %v4873_v30 = vmax.f32 %v4544_v15, 0.0  ;;  %v2019_v15 = vmax.f32 %v1746_v58, 0.0  ;;  %v1751_v58 = vadd.f32 %v8183_v56, %v8076_v18 }
 0x836   : > { %v3151_v34 = vpop.f32.mrf.mxu3 }
 0x837   : > { %v8192_v26 = vpack.c.bf16 %v4873_v30, %v4872_v22  ;;  %v3152_v14 = vadd.f32 %v7911_v11, %v3151_v34  ;;  %v2153_v17 = vpack.c.bf16 %v2020_v50, %v2019_v15 }
 0x839   : > { %v3454_v42 = vmax.f32 %v3152_v14, 0.0 }
 0x83a   : > { %v4546_v9 = vpop.f32.mrf.mxu2 }
 0x83b   : > { %v8195_v49 = vpack.c.bf16 %v3454_v42, %v3453_v13  ;;  %6064 = vmatmul.msk.bf16.gmra.mxu3 %vm2195_vm1, %v2152_v57  ;;  %v4547_v51 = vadd.f32 %v8029_v5, %v4546_v9 }
 0x83d   : > { %v4874_v45 = vmax.f32 %v4547_v51, 0.0 }
 0x83e   : > { %v3154_v46 = vpop.f32.mrf.mxu3 }
 0x83f   : > { %v3155_v22 = vadd.f32 %v7911_v11, %v3154_v46  ;;  %v1753_v46 = vadd.f32 %v8183_v56, %v8084_v53 }
 0x841   : > { %v3455_v57 = vmax.f32 %v3155_v22, 0.0  ;;  %v2022_v15 = vmax.f32 %v1753_v46, 0.0 }
 0x842   : > { %v4548_v16 = vpop.f32.mrf.mxu2 }
 0x843   : > { %v4549_v48 = vadd.f32 %v8029_v5, %v4548_v16 }
 0x845   : > { %v4875_v12 = vmax.f32 %v4549_v48, 0.0  ;;  %v2021_v48 = vmax.f32 %v1751_v58, 0.0  ;;  %v1756_v58 = vadd.f32 %v8183_v56, %v8094_v25 }
 0x846   : > { %v3156_v30 = vpop.f32.mrf.mxu3 }
 0x847   : > { %v8205_v34 = vpack.c.bf16 %v4875_v12, %v4874_v45  ;;  %v3157_v14 = vadd.f32 %v7911_v11, %v3156_v30  ;;  %v2154_v18 = vpack.c.bf16 %v2022_v15, %v2021_v48 }
 0x849   : > { %v3456_v13 = vmax.f32 %v3157_v14, 0.0 }
 0x84a   : > { %v4551_v60 = vpop.f32.mrf.mxu2 }
 0x84b   : > { %v8208_v42 = vpack.c.bf16 %v3456_v13, %v3455_v57  ;;  %6065 = vmatmul.msk.bf16.gmra.mxu3 %vm2195_vm1, %v2153_v17  ;;  %v4552_v32 = vadd.f32 %v8029_v5, %v4551_v60 }
 0x84d   : > { %v4876_v50 = vmax.f32 %v4552_v32, 0.0 }
 0x84e   : > { %v3159_v9 = vpop.f32.mrf.mxu3 }
 0x84f   : > { %v3160_v45 = vadd.f32 %v7911_v11, %v3159_v9  ;;  %v1758_v9 = vadd.f32 %v8183_v56, %v8104_v43 }
 0x851   : > { %v3457_v17 = vmax.f32 %v3160_v45, 0.0  ;;  %v2024_v48 = vmax.f32 %v1758_v9, 0.0 }
 0x852   : > { %v4553_v51 = vpop.f32.mrf.mxu2 }
 0x853   : > { %v4554_v16 = vadd.f32 %v8029_v5, %v4553_v51 }
 0x855   : > { %v4877_v22 = vmax.f32 %v4554_v16, 0.0  ;;  %v2023_v16 = vmax.f32 %v1756_v58, 0.0  ;;  %v1761_v58 = vadd.f32 %v8183_v56, %v8116_v0 }
 0x856   : > { %v3161_v12 = vpop.f32.mrf.mxu3 }
 0x857   : > { %v8218_v30 = vpack.c.bf16 %v4877_v22, %v4876_v50  ;;  %v3162_v14 = vadd.f32 %v7911_v11, %v3161_v12  ;;  %v2155_v25 = vpack.c.bf16 %v2024_v48, %v2023_v16  ;;  %v8246_v48 = vld [vmem:[%s8792_s4] ss:$0 sm:$0xff] }
 0x859   : > { %v3458_v57 = vmax.f32 %v3162_v14, 0.0 }
 0x85a   : > { %v4556_v53 = vpop.f32.mrf.mxu2 }
 0x85b   : > { %v8221_v13 = vpack.c.bf16 %v3458_v57, %v3457_v17  ;;  %6066 = vmatmul.msk.bf16.gmra.mxu3 %vm2195_vm1, %v2154_v18  ;;  %v4557_v46 = vadd.f32 %v8029_v5, %v4556_v53 }
 0x85d   : > { %v4878_v15 = vmax.f32 %v4557_v46, 0.0 }
 0x85e   : > { %v3164_v60 = vpop.f32.mrf.mxu3 }
 0x85f   : > { %v3165_v50 = vadd.f32 %v7911_v11, %v3164_v60  ;;  %v1763_v60 = vadd.f32 %v8183_v56, %v8122_v59 }
 0x861   : > { %v3459_v18 = vmax.f32 %v3165_v50, 0.0 }
 0x862   : > { %v4558_v32 = vpop.f32.mrf.mxu2 }
 0x863   : > { %v4559_v51 = vadd.f32 %v8029_v5, %v4558_v32  ;;  %v2025_v32 = vmax.f32 %v1761_v58, 0.0  ;;  %v1766_v58 = vadd.f32 %v8183_v56, %v8135_v47 }
 0x865   : > { %v4879_v45 = vmax.f32 %v4559_v51, 0.0  ;;  %v2026_v51 = vmax.f32 %v1763_v60, 0.0 }
 0x866   : > { %v3166_v22 = vpop.f32.mrf.mxu3 }
 0x867   : > { %v8231_v12 = vpack.c.bf16 %v4879_v45, %v4878_v15  ;;  %v3167_v14 = vadd.f32 %v7911_v11, %v3166_v22  ;;  %v2156_v22 = vpack.c.bf16 %v2026_v51, %v2025_v32 }
 0x869   : > { %v3460_v17 = vmax.f32 %v3167_v14, 0.0 }
 0x86a   : > { %v4561_v43 = vpop.f32.mrf.mxu2 }
 0x86b   : > { %v8234_v57 = vpack.c.bf16 %v3460_v17, %v3459_v18  ;;  %6067 = vmatmul.msk.bf16.gmra.mxu3 %vm2195_vm1, %v2155_v25  ;;  %v4562_v9 = vadd.f32 %v8029_v5, %v4561_v43 }
 0x86d   : > { %v4880_v16 = vmax.f32 %v4562_v9, 0.0 }
 0x86e   : > { %v3169_v53 = vpop.f32.mrf.mxu3 }
 0x86f   : > { %v3170_v15 = vadd.f32 %v8246_v48, %v3169_v53  ;;  %v1768_v53 = vadd.f32 %v8183_v56, %v8145_v20 }
 0x871   : > { %v3461_v14 = vmax.f32 %v3170_v15, 0.0  ;;  %v2028_v32 = vmax.f32 %v1768_v53, 0.0 }
 0x872   : > { %v4563_v46 = vpop.f32.mrf.mxu2 }
 0x873   : > { %v4564_v11 = vadd.f32 %v8029_v5, %v4563_v46 }
 0x875   : > { %v4881_v50 = vmax.f32 %v4564_v11, 0.0  ;;  %v2027_v11 = vmax.f32 %v1766_v58, 0.0 }
 0x876   : > { %v3171_v0 = vpop.f32.mrf.mxu3 }
 0x877   : > { %v8249_v45 = vpack.c.bf16 %v4881_v50, %v4880_v16  ;;  %v3172_v59 = vadd.f32 %v8246_v48, %v3171_v0  ;;  %v2157_v47 = vpack.c.bf16 %v2028_v32, %v2027_v11 }
 0x879   : > { %v3462_v25 = vmax.f32 %v3172_v59, 0.0 }
 0x87a   : > { %v4566_v18 = vpop.f32.mrf.mxu2 }
 0x87b   : > { %v8252_v17 = vpack.c.bf16 %v3462_v25, %v3461_v14  ;;  %6068 = vmatmul.msk.bf16.gmra.mxu3 %vm2195_vm1, %v2156_v22  ;;  %v4567_v60 = vadd.f32 %v8029_v5, %v4566_v18  ;;  %v1771_v18 = vadd.f32 %v8183_v56, %v8152_v38 }
 0x87d   : > { %v4882_v51 = vmax.f32 %v4567_v60, 0.0  ;;  %v2029_v58 = vmax.f32 %v1771_v18, 0.0 }
 0x87e   : > { %v3174_v43 = vpop.f32.mrf.mxu3 }
 0x87f   : > { %v3175_v16 = vadd.f32 %v8246_v48, %v3174_v43  ;;  %v1773_v43 = vadd.f32 %v8183_v56, %v8162_v19 }
 0x881   : > { %v3463_v22 = vmax.f32 %v3175_v16, 0.0  ;;  %v2030_v53 = vmax.f32 %v1773_v43, 0.0 }
 0x882   : > { %v4568_v9 = vpop.f32.mrf.mxu2 }
 0x883   : > { %v4569_v46 = vadd.f32 %v8029_v5, %v4568_v9  ;;  %v2158_v11 = vpack.c.bf16 %v2030_v53, %v2029_v58 }
 0x885   : > { %v4883_v15 = vmax.f32 %v4569_v46, 0.0 }
 0x886   : > { %v3176_v50 = vpop.f32.mrf.mxu3 }
 0x887   : > { %v8262_v0 = vpack.c.bf16 %v4883_v15, %v4882_v51  ;;  %v3177_v59 = vadd.f32 %v8246_v48, %v3176_v50 }
 0x889   : > { %v3464_v14 = vmax.f32 %v3177_v59, 0.0 }
 0x88b   : > { %v8265_v20 = vpack.c.bf16 %v3464_v14, %v3463_v22  ;;  %6069 = vmatmul.msk.bf16.gmra.mxu3 %vm2195_vm1, %v2157_v47  ;;  %v5108_v22 = vsel %vm5058_vm2, %v6891_v28, 0  ;;  %v5102_v28 = vsel %vm5058_vm2, %v6866_v29, 0  ;;  %v5096_v29 = vsel %vm5058_vm2, %v6835_v31, 0 }
 0x88c   : > { %v5090_v31 = vsel %vm5058_vm2, %v6809_v37, 0 }
 0x88e   : > { %v3179_v25 = vpop.f32.mrf.mxu3 }
 0x88f   : > { %v3180_v60 = vadd.f32 %v8246_v48, %v3179_v25  ;;  %v5105_v25 = vsel %vm5058_vm2, %v6879_v61, 0  ;;  %v5099_v61 = vsel %vm5058_vm2, %v6853_v62, 0  ;;  %v5093_v62 = vsel %vm5058_vm2, %v6822_v3, 0 }
 0x890   : > { %v5087_v3 = vsel %vm5058_vm2, %v6796_v8, 0 }
 0x891   : > { %v3465_v32 = vmax.f32 %v3180_v60, 0.0 }
 0x896   : > { %v3181_v9 = vpop.f32.mrf.mxu3 }
 0x897   : > { %v3182_v46 = vadd.f32 %v8246_v48, %v3181_v9 }
 0x899   : > { %v3466_v51 = vmax.f32 %v3182_v46, 0.0 }
 0x89b   : > { %v8274_v16 = vpack.c.bf16 %v3466_v51, %v3465_v32  ;;  %6070 = vmatmul.msk.bf16.gmra.mxu3 %vm2195_vm1, %v2158_v11 }
 0x89e   : > { %v3184_v15 = vpop.f32.mrf.mxu3 }
 0x89f   : > { %v3185_v38 = vadd.f32 %v8246_v48, %v3184_v15 }
 0x8a1   : > { %v3467_v56 = vmax.f32 %v3185_v38, 0.0 }
 0x8a6   : > { %v3186_v50 = vpop.f32.mrf.mxu3 }
 0x8a7   : > { %v3187_v19 = vadd.f32 %v8246_v48, %v3186_v50 }
 0x8a9   : > { %v3468_v59 = vmax.f32 %v3187_v19, 0.0 }
 0x8ab   : > { %v8279_v47 = vpack.c.bf16 %v3468_v59, %v3467_v56  ;;  %6191 = vmatmul.msk.bf16.vlgmr.msra.gmra.mxu3 %vm741_vm0, %v8195_v49 }
 0x8ac   : > { %5459 = vmatpush.bf16.xpose.msra.mxu3 %v5108_v22 }
 0x8ae   : > { %v3189_v14 = vpop.f32.mrf.mxu3 }
 0x8af   : > { %v3190_v18 = vadd.f32 %v8246_v48, %v3189_v14 }
 0x8b1   : > { %v3469_v53 = vmax.f32 %v3190_v18, 0.0 }
 0x8b4   : > { %5460 = vmatpush.bf16.xpose.msra.mxu3 %v5105_v25 }
 0x8b6   : > { %v3191_v43 = vpop.f32.mrf.mxu3 }
 0x8b7   : > { %v3192_v58 = vadd.f32 %v8246_v48, %v3191_v43 }
 0x8b9   : > { %v3470_v60 = vmax.f32 %v3192_v58, 0.0 }
 0x8bb   : > { %v8289_v9 = vpack.c.bf16 %v3470_v60, %v3469_v53  ;;  %6192 = vmatmul.msk.bf16.gmra.mxu3 %vm741_vm0, %v8208_v42 }
 0x8bc   : > { %5461 = vmatpush.bf16.xpose.msra.mxu3 %v5102_v28 }
 0x8be   : > { %v3194_v49 = vpop.f32.mrf.mxu3 }
 0x8bf   : > { %v3195_v46 = vadd.f32 %v8246_v48, %v3194_v49 }
 0x8c1   : > { %v3471_v51 = vmax.f32 %v3195_v46, 0.0 }
 0x8c4   : > { %5462 = vmatpush.bf16.xpose.msra.mxu3 %v5099_v61 }
 0x8c6   : > { %v3196_v11 = vpop.f32.mrf.mxu3 }
 0x8c7   : > { %v3197_v32 = vadd.f32 %v8246_v48, %v3196_v11 }
 0x8c9   : > { %v3472_v15 = vmax.f32 %v3197_v32, 0.0 }
 0x8cb   : > { %v8299_v38 = vpack.c.bf16 %v3472_v15, %v3471_v51  ;;  %6193 = vmatmul.msk.bf16.gmra.mxu3 %vm741_vm0, %v8221_v13 }
 0x8cc   : > { %5463 = vmatpush.bf16.xpose.msra.mxu3 %v5096_v29 }
 0x8ce   : > { %v3199_v42 = vpop.f32.mrf.mxu3 }
 0x8cf   : > { %v3200_v50 = vadd.f32 %v8246_v48, %v3199_v42 }
 0x8d1   : > { %v3473_v59 = vmax.f32 %v3200_v50, 0.0 }
 0x8d4   : > { %5464 = vmatpush.bf16.xpose.msra.mxu3 %v5093_v62 }
 0x8d6   : > { %v3201_v19 = vpop.f32.mrf.mxu3 }
 0x8d7   : > { %v3202_v56 = vadd.f32 %v8246_v48, %v3201_v19 }
 0x8d9   : > { %v3474_v22 = vmax.f32 %v3202_v56, 0.0 }
 0x8db   : > { %v3607_v14 = vpack.c.bf16 %v3474_v22, %v3473_v59  ;;  %6194 = vmatmul.msk.bf16.gmra.mxu3 %vm741_vm0, %v8234_v57 }
 0x8dc   : > { %5465 = vmatpush.bf16.xpose.msra.mxu3 %v5090_v31 }
 0x8de   : > { %v3204_v13 = vpop.f32.mrf.mxu3 }
 0x8df   : > { %v3205_v25 = vadd.f32 %v8246_v48, %v3204_v13 }
 0x8e1   : > { %v3475_v58 = vmax.f32 %v3205_v25, 0.0 }
 0x8e4   : > { %5466 = vmatpush.bf16.xpose.msra.mxu3 %v5087_v3 }
 0x8e6   : > { %v3206_v18 = vpop.f32.mrf.mxu3 }
 0x8e7   : > { %v3207_v43 = vadd.f32 %v8246_v48, %v3206_v18 }
 0x8e9   : > { %v3476_v53 = vmax.f32 %v3207_v43, 0.0 }
 0x8eb   : > { %v3608_v60 = vpack.c.bf16 %v3476_v53, %v3475_v58  ;;  %6195 = vmatmul.msk.bf16.gmra.mxu3 %vm741_vm0, %v8252_v17 }
 0x8ee   : > { %v3209_v57 = vpop.f32.mrf.mxu3 }
 0x8ef   : > { %v3210_v37 = vadd.f32 %v8246_v48, %v3209_v57 }
 0x8f1   : > { %v3477_v61 = vmax.f32 %v3210_v37, 0.0 }
 0x8f6   : > { %v3211_v28 = vpop.f32.mrf.mxu3 }
 0x8f7   : > { %v3212_v49 = vadd.f32 %v8246_v48, %v3211_v28 }
 0x8f9   : > { %v3478_v8 = vmax.f32 %v3212_v49, 0.0 }
 0x8fb   : > { %v3609_v46 = vpack.c.bf16 %v3478_v8, %v3477_v61  ;;  %6196 = vmatmul.msk.bf16.gmra.mxu3 %vm741_vm0, %v8265_v20 }
 0x8fe   : > { %v3214_v11 = vpop.f32.mrf.mxu3 }
 0x8ff   : > { %v3215_v32 = vadd.f32 %v8246_v48, %v3214_v11 }
 0x901   : > { %v3479_v29 = vmax.f32 %v3215_v32, 0.0 }
 0x906   : > { %v3216_v51 = vpop.f32.mrf.mxu3 }
 0x907   : > { %v3217_v15 = vadd.f32 %v8246_v48, %v3216_v51 }
 0x909   : > { %v3480_v17 = vmax.f32 %v3217_v15, 0.0 }
 0x90b   : > { %v3610_v42 = vpack.c.bf16 %v3480_v17, %v3479_v29  ;;  %6197 = vmatmul.msk.bf16.gmra.mxu3 %vm741_vm0, %v8274_v16 }
 0x90e   : > { %v3219_v62 = vpop.f32.mrf.mxu3 }
 0x90f   : > { %v3220_v50 = vadd.f32 %v8246_v48, %v3219_v62 }
 0x911   : > { %v3481_v59 = vmax.f32 %v3220_v50, 0.0 }
 0x916   : > { %v3221_v19 = vpop.f32.mrf.mxu3 }
 0x917   : > { %v3222_v56 = vadd.f32 %v8246_v48, %v3221_v19 }
 0x919   : > { %v3482_v20 = vmax.f32 %v3222_v56, 0.0 }
 0x91b   : > { %v3611_v22 = vpack.c.bf16 %v3482_v20, %v3481_v59  ;;  %6198 = vmatmul.msk.bf16.gmra.mxu3 %vm741_vm0, %v8279_v47 }
 0x91e   : > { %v3224_v31 = vpop.f32.mrf.mxu3 }
 0x91f   : > { %v3225_v13 = vadd.f32 %v8246_v48, %v3224_v31 }
 0x921   : > { %v3483_v18 = vmax.f32 %v3225_v13, 0.0 }
 0x926   : > { %v3226_v3 = vpop.f32.mrf.mxu3 }
 0x927   : > { %v3227_v25 = vadd.f32 %v8246_v48, %v3226_v3 }
 0x929   : > { %v3484_v16 = vmax.f32 %v3227_v25, 0.0 }
 0x92b   : > { %v3612_v43 = vpack.c.bf16 %v3484_v16, %v3483_v18  ;;  %6199 = vmatmul.msk.bf16.gmra.mxu3 %vm741_vm0, %v8289_v9 }
 0x92e   : > { %v4586_v58 = vpop.f32.mrf.mxu3 }
 0x92f   : > { %v4587_v53 = vadd.f32 %v8029_v5, %v4586_v58 }
 0x931   : > { %v4890_v28 = vmax.f32 %v4587_v53, 0.0 }
 0x936   : > { %v4588_v57 = vpop.f32.mrf.mxu3 }
 0x937   : > { %v4589_v37 = vadd.f32 %v8029_v5, %v4588_v57 }
 0x939   : > { %v4891_v47 = vmax.f32 %v4589_v37, 0.0 }
 0x93b   : > { %6200 = vmatmul.msk.bf16.gmra.mxu3 %vm741_vm0, %v8299_v38  ;;  %v8339_v49 = vpack.c.bf16 %v4891_v47, %v4890_v28 }
 0x93e   : > { %v4591_v48 = vpop.f32.mrf.mxu3 }
 0x93f   : > { %v4592_v61 = vadd.f32 %v8029_v5, %v4591_v48 }
 0x941   : > { %v4892_v9 = vmax.f32 %v4592_v61, 0.0 }
 0x946   : > { %v4593_v8 = vpop.f32.mrf.mxu3 }
 0x947   : > { %v4594_v11 = vadd.f32 %v8029_v5, %v4593_v8 }
 0x949   : > { %v4893_v32 = vmax.f32 %v4594_v11, 0.0 }
 0x94b   : > { %6201 = vmatmul.msk.bf16.gmra.mxu3 %vm741_vm0, %v3607_v14  ;;  %v8344_v51 = vpack.c.bf16 %v4893_v32, %v4892_v9  ;;  %v5051_v32 = vld [vmem:[#allocation2] sm:$0x1] }
 0x94e   : > { %v4596_v15 = vpop.f32.mrf.mxu3 }
 0x94f   : > { %v4597_v29 = vadd.f32 %v8029_v5, %v4596_v15 }
 0x951   : > { %v4894_v62 = vmax.f32 %v4597_v29, 0.0 }
 0x956   : > { %v4598_v17 = vpop.f32.mrf.mxu3 }
 0x957   : > { %v4599_v38 = vadd.f32 %v8029_v5, %v4598_v17 }
 0x959   : > { %v4895_v50 = vmax.f32 %v4599_v38, 0.0 }
 0x95b   : > { %6202 = vmatmul.msk.bf16.gmra.mxu3 %vm741_vm0, %v3608_v60  ;;  %v8349_v19 = vpack.c.bf16 %v4895_v50, %v4894_v62  ;;  %v5126_v62 = vsel %vm5058_vm2, %v6975_v54, 0 }
 0x95e   : > { %v4601_v56 = vpop.f32.mrf.mxu3 }
 0x95f   : > { %v4602_v59 = vadd.f32 %v8029_v5, %v4601_v56 }
 0x961   : > { %v4896_v31 = vmax.f32 %v4602_v59, 0.0 }
 0x966   : > { %v4603_v20 = vpop.f32.mrf.mxu3 }
 0x967   : > { %v4604_v14 = vadd.f32 %v8029_v5, %v4603_v20  ;;  %v5117_v20 = vsel %vm5058_vm2, %v6931_v7, 0  ;;  %v5153_v7 = vsel %vm5058_vm2, %v7097_v55, 0 }
 0x969   : > { %v4897_v13 = vmax.f32 %v4604_v14, 0.0  ;;  %v5114_v14 = vsel %vm5058_vm2, %v6918_v36, 0 }
 0x96b   : > { %6203 = vmatmul.msk.bf16.gmra.mxu3 %vm741_vm0, %v3609_v46  ;;  %v8354_v3 = vpack.c.bf16 %v4897_v13, %v4896_v31  ;;  %v5111_v31 = vsel %vm5058_vm2, %v6905_v2, 0 }
 0x96e   : > { %v4606_v25 = vpop.f32.mrf.mxu3 }
 0x96f   : > { %v4607_v18 = vadd.f32 %v8029_v5, %v4606_v25  ;;  %v5150_v25 = vsel %vm5058_vm2, %v7084_v10, 0 }
 0x971   : > { %v4898_v58 = vmax.f32 %v4607_v18, 0.0 }
 0x976   : > { %v4608_v16 = vpop.f32.mrf.mxu3 }
 0x977   : > { %v4609_v60 = vadd.f32 %v8029_v5, %v4608_v16  ;;  %v8866_v16 = vld [vmem:[#allocation9_spill] sm:$0xff] }
 0x979   : > { %v4899_v53 = vmax.f32 %v4609_v60, 0.0  ;;  %v5144_v60 = vsel %vm5058_vm2, %v8866_v16, 0 }
 0x97b   : > { %6204 = vmatmul.msk.bf16.gmra.mxu3 %vm741_vm0, %v3610_v42  ;;  %v8359_v57 = vpack.c.bf16 %v4899_v53, %v4898_v58  ;;  %v6371_v42 = vmov 0   ;;  %v8867_v58 = vld [vmem:[#allocation8_spill] sm:$0xff] }
 0x97c   : > { %6283 = vset.pattern.permute.xlu0 %v6371_v42  ;;  %v5141_v53 = vsel %vm5058_vm2, %v8867_v58, 0  ;;  %v8871_v42 = vld [vmem:[#allocation16_spill] sm:$0xff] }
 0x97d   : > { %5054 = vperm.xlu0 %6283, %v5051_v32  }
 0x97e   : > { %v4611_v37 = vpop.f32.mrf.mxu3 }
 0x97f   : > { %v4612_v28 = vadd.f32 %v8029_v5, %v4611_v37  ;;  %v8868_v37 = vld [vmem:[#allocation7_spill] sm:$0xff] }
 0x981   : > { %v4900_v48 = vmax.f32 %v4612_v28, 0.0  ;;  %v5138_v28 = vsel %vm5058_vm2, %v8868_v37, 0 }
 0x986   : > { %v4613_v47 = vpop.f32.mrf.mxu3 }
 0x987   : > { %v4614_v46 = vadd.f32 %v8029_v5, %v4613_v47  ;;  %v8378_v5 = vld [vmem:[%s8795_s7] sm:$0x1]  ;;  %v8869_v47 = vld [vmem:[#allocation6_spill] sm:$0xff] }
 0x989   : > { %v4901_v61 = vmax.f32 %v4614_v46, 0.0  ;;  %v5135_v46 = vsel %vm5058_vm2, %v8869_v47, 0 }
 0x98b   : > { %6205 = vmatmul.msk.bf16.gmra.mxu3 %vm741_vm0, %v3611_v22  ;;  %v8364_v8 = vpack.c.bf16 %v4901_v61, %v4900_v48  ;;  %v5132_v22 = vsel %vm5058_vm2, %v7000_v1, 0  ;;  %v5123_v1 = vsel %vm5058_vm2, %v6962_v33, 0  ;;  %v8870_v48 = vld [vmem:[#allocation17_spill] sm:$0xff] }
 0x98c   : > { %v5180_v61 = vsel %vm5058_vm2, %v8870_v48, 0  ;;  %v8876_v48 = vld [vmem:[#allocation11_spill] sm:$0xff] }
 0x98e   : > { %v8366_v11 = vpop.f32.mrf.mxu3 }
 0x996   : > { %v8368_v9 = vpop.f32.mrf.mxu3 }
 0x99b   : > { %6206 = vmatmul.msk.bf16.gmra.mxu3 %vm741_vm0, %v3612_v43  ;;  %v5129_v43 = vsel %vm5058_vm2, %v6988_v24, 0  ;;  %v5120_v24 = vsel %vm5058_vm2, %v6949_v44, 0  ;;  %v5156_v44 = vsel %vm5058_vm2, %v7114_v41, 0  ;;  %v5147_v41 = vsel %vm5058_vm2, %v7071_v23, 0 }
 0x99e   : > { %v8371_v15 = vpop.f32.mrf.mxu3 }
 0x9a6   : > { %v8373_v29 = vpop.f32.mrf.mxu3 }
 0x9ab   : > { %6207 = vmatmul.msk.bf16.vlgmr.msrb.gmra.mxu3 %vm5058_vm2, %v8378_v5 }
 0x9ac   : > { %5472 = vmatpush.bf16.xpose.msrb.mxu3 %v5132_v22  ;;  %v5177_v22 = vsel %vm5058_vm2, %v8871_v42, 0  ;;  %v8877_v42 = vld [vmem:[#allocation10_spill] sm:$0xff] }
 0x9ae   : > { %v8384_v17 = vpop.f32.mrf.mxu3 }
 0x9b4   : > { %5473 = vmatpush.bf16.xpose.msrb.mxu3 %v5129_v43 }
 0x9b6   : > { %v8388_v38 = vpop.f32.mrf.mxu3 }
 0x9bb   : > { %6208 = vmatmul.msk.bf16.vlgmr.msra.gmra.mxu3 %vm5058_vm2, %v8378_v5 }
 0x9bc   : > { %5474 = vmatpush.bf16.xpose.msrb.mxu3 %v5126_v62  ;;  %v8872_v62 = vld [vmem:[#allocation15_spill] sm:$0xff] }
 0x9be   : > { %v8394_v50 = vpop.f32.mrf.mxu3 }
 0x9c4   : > { %5475 = vmatpush.bf16.xpose.msrb.mxu3 %v5123_v1  ;;  %v5174_v1 = vsel %vm5058_vm2, %v8872_v62, 0  ;;  %v8878_v62 = vld [vmem:[#allocation25_spill] sm:$0xff] }
 0x9c6   : > { %v8398_v56 = vpop.f32.mrf.mxu3 }
 0x9cc   : > { %5476 = vmatpush.bf16.xpose.msrb.mxu3 %v5120_v24 }
 0x9ce   : > { %v8402_v59 = vpop.f32.mrf.mxu3 }
 0x9d4   : > { %5477 = vmatpush.bf16.xpose.msrb.mxu3 %v5117_v20  ;;  %v8873_v20 = vld [vmem:[#allocation14_spill] sm:$0xff] }
 0x9d6   : > { %v8406_v54 = vpop.f32.mrf.mxu3 }
 0x9dc   : > { %5478 = vmatpush.bf16.xpose.msrb.mxu3 %v5114_v14  ;;  %v5171_v14 = vsel %vm5058_vm2, %v8873_v20, 0 }
 0x9de   : > { %v8410_v33 = vpop.f32.mrf.mxu3 }
 0x9e4   : > { %5479 = vmatpush.bf16.xpose.msrb.mxu3 %v5111_v31 }
 0x9e6   : > { %v8416_v13 = vpop.f32.mrf.mxu3 }
 0x9eb   : > { %6209 = vmatmul.msk.bf16.vlgmr.msrb.gmra.mxu3 %vm5058_vm2, %v8378_v5 }
 0x9ec   : > { %5485 = vmatpush.bf16.xpose.msra.mxu3 %v5156_v44 }
 0x9ee   : > { %v8422_v36 = vpop.f32.mrf.mxu3 }
 0x9ef   : > { %v5055_v44 = vpop.permute.xlu0 %5054 }
 0x9f4   : > { %5486 = vmatpush.bf16.xpose.msra.mxu3 %v5153_v7  ;;  %v8460_v7 = vperm.slane %v5055_v44, 0  ;;  %v8881_v44 = vld [vmem:[#allocation22_spill] sm:$0xff] }
 0x9f6   : > { %v8426_v2 = vpop.f32.mrf.mxu3 }
 0x9fc   : > { %5487 = vmatpush.bf16.xpose.msra.mxu3 %v5150_v25  ;;  %v8874_v25 = vld [vmem:[#allocation13_spill] sm:$0xff] }
 0x9fe   : > { %v8430_v18 = vpop.f32.mrf.mxu3 }
 0xa04   : > { %5488 = vmatpush.bf16.xpose.msra.mxu3 %v5147_v41  ;;  %v5168_v41 = vsel %vm5058_vm2, %v8874_v25, 0  ;;  %v5195_v25 = vsel %vm5058_vm2, %v8881_v44, 0  ;;  %v8889_v44 = vld [vmem:[#allocation30_spill] sm:$0xff] }
 0xa06   : > { %v8434_v55 = vpop.f32.mrf.mxu3 }
 0xa0c   : > { %5489 = vmatpush.bf16.xpose.msra.mxu3 %v5144_v60 }
 0xa0e   : > { %v8438_v10 = vpop.f32.mrf.mxu3 }
 0xa14   : > { %5490 = vmatpush.bf16.xpose.msra.mxu3 %v5141_v53 }
 0xa16   : > { %v8442_v23 = vpop.f32.mrf.mxu3 }
 0xa1c   : > { %5491 = vmatpush.bf16.xpose.msra.mxu3 %v5138_v28  ;;  %v8875_v28 = vld [vmem:[#allocation12_spill] sm:$0xff] }
 0xa1d   : > { %v5165_v47 = vsel %vm5058_vm2, %v8875_v28, 0 }
 0xa1e   : > { %v8448_v32 = vpop.f32.mrf.mxu3 }
 0xa24   : > { %5492 = vmatpush.bf16.xpose.msra.mxu3 %v5135_v46 }
 0xa26   : > { %v8454_v43 = vpop.f32.mrf.mxu3 }
 0xa2b   : > { %6210 = vmatmul.msk.bf16.vlgmr.msra.gmra.mxu3 %vm5058_vm2, %v8378_v5 }
 0xa2c   : > { %5498 = vmatpush.bf16.xpose.msrb.mxu3 %v5180_v61  ;;  %v5162_v61 = vsel %vm5058_vm2, %v8876_v48, 0  ;;  %v8885_v48 = vld [vmem:[#allocation18_spill] sm:$0xff] }
 0xa2e   : > { %v5455_v24 = vpop.f32.mrf.mxu3 }
 0xa2f   : > { %v5456_v58 = vadd.f32 %v5455_v24, %v8460_v7  ;;  %v8879_v24 = vld [vmem:[#allocation24_spill] sm:$0xff] }
 0xa30   : > { %v5201_v20 = vsel %vm5058_vm2, %v8879_v24, 0  ;;  %v8888_v24 = vld [vmem:[#allocation31_spill] sm:$0xff] }
 0xa34   : > { %5499 = vmatpush.bf16.xpose.msrb.mxu3 %v5177_v22  ;;  %v5159_v22 = vsel %vm5058_vm2, %v8877_v42, 0  ;;  %v8886_v42 = vld [vmem:[#allocation33_spill] sm:$0xff] }
 0xa36   : > { %v5457_v31 = vpop.f32.mrf.mxu3 }
 0xa3c   : > { %5500 = vmatpush.bf16.xpose.msrb.mxu3 %v5174_v1  ;;  %v5204_v1 = vsel %vm5058_vm2, %v8878_v62, 0  ;;  %v8887_v62 = vld [vmem:[#allocation32_spill] sm:$0xff] }
 0xa3e   : > { %v5468_v16 = vpop.f32.mrf.mxu3 }
 0xa3f   : > { %v5469_v60 = vadd.f32 %v5468_v16, %v8460_v7 }
 0xa41   : > { %v5670_v53 = vrot.slane %v5469_v60, 7 }
 0xa43   : > { %v5685_v37 = vsel %vm5684_vm3, %v5456_v58, %v5670_v53  ;;  %v8883_v58 = vld [vmem:[#allocation20_spill] sm:$0xff] }
 0xa44   : > { %5501 = vmatpush.bf16.xpose.msrb.mxu3 %v5171_v14  ;;  %v8880_v14 = vld [vmem:[#allocation23_spill] sm:$0xff]  ;;  %v5189_v53 = vsel %vm5058_vm2, %v8883_v58, 0 }
 0xa45   : > { %v5198_v31 = vsel %vm5058_vm2, %v8880_v14, 0 }
 0xa46   : > { %v5470_v46 = vpop.f32.mrf.mxu3 }
 0xa4c   : > { %5502 = vmatpush.bf16.xpose.msrb.mxu3 %v5168_v41  ;;  %v8882_v41 = vld [vmem:[#allocation21_spill] sm:$0xff] }
 0xa4d   : > { %v5192_v16 = vsel %vm5058_vm2, %v8882_v41, 0 }
 0xa54   : > { %5503 = vmatpush.bf16.xpose.msrb.mxu3 %v5165_v47  ;;  %v8884_v47 = vld [vmem:[#allocation19_spill] sm:$0xff] }
 0xa55   : > { %v5186_v46 = vsel %vm5058_vm2, %v8884_v47, 0  ;;  %v8890_v47 = vld [vmem:[#allocation29_spill] sm:$0xff] }
 0xa5c   : > { %5504 = vmatpush.bf16.xpose.msrb.mxu3 %v5162_v61  ;;  %v5183_v61 = vsel %vm5058_vm2, %v8885_v48, 0  ;;  %v8891_v48 = vld [vmem:[#allocation28_spill] sm:$0xff] }
 0xa64   : > { %5505 = vmatpush.bf16.xpose.msrb.mxu3 %v5159_v22  ;;  %v5228_v22 = vsel %vm5058_vm2, %v8886_v42, 0  ;;  %v8892_v42 = vld [vmem:[#allocation27_spill] sm:$0xff] }
 0xa6b   : > { %6211 = vmatmul.msk.bf16.vlgmr.msrb.gmra.mxu3 %vm5058_vm2, %v8378_v5 }
 0xa6c   : > { %5511 = vmatpush.bf16.xpose.msra.mxu3 %v5204_v1  ;;  %v5225_v1 = vsel %vm5058_vm2, %v8887_v62, 0  ;;  %v8893_v62 = vld [vmem:[#allocation26_spill] sm:$0xff] }
 0xa6e   : > { %v5481_v60 = vpop.f32.mrf.mxu3 }
 0xa6f   : > { %v5482_v14 = vadd.f32 %v5481_v60, %v8460_v7 }
 0xa74   : > { %5512 = vmatpush.bf16.xpose.msra.mxu3 %v5201_v20  ;;  %v5222_v20 = vsel %vm5058_vm2, %v8888_v24, 0  ;;  %v8894_v24 = vld [vmem:[#allocation41_spill] sm:$0xff] }
 0xa76   : > { %v5483_v28 = vpop.f32.mrf.mxu3 }
 0xa7c   : > { %5513 = vmatpush.bf16.xpose.msra.mxu3 %v5198_v31 }
 0xa84   : > { %5514 = vmatpush.bf16.xpose.msra.mxu3 %v5195_v25  ;;  %v5219_v25 = vsel %vm5058_vm2, %v8889_v44, 0 }
 0xa8c   : > { %5515 = vmatpush.bf16.xpose.msra.mxu3 %v5192_v16  ;;  %v5671_v16 = vrot.slane %v5482_v14, 6 }
 0xa94   : > { %5516 = vmatpush.bf16.xpose.msra.mxu3 %v5189_v53 }
 0xa9c   : > { %5517 = vmatpush.bf16.xpose.msra.mxu3 %v5186_v46  ;;  %v5216_v46 = vsel %vm5058_vm2, %v8890_v47, 0  ;;  %v8899_v47 = vld [vmem:[#allocation36_spill] sm:$0xff] }
 0xaa4   : > { %5518 = vmatpush.bf16.xpose.msra.mxu3 %v5183_v61  ;;  %v5213_v61 = vsel %vm5058_vm2, %v8891_v48, 0  ;;  %v8900_v48 = vld [vmem:[#allocation35_spill] sm:$0xff] }
 0xaab   : > { %6212 = vmatmul.msk.bf16.vlgmr.msra.gmra.mxu3 %vm5058_vm2, %v8378_v5 }
 0xaac   : > { %5524 = vmatpush.bf16.xpose.msrb.mxu3 %v5228_v22  ;;  %v5210_v22 = vsel %vm5058_vm2, %v8892_v42, 0  ;;  %v8901_v42 = vld [vmem:[#allocation34_spill] sm:$0xff] }
 0xaae   : > { %v5494_v31 = vpop.f32.mrf.mxu3 }
 0xaaf   : > { %v5495_v41 = vadd.f32 %v5494_v31, %v8460_v7  ;;  %v8896_v31 = vld [vmem:[#allocation39_spill] sm:$0xff] }
 0xab0   : > { %v5246_v44 = vsel %vm5058_vm2, %v8896_v31, 0 }
 0xab1   : > { %v5672_v58 = vrot.slane %v5495_v41, 5 }
 0xab3   : > { %v5687_v53 = vsel %vm5686_vm4, %v5671_v16, %v5672_v58  ;;  %v8898_v16 = vld [vmem:[#allocation37_spill] sm:$0xff] }
 0xab4   : > { %5525 = vmatpush.bf16.xpose.msrb.mxu3 %v5225_v1  ;;  %v8505_v28 = vsel %vm5688_vm5, %v5685_v37, %v5687_v53  ;;  %v5207_v1 = vsel %vm5058_vm2, %v8893_v62, 0  ;;  %v5252_v37 = vsel %vm5058_vm2, %v8894_v24, 0  ;;  %v5240_v58 = vsel %vm5058_vm2, %v8898_v16, 0  ;;  %v8902_v62 = vld [vmem:[#allocation49_spill] sm:$0xff]  ;;  %v8903_v24 = vld [vmem:[#allocation48_spill] sm:$0xff] }
 0xab6   : > { %v5496_v60 = vpop.f32.mrf.mxu3 }
 0xabc   : > { %5526 = vmatpush.bf16.xpose.msrb.mxu3 %v5222_v20  ;;  %v8895_v20 = vld [vmem:[#allocation40_spill] sm:$0xff] }
 0xabd   : > { %v5249_v14 = vsel %vm5058_vm2, %v8895_v20, 0  ;;  %v8904_v20 = vld [vmem:[#allocation47_spill] sm:$0xff] }
 0xac4   : > { %5527 = vmatpush.bf16.xpose.msrb.mxu3 %v5219_v25  ;;  %v8897_v25 = vld [vmem:[#allocation38_spill] sm:$0xff] }
 0xac5   : > { %v5243_v41 = vsel %vm5058_vm2, %v8897_v25, 0  ;;  %v8905_v25 = vld [vmem:[#allocation46_spill] sm:$0xff] }
 0xacc   : > { %5528 = vmatpush.bf16.xpose.msrb.mxu3 %v5216_v46  ;;  %v5237_v46 = vsel %vm5058_vm2, %v8899_v47, 0 }
 0xad4   : > { %5529 = vmatpush.bf16.xpose.msrb.mxu3 %v5213_v61  ;;  %v5234_v61 = vsel %vm5058_vm2, %v8900_v48, 0 }
 0xadc   : > { %5530 = vmatpush.bf16.xpose.msrb.mxu3 %v5210_v22  ;;  %v5231_v22 = vsel %vm5058_vm2, %v8901_v42, 0  ;;  %v8907_v42 = vld [vmem:[#allocation44_spill] sm:$0xff] }
 0xae4   : > { %5531 = vmatpush.bf16.xpose.msrb.mxu3 %v5207_v1  ;;  %v5276_v1 = vsel %vm5058_vm2, %v8902_v62, 0 }
 0xaeb   : > { %6213 = vmatmul.msk.bf16.vlgmr.msrb.gmra.mxu3 %vm5058_vm2, %v8378_v5 }
 0xaec   : > { %5537 = vmatpush.bf16.xpose.msra.mxu3 %v5252_v37  ;;  %v5273_v37 = vsel %vm5058_vm2, %v8903_v24, 0 }
 0xaee   : > { %v5507_v53 = vpop.f32.mrf.mxu3 }
 0xaef   : > { %v5508_v31 = vadd.f32 %v5507_v53, %v8460_v7  ;;  %v5261_v53 = vsel %vm5058_vm2, %v8907_v42, 0 }
 0xaf4   : > { %5538 = vmatpush.bf16.xpose.msra.mxu3 %v5249_v14  ;;  %v5270_v14 = vsel %vm5058_vm2, %v8904_v20, 0 }
 0xaf6   : > { %v5509_v60 = vpop.f32.mrf.mxu3 }
 0xaf7   : > { %v8906_v60 = vld [vmem:[#allocation45_spill] sm:$0xff] }
 0xaf8   : > { %v5264_v48 = vsel %vm5058_vm2, %v8906_v60, 0 }
 0xafc   : > { %5539 = vmatpush.bf16.xpose.msra.mxu3 %v5246_v44 }
 0xb04   : > { %5540 = vmatpush.bf16.xpose.msra.mxu3 %v5243_v41  ;;  %v5267_v41 = vsel %vm5058_vm2, %v8905_v25, 0 }
 0xb0c   : > { %5541 = vmatpush.bf16.xpose.msra.mxu3 %v5240_v58  ;;  %v5673_v58 = vrot.slane %v5508_v31, 4 }
 0xb14   : > { %5542 = vmatpush.bf16.xpose.msra.mxu3 %v5237_v46 }
 0xb1c   : > { %5543 = vmatpush.bf16.xpose.msra.mxu3 %v5234_v61 }
 0xb24   : > { %5544 = vmatpush.bf16.xpose.msra.mxu3 %v5231_v22  ;;  %v8908_v22 = vld [vmem:[#allocation43_spill] sm:$0xff] }
 0xb25   : > { %v5258_v62 = vsel %vm5058_vm2, %v8908_v22, 0 }
 0xb2b   : > { %6214 = vmatmul.msk.bf16.vlgmr.msra.gmra.mxu3 %vm5058_vm2, %v8378_v5 }
 0xb2c   : > { %5550 = vmatpush.bf16.xpose.msrb.mxu3 %v5276_v1  ;;  %v8909_v1 = vld [vmem:[#allocation42_spill] sm:$0xff] }
 0xb2d   : > { %v5255_v24 = vsel %vm5058_vm2, %v8909_v1, 0 }
 0xb2e   : > { %v5520_v44 = vpop.f32.mrf.mxu3 }
 0xb2f   : > { %v5521_v16 = vadd.f32 %v5520_v44, %v8460_v7  ;;  %v8912_v44 = vld [vmem:[#allocation55_spill] sm:$0xff] }
 0xb30   : > { %v5294_v25 = vsel %vm5058_vm2, %v8912_v44, 0 }
 0xb31   : > { %v5674_v47 = vrot.slane %v5521_v16, 3 }
 0xb33   : > { %v5691_v46 = vsel %vm5690_vm6, %v5673_v58, %v5674_v47  ;;  %v8914_v58 = vld [vmem:[#allocation53_spill] sm:$0xff] }
 0xb34   : > { %5551 = vmatpush.bf16.xpose.msrb.mxu3 %v5273_v37  ;;  %v8910_v37 = vld [vmem:[#allocation57_spill] sm:$0xff]  ;;  %v5288_v47 = vsel %vm5058_vm2, %v8914_v58, 0 }
 0xb35   : > { %v5300_v20 = vsel %vm5058_vm2, %v8910_v37, 0 }
 0xb36   : > { %v5522_v61 = vpop.f32.mrf.mxu3 }
 0xb3c   : > { %5552 = vmatpush.bf16.xpose.msrb.mxu3 %v5270_v14  ;;  %v8911_v14 = vld [vmem:[#allocation56_spill] sm:$0xff] }
 0xb3d   : > { %v5297_v31 = vsel %vm5058_vm2, %v8911_v14, 0 }
 0xb44   : > { %5553 = vmatpush.bf16.xpose.msrb.mxu3 %v5267_v41  ;;  %v8913_v41 = vld [vmem:[#allocation54_spill] sm:$0xff] }
 0xb45   : > { %v5291_v16 = vsel %vm5058_vm2, %v8913_v41, 0 }
 0xb4c   : > { %5554 = vmatpush.bf16.xpose.msrb.mxu3 %v5264_v48  ;;  %v8915_v48 = vld [vmem:[#allocation52_spill] sm:$0xff] }
 0xb4d   : > { %v5285_v61 = vsel %vm5058_vm2, %v8915_v48, 0 }
 0xb54   : > { %5555 = vmatpush.bf16.xpose.msrb.mxu3 %v5261_v53  ;;  %v8916_v53 = vld [vmem:[#allocation51_spill] sm:$0xff] }
 0xb55   : > { %v5282_v22 = vsel %vm5058_vm2, %v8916_v53, 0 }
 0xb5c   : > { %5556 = vmatpush.bf16.xpose.msrb.mxu3 %v5258_v62  ;;  %v8917_v62 = vld [vmem:[#allocation50_spill] sm:$0xff] }
 0xb5d   : > { %v5279_v1 = vsel %vm5058_vm2, %v8917_v62, 0 }
 0xb64   : > { %5557 = vmatpush.bf16.xpose.msrb.mxu3 %v5255_v24  ;;  %v8918_v24 = vld [vmem:[#allocation65_spill] sm:$0xff] }
 0xb65   : > { %v5324_v37 = vsel %vm5058_vm2, %v8918_v24, 0  ;;  %v8923_v24 = vld [vmem:[#allocation60_spill] sm:$0xff] }
 0xb6b   : > { %6215 = vmatmul.msk.bf16.vlgmr.msrb.gmra.mxu3 %vm5058_vm2, %v8378_v5 }
 0xb6c   : > { %5563 = vmatpush.bf16.xpose.msra.mxu3 %v5300_v20  ;;  %v8919_v20 = vld [vmem:[#allocation64_spill] sm:$0xff] }
 0xb6d   : > { %v5321_v14 = vsel %vm5058_vm2, %v8919_v20, 0  ;;  %v8924_v20 = vld [vmem:[#allocation59_spill] sm:$0xff] }
 0xb6e   : > { %v5533_v60 = vpop.f32.mrf.mxu3 }
 0xb74   : > { %5564 = vmatpush.bf16.xpose.msra.mxu3 %v5297_v31  ;;  %v8920_v31 = vld [vmem:[#allocation63_spill] sm:$0xff] }
 0xb75   : > { %v5318_v44 = vsel %vm5058_vm2, %v8920_v31, 0  ;;  %v5348_v31 = vsel %vm5058_vm2, %v8069_v35, 0 }
 0xb76   : > { %v5535_v42 = vpop.f32.mrf.mxu3 }
 0xb7c   : > { %5565 = vmatpush.bf16.xpose.msra.mxu3 %v5294_v25  ;;  %v5534_v25 = vadd.f32 %v5533_v60, %v8460_v7 }
 0xb7e   : > { %v5675_v48 = vrot.slane %v5534_v25, 2  ;;  %v5342_v25 = vsel %vm5058_vm2, %v8039_v39, 0  ;;  %v4571_v39 = vpop.f32.mrf.mxu2 }
 0xb84   : > { %5566 = vmatpush.bf16.xpose.msra.mxu3 %v5291_v16  ;;  %v8921_v16 = vld [vmem:[#allocation62_spill] sm:$0xff] }
 0xb85   : > { %v5315_v58 = vsel %vm5058_vm2, %v8921_v16, 0 }
 0xb8c   : > { %5567 = vmatpush.bf16.xpose.msra.mxu3 %v5288_v47 }
 0xb94   : > { %5568 = vmatpush.bf16.xpose.msra.mxu3 %v5285_v61 }
 0xb9c   : > { %5569 = vmatpush.bf16.xpose.msra.mxu3 %v5282_v22  ;;  %v8922_v22 = vld [vmem:[#allocation61_spill] sm:$0xff] }
 0xb9d   : > { %v5312_v62 = vsel %vm5058_vm2, %v8922_v22, 0 }
 0xba4   : > { %5570 = vmatpush.bf16.xpose.msra.mxu3 %v5279_v1 }
 0xbab   : > { %6216 = vmatmul.msk.bf16.vlgmr.msra.gmra.mxu3 %vm5058_vm2, %v8378_v5 }
 0xbac   : > { %5576 = vmatpush.bf16.xpose.msrb.mxu3 %v5324_v37  ;;  %v5309_v37 = vsel %vm5058_vm2, %v8923_v24, 0  ;;  %v5369_v24 = vsel %vm5058_vm2, %v8175_v40, 0 }
 0xbae   : > { %v5546_v41 = vpop.f32.mrf.mxu3 }
 0xbaf   : > { %v5547_v47 = vadd.f32 %v5546_v41, %v8460_v7  ;;  %v8926_v41 = vld [vmem:[#allocation70_spill] sm:$0xff] }
 0xbb0   : > { %v5339_v16 = vsel %vm5058_vm2, %v8926_v41, 0  ;;  %v5360_v41 = vsel %vm5058_vm2, %v8133_v6, 0 }
 0xbb1   : > { %v5676_v61 = vrot.slane %v5547_v47, 1 }
 0xbb3   : > { %v5693_v42 = vsel %vm5692_vm7, %v5675_v48, %v5676_v61  ;;  %v8928_v48 = vld [vmem:[#allocation68_spill] sm:$0xff] }
 0xbb4   : > { %5577 = vmatpush.bf16.xpose.msrb.mxu3 %v5321_v14  ;;  %v5695_v53 = vsel %vm5694_vm8, %v5691_v46, %v5693_v42  ;;  %v5306_v14 = vsel %vm5058_vm2, %v8924_v20, 0  ;;  %v8925_v46 = vld [vmem:[#allocation58_spill] sm:$0xff]  ;;  %v5333_v61 = vsel %vm5058_vm2, %v8928_v48, 0  ;;  %v5366_v20 = vsel %vm5058_vm2, %v8164_v4, 0 }
 0xbb5   : > { %v5697_v60 = vsel %vm5696_vm9, %v8505_v28, %v5695_v53  ;;  %v5303_v28 = vsel %vm5058_vm2, %v8925_v46, 0  ;;  %v5354_v48 = vsel %vm5058_vm2, %v8102_v63, 0 }
 0xbb6   : > { %v5548_v1 = vpop.f32.mrf.mxu3  ;;  %5707 = vst [vmem:[%s8593_s29] sm:$0xff] %v5697_v60  ;;  %v8930_v60 = vld [vmem:[#allocation66_spill] sm:$0xff] }
 0xbb7   : > { %v5327_v22 = vsel %vm5058_vm2, %v8930_v60, 0  ;;  %v4573_v1 = vpop.f32.mrf.mxu2 }
 0xbbc   : > { %5578 = vmatpush.bf16.xpose.msrb.mxu3 %v5318_v44  ;;  %v5345_v44 = vsel %vm5058_vm2, %v8053_v21, 0  ;;  %v8929_v21 = vld [vmem:[#allocation67_spill] sm:$0xff] }
 0xbbd   : > { %v5330_v53 = vsel %vm5058_vm2, %v8929_v21, 0 }
 0xbc4   : > { %5579 = vmatpush.bf16.xpose.msrb.mxu3 %v5315_v58  ;;  %v8927_v58 = vld [vmem:[#allocation69_spill] sm:$0xff] }
 0xbc5   : > { %v5336_v47 = vsel %vm5058_vm2, %v8927_v58, 0  ;;  %v8642_v58 = vld [vmem:[%s8794_s6] ss:$0 sm:$0xff] }
 0xbcc   : > { %5580 = vmatpush.bf16.xpose.msrb.mxu3 %v5312_v62  ;;  %v5372_v62 = vsel %vm5058_vm2, %v8192_v26, 0 }
 0xbd4   : > { %5581 = vmatpush.bf16.xpose.msrb.mxu3 %v5309_v37  ;;  %v4576_v37 = vpop.f32.mrf.mxu2 }
 0xbd5   : > { %v4577_v21 = vadd.f32 %v8642_v58, %v4576_v37 }
 0xbdc   : > { %5582 = vmatpush.bf16.xpose.msrb.mxu3 %v5306_v14  ;;  %v4578_v14 = vpop.f32.mrf.mxu2 }
 0xbe4   : > { %5583 = vmatpush.bf16.xpose.msrb.mxu3 %v5303_v28  ;;  %v5363_v28 = vsel %vm5058_vm2, %v8148_v27, 0  ;;  %v4581_v40 = vpop.f32.mrf.mxu2 }
 0xbeb   : > { %6217 = vmatmul.msk.bf16.vlgmr.msrb.gmra.mxu3 %vm5058_vm2, %v8378_v5 }
 0xbec   : > { %5589 = vmatpush.bf16.xpose.msra.mxu3 %v5348_v31  ;;  %v4583_v27 = vpop.f32.mrf.mxu2 }
 0xbee   : > { %v5559_v35 = vpop.f32.mrf.mxu3 }
 0xbef   : > { %v5560_v31 = vadd.f32 %v5559_v35, %v8460_v7  ;;  %v4582_v35 = vadd.f32 %v8642_v58, %v4581_v40  ;;  %v5381_v40 = vsel %vm5058_vm2, %v8231_v12, 0  ;;  %v4617_v12 = vadd.f32 %v8642_v58, %v8366_v11 }
 0xbf4   : > { %5590 = vmatpush.bf16.xpose.msra.mxu3 %v5345_v44 }
 0xbf6   : > { %v5561_v42 = vpop.f32.mrf.mxu3 }
 0xbf7   : > { %v4579_v42 = vadd.f32 %v8642_v58, %v4578_v14 }
 0xbfc   : > { %5591 = vmatpush.bf16.xpose.msra.mxu3 %v5342_v25 }
 0xc04   : > { %5592 = vmatpush.bf16.xpose.msra.mxu3 %v5339_v16  ;;  %v5357_v16 = vsel %vm5058_vm2, %v8119_v52, 0 }
 0xc0c   : > { %5593 = vmatpush.bf16.xpose.msra.mxu3 %v5336_v47  ;;  %v4584_v47 = vadd.f32 %v8642_v58, %v4583_v27 }
 0xc0e   : > { %v4889_v6 = vmax.f32 %v4584_v47, 0.0 }
 0xc14   : > { %5594 = vmatpush.bf16.xpose.msra.mxu3 %v5333_v61  ;;  %v4888_v61 = vmax.f32 %v4582_v35, 0.0 }
 0xc16   : > { %v5033_v52 = vpack.c.bf16 %v4889_v6, %v4888_v61  ;;  %v4902_v6 = vmax.f32 %v4617_v12, 0.0 }
 0xc1c   : > { %5595 = vmatpush.bf16.xpose.msra.mxu3 %v5330_v53  ;;  %v8931_v53 = vld [vmem:[#allocation71_spill] sm:$0xff] }
 0xc1d   : > { %v5351_v60 = vsel %vm5058_vm2, %v8931_v53, 0 }
 0xc24   : > { %5596 = vmatpush.bf16.xpose.msra.mxu3 %v5327_v22  ;;  %v4887_v22 = vmax.f32 %v4579_v42, 0.0  ;;  %v5411_v42 = vsel %vm5058_vm2, %v8359_v57, 0  ;;  %v4664_v57 = vadd.f32 %v8642_v58, %v8454_v43 }
 0xc2b   : > { %6218 = vmatmul.msk.bf16.vlgmr.msra.gmra.mxu3 %vm5058_vm2, %v8378_v5 }
 0xc2c   : > { %5602 = vmatpush.bf16.xpose.msrb.mxu3 %v5372_v62  ;;  %v5396_v62 = vsel %vm5058_vm2, %v5033_v52, 0 }
 0xc2e   : > { %v5572_v46 = vpop.f32.mrf.mxu3 }
 0xc2f   : > { %v5573_v26 = vadd.f32 %v5572_v46, %v8460_v7  ;;  %v4572_v46 = vadd.f32 %v8642_v58, %v4571_v39 }
 0xc31   : > { %v5677_v44 = vrot.slane %v5573_v26, 7 }
 0xc33   : > { %v8633_v25 = vsel %vm5684_vm3, %v5560_v31, %v5677_v44  ;;  %v5387_v44 = vsel %vm5058_vm2, %v8262_v0, 0  ;;  %v5378_v0 = vsel %vm5058_vm2, %v8218_v30, 0 }
 0xc34   : > { %5603 = vmatpush.bf16.xpose.msrb.mxu3 %v5369_v24  ;;  %v4886_v24 = vmax.f32 %v4577_v21, 0.0 }
 0xc36   : > { %v5574_v4 = vpop.f32.mrf.mxu3  ;;  %v5032_v63 = vpack.c.bf16 %v4887_v22, %v4886_v24  ;;  %v5405_v24 = vsel %vm5058_vm2, %v8349_v19, 0  ;;  %v4657_v19 = vadd.f32 %v8642_v58, %v8438_v10 }
 0xc37   : > { %v4624_v4 = vadd.f32 %v8642_v58, %v8373_v29 }
 0xc38   : > { %v5393_v37 = vsel %vm5058_vm2, %v5032_v63, 0  ;;  %v5402_v63 = vsel %vm5058_vm2, %v8344_v51, 0  ;;  %v4654_v51 = vadd.f32 %v8642_v58, %v8434_v55 }
 0xc39   : > { %v4905_v27 = vmax.f32 %v4624_v4, 0.0 }
 0xc3a   : > { %v4917_v10 = vmax.f32 %v4654_v51, 0.0 }
 0xc3c   : > { %5604 = vmatpush.bf16.xpose.msrb.mxu3 %v5366_v20  ;;  %v4574_v20 = vadd.f32 %v8642_v58, %v4573_v1  ;;  %v5384_v1 = vsel %vm5058_vm2, %v8249_v45, 0  ;;  %v4619_v45 = vadd.f32 %v8642_v58, %v8368_v9  ;;  %v5414_v9 = vsel %vm5058_vm2, %v8364_v8, 0 }
 0xc3d   : > { %v5408_v8 = vsel %vm5058_vm2, %v8354_v3, 0  ;;  %v4659_v3 = vadd.f32 %v8642_v58, %v8442_v23  ;;  %v4652_v23 = vadd.f32 %v8642_v58, %v8430_v18 }
 0xc3e   : > { %v4885_v14 = vmax.f32 %v4574_v20, 0.0  ;;  %v4903_v29 = vmax.f32 %v4619_v45, 0.0  ;;  %v4662_v20 = vadd.f32 %v8642_v58, %v8448_v32  ;;  %v4637_v45 = vadd.f32 %v8642_v58, %v8402_v59 }
 0xc3f   : > { %v4919_v43 = vmax.f32 %v4659_v3, 0.0  ;;  %v4629_v59 = vadd.f32 %v8642_v58, %v8388_v38 }
 0xc40   : > { %v5040_v30 = vpack.c.bf16 %v4903_v29, %v4902_v6 }
 0xc42   : > { %v5417_v61 = vsel %vm5058_vm2, %v5040_v30, 0 }
 0xc44   : > { %5605 = vmatpush.bf16.xpose.msrb.mxu3 %v5363_v28  ;;  %v4884_v28 = vmax.f32 %v4572_v46, 0.0  ;;  %v4920_v46 = vmax.f32 %v4662_v20, 0.0 }
 0xc46   : > { %v5031_v26 = vpack.c.bf16 %v4885_v14, %v4884_v28  ;;  %v4918_v28 = vmax.f32 %v4657_v19, 0.0 }
 0xc48   : > { %v5390_v31 = vsel %vm5058_vm2, %v5031_v26, 0  ;;  %v5048_v26 = vpack.c.bf16 %v4919_v43, %v4918_v28 }
 0xc4c   : > { %5606 = vmatpush.bf16.xpose.msrb.mxu3 %v5360_v41 }
 0xc54   : > { %5607 = vmatpush.bf16.xpose.msrb.mxu3 %v5357_v16  ;;  %v4622_v16 = vadd.f32 %v8642_v58, %v8371_v15 }
 0xc56   : > { %v4904_v47 = vmax.f32 %v4622_v16, 0.0  ;;  %v4642_v16 = vadd.f32 %v8642_v58, %v8410_v33  ;;  %v4634_v33 = vadd.f32 %v8642_v58, %v8398_v56 }
 0xc58   : > { %v5041_v35 = vpack.c.bf16 %v4905_v27, %v4904_v47  ;;  %v4909_v6 = vmax.f32 %v4634_v33, 0.0 }
 0xc5a   : > { %v5420_v15 = vsel %vm5058_vm2, %v5041_v35, 0 }
 0xc5c   : > { %5608 = vmatpush.bf16.xpose.msrb.mxu3 %v5354_v48  ;;  %v5375_v48 = vsel %vm5058_vm2, %v8205_v34, 0 }
 0xc64   : > { %5609 = vmatpush.bf16.xpose.msrb.mxu3 %v5351_v60 }
 0xc6b   : > { %6219 = vmatmul.msk.bf16.vlgmr.msrb.gmra.mxu3 %vm5058_vm2, %v8378_v5 }
 0xc6c   : > { %5615 = vmatpush.bf16.xpose.msra.mxu3 %v5396_v62 }
 0xc6e   : > { %v5585_v39 = vpop.f32.mrf.mxu3 }
 0xc6f   : > { %v5586_v11 = vadd.f32 %v5585_v39, %v8460_v7  ;;  %v4647_v39 = vadd.f32 %v8642_v58, %v8422_v36  ;;  %v4639_v36 = vadd.f32 %v8642_v58, %v8406_v54 }
 0xc71   : > { %v5678_v21 = vrot.slane %v5586_v11, 6  ;;  %v4914_v18 = vmax.f32 %v4647_v39, 0.0  ;;  %v4911_v35 = vmax.f32 %v4639_v36, 0.0  ;;  %v4627_v11 = vadd.f32 %v8642_v58, %v8384_v17 }
 0xc74   : > { %5616 = vmatpush.bf16.xpose.msra.mxu3 %v5393_v37  ;;  %v5399_v37 = vsel %vm5058_vm2, %v8339_v49, 0  ;;  %v4916_v49 = vmax.f32 %v4652_v23, 0.0 }
 0xc76   : > { %v5587_v41 = vpop.f32.mrf.mxu3 }
 0xc77   : > { %v4644_v41 = vadd.f32 %v8642_v58, %v8416_v13 }
 0xc7c   : > { %5617 = vmatpush.bf16.xpose.msra.mxu3 %v5390_v31  ;;  %v5441_v31 = vsel %vm5058_vm2, %v5048_v26, 0 }
 0xc84   : > { %5618 = vmatpush.bf16.xpose.msra.mxu3 %v5387_v44  ;;  %v4649_v44 = vadd.f32 %v8642_v58, %v8426_v2  ;;  %v4912_v2 = vmax.f32 %v4642_v16, 0.0 }
 0xc86   : > { %v4915_v55 = vmax.f32 %v4649_v44, 0.0 }
 0xc88   : > { %v5046_v4 = vpack.c.bf16 %v4915_v55, %v4914_v18 }
 0xc8a   : > { %v5435_v27 = vsel %vm5058_vm2, %v5046_v4, 0 }
 0xc8c   : > { %5619 = vmatpush.bf16.xpose.msra.mxu3 %v5384_v1  ;;  %v5047_v1 = vpack.c.bf16 %v4917_v10, %v4916_v49 }
 0xc94   : > { %5620 = vmatpush.bf16.xpose.msra.mxu3 %v5381_v40  ;;  %v5438_v40 = vsel %vm5058_vm2, %v5047_v1, 0 }
 0xc9c   : > { %5621 = vmatpush.bf16.xpose.msra.mxu3 %v5378_v0  ;;  %v4913_v0 = vmax.f32 %v4644_v41, 0.0 }
 0xc9e   : > { %v5045_v47 = vpack.c.bf16 %v4913_v0, %v4912_v2 }
 0xca0   : > { %v5432_v12 = vsel %vm5058_vm2, %v5045_v47, 0 }
 0xca4   : > { %5622 = vmatpush.bf16.xpose.msra.mxu3 %v5375_v48  ;;  %v4910_v48 = vmax.f32 %v4637_v45, 0.0 }
 0xca6   : > { %v5044_v29 = vpack.c.bf16 %v4911_v35, %v4910_v48 }
 0xca8   : > { %v5429_v54 = vsel %vm5058_vm2, %v5044_v29, 0 }
 0xcab   : > { %6220 = vmatmul.msk.bf16.vlgmr.msra.gmra.mxu3 %vm5058_vm2, %v8378_v5 }
 0xcac   : > { %5628 = vmatpush.bf16.xpose.msrb.mxu3 %v5420_v15  ;;  %v4632_v15 = vadd.f32 %v8642_v58, %v8394_v50 }
 0xcae   : > { %v5598_v34 = vpop.f32.mrf.mxu3 }
 0xcaf   : > { %v5599_v52 = vadd.f32 %v5598_v34, %v8460_v7  ;;  %v4907_v34 = vmax.f32 %v4629_v59, 0.0 }
 0xcb1   : > { %v5679_v53 = vrot.slane %v5599_v52, 5 }
 0xcb3   : > { %v5699_v60 = vsel %vm5686_vm4, %v5678_v21, %v5679_v53 }
 0xcb4   : > { %5629 = vmatpush.bf16.xpose.msrb.mxu3 %v5417_v61  ;;  %v8690_v22 = vsel %vm5688_vm5, %v8633_v25, %v5699_v60  ;;  %v4921_v25 = vmax.f32 %v4664_v57, 0.0  ;;  %v4908_v61 = vmax.f32 %v4632_v15, 0.0 }
 0xcb6   : > { %v5600_v62 = vpop.f32.mrf.mxu3  ;;  %v5049_v14 = vpack.c.bf16 %v4921_v25, %v4920_v46 }
 0xcb8   : > { %v5444_v32 = vsel %vm5058_vm2, %v5049_v14, 0 }
 0xcbc   : > { %5630 = vmatpush.bf16.xpose.msrb.mxu3 %v5414_v9  ;;  %v5043_v9 = vpack.c.bf16 %v4909_v6, %v4908_v61 }
 0xcbe   : > { %v5426_v56 = vsel %vm5058_vm2, %v5043_v9, 0 }
 0xcc4   : > { %5631 = vmatpush.bf16.xpose.msrb.mxu3 %v5411_v42  ;;  %v4906_v42 = vmax.f32 %v4627_v11, 0.0 }
 0xcc6   : > { %v5042_v50 = vpack.c.bf16 %v4907_v34, %v4906_v42 }
 0xcc8   : > { %v5423_v52 = vsel %vm5058_vm2, %v5042_v50, 0 }
 0xccc   : > { %5632 = vmatpush.bf16.xpose.msrb.mxu3 %v5408_v8 }
 0xcd4   : > { %5633 = vmatpush.bf16.xpose.msrb.mxu3 %v5405_v24 }
 0xcdc   : > { %5634 = vmatpush.bf16.xpose.msrb.mxu3 %v5402_v63 }
 0xce4   : > { %5635 = vmatpush.bf16.xpose.msrb.mxu3 %v5399_v37 }
 0xceb   : > { %6221 = vmatmul.msk.bf16.vlgmr.msrb.gmra.mxu3 %vm5058_vm2, %v8378_v5 }
 0xcec   : > { %5641 = vmatpush.bf16.xpose.msra.mxu3 %v5444_v32 }
 0xcee   : > { %v5611_v13 = vpop.f32.mrf.mxu3 }
 0xcef   : > { %v5612_v21 = vadd.f32 %v5611_v13, %v8460_v7 }
 0xcf1   : > { %v5680_v17 = vrot.slane %v5612_v21, 4 }
 0xcf4   : > { %5642 = vmatpush.bf16.xpose.msra.mxu3 %v5441_v31 }
 0xcf6   : > { %v5613_v30 = vpop.f32.mrf.mxu3 }
 0xcfc   : > { %5643 = vmatpush.bf16.xpose.msra.mxu3 %v5438_v40 }
 0xd04   : > { %5644 = vmatpush.bf16.xpose.msra.mxu3 %v5435_v27 }
 0xd0c   : > { %5645 = vmatpush.bf16.xpose.msra.mxu3 %v5432_v12 }
 0xd14   : > { %5646 = vmatpush.bf16.xpose.msra.mxu3 %v5429_v54 }
 0xd1c   : > { %5647 = vmatpush.bf16.xpose.msra.mxu3 %v5426_v56 }
 0xd24   : > { %5648 = vmatpush.bf16.xpose.msra.mxu3 %v5423_v52 }
 0xd2b   : > { %6222 = vmatmul.msk.bf16.vlgmr.msra.gmra.mxu3 %vm5058_vm2, %v8378_v5 }
 0xd2e   : > { %v5624_v38 = vpop.f32.mrf.mxu3 }
 0xd2f   : > { %v5625_v53 = vadd.f32 %v5624_v38, %v8460_v7 }
 0xd31   : > { %v5681_v58 = vrot.slane %v5625_v53, 3 }
 0xd33   : > { %v5701_v60 = vsel %vm5690_vm6, %v5680_v17, %v5681_v58 }
 0xd36   : > { %v5626_v8 = vpop.f32.mrf.mxu3 }
 0xd6e   : > { %v5637_v62 = vpop.f32.mrf.mxu3 }
 0xd6f   : > { %v5638_v57 = vadd.f32 %v5637_v62, %v8460_v7 }
 0xd71   : > { %v5682_v63 = vrot.slane %v5638_v57, 2 }
 0xd76   : > { %v5639_v24 = vpop.f32.mrf.mxu3 }
 0xdae   : > { %v5650_v20 = vpop.f32.mrf.mxu3 }
 0xdaf   : > { %v5651_v5 = vadd.f32 %v5650_v20, %v8460_v7 }
 0xdb1   : > { %v5683_v25 = vrot.slane %v5651_v5, 1 }
 0xdb3   : > { %v5702_v46 = vsel %vm5692_vm7, %v5682_v63, %v5683_v25 }
 0xdb4   : > { %v5703_v3 = vsel %vm5694_vm8, %v5701_v60, %v5702_v46 }
 0xdb5   : > { %v5704_v14 = vsel %vm5696_vm9, %v8690_v22, %v5703_v3 }
 0xdb6   : > { %v5652_v19 = vpop.f32.mrf.mxu3  ;;  %5708 = vst [vmem:[%s8593_s29 + $0x8] sm:$0xff] %v5704_v14 }
 0xdb7   : > { %6334 = shalt.err (!%p6331_p3)
}
 0xdb8   : > { %6243 = dma.vmem_to_hbm [thread:$0]  (%p6463_p5), %s5723_s23, 256, %s5725_s24, %s5710_s8  }
 0xdb9 PF: > { %p6249_p4 = scmp.ge.s32.totalorder %s6369_s14, 2  ;;  %s5736_s27 = sand.u32 1, %s6357_s11  }
 0xdba   : > { %s5737_s29 = scalar_lea.sflag [#allocation4], %s5736_s27 }
 0xdbb   : > { %p6246_p7 = pnand %p6249_p4, %p6467_p6 }
 0xdbd   : > { %p6247_p8 = pneg %p6246_p7 }
 0xdbf   : > { %6352 = dma.done.wait (%p6247_p8), %s5737_s29, 256  }
 0xdc0   : > { %6354 = vsyncadd (%p6247_p8), %s5737_s29, 4294967040  ;;  %p21_p9 = scmp.ge.s32.totalorder %s6450_s16, 6   ;;  %s8932_s11 = smov %s6361_s12 }
 0xdc1   : > { %s8933_s12 = smov %s6365_s13  ;;  %s8934_s13 = smov %s6461_s19 }
 0xdc2   : > { %s8935_s14 = smov %s6450_s16  ;;  %23 = sbr.rel (!%p21_p9) target bundleno = 6 (0x6), region = 91 }
 0xdc7   :  { %5743 = vsyncpa [#allocation4], 1 }
 0xdc8   :  { %5745 = vsyncpa [#allocation4 + $0x1], 1 }

</bundles_post_ra>
